<compile_context>
chip_gen: v5e
topology: v5e:2x2
jax: 0.10.0
libtpu: 0.0.40
codegen_flags: <defaults>
</compile_context>

<pallas_src>
import functools

import jax
import jax.numpy as jnp
from jax.experimental import pallas as pl
from jax.experimental.pallas import tpu as pltpu


# ----------------------------------------------------------------------------
# Generic fused matmul kernel (stem conv via im2col, final linear)
# ----------------------------------------------------------------------------
def _mm_kernel(x_ref, w_ref, sh_ref, o_ref, *, act):
    y = jnp.dot(x_ref[...], w_ref[...], preferred_element_type=jnp.float32)
    y = y + sh_ref[...]
    if act == "swish":
        y = y * jax.nn.sigmoid(y)
    o_ref[...] = y.astype(o_ref.dtype)


def fused_matmul(x, w, shift, act="none", out_dtype=jnp.float32, tile_m=1024):
    """y = act(x @ w + shift).  x:(M,K) bf16, w:(K,N) bf16, shift:(1,N) f32.

    Row-tiled grid with a "parallel" axis so the pipeline double-buffers row
    tiles and megacore chips can shard them.
    """
    M, K = x.shape
    Nc = w.shape[1]
    tm = min(tile_m, M)
    Mp = pl.cdiv(M, tm) * tm
    if Mp != M:
        x = jnp.pad(x, ((0, Mp - M), (0, 0)))
    out = pl.pallas_call(
        functools.partial(_mm_kernel, act=act),
        out_shape=jax.ShapeDtypeStruct((Mp, Nc), out_dtype),
        grid=(Mp // tm,),
        in_specs=[
            pl.BlockSpec((tm, K), lambda i: (i, 0)),
            pl.BlockSpec((K, Nc), lambda i: (0, 0)),
            pl.BlockSpec((1, Nc), lambda i: (0, 0)),
        ],
        out_specs=pl.BlockSpec((tm, Nc), lambda i: (i, 0)),
        compiler_params=pltpu.CompilerParams(dimension_semantics=("parallel",)),
    )(x, w, shift)
    return out[:M] if Mp != M else out


# ----------------------------------------------------------------------------
# Fully fused MBConv block kernel (expand + dw3x3 + project + shortcut + SE)
# ----------------------------------------------------------------------------
def _mbconv_kernel(*refs, H, W, stride, shortcut, pad_top):
    (x_ref, wexp_ref, sh1_ref, wdw_ref, sh2_ref, wproj_ref, sh3_ref,
     fc1w_ref, fc1b_ref, fc2w_ref, fc2b_ref) = refs[:11]
    k = 11
    wsc_ref = shsc_ref = sel_ref = None
    if shortcut == "conv":
        wsc_ref, shsc_ref = refs[k], refs[k + 1]
        k += 2
    if stride != 1:
        sel_ref = refs[k]
        k += 1
    o_ref, pad_ref = refs[k], refs[k + 1]

    HW = H * W
    x = x_ref[0]                                                    # (HW, Cin) bf16

    # --- 1x1 expand + folded-BN + swish (f32 accumulate / element-wise) ------
    e = jnp.dot(x, wexp_ref[...], preferred_element_type=jnp.float32)
    e = e + sh1_ref[...]
    e = e * jax.nn.sigmoid(e)                                       # (HW, P) f32

    # --- depthwise 3x3 (pad=1) entirely in VMEM ------------------------------
    # Zero-padded row scratch: vertically out-of-image taps read the zero
    # bands, horizontally out-of-image taps are masked with a per-row mask.
    pad_ref[...] = jnp.zeros(pad_ref.shape, pad_ref.dtype)
    pad_ref[pl.ds(pad_top, HW), :] = e

    row = jax.lax.broadcasted_iota(jnp.int32, (HW, 1), 0)
    jj = row % W
    acc = jnp.zeros_like(e)
    t = 0
    for dh in (-1, 0, 1):
        for dw in (-1, 0, 1):
            s = dh * W + dw
            tap = pad_ref[pl.ds(pad_top + s, HW), :]                # (HW, P)
            ok = (jj + dw >= 0) & (jj + dw < W)
            acc = acc + jnp.where(ok, tap, 0.0) * wdw_ref[t]
            t += 1
    d = acc + sh2_ref[...]
    d = d * jax.nn.sigmoid(d)                                       # (HW, P) f32

    if stride != 1:
        # 0/1 selection matmul picks the strided output positions (exact).
        d = jnp.dot(sel_ref[...], d, preferred_element_type=jnp.float32)

    # --- 1x1 project + folded-BN (no activation) -----------------------------
    outp = jnp.dot(d.astype(wproj_ref.dtype), wproj_ref[...],
                   preferred_element_type=jnp.float32) + sh3_ref[...]   # (HWo, Cout)

    # --- shortcut -------------------------------------------------------------
    if shortcut == "identity":
        sc = x.astype(jnp.float32)
    elif shortcut == "conv":
        sc = jnp.dot(x, wsc_ref[...], preferred_element_type=jnp.float32) + shsc_ref[...]
    else:  # stride != 1: shortcut = out (matches the PyTorch reference)
        sc = outp

    # --- squeeze-excitation (GAP -> fc1 + swish -> fc2 + sigmoid) ------------
    pooled = jnp.mean(outp, axis=0, keepdims=True)                  # (1, Cout)
    # fc1: (S, Cout) weight, lane-reduce instead of a 1..3-lane MXU matmul.
    w1 = jnp.sum(fc1w_ref[...] * pooled, axis=1, keepdims=True) + fc1b_ref[...]  # (S,1)
    w1 = w1 * jax.nn.sigmoid(w1)
    # fc2: stored as (S, Cout); sublane-reduce.
    w2 = jnp.sum(w1 * fc2w_ref[...], axis=0, keepdims=True) + fc2b_ref[...]      # (1,Cout)
    w2 = jax.nn.sigmoid(w2)

    o_ref[0] = (outp * w2 + sc).astype(o_ref.dtype)


def _const_spec(shape):
    zeros = (0,) * len(shape)
    return pl.BlockSpec(shape, lambda n, _z=zeros: _z)


def mbconv_block(x, p, *, H, W, stride, in_planes, out_planes, expansion):
    """x: (N, H*W, in_planes) bf16 -> ((N, Ho*Wo, out_planes) bf16, Ho, Wo)."""
    N, HW, _ = x.shape
    P = expansion * in_planes
    Ho = (H - 1) // stride + 1
    Wo = (W - 1) // stride + 1
    HWo = Ho * Wo
    if stride == 1:
        shortcut = "conv" if in_planes != out_planes else "identity"
    else:
        shortcut = "none"

    pad_top = -(-(W + 1) // 8) * 8                       # round_up(W+1, 8)
    R = pad_top + (-(-(HW + W + 1) // 8) * 8)            # rows of padded scratch

    inputs = [x, p["w_expand"], p["sh1"], p["w_dw"], p["sh2"],
              p["w_proj"], p["sh3"], p["fc1_w"], p["fc1_b"],
              p["fc2_w"], p["fc2_b"]]
    in_specs = [pl.BlockSpec((1, HW, in_planes), lambda n: (n, 0, 0))]
    in_specs += [_const_spec(a.shape) for a in inputs[1:]]
    if shortcut == "conv":
        inputs += [p["w_sc"], p["sh_sc"]]
        in_specs += [_const_spec(p["w_sc"].shape), _const_spec(p["sh_sc"].shape)]
    if stride != 1:
        idx = (jnp.arange(Ho)[:, None] * (stride * W)
               + jnp.arange(Wo)[None, :] * stride).reshape(-1)
        sel = jax.nn.one_hot(idx, HW, dtype=jnp.float32)            # (HWo, HW)
        inputs += [sel]
        in_specs += [_const_spec((HWo, HW))]

    kernel = functools.partial(_mbconv_kernel, H=H, W=W, stride=stride,
                               shortcut=shortcut, pad_top=pad_top)
    out = pl.pallas_call(
        kernel,
        out_shape=jax.ShapeDtypeStruct((N, HWo, out_planes), jnp.bfloat16),
        grid=(N,),
        in_specs=in_specs,
        out_specs=pl.BlockSpec((1, HWo, out_planes), lambda n: (n, 0, 0)),
        scratch_shapes=[pltpu.VMEM((R, P), jnp.float32)],
        compiler_params=pltpu.CompilerParams(dimension_semantics=("parallel",)),
    )(*inputs)
    return out, Ho, Wo


# ----------------------------------------------------------------------------
# JAX glue: stem im2col (tiny 3-channel input), network wiring, params
# ----------------------------------------------------------------------------
def im2col3x3(x):
    """x: (N,H,W,C) NHWC, 3x3, pad=1, stride=1 -> (N*H*W, 9*C), (kh,kw,c) cols."""
    N, H, W, C = x.shape
    xp = jnp.pad(x, ((0, 0), (1, 1), (1, 1), (0, 0)))
    taps = [xp[:, kh:kh + H, kw:kw + W, :] for kh in range(3) for kw in range(3)]
    cols = jnp.stack(taps, axis=3)
    return cols.reshape(N * H * W, 9 * C)


def efficientnet_forward(params, x_nchw, cfg):
    x = jnp.transpose(x_nchw, (0, 2, 3, 1)).astype(jnp.bfloat16)    # NCHW -> NHWC
    N, H, W, _ = x.shape
    cols = im2col3x3(x)                                             # stem input is tiny (3 ch)
    h = fused_matmul(cols, params["conv1_w"], params["conv1_sh"],
                     act="swish", out_dtype=jnp.bfloat16)
    h = h.reshape(N, H * W, 32)

    in_planes, Hc, Wc = 32, H, W
    idx = 0
    for expansion, out_planes, num_blocks, stride in cfg:
        for s in [stride] + [1] * (num_blocks - 1):
            h, Hc, Wc = mbconv_block(h, params["blocks"][idx], H=Hc, W=Wc,
                                     stride=s, in_planes=in_planes,
                                     out_planes=out_planes, expansion=expansion)
            in_planes = out_planes
            idx += 1

    # PyTorch flattens NCHW; with the final 1x1 spatial this is a plain reshape.
    Nb, HWf, Cf = h.shape
    if HWf == 1:
        feat = h.reshape(Nb, Cf)
    else:
        feat = jnp.transpose(h.reshape(Nb, Hc, Wc, Cf), (0, 3, 1, 2)).reshape(Nb, -1)
    return fused_matmul(feat, params["lin_w"], params["lin_b"],
                        act="none", out_dtype=jnp.float32)


def init_params(key, cfg, num_classes=10):
    keys = iter(jax.random.split(key, 512))

    def nrm(shape, s=0.1):
        return s * jax.random.normal(next(keys), shape, jnp.float32)

    def bn_fold(c, eps=1e-5):
        # eval-mode BatchNorm folded to per-channel scale/shift.
        gamma = 1.0 + nrm((c,), 0.05)
        beta = nrm((c,), 0.05)
        mean = nrm((c,), 0.05)
        var = jnp.abs(1.0 + nrm((c,), 0.05))
        scale = gamma / jnp.sqrt(var + eps)
        shift = beta - mean * scale
        return scale, shift

    params = {}
    w1 = nrm((27, 32))                                  # conv1 as (kh*kw*cin, cout)
    s1, sh1 = bn_fold(32)
    params["conv1_w"] = (w1 * s1[None, :]).astype(jnp.bfloat16)
    params["conv1_sh"] = sh1.reshape(1, 32)

    blocks = []
    in_planes = 32
    for expansion, out_planes, num_blocks, stride in cfg:
        for s in [stride] + [1] * (num_blocks - 1):
            P = expansion * in_planes
            se = out_planes // 16
            we = nrm((in_planes, P)); sc1, sf1 = bn_fold(P)
            wd = nrm((3, 3, P));      sc2, sf2 = bn_fold(P)
            wp = nrm((P, out_planes)); sc3, sf3 = bn_fold(out_planes)
            bp = {
                "w_expand": (we * sc1[None, :]).astype(jnp.bfloat16),
                "sh1": sf1.reshape(1, P),
                "w_dw": wd.reshape(9, 1, P) * sc2.reshape(1, 1, P),
                "sh2": sf2.reshape(1, P),
                "w_proj": (wp * sc3[None, :]).astype(jnp.bfloat16),
                "sh3": sf3.reshape(1, out_planes),
                # fc1: torch Conv2d(out_planes, se, 1) weight as (se, out_planes).
                "fc1_w": nrm((se, out_planes)),
                "fc1_b": nrm((se,)).reshape(se, 1),
                # fc2 stored transposed relative to torch: (se, out_planes).
                "fc2_w": nrm((se, out_planes)),
                "fc2_b": nrm((out_planes,)).reshape(1, out_planes),
            }
            if s == 1 and in_planes != out_planes:
                ws = nrm((in_planes, out_planes)); scs, sfs = bn_fold(out_planes)
                bp["w_sc"] = (ws * scs[None, :]).astype(jnp.bfloat16)
                bp["sh_sc"] = sfs.reshape(1, out_planes)
            blocks.append(bp)
            in_planes = out_planes
    params["blocks"] = blocks
    # TODO(synk): real PyTorch Linear weights are (out, in); transpose when loading.
    params["lin_w"] = nrm((cfg[-1][1], num_classes)).astype(jnp.bfloat16)
    params["lin_b"] = nrm((num_classes,)).reshape(1, num_classes)
    return params


if __name__ == "__main__":
    # small cfg: (expansion, out_planes, num_blocks, stride); strides 1,2,2,2
    # take the 8x8 input down to 1x1, matching Linear(cfg[-1][1], num_classes).
    cfg = [(1, 16, 1, 1), (2, 32, 1, 2), (2, 32, 1, 2), (2, 48, 1, 2)]
    key = jax.random.PRNGKey(0)
    pkey, xkey = jax.random.split(key)
    params = init_params(pkey, cfg)
    x = jax.random.normal(xkey, (2, 3, 8, 8), jnp.float32)          # NCHW like PyTorch

    fwd = jax.jit(lambda p, xx: efficientnet_forward(p, xx, cfg))
    out = fwd(params, x)
    jax.block_until_ready(out)
    assert out.shape == (2, 10) and out.dtype == jnp.float32
    assert bool(jnp.all(jnp.isfinite(out)))
    print("KERNEL_OK")
</pallas_src>

<mosaic_0001>
module attributes {stable_mosaic.version = 11 : i64} {
  func.func @_mm_kernel(%arg0: i32, %arg1: memref<128x27xbf16, #tpu.memory_space<vmem>>, %arg2: memref<27x32xbf16, #tpu.memory_space<vmem>>, %arg3: memref<1x32xf32, #tpu.memory_space<vmem>>, %arg4: memref<128x32xbf16, #tpu.memory_space<vmem>>) attributes {dimension_semantics = [#tpu.dimension_semantics<parallel>], iteration_bounds = array<i64: 1>, scalar_prefetch = 0 : i64, scratch_operands = 0 : i64, tpu.core_type = #tpu.core_type<tc>, window_params = [{transform_indices = @transform_0, window_bounds = array<i64: 128, 27>}, {pipeline_mode = #tpu.pipeline_mode<synchronous>, transform_indices = @transform_1, window_bounds = array<i64: 27, 32>}, {pipeline_mode = #tpu.pipeline_mode<synchronous>, transform_indices = @transform_2, window_bounds = array<i64: 1, 32>}, {transform_indices = @transform_3, window_bounds = array<i64: 128, 32>}]} {
    %c0 = arith.constant 0 : index
    %c0_0 = arith.constant 0 : index
    %0 = vector.load %arg1[%c0, %c0_0] : memref<128x27xbf16, #tpu.memory_space<vmem>>, vector<128x27xbf16>
    %c0_1 = arith.constant 0 : index
    %c0_2 = arith.constant 0 : index
    %1 = vector.load %arg2[%c0_1, %c0_2] : memref<27x32xbf16, #tpu.memory_space<vmem>>, vector<27x32xbf16>
    %cst = arith.constant dense<0.000000e+00> : vector<128x32xf32>
    %2 = tpu.matmul %0, %1, %cst {dimension_numbers = #tpu.dot_dimension_numbers<[1], [0], [0], [1], [0, 0, 1, 1], [], []>} : vector<128x27xbf16>, vector<27x32xbf16>, vector<128x32xf32> -> vector<128x32xf32>
    %c0_3 = arith.constant 0 : index
    %c0_4 = arith.constant 0 : index
    %3 = vector.load %arg3[%c0_3, %c0_4] : memref<1x32xf32, #tpu.memory_space<vmem>>, vector<1x32xf32>
    %4 = vector.broadcast %3 : vector<1x32xf32> to vector<128x32xf32>
    %5 = arith.addf %2, %4 : vector<128x32xf32>
    %6 = arith.negf %5 : vector<128x32xf32>
    %7 = math.exp %6 : vector<128x32xf32>
    %cst_5 = arith.constant 1.000000e+00 : f32
    %8 = vector.broadcast %cst_5 : f32 to vector<128x32xf32>
    %9 = arith.addf %8, %7 : vector<128x32xf32>
    %10 = arith.divf %8, %9 : vector<128x32xf32>
    %11 = arith.mulf %5, %10 : vector<128x32xf32>
    %12 = arith.truncf %11 : vector<128x32xf32> to vector<128x32xbf16>
    %c0_6 = arith.constant 0 : index
    %c0_7 = arith.constant 0 : index
    %13 = vector.load %arg4[%c0_6, %c0_7] : memref<128x32xbf16, #tpu.memory_space<vmem>>, vector<128x32xbf16>
    tpu.vector_store %arg4[%c0_6, %c0_7], %12 {strides = array<i32>} : memref<128x32xbf16, #tpu.memory_space<vmem>>, vector<128x32xbf16>,
    return
  }
  func.func @transform_0(%arg0: i32) -> (i32, i32) {
    %c0_i32 = arith.constant 0 : i32
    %c0_i32_0 = arith.constant 0 : i32
    return %arg0, %c0_i32 : i32, i32
  }
  func.func @transform_1(%arg0: i32) -> (i32, i32) {
    %c0_i32 = arith.constant 0 : i32
    %c0_i32_0 = arith.constant 0 : i32
    %c0_i32_1 = arith.constant 0 : i32
    return %c0_i32, %c0_i32_0 : i32, i32
  }
  func.func @transform_2(%arg0: i32) -> (i32, i32) {
    %c0_i32 = arith.constant 0 : i32
    %c0_i32_0 = arith.constant 0 : i32
    %c0_i32_1 = arith.constant 0 : i32
    return %c0_i32, %c0_i32_0 : i32, i32
  }
  func.func @transform_3(%arg0: i32) -> (i32, i32) {
    %c0_i32 = arith.constant 0 : i32
    %c0_i32_0 = arith.constant 0 : i32
    return %arg0, %c0_i32 : i32, i32
  }
}

module attributes {stable_mosaic.version = 11 : i64} {
  func.func @_mbconv_kernel(%arg0: i32, %arg1: memref<1x64x32xbf16, #tpu.memory_space<vmem>>, %arg2: memref<32x32xbf16, #tpu.memory_space<vmem>>, %arg3: memref<1x32xf32, #tpu.memory_space<vmem>>, %arg4: memref<9x1x32xf32, #tpu.memory_space<vmem>>, %arg5: memref<1x32xf32, #tpu.memory_space<vmem>>, %arg6: memref<32x16xbf16, #tpu.memory_space<vmem>>, %arg7: memref<1x16xf32, #tpu.memory_space<vmem>>, %arg8: memref<1x16xf32, #tpu.memory_space<vmem>>, %arg9: memref<1x1xf32, #tpu.memory_space<vmem>>, %arg10: memref<1x16xf32, #tpu.memory_space<vmem>>, %arg11: memref<1x16xf32, #tpu.memory_space<vmem>>, %arg12: memref<32x16xbf16, #tpu.memory_space<vmem>>, %arg13: memref<1x16xf32, #tpu.memory_space<vmem>>, %arg14: memref<1x64x16xbf16, #tpu.memory_space<vmem>>, %arg15: memref<96x32xf32, #tpu.memory_space<vmem>>) attributes {dimension_semantics = [#tpu.dimension_semantics<parallel>], iteration_bounds = array<i64: 2>, scalar_prefetch = 0 : i64, scratch_operands = 1 : i64, tpu.core_type = #tpu.core_type<tc>, window_params = [{transform_indices = @transform_0, window_bounds = array<i64: 1, 64, 32>}, {pipeline_mode = #tpu.pipeline_mode<synchronous>, transform_indices = @transform_1, window_bounds = array<i64: 32, 32>}, {pipeline_mode = #tpu.pipeline_mode<synchronous>, transform_indices = @transform_2, window_bounds = array<i64: 1, 32>}, {pipeline_mode = #tpu.pipeline_mode<synchronous>, transform_indices = @transform_3, window_bounds = array<i64: 9, 1, 32>}, {pipeline_mode = #tpu.pipeline_mode<synchronous>, transform_indices = @transform_4, window_bounds = array<i64: 1, 32>}, {pipeline_mode = #tpu.pipeline_mode<synchronous>, transform_indices = @transform_5, window_bounds = array<i64: 32, 16>}, {pipeline_mode = #tpu.pipeline_mode<synchronous>, transform_indices = @transform_6, window_bounds = array<i64: 1, 16>}, {pipeline_mode = #tpu.pipeline_mode<synchronous>, transform_indices = @transform_7, window_bounds = array<i64: 1, 16>}, {pipeline_mode = #tpu.pipeline_mode<synchronous>, transform_indices = @transform_8, window_bounds = array<i64: 1, 1>}, {pipeline_mode = #tpu.pipeline_mode<synchronous>, transform_indices = @transform_9, window_bounds = array<i64: 1, 16>}, {pipeline_mode = #tpu.pipeline_mode<synchronous>, transform_indices = @transform_10, window_bounds = array<i64: 1, 16>}, {pipeline_mode = #tpu.pipeline_mode<synchronous>, transform_indices = @transform_11, window_bounds = array<i64: 32, 16>}, {pipeline_mode = #tpu.pipeline_mode<synchronous>, transform_indices = @transform_12, window_bounds = array<i64: 1, 16>}, {transform_indices = @transform_13, window_bounds = array<i64: 1, 64, 16>}]} {
    %c0 = arith.constant 0 : index
    %c0_0 = arith.constant 0 : index
    %c0_1 = arith.constant 0 : index
    %0 = vector.load %arg1[%c0, %c0_0, %c0_1] : memref<1x64x32xbf16, #tpu.memory_space<vmem>>, vector<1x64x32xbf16>
    %1 = vector.shape_cast %0 : vector<1x64x32xbf16> to vector<64x32xbf16>
    %c0_2 = arith.constant 0 : index
    %c0_3 = arith.constant 0 : index
    %2 = vector.load %arg2[%c0_2, %c0_3] : memref<32x32xbf16, #tpu.memory_space<vmem>>, vector<32x32xbf16>
    %cst = arith.constant dense<0.000000e+00> : vector<64x32xf32>
    %3 = tpu.matmul %1, %2, %cst {dimension_numbers = #tpu.dot_dimension_numbers<[1], [0], [0], [1], [0, 0, 1, 1], [], []>} : vector<64x32xbf16>, vector<32x32xbf16>, vector<64x32xf32> -> vector<64x32xf32>
    %c0_4 = arith.constant 0 : index
    %c0_5 = arith.constant 0 : index
    %4 = vector.load %arg3[%c0_4, %c0_5] : memref<1x32xf32, #tpu.memory_space<vmem>>, vector<1x32xf32>
    %5 = vector.broadcast %4 : vector<1x32xf32> to vector<64x32xf32>
    %6 = arith.addf %3, %5 : vector<64x32xf32>
    %7 = arith.negf %6 : vector<64x32xf32>
    %8 = math.exp %7 : vector<64x32xf32>
    %cst_6 = arith.constant 1.000000e+00 : f32
    %9 = vector.broadcast %cst_6 : f32 to vector<64x32xf32>
    %10 = arith.addf %9, %8 : vector<64x32xf32>
    %11 = arith.divf %9, %10 : vector<64x32xf32>
    %12 = arith.mulf %6, %11 : vector<64x32xf32>
    %cst_7 = arith.constant 0.000000e+00 : f32
    %13 = vector.broadcast %cst_7 : f32 to vector<96x32xf32>
    %c0_8 = arith.constant 0 : index
    %c0_9 = arith.constant 0 : index
    %14 = vector.load %arg15[%c0_8, %c0_9] : memref<96x32xf32, #tpu.memory_space<vmem>>, vector<96x32xf32>
    tpu.vector_store %arg15[%c0_8, %c0_9], %13 {strides = array<i32>} : memref<96x32xf32, #tpu.memory_space<vmem>>, vector<96x32xf32>,
    %c16 = arith.constant 16 : index
    %c0_10 = arith.constant 0 : index
    %15 = vector.load %arg15[%c16, %c0_10] : memref<96x32xf32, #tpu.memory_space<vmem>>, vector<64x32xf32>
    tpu.vector_store %arg15[%c16, %c0_10], %12 {strides = array<i32>} : memref<96x32xf32, #tpu.memory_space<vmem>>, vector<64x32xf32>,
    %16 = tpu.iota {dimensions = array<i32: 0>} : vector<64x1xi32>
    %c8_i32 = arith.constant 8 : i32
    %c0_i32 = arith.constant 0 : i32
    %17 = arith.cmpi eq, %c8_i32, %c0_i32 : i32
    %c1_i32 = arith.constant 1 : i32
    %18 = arith.select %17, %c1_i32, %c8_i32 : i32
    %19 = vector.broadcast %18 : i32 to vector<64x1xi32>
    %20 = arith.remsi %16, %19 : vector<64x1xi32>
    %c0_i32_11 = arith.constant 0 : i32
    %21 = vector.broadcast %c0_i32_11 : i32 to vector<64x1xi32>
    %22 = arith.cmpi ne, %20, %21 : vector<64x1xi32>
    %c0_i32_12 = arith.constant 0 : i32
    %23 = vector.broadcast %c0_i32_12 : i32 to vector<64x1xi32>
    %24 = arith.cmpi slt, %20, %23 : vector<64x1xi32>
    %c0_i32_13 = arith.constant 0 : i32
    %25 = arith.cmpi slt, %18, %c0_i32_13 : i32
    %26 = vector.broadcast %25 : i1 to vector<64x1xi1>
    %27 = vector.broadcast %26 : vector<64x1xi1> to vector<64x1xi1>
    %28 = arith.xori %24, %27 : vector<64x1xi1>
    %29 = arith.andi %28, %22 : vector<64x1xi1>
    %30 = vector.broadcast %18 : i32 to vector<64x1xi32>
    %31 = arith.addi %20, %30 : vector<64x1xi32>
    %32 = arith.select %29, %31, %20 : vector<64x1xi1>, vector<64x1xi32>
    %cst_14 = arith.constant 0.000000e+00 : f32
    %33 = vector.broadcast %cst_14 : f32 to vector<64x32xf32>
    %c7 = arith.constant 7 : index
    %c0_15 = arith.constant 0 : index
    %34 = vector.load %arg15[%c7, %c0_15] : memref<96x32xf32, #tpu.memory_space<vmem>>, vector<64x32xf32>
    %c-1_i32 = arith.constant -1 : i32
    %35 = vector.broadcast %c-1_i32 : i32 to vector<64x1xi32>
    %36 = arith.addi %32, %35 : vector<64x1xi32>
    %c0_i32_16 = arith.constant 0 : i32
    %37 = vector.broadcast %c0_i32_16 : i32 to vector<64x1xi32>
    %38 = arith.cmpi sge, %36, %37 : vector<64x1xi32>
    %c-1_i32_17 = arith.constant -1 : i32
    %39 = vector.broadcast %c-1_i32_17 : i32 to vector<64x1xi32>
    %40 = arith.addi %32, %39 : vector<64x1xi32>
    %c8_i32_18 = arith.constant 8 : i32
    %41 = vector.broadcast %c8_i32_18 : i32 to vector<64x1xi32>
    %42 = arith.cmpi slt, %40, %41 : vector<64x1xi32>
    %43 = arith.andi %38, %42 : vector<64x1xi1>
    %cst_19 = arith.constant 0.000000e+00 : f32
    %44 = vector.shape_cast %43 : vector<64x1xi1> to vector<64x1xi1>
    %45 = vector.broadcast %44 : vector<64x1xi1> to vector<64x32xi1>
    %46 = vector.broadcast %cst_19 : f32 to vector<64x32xf32>
    %47 = arith.select %45, %34, %46 : vector<64x32xi1>, vector<64x32xf32>
    %c0_20 = arith.constant 0 : index
    %c0_21 = arith.constant 0 : index
    %c0_22 = arith.constant 0 : index
    %48 = vector.load %arg4[%c0_20, %c0_21, %c0_22] : memref<9x1x32xf32, #tpu.memory_space<vmem>>, vector<1x1x32xf32>
    %49 = vector.shape_cast %48 : vector<1x1x32xf32> to vector<1x32xf32>
    %50 = vector.broadcast %49 : vector<1x32xf32> to vector<64x32xf32>
    %51 = arith.mulf %47, %50 : vector<64x32xf32>
    %52 = arith.addf %33, %51 : vector<64x32xf32>
    %c8 = arith.constant 8 : index
    %c0_23 = arith.constant 0 : index
    %53 = vector.load %arg15[%c8, %c0_23] : memref<96x32xf32, #tpu.memory_space<vmem>>, vector<64x32xf32>
    %c0_i32_24 = arith.constant 0 : i32
    %54 = vector.broadcast %c0_i32_24 : i32 to vector<64x1xi32>
    %55 = arith.addi %32, %54 : vector<64x1xi32>
    %c0_i32_25 = arith.constant 0 : i32
    %56 = vector.broadcast %c0_i32_25 : i32 to vector<64x1xi32>
    %57 = arith.cmpi sge, %55, %56 : vector<64x1xi32>
    %c0_i32_26 = arith.constant 0 : i32
    %58 = vector.broadcast %c0_i32_26 : i32 to vector<64x1xi32>
    %59 = arith.addi %32, %58 : vector<64x1xi32>
    %c8_i32_27 = arith.constant 8 : i32
    %60 = vector.broadcast %c8_i32_27 : i32 to vector<64x1xi32>
    %61 = arith.cmpi slt, %59, %60 : vector<64x1xi32>
    %62 = arith.andi %57, %61 : vector<64x1xi1>
    %cst_28 = arith.constant 0.000000e+00 : f32
    %63 = vector.shape_cast %62 : vector<64x1xi1> to vector<64x1xi1>
    %64 = vector.broadcast %63 : vector<64x1xi1> to vector<64x32xi1>
    %65 = vector.broadcast %cst_28 : f32 to vector<64x32xf32>
    %66 = arith.select %64, %53, %65 : vector<64x32xi1>, vector<64x32xf32>
    %c1 = arith.constant 1 : index
    %c0_29 = arith.constant 0 : index
    %c0_30 = arith.constant 0 : index
    %67 = vector.load %arg4[%c1, %c0_29, %c0_30] : memref<9x1x32xf32, #tpu.memory_space<vmem>>, vector<1x1x32xf32>
    %68 = vector.shape_cast %67 : vector<1x1x32xf32> to vector<1x32xf32>
    %69 = vector.broadcast %68 : vector<1x32xf32> to vector<64x32xf32>
    %70 = arith.mulf %66, %69 : vector<64x32xf32>
    %71 = arith.addf %52, %70 : vector<64x32xf32>
    %c9 = arith.constant 9 : index
    %c0_31 = arith.constant 0 : index
    %72 = vector.load %arg15[%c9, %c0_31] : memref<96x32xf32, #tpu.memory_space<vmem>>, vector<64x32xf32>
    %c1_i32_32 = arith.constant 1 : i32
    %73 = vector.broadcast %c1_i32_32 : i32 to vector<64x1xi32>
    %74 = arith.addi %32, %73 : vector<64x1xi32>
    %c0_i32_33 = arith.constant 0 : i32
    %75 = vector.broadcast %c0_i32_33 : i32 to vector<64x1xi32>
    %76 = arith.cmpi sge, %74, %75 : vector<64x1xi32>
    %c1_i32_34 = arith.constant 1 : i32
    %77 = vector.broadcast %c1_i32_34 : i32 to vector<64x1xi32>
    %78 = arith.addi %32, %77 : vector<64x1xi32>
    %c8_i32_35 = arith.constant 8 : i32
    %79 = vector.broadcast %c8_i32_35 : i32 to vector<64x1xi32>
    %80 = arith.cmpi slt, %78, %79 : vector<64x1xi32>
    %81 = arith.andi %76, %80 : vector<64x1xi1>
    %cst_36 = arith.constant 0.000000e+00 : f32
    %82 = vector.shape_cast %81 : vector<64x1xi1> to vector<64x1xi1>
    %83 = vector.broadcast %82 : vector<64x1xi1> to vector<64x32xi1>
    %84 = vector.broadcast %cst_36 : f32 to vector<64x32xf32>
    %85 = arith.select %83, %72, %84 : vector<64x32xi1>, vector<64x32xf32>
    %c2 = arith.constant 2 : index
    %c0_37 = arith.constant 0 : index
    %c0_38 = arith.constant 0 : index
    %86 = vector.load %arg4[%c2, %c0_37, %c0_38] : memref<9x1x32xf32, #tpu.memory_space<vmem>>, vector<1x1x32xf32>
    %87 = vector.shape_cast %86 : vector<1x1x32xf32> to vector<1x32xf32>
    %88 = vector.broadcast %87 : vector<1x32xf32> to vector<64x32xf32>
    %89 = arith.mulf %85, %88 : vector<64x32xf32>
    %90 = arith.addf %71, %89 : vector<64x32xf32>
    %c15 = arith.constant 15 : index
    %c0_39 = arith.constant 0 : index
    %91 = vector.load %arg15[%c15, %c0_39] : memref<96x32xf32, #tpu.memory_space<vmem>>, vector<64x32xf32>
    %c-1_i32_40 = arith.constant -1 : i32
    %92 = vector.broadcast %c-1_i32_40 : i32 to vector<64x1xi32>
    %93 = arith.addi %32, %92 : vector<64x1xi32>
    %c0_i32_41 = arith.constant 0 : i32
    %94 = vector.broadcast %c0_i32_41 : i32 to vector<64x1xi32>
    %95 = arith.cmpi sge, %93, %94 : vector<64x1xi32>
    %c-1_i32_42 = arith.constant -1 : i32
    %96 = vector.broadcast %c-1_i32_42 : i32 to vector<64x1xi32>
    %97 = arith.addi %32, %96 : vector<64x1xi32>
    %c8_i32_43 = arith.constant 8 : i32
    %98 = vector.broadcast %c8_i32_43 : i32 to vector<64x1xi32>
    %99 = arith.cmpi slt, %97, %98 : vector<64x1xi32>
    %100 = arith.andi %95, %99 : vector<64x1xi1>
    %cst_44 = arith.constant 0.000000e+00 : f32
    %101 = vector.shape_cast %100 : vector<64x1xi1> to vector<64x1xi1>
    %102 = vector.broadcast %101 : vector<64x1xi1> to vector<64x32xi1>
    %103 = vector.broadcast %cst_44 : f32 to vector<64x32xf32>
    %104 = arith.select %102, %91, %103 : vector<64x32xi1>, vector<64x32xf32>
    %c3 = arith.constant 3 : index
    %c0_45 = arith.constant 0 : index
    %c0_46 = arith.constant 0 : index
    %105 = vector.load %arg4[%c3, %c0_45, %c0_46] : memref<9x1x32xf32, #tpu.memory_space<vmem>>, vector<1x1x32xf32>
    %106 = vector.shape_cast %105 : vector<1x1x32xf32> to vector<1x32xf32>
    %107 = vector.broadcast %106 : vector<1x32xf32> to vector<64x32xf32>
    %108 = arith.mulf %104, %107 : vector<64x32xf32>
    %109 = arith.addf %90, %108 : vector<64x32xf32>
    %c16_47 = arith.constant 16 : index
    %c0_48 = arith.constant 0 : index
    %110 = vector.load %arg15[%c16_47, %c0_48] : memref<96x32xf32, #tpu.memory_space<vmem>>, vector<64x32xf32>
    %c0_i32_49 = arith.constant 0 : i32
    %111 = vector.broadcast %c0_i32_49 : i32 to vector<64x1xi32>
    %112 = arith.addi %32, %111 : vector<64x1xi32>
    %c0_i32_50 = arith.constant 0 : i32
    %113 = vector.broadcast %c0_i32_50 : i32 to vector<64x1xi32>
    %114 = arith.cmpi sge, %112, %113 : vector<64x1xi32>
    %c0_i32_51 = arith.constant 0 : i32
    %115 = vector.broadcast %c0_i32_51 : i32 to vector<64x1xi32>
    %116 = arith.addi %32, %115 : vector<64x1xi32>
    %c8_i32_52 = arith.constant 8 : i32
    %117 = vector.broadcast %c8_i32_52 : i32 to vector<64x1xi32>
    %118 = arith.cmpi slt, %116, %117 : vector<64x1xi32>
    %119 = arith.andi %114, %118 : vector<64x1xi1>
    %cst_53 = arith.constant 0.000000e+00 : f32
    %120 = vector.shape_cast %119 : vector<64x1xi1> to vector<64x1xi1>
    %121 = vector.broadcast %120 : vector<64x1xi1> to vector<64x32xi1>
    %122 = vector.broadcast %cst_53 : f32 to vector<64x32xf32>
    %123 = arith.select %121, %110, %122 : vector<64x32xi1>, vector<64x32xf32>
    %c4 = arith.constant 4 : index
    %c0_54 = arith.constant 0 : index
    %c0_55 = arith.constant 0 : index
    %124 = vector.load %arg4[%c4, %c0_54, %c0_55] : memref<9x1x32xf32, #tpu.memory_space<vmem>>, vector<1x1x32xf32>
    %125 = vector.shape_cast %124 : vector<1x1x32xf32> to vector<1x32xf32>
    %126 = vector.broadcast %125 : vector<1x32xf32> to vector<64x32xf32>
    %127 = arith.mulf %123, %126 : vector<64x32xf32>
    %128 = arith.addf %109, %127 : vector<64x32xf32>
    %c17 = arith.constant 17 : index
    %c0_56 = arith.constant 0 : index
    %129 = vector.load %arg15[%c17, %c0_56] : memref<96x32xf32, #tpu.memory_space<vmem>>, vector<64x32xf32>
    %c1_i32_57 = arith.constant 1 : i32
    %130 = vector.broadcast %c1_i32_57 : i32 to vector<64x1xi32>
    %131 = arith.addi %32, %130 : vector<64x1xi32>
    %c0_i32_58 = arith.constant 0 : i32
    %132 = vector.broadcast %c0_i32_58 : i32 to vector<64x1xi32>
    %133 = arith.cmpi sge, %131, %132 : vector<64x1xi32>
    %c1_i32_59 = arith.constant 1 : i32
    %134 = vector.broadcast %c1_i32_59 : i32 to vector<64x1xi32>
    %135 = arith.addi %32, %134 : vector<64x1xi32>
    %c8_i32_60 = arith.constant 8 : i32
    %136 = vector.broadcast %c8_i32_60 : i32 to vector<64x1xi32>
    %137 = arith.cmpi slt, %135, %136 : vector<64x1xi32>
    %138 = arith.andi %133, %137 : vector<64x1xi1>
    %cst_61 = arith.constant 0.000000e+00 : f32
    %139 = vector.shape_cast %138 : vector<64x1xi1> to vector<64x1xi1>
    %140 = vector.broadcast %139 : vector<64x1xi1> to vector<64x32xi1>
    %141 = vector.broadcast %cst_61 : f32 to vector<64x32xf32>
    %142 = arith.select %140, %129, %141 : vector<64x32xi1>, vector<64x32xf32>
    %c5 = arith.constant 5 : index
    %c0_62 = arith.constant 0 : index
    %c0_63 = arith.constant 0 : index
    %143 = vector.load %arg4[%c5, %c0_62, %c0_63] : memref<9x1x32xf32, #tpu.memory_space<vmem>>, vector<1x1x32xf32>
    %144 = vector.shape_cast %143 : vector<1x1x32xf32> to vector<1x32xf32>
    %145 = vector.broadcast %144 : vector<1x32xf32> to vector<64x32xf32>
    %146 = arith.mulf %142, %145 : vector<64x32xf32>
    %147 = arith.addf %128, %146 : vector<64x32xf32>
    %c23 = arith.constant 23 : index
    %c0_64 = arith.constant 0 : index
    %148 = vector.load %arg15[%c23, %c0_64] : memref<96x32xf32, #tpu.memory_space<vmem>>, vector<64x32xf32>
    %c-1_i32_65 = arith.constant -1 : i32
    %149 = vector.broadcast %c-1_i32_65 : i32 to vector<64x1xi32>
    %150 = arith.addi %32, %149 : vector<64x1xi32>
    %c0_i32_66 = arith.constant 0 : i32
    %151 = vector.broadcast %c0_i32_66 : i32 to vector<64x1xi32>
    %152 = arith.cmpi sge, %150, %151 : vector<64x1xi32>
    %c-1_i32_67 = arith.constant -1 : i32
    %153 = vector.broadcast %c-1_i32_67 : i32 to vector<64x1xi32>
    %154 = arith.addi %32, %153 : vector<64x1xi32>
    %c8_i32_68 = arith.constant 8 : i32
    %155 = vector.broadcast %c8_i32_68 : i32 to vector<64x1xi32>
    %156 = arith.cmpi slt, %154, %155 : vector<64x1xi32>
    %157 = arith.andi %152, %156 : vector<64x1xi1>
    %cst_69 = arith.constant 0.000000e+00 : f32
    %158 = vector.shape_cast %157 : vector<64x1xi1> to vector<64x1xi1>
    %159 = vector.broadcast %158 : vector<64x1xi1> to vector<64x32xi1>
    %160 = vector.broadcast %cst_69 : f32 to vector<64x32xf32>
    %161 = arith.select %159, %148, %160 : vector<64x32xi1>, vector<64x32xf32>
    %c6 = arith.constant 6 : index
    %c0_70 = arith.constant 0 : index
    %c0_71 = arith.constant 0 : index
    %162 = vector.load %arg4[%c6, %c0_70, %c0_71] : memref<9x1x32xf32, #tpu.memory_space<vmem>>, vector<1x1x32xf32>
    %163 = vector.shape_cast %162 : vector<1x1x32xf32> to vector<1x32xf32>
    %164 = vector.broadcast %163 : vector<1x32xf32> to vector<64x32xf32>
    %165 = arith.mulf %161, %164 : vector<64x32xf32>
    %166 = arith.addf %147, %165 : vector<64x32xf32>
    %c24 = arith.constant 24 : index
    %c0_72 = arith.constant 0 : index
    %167 = vector.load %arg15[%c24, %c0_72] : memref<96x32xf32, #tpu.memory_space<vmem>>, vector<64x32xf32>
    %c0_i32_73 = arith.constant 0 : i32
    %168 = vector.broadcast %c0_i32_73 : i32 to vector<64x1xi32>
    %169 = arith.addi %32, %168 : vector<64x1xi32>
    %c0_i32_74 = arith.constant 0 : i32
    %170 = vector.broadcast %c0_i32_74 : i32 to vector<64x1xi32>
    %171 = arith.cmpi sge, %169, %170 : vector<64x1xi32>
    %c0_i32_75 = arith.constant 0 : i32
    %172 = vector.broadcast %c0_i32_75 : i32 to vector<64x1xi32>
    %173 = arith.addi %32, %172 : vector<64x1xi32>
    %c8_i32_76 = arith.constant 8 : i32
    %174 = vector.broadcast %c8_i32_76 : i32 to vector<64x1xi32>
    %175 = arith.cmpi slt, %173, %174 : vector<64x1xi32>
    %176 = arith.andi %171, %175 : vector<64x1xi1>
    %cst_77 = arith.constant 0.000000e+00 : f32
    %177 = vector.shape_cast %176 : vector<64x1xi1> to vector<64x1xi1>
    %178 = vector.broadcast %177 : vector<64x1xi1> to vector<64x32xi1>
    %179 = vector.broadcast %cst_77 : f32 to vector<64x32xf32>
    %180 = arith.select %178, %167, %179 : vector<64x32xi1>, vector<64x32xf32>
    %c7_78 = arith.constant 7 : index
    %c0_79 = arith.constant 0 : index
    %c0_80 = arith.constant 0 : index
    %181 = vector.load %arg4[%c7_78, %c0_79, %c0_80] : memref<9x1x32xf32, #tpu.memory_space<vmem>>, vector<1x1x32xf32>
    %182 = vector.shape_cast %181 : vector<1x1x32xf32> to vector<1x32xf32>
    %183 = vector.broadcast %182 : vector<1x32xf32> to vector<64x32xf32>
    %184 = arith.mulf %180, %183 : vector<64x32xf32>
    %185 = arith.addf %166, %184 : vector<64x32xf32>
    %c25 = arith.constant 25 : index
    %c0_81 = arith.constant 0 : index
    %186 = vector.load %arg15[%c25, %c0_81] : memref<96x32xf32, #tpu.memory_space<vmem>>, vector<64x32xf32>
    %c1_i32_82 = arith.constant 1 : i32
    %187 = vector.broadcast %c1_i32_82 : i32 to vector<64x1xi32>
    %188 = arith.addi %32, %187 : vector<64x1xi32>
    %c0_i32_83 = arith.constant 0 : i32
    %189 = vector.broadcast %c0_i32_83 : i32 to vector<64x1xi32>
    %190 = arith.cmpi sge, %188, %189 : vector<64x1xi32>
    %c1_i32_84 = arith.constant 1 : i32
    %191 = vector.broadcast %c1_i32_84 : i32 to vector<64x1xi32>
    %192 = arith.addi %32, %191 : vector<64x1xi32>
    %c8_i32_85 = arith.constant 8 : i32
    %193 = vector.broadcast %c8_i32_85 : i32 to vector<64x1xi32>
    %194 = arith.cmpi slt, %192, %193 : vector<64x1xi32>
    %195 = arith.andi %190, %194 : vector<64x1xi1>
    %cst_86 = arith.constant 0.000000e+00 : f32
    %196 = vector.shape_cast %195 : vector<64x1xi1> to vector<64x1xi1>
    %197 = vector.broadcast %196 : vector<64x1xi1> to vector<64x32xi1>
    %198 = vector.broadcast %cst_86 : f32 to vector<64x32xf32>
    %199 = arith.select %197, %186, %198 : vector<64x32xi1>, vector<64x32xf32>
    %c8_87 = arith.constant 8 : index
    %c0_88 = arith.constant 0 : index
    %c0_89 = arith.constant 0 : index
    %200 = vector.load %arg4[%c8_87, %c0_88, %c0_89] : memref<9x1x32xf32, #tpu.memory_space<vmem>>, vector<1x1x32xf32>
    %201 = vector.shape_cast %200 : vector<1x1x32xf32> to vector<1x32xf32>
    %202 = vector.broadcast %201 : vector<1x32xf32> to vector<64x32xf32>
    %203 = arith.mulf %199, %202 : vector<64x32xf32>
    %204 = arith.addf %185, %203 : vector<64x32xf32>
    %c0_90 = arith.constant 0 : index
    %c0_91 = arith.constant 0 : index
    %205 = vector.load %arg5[%c0_90, %c0_91] : memref<1x32xf32, #tpu.memory_space<vmem>>, vector<1x32xf32>
    %206 = vector.broadcast %205 : vector<1x32xf32> to vector<64x32xf32>
    %207 = arith.addf %204, %206 : vector<64x32xf32>
    %208 = arith.negf %207 : vector<64x32xf32>
    %209 = math.exp %208 : vector<64x32xf32>
    %cst_92 = arith.constant 1.000000e+00 : f32
    %210 = vector.broadcast %cst_92 : f32 to vector<64x32xf32>
    %211 = arith.addf %210, %209 : vector<64x32xf32>
    %212 = arith.divf %210, %211 : vector<64x32xf32>
    %213 = arith.mulf %207, %212 : vector<64x32xf32>
    %214 = arith.truncf %213 : vector<64x32xf32> to vector<64x32xbf16>
    %c0_93 = arith.constant 0 : index
    %c0_94 = arith.constant 0 : index
    %215 = vector.load %arg6[%c0_93, %c0_94] : memref<32x16xbf16, #tpu.memory_space<vmem>>, vector<32x16xbf16>
    %cst_95 = arith.constant dense<0.000000e+00> : vector<64x16xf32>
    %216 = tpu.matmul %214, %215, %cst_95 {dimension_numbers = #tpu.dot_dimension_numbers<[1], [0], [0], [1], [0, 0, 1, 1], [], []>} : vector<64x32xbf16>, vector<32x16xbf16>, vector<64x16xf32> -> vector<64x16xf32>
    %c0_96 = arith.constant 0 : index
    %c0_97 = arith.constant 0 : index
    %217 = vector.load %arg7[%c0_96, %c0_97] : memref<1x16xf32, #tpu.memory_space<vmem>>, vector<1x16xf32>
    %218 = vector.broadcast %217 : vector<1x16xf32> to vector<64x16xf32>
    %219 = arith.addf %216, %218 : vector<64x16xf32>
    %c0_98 = arith.constant 0 : index
    %c0_99 = arith.constant 0 : index
    %220 = vector.load %arg12[%c0_98, %c0_99] : memref<32x16xbf16, #tpu.memory_space<vmem>>, vector<32x16xbf16>
    %cst_100 = arith.constant dense<0.000000e+00> : vector<64x16xf32>
    %221 = tpu.matmul %1, %220, %cst_100 {dimension_numbers = #tpu.dot_dimension_numbers<[1], [0], [0], [1], [0, 0, 1, 1], [], []>} : vector<64x32xbf16>, vector<32x16xbf16>, vector<64x16xf32> -> vector<64x16xf32>
    %c0_101 = arith.constant 0 : index
    %c0_102 = arith.constant 0 : index
    %222 = vector.load %arg13[%c0_101, %c0_102] : memref<1x16xf32, #tpu.memory_space<vmem>>, vector<1x16xf32>
    %223 = vector.broadcast %222 : vector<1x16xf32> to vector<64x16xf32>
    %224 = arith.addf %221, %223 : vector<64x16xf32>
    %cst_103 = arith.constant dense<0.000000e+00> : vector<16xf32>
    %225 = vector.multi_reduction <add>, %219, %cst_103 [0] : vector<64x16xf32> to vector<16xf32>
    %226 = vector.shape_cast %225 : vector<16xf32> to vector<1x16xf32>
    %cst_104 = arith.constant 6.400000e+01 : f32
    %227 = vector.broadcast %cst_104 : f32 to vector<1x16xf32>
    %228 = arith.divf %226, %227 : vector<1x16xf32>
    %c0_105 = arith.constant 0 : index
    %c0_106 = arith.constant 0 : index
    %229 = vector.load %arg8[%c0_105, %c0_106] : memref<1x16xf32, #tpu.memory_space<vmem>>, vector<1x16xf32>
    %230 = arith.mulf %229, %228 : vector<1x16xf32>
    %cst_107 = arith.constant dense<0.000000e+00> : vector<1xf32>
    %231 = vector.multi_reduction <add>, %230, %cst_107 [1] : vector<1x16xf32> to vector<1xf32>
    %232 = vector.shape_cast %231 : vector<1xf32> to vector<1x1xf32>
    %c0_108 = arith.constant 0 : index
    %c0_109 = arith.constant 0 : index
    %233 = vector.load %arg9[%c0_108, %c0_109] : memref<1x1xf32, #tpu.memory_space<vmem>>, vector<1x1xf32>
    %234 = arith.addf %232, %233 : vector<1x1xf32>
    %235 = arith.negf %234 : vector<1x1xf32>
    %236 = math.exp %235 : vector<1x1xf32>
    %cst_110 = arith.constant 1.000000e+00 : f32
    %237 = vector.broadcast %cst_110 : f32 to vector<1x1xf32>
    %238 = arith.addf %237, %236 : vector<1x1xf32>
    %239 = arith.divf %237, %238 : vector<1x1xf32>
    %240 = arith.mulf %234, %239 : vector<1x1xf32>
    %c0_111 = arith.constant 0 : index
    %c0_112 = arith.constant 0 : index
    %241 = vector.load %arg10[%c0_111, %c0_112] : memref<1x16xf32, #tpu.memory_space<vmem>>, vector<1x16xf32>
    %242 = vector.broadcast %240 : vector<1x1xf32> to vector<1x16xf32>
    %243 = arith.mulf %242, %241 : vector<1x16xf32>
    %cst_113 = arith.constant dense<0.000000e+00> : vector<16xf32>
    %244 = vector.multi_reduction <add>, %243, %cst_113 [0] : vector<1x16xf32> to vector<16xf32>
    %245 = vector.shape_cast %244 : vector<16xf32> to vector<1x16xf32>
    %c0_114 = arith.constant 0 : index
    %c0_115 = arith.constant 0 : index
    %246 = vector.load %arg11[%c0_114, %c0_115] : memref<1x16xf32, #tpu.memory_space<vmem>>, vector<1x16xf32>
    %247 = arith.addf %245, %246 : vector<1x16xf32>
    %248 = arith.negf %247 : vector<1x16xf32>
    %249 = math.exp %248 : vector<1x16xf32>
    %cst_116 = arith.constant 1.000000e+00 : f32
    %250 = vector.broadcast %cst_116 : f32 to vector<1x16xf32>
    %251 = arith.addf %250, %249 : vector<1x16xf32>
    %252 = arith.divf %250, %251 : vector<1x16xf32>
    %253 = vector.broadcast %252 : vector<1x16xf32> to vector<64x16xf32>
    %254 = arith.mulf %219, %253 : vector<64x16xf32>
    %255 = arith.addf %254, %224 : vector<64x16xf32>
    %256 = arith.truncf %255 : vector<64x16xf32> to vector<64x16xbf16>
    %c0_117 = arith.constant 0 : index
    %c0_118 = arith.constant 0 : index
    %c0_119 = arith.constant 0 : index
    %257 = vector.load %arg14[%c0_117, %c0_118, %c0_119] : memref<1x64x16xbf16, #tpu.memory_space<vmem>>, vector<1x64x16xbf16>
    %258 = vector.shape_cast %257 : vector<1x64x16xbf16> to vector<64x16xbf16>
    %259 = vector.shape_cast %256 : vector<64x16xbf16> to vector<1x64x16xbf16>
    tpu.vector_store %arg14[%c0_117, %c0_118, %c0_119], %259 {strides = array<i32>} : memref<1x64x16xbf16, #tpu.memory_space<vmem>>, vector<1x64x16xbf16>,
    return
  }
  func.func @transform_0(%arg0: i32) -> (i32, i32, i32) {
    %c0_i32 = arith.constant 0 : i32
    %c0_i32_0 = arith.constant 0 : i32
    %c0_i32_1 = arith.constant 0 : i32
    return %arg0, %c0_i32, %c0_i32_0 : i32, i32, i32
  }
  func.func @transform_1(%arg0: i32) -> (i32, i32) {
    %c0_i32 = arith.constant 0 : i32
    %c0_i32_0 = arith.constant 0 : i32
    %c0_i32_1 = arith.constant 0 : i32
    return %c0_i32, %c0_i32_0 : i32, i32
  }
  func.func @transform_2(%arg0: i32) -> (i32, i32) {
    %c0_i32 = arith.constant 0 : i32
    %c0_i32_0 = arith.constant 0 : i32
    %c0_i32_1 = arith.constant 0 : i32
    return %c0_i32, %c0_i32_0 : i32, i32
  }
  func.func @transform_3(%arg0: i32) -> (i32, i32, i32) {
    %c0_i32 = arith.constant 0 : i32
    %c0_i32_0 = arith.constant 0 : i32
    %c0_i32_1 = arith.constant 0 : i32
    %c0_i32_2 = arith.constant 0 : i32
    return %c0_i32, %c0_i32_0, %c0_i32_1 : i32, i32, i32
  }
  func.func @transform_4(%arg0: i32) -> (i32, i32) {
    %c0_i32 = arith.constant 0 : i32
    %c0_i32_0 = arith.constant 0 : i32
    %c0_i32_1 = arith.constant 0 : i32
    return %c0_i32, %c0_i32_0 : i32, i32
  }
  func.func @transform_5(%arg0: i32) -> (i32, i32) {
    %c0_i32 = arith.constant 0 : i32
    %c0_i32_0 = arith.constant 0 : i32
    %c0_i32_1 = arith.constant 0 : i32
    return %c0_i32, %c0_i32_0 : i32, i32
  }
  func.func @transform_6(%arg0: i32) -> (i32, i32) {
    %c0_i32 = arith.constant 0 : i32
    %c0_i32_0 = arith.constant 0 : i32
    %c0_i32_1 = arith.constant 0 : i32
    return %c0_i32, %c0_i32_0 : i32, i32
  }
  func.func @transform_7(%arg0: i32) -> (i32, i32) {
    %c0_i32 = arith.constant 0 : i32
    %c0_i32_0 = arith.constant 0 : i32
    %c0_i32_1 = arith.constant 0 : i32
    return %c0_i32, %c0_i32_0 : i32, i32
  }
  func.func @transform_8(%arg0: i32) -> (i32, i32) {
    %c0_i32 = arith.constant 0 : i32
    %c0_i32_0 = arith.constant 0 : i32
    %c0_i32_1 = arith.constant 0 : i32
    return %c0_i32, %c0_i32_0 : i32, i32
  }
  func.func @transform_9(%arg0: i32) -> (i32, i32) {
    %c0_i32 = arith.constant 0 : i32
    %c0_i32_0 = arith.constant 0 : i32
    %c0_i32_1 = arith.constant 0 : i32
    return %c0_i32, %c0_i32_0 : i32, i32
  }
  func.func @transform_10(%arg0: i32) -> (i32, i32) {
    %c0_i32 = arith.constant 0 : i32
    %c0_i32_0 = arith.constant 0 : i32
    %c0_i32_1 = arith.constant 0 : i32
    return %c0_i32, %c0_i32_0 : i32, i32
  }
  func.func @transform_11(%arg0: i32) -> (i32, i32) {
    %c0_i32 = arith.constant 0 : i32
    %c0_i32_0 = arith.constant 0 : i32
    %c0_i32_1 = arith.constant 0 : i32
    return %c0_i32, %c0_i32_0 : i32, i32
  }
  func.func @transform_12(%arg0: i32) -> (i32, i32) {
    %c0_i32 = arith.constant 0 : i32
    %c0_i32_0 = arith.constant 0 : i32
    %c0_i32_1 = arith.constant 0 : i32
    return %c0_i32, %c0_i32_0 : i32, i32
  }
  func.func @transform_13(%arg0: i32) -> (i32, i32, i32) {
    %c0_i32 = arith.constant 0 : i32
    %c0_i32_0 = arith.constant 0 : i32
    %c0_i32_1 = arith.constant 0 : i32
    return %arg0, %c0_i32, %c0_i32_0 : i32, i32, i32
  }
}

module attributes {stable_mosaic.version = 11 : i64} {
  func.func @_mbconv_kernel(%arg0: i32, %arg1: memref<1x64x16xbf16, #tpu.memory_space<vmem>>, %arg2: memref<16x32xbf16, #tpu.memory_space<vmem>>, %arg3: memref<1x32xf32, #tpu.memory_space<vmem>>, %arg4: memref<9x1x32xf32, #tpu.memory_space<vmem>>, %arg5: memref<1x32xf32, #tpu.memory_space<vmem>>, %arg6: memref<32x32xbf16, #tpu.memory_space<vmem>>, %arg7: memref<1x32xf32, #tpu.memory_space<vmem>>, %arg8: memref<2x32xf32, #tpu.memory_space<vmem>>, %arg9: memref<2x1xf32, #tpu.memory_space<vmem>>, %arg10: memref<2x32xf32, #tpu.memory_space<vmem>>, %arg11: memref<1x32xf32, #tpu.memory_space<vmem>>, %arg12: memref<16x64xf32, #tpu.memory_space<vmem>>, %arg13: memref<1x16x32xbf16, #tpu.memory_space<vmem>>, %arg14: memref<96x32xf32, #tpu.memory_space<vmem>>) attributes {dimension_semantics = [#tpu.dimension_semantics<parallel>], iteration_bounds = array<i64: 2>, scalar_prefetch = 0 : i64, scratch_operands = 1 : i64, tpu.core_type = #tpu.core_type<tc>, window_params = [{transform_indices = @transform_0, window_bounds = array<i64: 1, 64, 16>}, {pipeline_mode = #tpu.pipeline_mode<synchronous>, transform_indices = @transform_1, window_bounds = array<i64: 16, 32>}, {pipeline_mode = #tpu.pipeline_mode<synchronous>, transform_indices = @transform_2, window_bounds = array<i64: 1, 32>}, {pipeline_mode = #tpu.pipeline_mode<synchronous>, transform_indices = @transform_3, window_bounds = array<i64: 9, 1, 32>}, {pipeline_mode = #tpu.pipeline_mode<synchronous>, transform_indices = @transform_4, window_bounds = array<i64: 1, 32>}, {pipeline_mode = #tpu.pipeline_mode<synchronous>, transform_indices = @transform_5, window_bounds = array<i64: 32, 32>}, {pipeline_mode = #tpu.pipeline_mode<synchronous>, transform_indices = @transform_6, window_bounds = array<i64: 1, 32>}, {pipeline_mode = #tpu.pipeline_mode<synchronous>, transform_indices = @transform_7, window_bounds = array<i64: 2, 32>}, {pipeline_mode = #tpu.pipeline_mode<synchronous>, transform_indices = @transform_8, window_bounds = array<i64: 2, 1>}, {pipeline_mode = #tpu.pipeline_mode<synchronous>, transform_indices = @transform_9, window_bounds = array<i64: 2, 32>}, {pipeline_mode = #tpu.pipeline_mode<synchronous>, transform_indices = @transform_10, window_bounds = array<i64: 1, 32>}, {pipeline_mode = #tpu.pipeline_mode<synchronous>, transform_indices = @transform_11, window_bounds = array<i64: 16, 64>}, {transform_indices = @transform_12, window_bounds = array<i64: 1, 16, 32>}]} {
    %c0 = arith.constant 0 : index
    %c0_0 = arith.constant 0 : index
    %c0_1 = arith.constant 0 : index
    %0 = vector.load %arg1[%c0, %c0_0, %c0_1] : memref<1x64x16xbf16, #tpu.memory_space<vmem>>, vector<1x64x16xbf16>
    %1 = vector.shape_cast %0 : vector<1x64x16xbf16> to vector<64x16xbf16>
    %c0_2 = arith.constant 0 : index
    %c0_3 = arith.constant 0 : index
    %2 = vector.load %arg2[%c0_2, %c0_3] : memref<16x32xbf16, #tpu.memory_space<vmem>>, vector<16x32xbf16>
    %cst = arith.constant dense<0.000000e+00> : vector<64x32xf32>
    %3 = tpu.matmul %1, %2, %cst {dimension_numbers = #tpu.dot_dimension_numbers<[1], [0], [0], [1], [0, 0, 1, 1], [], []>} : vector<64x16xbf16>, vector<16x32xbf16>, vector<64x32xf32> -> vector<64x32xf32>
    %c0_4 = arith.constant 0 : index
    %c0_5 = arith.constant 0 : index
    %4 = vector.load %arg3[%c0_4, %c0_5] : memref<1x32xf32, #tpu.memory_space<vmem>>, vector<1x32xf32>
    %5 = vector.broadcast %4 : vector<1x32xf32> to vector<64x32xf32>
    %6 = arith.addf %3, %5 : vector<64x32xf32>
    %7 = arith.negf %6 : vector<64x32xf32>
    %8 = math.exp %7 : vector<64x32xf32>
    %cst_6 = arith.constant 1.000000e+00 : f32
    %9 = vector.broadcast %cst_6 : f32 to vector<64x32xf32>
    %10 = arith.addf %9, %8 : vector<64x32xf32>
    %11 = arith.divf %9, %10 : vector<64x32xf32>
    %12 = arith.mulf %6, %11 : vector<64x32xf32>
    %cst_7 = arith.constant 0.000000e+00 : f32
    %13 = vector.broadcast %cst_7 : f32 to vector<96x32xf32>
    %c0_8 = arith.constant 0 : index
    %c0_9 = arith.constant 0 : index
    %14 = vector.load %arg14[%c0_8, %c0_9] : memref<96x32xf32, #tpu.memory_space<vmem>>, vector<96x32xf32>
    tpu.vector_store %arg14[%c0_8, %c0_9], %13 {strides = array<i32>} : memref<96x32xf32, #tpu.memory_space<vmem>>, vector<96x32xf32>,
    %c16 = arith.constant 16 : index
    %c0_10 = arith.constant 0 : index
    %15 = vector.load %arg14[%c16, %c0_10] : memref<96x32xf32, #tpu.memory_space<vmem>>, vector<64x32xf32>
    tpu.vector_store %arg14[%c16, %c0_10], %12 {strides = array<i32>} : memref<96x32xf32, #tpu.memory_space<vmem>>, vector<64x32xf32>,
    %16 = tpu.iota {dimensions = array<i32: 0>} : vector<64x1xi32>
    %c8_i32 = arith.constant 8 : i32
    %c0_i32 = arith.constant 0 : i32
    %17 = arith.cmpi eq, %c8_i32, %c0_i32 : i32
    %c1_i32 = arith.constant 1 : i32
    %18 = arith.select %17, %c1_i32, %c8_i32 : i32
    %19 = vector.broadcast %18 : i32 to vector<64x1xi32>
    %20 = arith.remsi %16, %19 : vector<64x1xi32>
    %c0_i32_11 = arith.constant 0 : i32
    %21 = vector.broadcast %c0_i32_11 : i32 to vector<64x1xi32>
    %22 = arith.cmpi ne, %20, %21 : vector<64x1xi32>
    %c0_i32_12 = arith.constant 0 : i32
    %23 = vector.broadcast %c0_i32_12 : i32 to vector<64x1xi32>
    %24 = arith.cmpi slt, %20, %23 : vector<64x1xi32>
    %c0_i32_13 = arith.constant 0 : i32
    %25 = arith.cmpi slt, %18, %c0_i32_13 : i32
    %26 = vector.broadcast %25 : i1 to vector<64x1xi1>
    %27 = vector.broadcast %26 : vector<64x1xi1> to vector<64x1xi1>
    %28 = arith.xori %24, %27 : vector<64x1xi1>
    %29 = arith.andi %28, %22 : vector<64x1xi1>
    %30 = vector.broadcast %18 : i32 to vector<64x1xi32>
    %31 = arith.addi %20, %30 : vector<64x1xi32>
    %32 = arith.select %29, %31, %20 : vector<64x1xi1>, vector<64x1xi32>
    %cst_14 = arith.constant 0.000000e+00 : f32
    %33 = vector.broadcast %cst_14 : f32 to vector<64x32xf32>
    %c7 = arith.constant 7 : index
    %c0_15 = arith.constant 0 : index
    %34 = vector.load %arg14[%c7, %c0_15] : memref<96x32xf32, #tpu.memory_space<vmem>>, vector<64x32xf32>
    %c-1_i32 = arith.constant -1 : i32
    %35 = vector.broadcast %c-1_i32 : i32 to vector<64x1xi32>
    %36 = arith.addi %32, %35 : vector<64x1xi32>
    %c0_i32_16 = arith.constant 0 : i32
    %37 = vector.broadcast %c0_i32_16 : i32 to vector<64x1xi32>
    %38 = arith.cmpi sge, %36, %37 : vector<64x1xi32>
    %c-1_i32_17 = arith.constant -1 : i32
    %39 = vector.broadcast %c-1_i32_17 : i32 to vector<64x1xi32>
    %40 = arith.addi %32, %39 : vector<64x1xi32>
    %c8_i32_18 = arith.constant 8 : i32
    %41 = vector.broadcast %c8_i32_18 : i32 to vector<64x1xi32>
    %42 = arith.cmpi slt, %40, %41 : vector<64x1xi32>
    %43 = arith.andi %38, %42 : vector<64x1xi1>
    %cst_19 = arith.constant 0.000000e+00 : f32
    %44 = vector.shape_cast %43 : vector<64x1xi1> to vector<64x1xi1>
    %45 = vector.broadcast %44 : vector<64x1xi1> to vector<64x32xi1>
    %46 = vector.broadcast %cst_19 : f32 to vector<64x32xf32>
    %47 = arith.select %45, %34, %46 : vector<64x32xi1>, vector<64x32xf32>
    %c0_20 = arith.constant 0 : index
    %c0_21 = arith.constant 0 : index
    %c0_22 = arith.constant 0 : index
    %48 = vector.load %arg4[%c0_20, %c0_21, %c0_22] : memref<9x1x32xf32, #tpu.memory_space<vmem>>, vector<1x1x32xf32>
    %49 = vector.shape_cast %48 : vector<1x1x32xf32> to vector<1x32xf32>
    %50 = vector.broadcast %49 : vector<1x32xf32> to vector<64x32xf32>
    %51 = arith.mulf %47, %50 : vector<64x32xf32>
    %52 = arith.addf %33, %51 : vector<64x32xf32>
    %c8 = arith.constant 8 : index
    %c0_23 = arith.constant 0 : index
    %53 = vector.load %arg14[%c8, %c0_23] : memref<96x32xf32, #tpu.memory_space<vmem>>, vector<64x32xf32>
    %c0_i32_24 = arith.constant 0 : i32
    %54 = vector.broadcast %c0_i32_24 : i32 to vector<64x1xi32>
    %55 = arith.addi %32, %54 : vector<64x1xi32>
    %c0_i32_25 = arith.constant 0 : i32
    %56 = vector.broadcast %c0_i32_25 : i32 to vector<64x1xi32>
    %57 = arith.cmpi sge, %55, %56 : vector<64x1xi32>
    %c0_i32_26 = arith.constant 0 : i32
    %58 = vector.broadcast %c0_i32_26 : i32 to vector<64x1xi32>
    %59 = arith.addi %32, %58 : vector<64x1xi32>
    %c8_i32_27 = arith.constant 8 : i32
    %60 = vector.broadcast %c8_i32_27 : i32 to vector<64x1xi32>
    %61 = arith.cmpi slt, %59, %60 : vector<64x1xi32>
    %62 = arith.andi %57, %61 : vector<64x1xi1>
    %cst_28 = arith.constant 0.000000e+00 : f32
    %63 = vector.shape_cast %62 : vector<64x1xi1> to vector<64x1xi1>
    %64 = vector.broadcast %63 : vector<64x1xi1> to vector<64x32xi1>
    %65 = vector.broadcast %cst_28 : f32 to vector<64x32xf32>
    %66 = arith.select %64, %53, %65 : vector<64x32xi1>, vector<64x32xf32>
    %c1 = arith.constant 1 : index
    %c0_29 = arith.constant 0 : index
    %c0_30 = arith.constant 0 : index
    %67 = vector.load %arg4[%c1, %c0_29, %c0_30] : memref<9x1x32xf32, #tpu.memory_space<vmem>>, vector<1x1x32xf32>
    %68 = vector.shape_cast %67 : vector<1x1x32xf32> to vector<1x32xf32>
    %69 = vector.broadcast %68 : vector<1x32xf32> to vector<64x32xf32>
    %70 = arith.mulf %66, %69 : vector<64x32xf32>
    %71 = arith.addf %52, %70 : vector<64x32xf32>
    %c9 = arith.constant 9 : index
    %c0_31 = arith.constant 0 : index
    %72 = vector.load %arg14[%c9, %c0_31] : memref<96x32xf32, #tpu.memory_space<vmem>>, vector<64x32xf32>
    %c1_i32_32 = arith.constant 1 : i32
    %73 = vector.broadcast %c1_i32_32 : i32 to vector<64x1xi32>
    %74 = arith.addi %32, %73 : vector<64x1xi32>
    %c0_i32_33 = arith.constant 0 : i32
    %75 = vector.broadcast %c0_i32_33 : i32 to vector<64x1xi32>
    %76 = arith.cmpi sge, %74, %75 : vector<64x1xi32>
    %c1_i32_34 = arith.constant 1 : i32
    %77 = vector.broadcast %c1_i32_34 : i32 to vector<64x1xi32>
    %78 = arith.addi %32, %77 : vector<64x1xi32>
    %c8_i32_35 = arith.constant 8 : i32
    %79 = vector.broadcast %c8_i32_35 : i32 to vector<64x1xi32>
    %80 = arith.cmpi slt, %78, %79 : vector<64x1xi32>
    %81 = arith.andi %76, %80 : vector<64x1xi1>
    %cst_36 = arith.constant 0.000000e+00 : f32
    %82 = vector.shape_cast %81 : vector<64x1xi1> to vector<64x1xi1>
    %83 = vector.broadcast %82 : vector<64x1xi1> to vector<64x32xi1>
    %84 = vector.broadcast %cst_36 : f32 to vector<64x32xf32>
    %85 = arith.select %83, %72, %84 : vector<64x32xi1>, vector<64x32xf32>
    %c2 = arith.constant 2 : index
    %c0_37 = arith.constant 0 : index
    %c0_38 = arith.constant 0 : index
    %86 = vector.load %arg4[%c2, %c0_37, %c0_38] : memref<9x1x32xf32, #tpu.memory_space<vmem>>, vector<1x1x32xf32>
    %87 = vector.shape_cast %86 : vector<1x1x32xf32> to vector<1x32xf32>
    %88 = vector.broadcast %87 : vector<1x32xf32> to vector<64x32xf32>
    %89 = arith.mulf %85, %88 : vector<64x32xf32>
    %90 = arith.addf %71, %89 : vector<64x32xf32>
    %c15 = arith.constant 15 : index
    %c0_39 = arith.constant 0 : index
    %91 = vector.load %arg14[%c15, %c0_39] : memref<96x32xf32, #tpu.memory_space<vmem>>, vector<64x32xf32>
    %c-1_i32_40 = arith.constant -1 : i32
    %92 = vector.broadcast %c-1_i32_40 : i32 to vector<64x1xi32>
    %93 = arith.addi %32, %92 : vector<64x1xi32>
    %c0_i32_41 = arith.constant 0 : i32
    %94 = vector.broadcast %c0_i32_41 : i32 to vector<64x1xi32>
    %95 = arith.cmpi sge, %93, %94 : vector<64x1xi32>
    %c-1_i32_42 = arith.constant -1 : i32
    %96 = vector.broadcast %c-1_i32_42 : i32 to vector<64x1xi32>
    %97 = arith.addi %32, %96 : vector<64x1xi32>
    %c8_i32_43 = arith.constant 8 : i32
    %98 = vector.broadcast %c8_i32_43 : i32 to vector<64x1xi32>
    %99 = arith.cmpi slt, %97, %98 : vector<64x1xi32>
    %100 = arith.andi %95, %99 : vector<64x1xi1>
    %cst_44 = arith.constant 0.000000e+00 : f32
    %101 = vector.shape_cast %100 : vector<64x1xi1> to vector<64x1xi1>
    %102 = vector.broadcast %101 : vector<64x1xi1> to vector<64x32xi1>
    %103 = vector.broadcast %cst_44 : f32 to vector<64x32xf32>
    %104 = arith.select %102, %91, %103 : vector<64x32xi1>, vector<64x32xf32>
    %c3 = arith.constant 3 : index
    %c0_45 = arith.constant 0 : index
    %c0_46 = arith.constant 0 : index
    %105 = vector.load %arg4[%c3, %c0_45, %c0_46] : memref<9x1x32xf32, #tpu.memory_space<vmem>>, vector<1x1x32xf32>
    %106 = vector.shape_cast %105 : vector<1x1x32xf32> to vector<1x32xf32>
    %107 = vector.broadcast %106 : vector<1x32xf32> to vector<64x32xf32>
    %108 = arith.mulf %104, %107 : vector<64x32xf32>
    %109 = arith.addf %90, %108 : vector<64x32xf32>
    %c16_47 = arith.constant 16 : index
    %c0_48 = arith.constant 0 : index
    %110 = vector.load %arg14[%c16_47, %c0_48] : memref<96x32xf32, #tpu.memory_space<vmem>>, vector<64x32xf32>
    %c0_i32_49 = arith.constant 0 : i32
    %111 = vector.broadcast %c0_i32_49 : i32 to vector<64x1xi32>
    %112 = arith.addi %32, %111 : vector<64x1xi32>
    %c0_i32_50 = arith.constant 0 : i32
    %113 = vector.broadcast %c0_i32_50 : i32 to vector<64x1xi32>
    %114 = arith.cmpi sge, %112, %113 : vector<64x1xi32>
    %c0_i32_51 = arith.constant 0 : i32
    %115 = vector.broadcast %c0_i32_51 : i32 to vector<64x1xi32>
    %116 = arith.addi %32, %115 : vector<64x1xi32>
    %c8_i32_52 = arith.constant 8 : i32
    %117 = vector.broadcast %c8_i32_52 : i32 to vector<64x1xi32>
    %118 = arith.cmpi slt, %116, %117 : vector<64x1xi32>
    %119 = arith.andi %114, %118 : vector<64x1xi1>
    %cst_53 = arith.constant 0.000000e+00 : f32
    %120 = vector.shape_cast %119 : vector<64x1xi1> to vector<64x1xi1>
    %121 = vector.broadcast %120 : vector<64x1xi1> to vector<64x32xi1>
    %122 = vector.broadcast %cst_53 : f32 to vector<64x32xf32>
    %123 = arith.select %121, %110, %122 : vector<64x32xi1>, vector<64x32xf32>
    %c4 = arith.constant 4 : index
    %c0_54 = arith.constant 0 : index
    %c0_55 = arith.constant 0 : index
    %124 = vector.load %arg4[%c4, %c0_54, %c0_55] : memref<9x1x32xf32, #tpu.memory_space<vmem>>, vector<1x1x32xf32>
    %125 = vector.shape_cast %124 : vector<1x1x32xf32> to vector<1x32xf32>
    %126 = vector.broadcast %125 : vector<1x32xf32> to vector<64x32xf32>
    %127 = arith.mulf %123, %126 : vector<64x32xf32>
    %128 = arith.addf %109, %127 : vector<64x32xf32>
    %c17 = arith.constant 17 : index
    %c0_56 = arith.constant 0 : index
    %129 = vector.load %arg14[%c17, %c0_56] : memref<96x32xf32, #tpu.memory_space<vmem>>, vector<64x32xf32>
    %c1_i32_57 = arith.constant 1 : i32
    %130 = vector.broadcast %c1_i32_57 : i32 to vector<64x1xi32>
    %131 = arith.addi %32, %130 : vector<64x1xi32>
    %c0_i32_58 = arith.constant 0 : i32
    %132 = vector.broadcast %c0_i32_58 : i32 to vector<64x1xi32>
    %133 = arith.cmpi sge, %131, %132 : vector<64x1xi32>
    %c1_i32_59 = arith.constant 1 : i32
    %134 = vector.broadcast %c1_i32_59 : i32 to vector<64x1xi32>
    %135 = arith.addi %32, %134 : vector<64x1xi32>
    %c8_i32_60 = arith.constant 8 : i32
    %136 = vector.broadcast %c8_i32_60 : i32 to vector<64x1xi32>
    %137 = arith.cmpi slt, %135, %136 : vector<64x1xi32>
    %138 = arith.andi %133, %137 : vector<64x1xi1>
    %cst_61 = arith.constant 0.000000e+00 : f32
    %139 = vector.shape_cast %138 : vector<64x1xi1> to vector<64x1xi1>
    %140 = vector.broadcast %139 : vector<64x1xi1> to vector<64x32xi1>
    %141 = vector.broadcast %cst_61 : f32 to vector<64x32xf32>
    %142 = arith.select %140, %129, %141 : vector<64x32xi1>, vector<64x32xf32>
    %c5 = arith.constant 5 : index
    %c0_62 = arith.constant 0 : index
    %c0_63 = arith.constant 0 : index
    %143 = vector.load %arg4[%c5, %c0_62, %c0_63] : memref<9x1x32xf32, #tpu.memory_space<vmem>>, vector<1x1x32xf32>
    %144 = vector.shape_cast %143 : vector<1x1x32xf32> to vector<1x32xf32>
    %145 = vector.broadcast %144 : vector<1x32xf32> to vector<64x32xf32>
    %146 = arith.mulf %142, %145 : vector<64x32xf32>
    %147 = arith.addf %128, %146 : vector<64x32xf32>
    %c23 = arith.constant 23 : index
    %c0_64 = arith.constant 0 : index
    %148 = vector.load %arg14[%c23, %c0_64] : memref<96x32xf32, #tpu.memory_space<vmem>>, vector<64x32xf32>
    %c-1_i32_65 = arith.constant -1 : i32
    %149 = vector.broadcast %c-1_i32_65 : i32 to vector<64x1xi32>
    %150 = arith.addi %32, %149 : vector<64x1xi32>
    %c0_i32_66 = arith.constant 0 : i32
    %151 = vector.broadcast %c0_i32_66 : i32 to vector<64x1xi32>
    %152 = arith.cmpi sge, %150, %151 : vector<64x1xi32>
    %c-1_i32_67 = arith.constant -1 : i32
    %153 = vector.broadcast %c-1_i32_67 : i32 to vector<64x1xi32>
    %154 = arith.addi %32, %153 : vector<64x1xi32>
    %c8_i32_68 = arith.constant 8 : i32
    %155 = vector.broadcast %c8_i32_68 : i32 to vector<64x1xi32>
    %156 = arith.cmpi slt, %154, %155 : vector<64x1xi32>
    %157 = arith.andi %152, %156 : vector<64x1xi1>
    %cst_69 = arith.constant 0.000000e+00 : f32
    %158 = vector.shape_cast %157 : vector<64x1xi1> to vector<64x1xi1>
    %159 = vector.broadcast %158 : vector<64x1xi1> to vector<64x32xi1>
    %160 = vector.broadcast %cst_69 : f32 to vector<64x32xf32>
    %161 = arith.select %159, %148, %160 : vector<64x32xi1>, vector<64x32xf32>
    %c6 = arith.constant 6 : index
    %c0_70 = arith.constant 0 : index
    %c0_71 = arith.constant 0 : index
    %162 = vector.load %arg4[%c6, %c0_70, %c0_71] : memref<9x1x32xf32, #tpu.memory_space<vmem>>, vector<1x1x32xf32>
    %163 = vector.shape_cast %162 : vector<1x1x32xf32> to vector<1x32xf32>
    %164 = vector.broadcast %163 : vector<1x32xf32> to vector<64x32xf32>
    %165 = arith.mulf %161, %164 : vector<64x32xf32>
    %166 = arith.addf %147, %165 : vector<64x32xf32>
    %c24 = arith.constant 24 : index
    %c0_72 = arith.constant 0 : index
    %167 = vector.load %arg14[%c24, %c0_72] : memref<96x32xf32, #tpu.memory_space<vmem>>, vector<64x32xf32>
    %c0_i32_73 = arith.constant 0 : i32
    %168 = vector.broadcast %c0_i32_73 : i32 to vector<64x1xi32>
    %169 = arith.addi %32, %168 : vector<64x1xi32>
    %c0_i32_74 = arith.constant 0 : i32
    %170 = vector.broadcast %c0_i32_74 : i32 to vector<64x1xi32>
    %171 = arith.cmpi sge, %169, %170 : vector<64x1xi32>
    %c0_i32_75 = arith.constant 0 : i32
    %172 = vector.broadcast %c0_i32_75 : i32 to vector<64x1xi32>
    %173 = arith.addi %32, %172 : vector<64x1xi32>
    %c8_i32_76 = arith.constant 8 : i32
    %174 = vector.broadcast %c8_i32_76 : i32 to vector<64x1xi32>
    %175 = arith.cmpi slt, %173, %174 : vector<64x1xi32>
    %176 = arith.andi %171, %175 : vector<64x1xi1>
    %cst_77 = arith.constant 0.000000e+00 : f32
    %177 = vector.shape_cast %176 : vector<64x1xi1> to vector<64x1xi1>
    %178 = vector.broadcast %177 : vector<64x1xi1> to vector<64x32xi1>
    %179 = vector.broadcast %cst_77 : f32 to vector<64x32xf32>
    %180 = arith.select %178, %167, %179 : vector<64x32xi1>, vector<64x32xf32>
    %c7_78 = arith.constant 7 : index
    %c0_79 = arith.constant 0 : index
    %c0_80 = arith.constant 0 : index
    %181 = vector.load %arg4[%c7_78, %c0_79, %c0_80] : memref<9x1x32xf32, #tpu.memory_space<vmem>>, vector<1x1x32xf32>
    %182 = vector.shape_cast %181 : vector<1x1x32xf32> to vector<1x32xf32>
    %183 = vector.broadcast %182 : vector<1x32xf32> to vector<64x32xf32>
    %184 = arith.mulf %180, %183 : vector<64x32xf32>
    %185 = arith.addf %166, %184 : vector<64x32xf32>
    %c25 = arith.constant 25 : index
    %c0_81 = arith.constant 0 : index
    %186 = vector.load %arg14[%c25, %c0_81] : memref<96x32xf32, #tpu.memory_space<vmem>>, vector<64x32xf32>
    %c1_i32_82 = arith.constant 1 : i32
    %187 = vector.broadcast %c1_i32_82 : i32 to vector<64x1xi32>
    %188 = arith.addi %32, %187 : vector<64x1xi32>
    %c0_i32_83 = arith.constant 0 : i32
    %189 = vector.broadcast %c0_i32_83 : i32 to vector<64x1xi32>
    %190 = arith.cmpi sge, %188, %189 : vector<64x1xi32>
    %c1_i32_84 = arith.constant 1 : i32
    %191 = vector.broadcast %c1_i32_84 : i32 to vector<64x1xi32>
    %192 = arith.addi %32, %191 : vector<64x1xi32>
    %c8_i32_85 = arith.constant 8 : i32
    %193 = vector.broadcast %c8_i32_85 : i32 to vector<64x1xi32>
    %194 = arith.cmpi slt, %192, %193 : vector<64x1xi32>
    %195 = arith.andi %190, %194 : vector<64x1xi1>
    %cst_86 = arith.constant 0.000000e+00 : f32
    %196 = vector.shape_cast %195 : vector<64x1xi1> to vector<64x1xi1>
    %197 = vector.broadcast %196 : vector<64x1xi1> to vector<64x32xi1>
    %198 = vector.broadcast %cst_86 : f32 to vector<64x32xf32>
    %199 = arith.select %197, %186, %198 : vector<64x32xi1>, vector<64x32xf32>
    %c8_87 = arith.constant 8 : index
    %c0_88 = arith.constant 0 : index
    %c0_89 = arith.constant 0 : index
    %200 = vector.load %arg4[%c8_87, %c0_88, %c0_89] : memref<9x1x32xf32, #tpu.memory_space<vmem>>, vector<1x1x32xf32>
    %201 = vector.shape_cast %200 : vector<1x1x32xf32> to vector<1x32xf32>
    %202 = vector.broadcast %201 : vector<1x32xf32> to vector<64x32xf32>
    %203 = arith.mulf %199, %202 : vector<64x32xf32>
    %204 = arith.addf %185, %203 : vector<64x32xf32>
    %c0_90 = arith.constant 0 : index
    %c0_91 = arith.constant 0 : index
    %205 = vector.load %arg5[%c0_90, %c0_91] : memref<1x32xf32, #tpu.memory_space<vmem>>, vector<1x32xf32>
    %206 = vector.broadcast %205 : vector<1x32xf32> to vector<64x32xf32>
    %207 = arith.addf %204, %206 : vector<64x32xf32>
    %208 = arith.negf %207 : vector<64x32xf32>
    %209 = math.exp %208 : vector<64x32xf32>
    %cst_92 = arith.constant 1.000000e+00 : f32
    %210 = vector.broadcast %cst_92 : f32 to vector<64x32xf32>
    %211 = arith.addf %210, %209 : vector<64x32xf32>
    %212 = arith.divf %210, %211 : vector<64x32xf32>
    %213 = arith.mulf %207, %212 : vector<64x32xf32>
    %c0_93 = arith.constant 0 : index
    %c0_94 = arith.constant 0 : index
    %214 = vector.load %arg12[%c0_93, %c0_94] : memref<16x64xf32, #tpu.memory_space<vmem>>, vector<16x64xf32>
    %cst_95 = arith.constant dense<0.000000e+00> : vector<16x32xf32>
    %215 = tpu.matmul %214, %213, %cst_95 {dimension_numbers = #tpu.dot_dimension_numbers<[1], [0], [0], [1], [0, 0, 1, 1], [], []>} : vector<16x64xf32>, vector<64x32xf32>, vector<16x32xf32> -> vector<16x32xf32>
    %216 = arith.truncf %215 : vector<16x32xf32> to vector<16x32xbf16>
    %c0_96 = arith.constant 0 : index
    %c0_97 = arith.constant 0 : index
    %217 = vector.load %arg6[%c0_96, %c0_97] : memref<32x32xbf16, #tpu.memory_space<vmem>>, vector<32x32xbf16>
    %cst_98 = arith.constant dense<0.000000e+00> : vector<16x32xf32>
    %218 = tpu.matmul %216, %217, %cst_98 {dimension_numbers = #tpu.dot_dimension_numbers<[1], [0], [0], [1], [0, 0, 1, 1], [], []>} : vector<16x32xbf16>, vector<32x32xbf16>, vector<16x32xf32> -> vector<16x32xf32>
    %c0_99 = arith.constant 0 : index
    %c0_100 = arith.constant 0 : index
    %219 = vector.load %arg7[%c0_99, %c0_100] : memref<1x32xf32, #tpu.memory_space<vmem>>, vector<1x32xf32>
    %220 = vector.broadcast %219 : vector<1x32xf32> to vector<16x32xf32>
    %221 = arith.addf %218, %220 : vector<16x32xf32>
    %cst_101 = arith.constant dense<0.000000e+00> : vector<32xf32>
    %222 = vector.multi_reduction <add>, %221, %cst_101 [0] : vector<16x32xf32> to vector<32xf32>
    %223 = vector.shape_cast %222 : vector<32xf32> to vector<1x32xf32>
    %cst_102 = arith.constant 1.600000e+01 : f32
    %224 = vector.broadcast %cst_102 : f32 to vector<1x32xf32>
    %225 = arith.divf %223, %224 : vector<1x32xf32>
    %c0_103 = arith.constant 0 : index
    %c0_104 = arith.constant 0 : index
    %226 = vector.load %arg8[%c0_103, %c0_104] : memref<2x32xf32, #tpu.memory_space<vmem>>, vector<2x32xf32>
    %227 = vector.broadcast %225 : vector<1x32xf32> to vector<2x32xf32>
    %228 = arith.mulf %226, %227 : vector<2x32xf32>
    %cst_105 = arith.constant dense<0.000000e+00> : vector<2xf32>
    %229 = vector.multi_reduction <add>, %228, %cst_105 [1] : vector<2x32xf32> to vector<2xf32>
    %230 = vector.shape_cast %229 : vector<2xf32> to vector<2x1xf32>
    %c0_106 = arith.constant 0 : index
    %c0_107 = arith.constant 0 : index
    %231 = vector.load %arg9[%c0_106, %c0_107] : memref<2x1xf32, #tpu.memory_space<vmem>>, vector<2x1xf32>
    %232 = arith.addf %230, %231 : vector<2x1xf32>
    %233 = arith.negf %232 : vector<2x1xf32>
    %234 = math.exp %233 : vector<2x1xf32>
    %cst_108 = arith.constant 1.000000e+00 : f32
    %235 = vector.broadcast %cst_108 : f32 to vector<2x1xf32>
    %236 = arith.addf %235, %234 : vector<2x1xf32>
    %237 = arith.divf %235, %236 : vector<2x1xf32>
    %238 = arith.mulf %232, %237 : vector<2x1xf32>
    %c0_109 = arith.constant 0 : index
    %c0_110 = arith.constant 0 : index
    %239 = vector.load %arg10[%c0_109, %c0_110] : memref<2x32xf32, #tpu.memory_space<vmem>>, vector<2x32xf32>
    %240 = vector.broadcast %238 : vector<2x1xf32> to vector<2x32xf32>
    %241 = arith.mulf %240, %239 : vector<2x32xf32>
    %cst_111 = arith.constant dense<0.000000e+00> : vector<32xf32>
    %242 = vector.multi_reduction <add>, %241, %cst_111 [0] : vector<2x32xf32> to vector<32xf32>
    %243 = vector.shape_cast %242 : vector<32xf32> to vector<1x32xf32>
    %c0_112 = arith.constant 0 : index
    %c0_113 = arith.constant 0 : index
    %244 = vector.load %arg11[%c0_112, %c0_113] : memref<1x32xf32, #tpu.memory_space<vmem>>, vector<1x32xf32>
    %245 = arith.addf %243, %244 : vector<1x32xf32>
    %246 = arith.negf %245 : vector<1x32xf32>
    %247 = math.exp %246 : vector<1x32xf32>
    %cst_114 = arith.constant 1.000000e+00 : f32
    %248 = vector.broadcast %cst_114 : f32 to vector<1x32xf32>
    %249 = arith.addf %248, %247 : vector<1x32xf32>
    %250 = arith.divf %248, %249 : vector<1x32xf32>
    %251 = vector.broadcast %250 : vector<1x32xf32> to vector<16x32xf32>
    %252 = arith.mulf %221, %251 : vector<16x32xf32>
    %253 = arith.addf %252, %221 : vector<16x32xf32>
    %254 = arith.truncf %253 : vector<16x32xf32> to vector<16x32xbf16>
    %c0_115 = arith.constant 0 : index
    %c0_116 = arith.constant 0 : index
    %c0_117 = arith.constant 0 : index
    %255 = vector.load %arg13[%c0_115, %c0_116, %c0_117] : memref<1x16x32xbf16, #tpu.memory_space<vmem>>, vector<1x16x32xbf16>
    %256 = vector.shape_cast %255 : vector<1x16x32xbf16> to vector<16x32xbf16>
    %257 = vector.shape_cast %254 : vector<16x32xbf16> to vector<1x16x32xbf16>
    tpu.vector_store %arg13[%c0_115, %c0_116, %c0_117], %257 {strides = array<i32>} : memref<1x16x32xbf16, #tpu.memory_space<vmem>>, vector<1x16x32xbf16>,
    return
  }
  func.func @transform_0(%arg0: i32) -> (i32, i32, i32) {
    %c0_i32 = arith.constant 0 : i32
    %c0_i32_0 = arith.constant 0 : i32
    %c0_i32_1 = arith.constant 0 : i32
    return %arg0, %c0_i32, %c0_i32_0 : i32, i32, i32
  }
  func.func @transform_1(%arg0: i32) -> (i32, i32) {
    %c0_i32 = arith.constant 0 : i32
    %c0_i32_0 = arith.constant 0 : i32
    %c0_i32_1 = arith.constant 0 : i32
    return %c0_i32, %c0_i32_0 : i32, i32
  }
  func.func @transform_2(%arg0: i32) -> (i32, i32) {
    %c0_i32 = arith.constant 0 : i32
    %c0_i32_0 = arith.constant 0 : i32
    %c0_i32_1 = arith.constant 0 : i32
    return %c0_i32, %c0_i32_0 : i32, i32
  }
  func.func @transform_3(%arg0: i32) -> (i32, i32, i32) {
    %c0_i32 = arith.constant 0 : i32
    %c0_i32_0 = arith.constant 0 : i32
    %c0_i32_1 = arith.constant 0 : i32
    %c0_i32_2 = arith.constant 0 : i32
    return %c0_i32, %c0_i32_0, %c0_i32_1 : i32, i32, i32
  }
  func.func @transform_4(%arg0: i32) -> (i32, i32) {
    %c0_i32 = arith.constant 0 : i32
    %c0_i32_0 = arith.constant 0 : i32
    %c0_i32_1 = arith.constant 0 : i32
    return %c0_i32, %c0_i32_0 : i32, i32
  }
  func.func @transform_5(%arg0: i32) -> (i32, i32) {
    %c0_i32 = arith.constant 0 : i32
    %c0_i32_0 = arith.constant 0 : i32
    %c0_i32_1 = arith.constant 0 : i32
    return %c0_i32, %c0_i32_0 : i32, i32
  }
  func.func @transform_6(%arg0: i32) -> (i32, i32) {
    %c0_i32 = arith.constant 0 : i32
    %c0_i32_0 = arith.constant 0 : i32
    %c0_i32_1 = arith.constant 0 : i32
    return %c0_i32, %c0_i32_0 : i32, i32
  }
  func.func @transform_7(%arg0: i32) -> (i32, i32) {
    %c0_i32 = arith.constant 0 : i32
    %c0_i32_0 = arith.constant 0 : i32
    %c0_i32_1 = arith.constant 0 : i32
    return %c0_i32, %c0_i32_0 : i32, i32
  }
  func.func @transform_8(%arg0: i32) -> (i32, i32) {
    %c0_i32 = arith.constant 0 : i32
    %c0_i32_0 = arith.constant 0 : i32
    %c0_i32_1 = arith.constant 0 : i32
    return %c0_i32, %c0_i32_0 : i32, i32
  }
  func.func @transform_9(%arg0: i32) -> (i32, i32) {
    %c0_i32 = arith.constant 0 : i32
    %c0_i32_0 = arith.constant 0 : i32
    %c0_i32_1 = arith.constant 0 : i32
    return %c0_i32, %c0_i32_0 : i32, i32
  }
  func.func @transform_10(%arg0: i32) -> (i32, i32) {
    %c0_i32 = arith.constant 0 : i32
    %c0_i32_0 = arith.constant 0 : i32
    %c0_i32_1 = arith.constant 0 : i32
    return %c0_i32, %c0_i32_0 : i32, i32
  }
  func.func @transform_11(%arg0: i32) -> (i32, i32) {
    %c0_i32 = arith.constant 0 : i32
    %c0_i32_0 = arith.constant 0 : i32
    %c0_i32_1 = arith.constant 0 : i32
    return %c0_i32, %c0_i32_0 : i32, i32
  }
  func.func @transform_12(%arg0: i32) -> (i32, i32, i32) {
    %c0_i32 = arith.constant 0 : i32
    %c0_i32_0 = arith.constant 0 : i32
    %c0_i32_1 = arith.constant 0 : i32
    return %arg0, %c0_i32, %c0_i32_0 : i32, i32, i32
  }
}

module attributes {stable_mosaic.version = 11 : i64} {
  func.func @_mbconv_kernel(%arg0: i32, %arg1: memref<1x16x32xbf16, #tpu.memory_space<vmem>>, %arg2: memref<32x64xbf16, #tpu.memory_space<vmem>>, %arg3: memref<1x64xf32, #tpu.memory_space<vmem>>, %arg4: memref<9x1x64xf32, #tpu.memory_space<vmem>>, %arg5: memref<1x64xf32, #tpu.memory_space<vmem>>, %arg6: memref<64x32xbf16, #tpu.memory_space<vmem>>, %arg7: memref<1x32xf32, #tpu.memory_space<vmem>>, %arg8: memref<2x32xf32, #tpu.memory_space<vmem>>, %arg9: memref<2x1xf32, #tpu.memory_space<vmem>>, %arg10: memref<2x32xf32, #tpu.memory_space<vmem>>, %arg11: memref<1x32xf32, #tpu.memory_space<vmem>>, %arg12: memref<4x16xf32, #tpu.memory_space<vmem>>, %arg13: memref<1x4x32xbf16, #tpu.memory_space<vmem>>, %arg14: memref<32x64xf32, #tpu.memory_space<vmem>>) attributes {dimension_semantics = [#tpu.dimension_semantics<parallel>], iteration_bounds = array<i64: 2>, scalar_prefetch = 0 : i64, scratch_operands = 1 : i64, tpu.core_type = #tpu.core_type<tc>, window_params = [{transform_indices = @transform_0, window_bounds = array<i64: 1, 16, 32>}, {pipeline_mode = #tpu.pipeline_mode<synchronous>, transform_indices = @transform_1, window_bounds = array<i64: 32, 64>}, {pipeline_mode = #tpu.pipeline_mode<synchronous>, transform_indices = @transform_2, window_bounds = array<i64: 1, 64>}, {pipeline_mode = #tpu.pipeline_mode<synchronous>, transform_indices = @transform_3, window_bounds = array<i64: 9, 1, 64>}, {pipeline_mode = #tpu.pipeline_mode<synchronous>, transform_indices = @transform_4, window_bounds = array<i64: 1, 64>}, {pipeline_mode = #tpu.pipeline_mode<synchronous>, transform_indices = @transform_5, window_bounds = array<i64: 64, 32>}, {pipeline_mode = #tpu.pipeline_mode<synchronous>, transform_indices = @transform_6, window_bounds = array<i64: 1, 32>}, {pipeline_mode = #tpu.pipeline_mode<synchronous>, transform_indices = @transform_7, window_bounds = array<i64: 2, 32>}, {pipeline_mode = #tpu.pipeline_mode<synchronous>, transform_indices = @transform_8, window_bounds = array<i64: 2, 1>}, {pipeline_mode = #tpu.pipeline_mode<synchronous>, transform_indices = @transform_9, window_bounds = array<i64: 2, 32>}, {pipeline_mode = #tpu.pipeline_mode<synchronous>, transform_indices = @transform_10, window_bounds = array<i64: 1, 32>}, {pipeline_mode = #tpu.pipeline_mode<synchronous>, transform_indices = @transform_11, window_bounds = array<i64: 4, 16>}, {transform_indices = @transform_12, window_bounds = array<i64: 1, 4, 32>}]} {
    %c0 = arith.constant 0 : index
    %c0_0 = arith.constant 0 : index
    %c0_1 = arith.constant 0 : index
    %0 = vector.load %arg1[%c0, %c0_0, %c0_1] : memref<1x16x32xbf16, #tpu.memory_space<vmem>>, vector<1x16x32xbf16>
    %1 = vector.shape_cast %0 : vector<1x16x32xbf16> to vector<16x32xbf16>
    %c0_2 = arith.constant 0 : index
    %c0_3 = arith.constant 0 : index
    %2 = vector.load %arg2[%c0_2, %c0_3] : memref<32x64xbf16, #tpu.memory_space<vmem>>, vector<32x64xbf16>
    %cst = arith.constant dense<0.000000e+00> : vector<16x64xf32>
    %3 = tpu.matmul %1, %2, %cst {dimension_numbers = #tpu.dot_dimension_numbers<[1], [0], [0], [1], [0, 0, 1, 1], [], []>} : vector<16x32xbf16>, vector<32x64xbf16>, vector<16x64xf32> -> vector<16x64xf32>
    %c0_4 = arith.constant 0 : index
    %c0_5 = arith.constant 0 : index
    %4 = vector.load %arg3[%c0_4, %c0_5] : memref<1x64xf32, #tpu.memory_space<vmem>>, vector<1x64xf32>
    %5 = vector.broadcast %4 : vector<1x64xf32> to vector<16x64xf32>
    %6 = arith.addf %3, %5 : vector<16x64xf32>
    %7 = arith.negf %6 : vector<16x64xf32>
    %8 = math.exp %7 : vector<16x64xf32>
    %cst_6 = arith.constant 1.000000e+00 : f32
    %9 = vector.broadcast %cst_6 : f32 to vector<16x64xf32>
    %10 = arith.addf %9, %8 : vector<16x64xf32>
    %11 = arith.divf %9, %10 : vector<16x64xf32>
    %12 = arith.mulf %6, %11 : vector<16x64xf32>
    %cst_7 = arith.constant 0.000000e+00 : f32
    %13 = vector.broadcast %cst_7 : f32 to vector<32x64xf32>
    %c0_8 = arith.constant 0 : index
    %c0_9 = arith.constant 0 : index
    %14 = vector.load %arg14[%c0_8, %c0_9] : memref<32x64xf32, #tpu.memory_space<vmem>>, vector<32x64xf32>
    tpu.vector_store %arg14[%c0_8, %c0_9], %13 {strides = array<i32>} : memref<32x64xf32, #tpu.memory_space<vmem>>, vector<32x64xf32>,
    %c8 = arith.constant 8 : index
    %c0_10 = arith.constant 0 : index
    %15 = vector.load %arg14[%c8, %c0_10] : memref<32x64xf32, #tpu.memory_space<vmem>>, vector<16x64xf32>
    tpu.vector_store %arg14[%c8, %c0_10], %12 {strides = array<i32>} : memref<32x64xf32, #tpu.memory_space<vmem>>, vector<16x64xf32>,
    %16 = tpu.iota {dimensions = array<i32: 0>} : vector<16x1xi32>
    %c4_i32 = arith.constant 4 : i32
    %c0_i32 = arith.constant 0 : i32
    %17 = arith.cmpi eq, %c4_i32, %c0_i32 : i32
    %c1_i32 = arith.constant 1 : i32
    %18 = arith.select %17, %c1_i32, %c4_i32 : i32
    %19 = vector.broadcast %18 : i32 to vector<16x1xi32>
    %20 = arith.remsi %16, %19 : vector<16x1xi32>
    %c0_i32_11 = arith.constant 0 : i32
    %21 = vector.broadcast %c0_i32_11 : i32 to vector<16x1xi32>
    %22 = arith.cmpi ne, %20, %21 : vector<16x1xi32>
    %c0_i32_12 = arith.constant 0 : i32
    %23 = vector.broadcast %c0_i32_12 : i32 to vector<16x1xi32>
    %24 = arith.cmpi slt, %20, %23 : vector<16x1xi32>
    %c0_i32_13 = arith.constant 0 : i32
    %25 = arith.cmpi slt, %18, %c0_i32_13 : i32
    %26 = vector.broadcast %25 : i1 to vector<16x1xi1>
    %27 = vector.broadcast %26 : vector<16x1xi1> to vector<16x1xi1>
    %28 = arith.xori %24, %27 : vector<16x1xi1>
    %29 = arith.andi %28, %22 : vector<16x1xi1>
    %30 = vector.broadcast %18 : i32 to vector<16x1xi32>
    %31 = arith.addi %20, %30 : vector<16x1xi32>
    %32 = arith.select %29, %31, %20 : vector<16x1xi1>, vector<16x1xi32>
    %cst_14 = arith.constant 0.000000e+00 : f32
    %33 = vector.broadcast %cst_14 : f32 to vector<16x64xf32>
    %c3 = arith.constant 3 : index
    %c0_15 = arith.constant 0 : index
    %34 = vector.load %arg14[%c3, %c0_15] : memref<32x64xf32, #tpu.memory_space<vmem>>, vector<16x64xf32>
    %c-1_i32 = arith.constant -1 : i32
    %35 = vector.broadcast %c-1_i32 : i32 to vector<16x1xi32>
    %36 = arith.addi %32, %35 : vector<16x1xi32>
    %c0_i32_16 = arith.constant 0 : i32
    %37 = vector.broadcast %c0_i32_16 : i32 to vector<16x1xi32>
    %38 = arith.cmpi sge, %36, %37 : vector<16x1xi32>
    %c-1_i32_17 = arith.constant -1 : i32
    %39 = vector.broadcast %c-1_i32_17 : i32 to vector<16x1xi32>
    %40 = arith.addi %32, %39 : vector<16x1xi32>
    %c4_i32_18 = arith.constant 4 : i32
    %41 = vector.broadcast %c4_i32_18 : i32 to vector<16x1xi32>
    %42 = arith.cmpi slt, %40, %41 : vector<16x1xi32>
    %43 = arith.andi %38, %42 : vector<16x1xi1>
    %cst_19 = arith.constant 0.000000e+00 : f32
    %44 = vector.shape_cast %43 : vector<16x1xi1> to vector<16x1xi1>
    %45 = vector.broadcast %44 : vector<16x1xi1> to vector<16x64xi1>
    %46 = vector.broadcast %cst_19 : f32 to vector<16x64xf32>
    %47 = arith.select %45, %34, %46 : vector<16x64xi1>, vector<16x64xf32>
    %c0_20 = arith.constant 0 : index
    %c0_21 = arith.constant 0 : index
    %c0_22 = arith.constant 0 : index
    %48 = vector.load %arg4[%c0_20, %c0_21, %c0_22] : memref<9x1x64xf32, #tpu.memory_space<vmem>>, vector<1x1x64xf32>
    %49 = vector.shape_cast %48 : vector<1x1x64xf32> to vector<1x64xf32>
    %50 = vector.broadcast %49 : vector<1x64xf32> to vector<16x64xf32>
    %51 = arith.mulf %47, %50 : vector<16x64xf32>
    %52 = arith.addf %33, %51 : vector<16x64xf32>
    %c4 = arith.constant 4 : index
    %c0_23 = arith.constant 0 : index
    %53 = vector.load %arg14[%c4, %c0_23] : memref<32x64xf32, #tpu.memory_space<vmem>>, vector<16x64xf32>
    %c0_i32_24 = arith.constant 0 : i32
    %54 = vector.broadcast %c0_i32_24 : i32 to vector<16x1xi32>
    %55 = arith.addi %32, %54 : vector<16x1xi32>
    %c0_i32_25 = arith.constant 0 : i32
    %56 = vector.broadcast %c0_i32_25 : i32 to vector<16x1xi32>
    %57 = arith.cmpi sge, %55, %56 : vector<16x1xi32>
    %c0_i32_26 = arith.constant 0 : i32
    %58 = vector.broadcast %c0_i32_26 : i32 to vector<16x1xi32>
    %59 = arith.addi %32, %58 : vector<16x1xi32>
    %c4_i32_27 = arith.constant 4 : i32
    %60 = vector.broadcast %c4_i32_27 : i32 to vector<16x1xi32>
    %61 = arith.cmpi slt, %59, %60 : vector<16x1xi32>
    %62 = arith.andi %57, %61 : vector<16x1xi1>
    %cst_28 = arith.constant 0.000000e+00 : f32
    %63 = vector.shape_cast %62 : vector<16x1xi1> to vector<16x1xi1>
    %64 = vector.broadcast %63 : vector<16x1xi1> to vector<16x64xi1>
    %65 = vector.broadcast %cst_28 : f32 to vector<16x64xf32>
    %66 = arith.select %64, %53, %65 : vector<16x64xi1>, vector<16x64xf32>
    %c1 = arith.constant 1 : index
    %c0_29 = arith.constant 0 : index
    %c0_30 = arith.constant 0 : index
    %67 = vector.load %arg4[%c1, %c0_29, %c0_30] : memref<9x1x64xf32, #tpu.memory_space<vmem>>, vector<1x1x64xf32>
    %68 = vector.shape_cast %67 : vector<1x1x64xf32> to vector<1x64xf32>
    %69 = vector.broadcast %68 : vector<1x64xf32> to vector<16x64xf32>
    %70 = arith.mulf %66, %69 : vector<16x64xf32>
    %71 = arith.addf %52, %70 : vector<16x64xf32>
    %c5 = arith.constant 5 : index
    %c0_31 = arith.constant 0 : index
    %72 = vector.load %arg14[%c5, %c0_31] : memref<32x64xf32, #tpu.memory_space<vmem>>, vector<16x64xf32>
    %c1_i32_32 = arith.constant 1 : i32
    %73 = vector.broadcast %c1_i32_32 : i32 to vector<16x1xi32>
    %74 = arith.addi %32, %73 : vector<16x1xi32>
    %c0_i32_33 = arith.constant 0 : i32
    %75 = vector.broadcast %c0_i32_33 : i32 to vector<16x1xi32>
    %76 = arith.cmpi sge, %74, %75 : vector<16x1xi32>
    %c1_i32_34 = arith.constant 1 : i32
    %77 = vector.broadcast %c1_i32_34 : i32 to vector<16x1xi32>
    %78 = arith.addi %32, %77 : vector<16x1xi32>
    %c4_i32_35 = arith.constant 4 : i32
    %79 = vector.broadcast %c4_i32_35 : i32 to vector<16x1xi32>
    %80 = arith.cmpi slt, %78, %79 : vector<16x1xi32>
    %81 = arith.andi %76, %80 : vector<16x1xi1>
    %cst_36 = arith.constant 0.000000e+00 : f32
    %82 = vector.shape_cast %81 : vector<16x1xi1> to vector<16x1xi1>
    %83 = vector.broadcast %82 : vector<16x1xi1> to vector<16x64xi1>
    %84 = vector.broadcast %cst_36 : f32 to vector<16x64xf32>
    %85 = arith.select %83, %72, %84 : vector<16x64xi1>, vector<16x64xf32>
    %c2 = arith.constant 2 : index
    %c0_37 = arith.constant 0 : index
    %c0_38 = arith.constant 0 : index
    %86 = vector.load %arg4[%c2, %c0_37, %c0_38] : memref<9x1x64xf32, #tpu.memory_space<vmem>>, vector<1x1x64xf32>
    %87 = vector.shape_cast %86 : vector<1x1x64xf32> to vector<1x64xf32>
    %88 = vector.broadcast %87 : vector<1x64xf32> to vector<16x64xf32>
    %89 = arith.mulf %85, %88 : vector<16x64xf32>
    %90 = arith.addf %71, %89 : vector<16x64xf32>
    %c7 = arith.constant 7 : index
    %c0_39 = arith.constant 0 : index
    %91 = vector.load %arg14[%c7, %c0_39] : memref<32x64xf32, #tpu.memory_space<vmem>>, vector<16x64xf32>
    %c-1_i32_40 = arith.constant -1 : i32
    %92 = vector.broadcast %c-1_i32_40 : i32 to vector<16x1xi32>
    %93 = arith.addi %32, %92 : vector<16x1xi32>
    %c0_i32_41 = arith.constant 0 : i32
    %94 = vector.broadcast %c0_i32_41 : i32 to vector<16x1xi32>
    %95 = arith.cmpi sge, %93, %94 : vector<16x1xi32>
    %c-1_i32_42 = arith.constant -1 : i32
    %96 = vector.broadcast %c-1_i32_42 : i32 to vector<16x1xi32>
    %97 = arith.addi %32, %96 : vector<16x1xi32>
    %c4_i32_43 = arith.constant 4 : i32
    %98 = vector.broadcast %c4_i32_43 : i32 to vector<16x1xi32>
    %99 = arith.cmpi slt, %97, %98 : vector<16x1xi32>
    %100 = arith.andi %95, %99 : vector<16x1xi1>
    %cst_44 = arith.constant 0.000000e+00 : f32
    %101 = vector.shape_cast %100 : vector<16x1xi1> to vector<16x1xi1>
    %102 = vector.broadcast %101 : vector<16x1xi1> to vector<16x64xi1>
    %103 = vector.broadcast %cst_44 : f32 to vector<16x64xf32>
    %104 = arith.select %102, %91, %103 : vector<16x64xi1>, vector<16x64xf32>
    %c3_45 = arith.constant 3 : index
    %c0_46 = arith.constant 0 : index
    %c0_47 = arith.constant 0 : index
    %105 = vector.load %arg4[%c3_45, %c0_46, %c0_47] : memref<9x1x64xf32, #tpu.memory_space<vmem>>, vector<1x1x64xf32>
    %106 = vector.shape_cast %105 : vector<1x1x64xf32> to vector<1x64xf32>
    %107 = vector.broadcast %106 : vector<1x64xf32> to vector<16x64xf32>
    %108 = arith.mulf %104, %107 : vector<16x64xf32>
    %109 = arith.addf %90, %108 : vector<16x64xf32>
    %c8_48 = arith.constant 8 : index
    %c0_49 = arith.constant 0 : index
    %110 = vector.load %arg14[%c8_48, %c0_49] : memref<32x64xf32, #tpu.memory_space<vmem>>, vector<16x64xf32>
    %c0_i32_50 = arith.constant 0 : i32
    %111 = vector.broadcast %c0_i32_50 : i32 to vector<16x1xi32>
    %112 = arith.addi %32, %111 : vector<16x1xi32>
    %c0_i32_51 = arith.constant 0 : i32
    %113 = vector.broadcast %c0_i32_51 : i32 to vector<16x1xi32>
    %114 = arith.cmpi sge, %112, %113 : vector<16x1xi32>
    %c0_i32_52 = arith.constant 0 : i32
    %115 = vector.broadcast %c0_i32_52 : i32 to vector<16x1xi32>
    %116 = arith.addi %32, %115 : vector<16x1xi32>
    %c4_i32_53 = arith.constant 4 : i32
    %117 = vector.broadcast %c4_i32_53 : i32 to vector<16x1xi32>
    %118 = arith.cmpi slt, %116, %117 : vector<16x1xi32>
    %119 = arith.andi %114, %118 : vector<16x1xi1>
    %cst_54 = arith.constant 0.000000e+00 : f32
    %120 = vector.shape_cast %119 : vector<16x1xi1> to vector<16x1xi1>
    %121 = vector.broadcast %120 : vector<16x1xi1> to vector<16x64xi1>
    %122 = vector.broadcast %cst_54 : f32 to vector<16x64xf32>
    %123 = arith.select %121, %110, %122 : vector<16x64xi1>, vector<16x64xf32>
    %c4_55 = arith.constant 4 : index
    %c0_56 = arith.constant 0 : index
    %c0_57 = arith.constant 0 : index
    %124 = vector.load %arg4[%c4_55, %c0_56, %c0_57] : memref<9x1x64xf32, #tpu.memory_space<vmem>>, vector<1x1x64xf32>
    %125 = vector.shape_cast %124 : vector<1x1x64xf32> to vector<1x64xf32>
    %126 = vector.broadcast %125 : vector<1x64xf32> to vector<16x64xf32>
    %127 = arith.mulf %123, %126 : vector<16x64xf32>
    %128 = arith.addf %109, %127 : vector<16x64xf32>
    %c9 = arith.constant 9 : index
    %c0_58 = arith.constant 0 : index
    %129 = vector.load %arg14[%c9, %c0_58] : memref<32x64xf32, #tpu.memory_space<vmem>>, vector<16x64xf32>
    %c1_i32_59 = arith.constant 1 : i32
    %130 = vector.broadcast %c1_i32_59 : i32 to vector<16x1xi32>
    %131 = arith.addi %32, %130 : vector<16x1xi32>
    %c0_i32_60 = arith.constant 0 : i32
    %132 = vector.broadcast %c0_i32_60 : i32 to vector<16x1xi32>
    %133 = arith.cmpi sge, %131, %132 : vector<16x1xi32>
    %c1_i32_61 = arith.constant 1 : i32
    %134 = vector.broadcast %c1_i32_61 : i32 to vector<16x1xi32>
    %135 = arith.addi %32, %134 : vector<16x1xi32>
    %c4_i32_62 = arith.constant 4 : i32
    %136 = vector.broadcast %c4_i32_62 : i32 to vector<16x1xi32>
    %137 = arith.cmpi slt, %135, %136 : vector<16x1xi32>
    %138 = arith.andi %133, %137 : vector<16x1xi1>
    %cst_63 = arith.constant 0.000000e+00 : f32
    %139 = vector.shape_cast %138 : vector<16x1xi1> to vector<16x1xi1>
    %140 = vector.broadcast %139 : vector<16x1xi1> to vector<16x64xi1>
    %141 = vector.broadcast %cst_63 : f32 to vector<16x64xf32>
    %142 = arith.select %140, %129, %141 : vector<16x64xi1>, vector<16x64xf32>
    %c5_64 = arith.constant 5 : index
    %c0_65 = arith.constant 0 : index
    %c0_66 = arith.constant 0 : index
    %143 = vector.load %arg4[%c5_64, %c0_65, %c0_66] : memref<9x1x64xf32, #tpu.memory_space<vmem>>, vector<1x1x64xf32>
    %144 = vector.shape_cast %143 : vector<1x1x64xf32> to vector<1x64xf32>
    %145 = vector.broadcast %144 : vector<1x64xf32> to vector<16x64xf32>
    %146 = arith.mulf %142, %145 : vector<16x64xf32>
    %147 = arith.addf %128, %146 : vector<16x64xf32>
    %c11 = arith.constant 11 : index
    %c0_67 = arith.constant 0 : index
    %148 = vector.load %arg14[%c11, %c0_67] : memref<32x64xf32, #tpu.memory_space<vmem>>, vector<16x64xf32>
    %c-1_i32_68 = arith.constant -1 : i32
    %149 = vector.broadcast %c-1_i32_68 : i32 to vector<16x1xi32>
    %150 = arith.addi %32, %149 : vector<16x1xi32>
    %c0_i32_69 = arith.constant 0 : i32
    %151 = vector.broadcast %c0_i32_69 : i32 to vector<16x1xi32>
    %152 = arith.cmpi sge, %150, %151 : vector<16x1xi32>
    %c-1_i32_70 = arith.constant -1 : i32
    %153 = vector.broadcast %c-1_i32_70 : i32 to vector<16x1xi32>
    %154 = arith.addi %32, %153 : vector<16x1xi32>
    %c4_i32_71 = arith.constant 4 : i32
    %155 = vector.broadcast %c4_i32_71 : i32 to vector<16x1xi32>
    %156 = arith.cmpi slt, %154, %155 : vector<16x1xi32>
    %157 = arith.andi %152, %156 : vector<16x1xi1>
    %cst_72 = arith.constant 0.000000e+00 : f32
    %158 = vector.shape_cast %157 : vector<16x1xi1> to vector<16x1xi1>
    %159 = vector.broadcast %158 : vector<16x1xi1> to vector<16x64xi1>
    %160 = vector.broadcast %cst_72 : f32 to vector<16x64xf32>
    %161 = arith.select %159, %148, %160 : vector<16x64xi1>, vector<16x64xf32>
    %c6 = arith.constant 6 : index
    %c0_73 = arith.constant 0 : index
    %c0_74 = arith.constant 0 : index
    %162 = vector.load %arg4[%c6, %c0_73, %c0_74] : memref<9x1x64xf32, #tpu.memory_space<vmem>>, vector<1x1x64xf32>
    %163 = vector.shape_cast %162 : vector<1x1x64xf32> to vector<1x64xf32>
    %164 = vector.broadcast %163 : vector<1x64xf32> to vector<16x64xf32>
    %165 = arith.mulf %161, %164 : vector<16x64xf32>
    %166 = arith.addf %147, %165 : vector<16x64xf32>
    %c12 = arith.constant 12 : index
    %c0_75 = arith.constant 0 : index
    %167 = vector.load %arg14[%c12, %c0_75] : memref<32x64xf32, #tpu.memory_space<vmem>>, vector<16x64xf32>
    %c0_i32_76 = arith.constant 0 : i32
    %168 = vector.broadcast %c0_i32_76 : i32 to vector<16x1xi32>
    %169 = arith.addi %32, %168 : vector<16x1xi32>
    %c0_i32_77 = arith.constant 0 : i32
    %170 = vector.broadcast %c0_i32_77 : i32 to vector<16x1xi32>
    %171 = arith.cmpi sge, %169, %170 : vector<16x1xi32>
    %c0_i32_78 = arith.constant 0 : i32
    %172 = vector.broadcast %c0_i32_78 : i32 to vector<16x1xi32>
    %173 = arith.addi %32, %172 : vector<16x1xi32>
    %c4_i32_79 = arith.constant 4 : i32
    %174 = vector.broadcast %c4_i32_79 : i32 to vector<16x1xi32>
    %175 = arith.cmpi slt, %173, %174 : vector<16x1xi32>
    %176 = arith.andi %171, %175 : vector<16x1xi1>
    %cst_80 = arith.constant 0.000000e+00 : f32
    %177 = vector.shape_cast %176 : vector<16x1xi1> to vector<16x1xi1>
    %178 = vector.broadcast %177 : vector<16x1xi1> to vector<16x64xi1>
    %179 = vector.broadcast %cst_80 : f32 to vector<16x64xf32>
    %180 = arith.select %178, %167, %179 : vector<16x64xi1>, vector<16x64xf32>
    %c7_81 = arith.constant 7 : index
    %c0_82 = arith.constant 0 : index
    %c0_83 = arith.constant 0 : index
    %181 = vector.load %arg4[%c7_81, %c0_82, %c0_83] : memref<9x1x64xf32, #tpu.memory_space<vmem>>, vector<1x1x64xf32>
    %182 = vector.shape_cast %181 : vector<1x1x64xf32> to vector<1x64xf32>
    %183 = vector.broadcast %182 : vector<1x64xf32> to vector<16x64xf32>
    %184 = arith.mulf %180, %183 : vector<16x64xf32>
    %185 = arith.addf %166, %184 : vector<16x64xf32>
    %c13 = arith.constant 13 : index
    %c0_84 = arith.constant 0 : index
    %186 = vector.load %arg14[%c13, %c0_84] : memref<32x64xf32, #tpu.memory_space<vmem>>, vector<16x64xf32>
    %c1_i32_85 = arith.constant 1 : i32
    %187 = vector.broadcast %c1_i32_85 : i32 to vector<16x1xi32>
    %188 = arith.addi %32, %187 : vector<16x1xi32>
    %c0_i32_86 = arith.constant 0 : i32
    %189 = vector.broadcast %c0_i32_86 : i32 to vector<16x1xi32>
    %190 = arith.cmpi sge, %188, %189 : vector<16x1xi32>
    %c1_i32_87 = arith.constant 1 : i32
    %191 = vector.broadcast %c1_i32_87 : i32 to vector<16x1xi32>
    %192 = arith.addi %32, %191 : vector<16x1xi32>
    %c4_i32_88 = arith.constant 4 : i32
    %193 = vector.broadcast %c4_i32_88 : i32 to vector<16x1xi32>
    %194 = arith.cmpi slt, %192, %193 : vector<16x1xi32>
    %195 = arith.andi %190, %194 : vector<16x1xi1>
    %cst_89 = arith.constant 0.000000e+00 : f32
    %196 = vector.shape_cast %195 : vector<16x1xi1> to vector<16x1xi1>
    %197 = vector.broadcast %196 : vector<16x1xi1> to vector<16x64xi1>
    %198 = vector.broadcast %cst_89 : f32 to vector<16x64xf32>
    %199 = arith.select %197, %186, %198 : vector<16x64xi1>, vector<16x64xf32>
    %c8_90 = arith.constant 8 : index
    %c0_91 = arith.constant 0 : index
    %c0_92 = arith.constant 0 : index
    %200 = vector.load %arg4[%c8_90, %c0_91, %c0_92] : memref<9x1x64xf32, #tpu.memory_space<vmem>>, vector<1x1x64xf32>
    %201 = vector.shape_cast %200 : vector<1x1x64xf32> to vector<1x64xf32>
    %202 = vector.broadcast %201 : vector<1x64xf32> to vector<16x64xf32>
    %203 = arith.mulf %199, %202 : vector<16x64xf32>
    %204 = arith.addf %185, %203 : vector<16x64xf32>
    %c0_93 = arith.constant 0 : index
    %c0_94 = arith.constant 0 : index
    %205 = vector.load %arg5[%c0_93, %c0_94] : memref<1x64xf32, #tpu.memory_space<vmem>>, vector<1x64xf32>
    %206 = vector.broadcast %205 : vector<1x64xf32> to vector<16x64xf32>
    %207 = arith.addf %204, %206 : vector<16x64xf32>
    %208 = arith.negf %207 : vector<16x64xf32>
    %209 = math.exp %208 : vector<16x64xf32>
    %cst_95 = arith.constant 1.000000e+00 : f32
    %210 = vector.broadcast %cst_95 : f32 to vector<16x64xf32>
    %211 = arith.addf %210, %209 : vector<16x64xf32>
    %212 = arith.divf %210, %211 : vector<16x64xf32>
    %213 = arith.mulf %207, %212 : vector<16x64xf32>
    %c0_96 = arith.constant 0 : index
    %c0_97 = arith.constant 0 : index
    %214 = vector.load %arg12[%c0_96, %c0_97] : memref<4x16xf32, #tpu.memory_space<vmem>>, vector<4x16xf32>
    %cst_98 = arith.constant dense<0.000000e+00> : vector<4x64xf32>
    %215 = tpu.matmul %214, %213, %cst_98 {dimension_numbers = #tpu.dot_dimension_numbers<[1], [0], [0], [1], [0, 0, 1, 1], [], []>} : vector<4x16xf32>, vector<16x64xf32>, vector<4x64xf32> -> vector<4x64xf32>
    %216 = arith.truncf %215 : vector<4x64xf32> to vector<4x64xbf16>
    %c0_99 = arith.constant 0 : index
    %c0_100 = arith.constant 0 : index
    %217 = vector.load %arg6[%c0_99, %c0_100] : memref<64x32xbf16, #tpu.memory_space<vmem>>, vector<64x32xbf16>
    %cst_101 = arith.constant dense<0.000000e+00> : vector<4x32xf32>
    %218 = tpu.matmul %216, %217, %cst_101 {dimension_numbers = #tpu.dot_dimension_numbers<[1], [0], [0], [1], [0, 0, 1, 1], [], []>} : vector<4x64xbf16>, vector<64x32xbf16>, vector<4x32xf32> -> vector<4x32xf32>
    %c0_102 = arith.constant 0 : index
    %c0_103 = arith.constant 0 : index
    %219 = vector.load %arg7[%c0_102, %c0_103] : memref<1x32xf32, #tpu.memory_space<vmem>>, vector<1x32xf32>
    %220 = vector.broadcast %219 : vector<1x32xf32> to vector<4x32xf32>
    %221 = arith.addf %218, %220 : vector<4x32xf32>
    %cst_104 = arith.constant dense<0.000000e+00> : vector<32xf32>
    %222 = vector.multi_reduction <add>, %221, %cst_104 [0] : vector<4x32xf32> to vector<32xf32>
    %223 = vector.shape_cast %222 : vector<32xf32> to vector<1x32xf32>
    %cst_105 = arith.constant 4.000000e+00 : f32
    %224 = vector.broadcast %cst_105 : f32 to vector<1x32xf32>
    %225 = arith.divf %223, %224 : vector<1x32xf32>
    %c0_106 = arith.constant 0 : index
    %c0_107 = arith.constant 0 : index
    %226 = vector.load %arg8[%c0_106, %c0_107] : memref<2x32xf32, #tpu.memory_space<vmem>>, vector<2x32xf32>
    %227 = vector.broadcast %225 : vector<1x32xf32> to vector<2x32xf32>
    %228 = arith.mulf %226, %227 : vector<2x32xf32>
    %cst_108 = arith.constant dense<0.000000e+00> : vector<2xf32>
    %229 = vector.multi_reduction <add>, %228, %cst_108 [1] : vector<2x32xf32> to vector<2xf32>
    %230 = vector.shape_cast %229 : vector<2xf32> to vector<2x1xf32>
    %c0_109 = arith.constant 0 : index
    %c0_110 = arith.constant 0 : index
    %231 = vector.load %arg9[%c0_109, %c0_110] : memref<2x1xf32, #tpu.memory_space<vmem>>, vector<2x1xf32>
    %232 = arith.addf %230, %231 : vector<2x1xf32>
    %233 = arith.negf %232 : vector<2x1xf32>
    %234 = math.exp %233 : vector<2x1xf32>
    %cst_111 = arith.constant 1.000000e+00 : f32
    %235 = vector.broadcast %cst_111 : f32 to vector<2x1xf32>
    %236 = arith.addf %235, %234 : vector<2x1xf32>
    %237 = arith.divf %235, %236 : vector<2x1xf32>
    %238 = arith.mulf %232, %237 : vector<2x1xf32>
    %c0_112 = arith.constant 0 : index
    %c0_113 = arith.constant 0 : index
    %239 = vector.load %arg10[%c0_112, %c0_113] : memref<2x32xf32, #tpu.memory_space<vmem>>, vector<2x32xf32>
    %240 = vector.broadcast %238 : vector<2x1xf32> to vector<2x32xf32>
    %241 = arith.mulf %240, %239 : vector<2x32xf32>
    %cst_114 = arith.constant dense<0.000000e+00> : vector<32xf32>
    %242 = vector.multi_reduction <add>, %241, %cst_114 [0] : vector<2x32xf32> to vector<32xf32>
    %243 = vector.shape_cast %242 : vector<32xf32> to vector<1x32xf32>
    %c0_115 = arith.constant 0 : index
    %c0_116 = arith.constant 0 : index
    %244 = vector.load %arg11[%c0_115, %c0_116] : memref<1x32xf32, #tpu.memory_space<vmem>>, vector<1x32xf32>
    %245 = arith.addf %243, %244 : vector<1x32xf32>
    %246 = arith.negf %245 : vector<1x32xf32>
    %247 = math.exp %246 : vector<1x32xf32>
    %cst_117 = arith.constant 1.000000e+00 : f32
    %248 = vector.broadcast %cst_117 : f32 to vector<1x32xf32>
    %249 = arith.addf %248, %247 : vector<1x32xf32>
    %250 = arith.divf %248, %249 : vector<1x32xf32>
    %251 = vector.broadcast %250 : vector<1x32xf32> to vector<4x32xf32>
    %252 = arith.mulf %221, %251 : vector<4x32xf32>
    %253 = arith.addf %252, %221 : vector<4x32xf32>
    %254 = arith.truncf %253 : vector<4x32xf32> to vector<4x32xbf16>
    %c0_118 = arith.constant 0 : index
    %c0_119 = arith.constant 0 : index
    %c0_120 = arith.constant 0 : index
    %255 = vector.load %arg13[%c0_118, %c0_119, %c0_120] : memref<1x4x32xbf16, #tpu.memory_space<vmem>>, vector<1x4x32xbf16>
    %256 = vector.shape_cast %255 : vector<1x4x32xbf16> to vector<4x32xbf16>
    %257 = vector.shape_cast %254 : vector<4x32xbf16> to vector<1x4x32xbf16>
    tpu.vector_store %arg13[%c0_118, %c0_119, %c0_120], %257 {strides = array<i32>} : memref<1x4x32xbf16, #tpu.memory_space<vmem>>, vector<1x4x32xbf16>,
    return
  }
  func.func @transform_0(%arg0: i32) -> (i32, i32, i32) {
    %c0_i32 = arith.constant 0 : i32
    %c0_i32_0 = arith.constant 0 : i32
    %c0_i32_1 = arith.constant 0 : i32
    return %arg0, %c0_i32, %c0_i32_0 : i32, i32, i32
  }
  func.func @transform_1(%arg0: i32) -> (i32, i32) {
    %c0_i32 = arith.constant 0 : i32
    %c0_i32_0 = arith.constant 0 : i32
    %c0_i32_1 = arith.constant 0 : i32
    return %c0_i32, %c0_i32_0 : i32, i32
  }
  func.func @transform_2(%arg0: i32) -> (i32, i32) {
    %c0_i32 = arith.constant 0 : i32
    %c0_i32_0 = arith.constant 0 : i32
    %c0_i32_1 = arith.constant 0 : i32
    return %c0_i32, %c0_i32_0 : i32, i32
  }
  func.func @transform_3(%arg0: i32) -> (i32, i32, i32) {
    %c0_i32 = arith.constant 0 : i32
    %c0_i32_0 = arith.constant 0 : i32
    %c0_i32_1 = arith.constant 0 : i32
    %c0_i32_2 = arith.constant 0 : i32
    return %c0_i32, %c0_i32_0, %c0_i32_1 : i32, i32, i32
  }
  func.func @transform_4(%arg0: i32) -> (i32, i32) {
    %c0_i32 = arith.constant 0 : i32
    %c0_i32_0 = arith.constant 0 : i32
    %c0_i32_1 = arith.constant 0 : i32
    return %c0_i32, %c0_i32_0 : i32, i32
  }
  func.func @transform_5(%arg0: i32) -> (i32, i32) {
    %c0_i32 = arith.constant 0 : i32
    %c0_i32_0 = arith.constant 0 : i32
    %c0_i32_1 = arith.constant 0 : i32
    return %c0_i32, %c0_i32_0 : i32, i32
  }
  func.func @transform_6(%arg0: i32) -> (i32, i32) {
    %c0_i32 = arith.constant 0 : i32
    %c0_i32_0 = arith.constant 0 : i32
    %c0_i32_1 = arith.constant 0 : i32
    return %c0_i32, %c0_i32_0 : i32, i32
  }
  func.func @transform_7(%arg0: i32) -> (i32, i32) {
    %c0_i32 = arith.constant 0 : i32
    %c0_i32_0 = arith.constant 0 : i32
    %c0_i32_1 = arith.constant 0 : i32
    return %c0_i32, %c0_i32_0 : i32, i32
  }
  func.func @transform_8(%arg0: i32) -> (i32, i32) {
    %c0_i32 = arith.constant 0 : i32
    %c0_i32_0 = arith.constant 0 : i32
    %c0_i32_1 = arith.constant 0 : i32
    return %c0_i32, %c0_i32_0 : i32, i32
  }
  func.func @transform_9(%arg0: i32) -> (i32, i32) {
    %c0_i32 = arith.constant 0 : i32
    %c0_i32_0 = arith.constant 0 : i32
    %c0_i32_1 = arith.constant 0 : i32
    return %c0_i32, %c0_i32_0 : i32, i32
  }
  func.func @transform_10(%arg0: i32) -> (i32, i32) {
    %c0_i32 = arith.constant 0 : i32
    %c0_i32_0 = arith.constant 0 : i32
    %c0_i32_1 = arith.constant 0 : i32
    return %c0_i32, %c0_i32_0 : i32, i32
  }
  func.func @transform_11(%arg0: i32) -> (i32, i32) {
    %c0_i32 = arith.constant 0 : i32
    %c0_i32_0 = arith.constant 0 : i32
    %c0_i32_1 = arith.constant 0 : i32
    return %c0_i32, %c0_i32_0 : i32, i32
  }
  func.func @transform_12(%arg0: i32) -> (i32, i32, i32) {
    %c0_i32 = arith.constant 0 : i32
    %c0_i32_0 = arith.constant 0 : i32
    %c0_i32_1 = arith.constant 0 : i32
    return %arg0, %c0_i32, %c0_i32_0 : i32, i32, i32
  }
}

module attributes {stable_mosaic.version = 11 : i64} {
  func.func @_mbconv_kernel(%arg0: i32, %arg1: memref<1x4x32xbf16, #tpu.memory_space<vmem>>, %arg2: memref<32x64xbf16, #tpu.memory_space<vmem>>, %arg3: memref<1x64xf32, #tpu.memory_space<vmem>>, %arg4: memref<9x1x64xf32, #tpu.memory_space<vmem>>, %arg5: memref<1x64xf32, #tpu.memory_space<vmem>>, %arg6: memref<64x48xbf16, #tpu.memory_space<vmem>>, %arg7: memref<1x48xf32, #tpu.memory_space<vmem>>, %arg8: memref<3x48xf32, #tpu.memory_space<vmem>>, %arg9: memref<3x1xf32, #tpu.memory_space<vmem>>, %arg10: memref<3x48xf32, #tpu.memory_space<vmem>>, %arg11: memref<1x48xf32, #tpu.memory_space<vmem>>, %arg12: memref<1x4xf32, #tpu.memory_space<vmem>>, %arg13: memref<1x1x48xbf16, #tpu.memory_space<vmem>>, %arg14: memref<16x64xf32, #tpu.memory_space<vmem>>) attributes {dimension_semantics = [#tpu.dimension_semantics<parallel>], iteration_bounds = array<i64: 2>, scalar_prefetch = 0 : i64, scratch_operands = 1 : i64, tpu.core_type = #tpu.core_type<tc>, window_params = [{transform_indices = @transform_0, window_bounds = array<i64: 1, 4, 32>}, {pipeline_mode = #tpu.pipeline_mode<synchronous>, transform_indices = @transform_1, window_bounds = array<i64: 32, 64>}, {pipeline_mode = #tpu.pipeline_mode<synchronous>, transform_indices = @transform_2, window_bounds = array<i64: 1, 64>}, {pipeline_mode = #tpu.pipeline_mode<synchronous>, transform_indices = @transform_3, window_bounds = array<i64: 9, 1, 64>}, {pipeline_mode = #tpu.pipeline_mode<synchronous>, transform_indices = @transform_4, window_bounds = array<i64: 1, 64>}, {pipeline_mode = #tpu.pipeline_mode<synchronous>, transform_indices = @transform_5, window_bounds = array<i64: 64, 48>}, {pipeline_mode = #tpu.pipeline_mode<synchronous>, transform_indices = @transform_6, window_bounds = array<i64: 1, 48>}, {pipeline_mode = #tpu.pipeline_mode<synchronous>, transform_indices = @transform_7, window_bounds = array<i64: 3, 48>}, {pipeline_mode = #tpu.pipeline_mode<synchronous>, transform_indices = @transform_8, window_bounds = array<i64: 3, 1>}, {pipeline_mode = #tpu.pipeline_mode<synchronous>, transform_indices = @transform_9, window_bounds = array<i64: 3, 48>}, {pipeline_mode = #tpu.pipeline_mode<synchronous>, transform_indices = @transform_10, window_bounds = array<i64: 1, 48>}, {pipeline_mode = #tpu.pipeline_mode<synchronous>, transform_indices = @transform_11, window_bounds = array<i64: 1, 4>}, {transform_indices = @transform_12, window_bounds = array<i64: 1, 1, 48>}]} {
    %c0 = arith.constant 0 : index
    %c0_0 = arith.constant 0 : index
    %c0_1 = arith.constant 0 : index
    %0 = vector.load %arg1[%c0, %c0_0, %c0_1] : memref<1x4x32xbf16, #tpu.memory_space<vmem>>, vector<1x4x32xbf16>
    %1 = vector.shape_cast %0 : vector<1x4x32xbf16> to vector<4x32xbf16>
    %c0_2 = arith.constant 0 : index
    %c0_3 = arith.constant 0 : index
    %2 = vector.load %arg2[%c0_2, %c0_3] : memref<32x64xbf16, #tpu.memory_space<vmem>>, vector<32x64xbf16>
    %cst = arith.constant dense<0.000000e+00> : vector<4x64xf32>
    %3 = tpu.matmul %1, %2, %cst {dimension_numbers = #tpu.dot_dimension_numbers<[1], [0], [0], [1], [0, 0, 1, 1], [], []>} : vector<4x32xbf16>, vector<32x64xbf16>, vector<4x64xf32> -> vector<4x64xf32>
    %c0_4 = arith.constant 0 : index
    %c0_5 = arith.constant 0 : index
    %4 = vector.load %arg3[%c0_4, %c0_5] : memref<1x64xf32, #tpu.memory_space<vmem>>, vector<1x64xf32>
    %5 = vector.broadcast %4 : vector<1x64xf32> to vector<4x64xf32>
    %6 = arith.addf %3, %5 : vector<4x64xf32>
    %7 = arith.negf %6 : vector<4x64xf32>
    %8 = math.exp %7 : vector<4x64xf32>
    %cst_6 = arith.constant 1.000000e+00 : f32
    %9 = vector.broadcast %cst_6 : f32 to vector<4x64xf32>
    %10 = arith.addf %9, %8 : vector<4x64xf32>
    %11 = arith.divf %9, %10 : vector<4x64xf32>
    %12 = arith.mulf %6, %11 : vector<4x64xf32>
    %cst_7 = arith.constant 0.000000e+00 : f32
    %13 = vector.broadcast %cst_7 : f32 to vector<16x64xf32>
    %c0_8 = arith.constant 0 : index
    %c0_9 = arith.constant 0 : index
    %14 = vector.load %arg14[%c0_8, %c0_9] : memref<16x64xf32, #tpu.memory_space<vmem>>, vector<16x64xf32>
    tpu.vector_store %arg14[%c0_8, %c0_9], %13 {strides = array<i32>} : memref<16x64xf32, #tpu.memory_space<vmem>>, vector<16x64xf32>,
    %c8 = arith.constant 8 : index
    %c0_10 = arith.constant 0 : index
    %15 = vector.load %arg14[%c8, %c0_10] : memref<16x64xf32, #tpu.memory_space<vmem>>, vector<4x64xf32>
    tpu.vector_store %arg14[%c8, %c0_10], %12 {strides = array<i32>} : memref<16x64xf32, #tpu.memory_space<vmem>>, vector<4x64xf32>,
    %16 = tpu.iota {dimensions = array<i32: 0>} : vector<4x1xi32>
    %c2_i32 = arith.constant 2 : i32
    %c0_i32 = arith.constant 0 : i32
    %17 = arith.cmpi eq, %c2_i32, %c0_i32 : i32
    %c1_i32 = arith.constant 1 : i32
    %18 = arith.select %17, %c1_i32, %c2_i32 : i32
    %19 = vector.broadcast %18 : i32 to vector<4x1xi32>
    %20 = arith.remsi %16, %19 : vector<4x1xi32>
    %c0_i32_11 = arith.constant 0 : i32
    %21 = vector.broadcast %c0_i32_11 : i32 to vector<4x1xi32>
    %22 = arith.cmpi ne, %20, %21 : vector<4x1xi32>
    %c0_i32_12 = arith.constant 0 : i32
    %23 = vector.broadcast %c0_i32_12 : i32 to vector<4x1xi32>
    %24 = arith.cmpi slt, %20, %23 : vector<4x1xi32>
    %c0_i32_13 = arith.constant 0 : i32
    %25 = arith.cmpi slt, %18, %c0_i32_13 : i32
    %26 = vector.broadcast %25 : i1 to vector<4x1xi1>
    %27 = vector.broadcast %26 : vector<4x1xi1> to vector<4x1xi1>
    %28 = arith.xori %24, %27 : vector<4x1xi1>
    %29 = arith.andi %28, %22 : vector<4x1xi1>
    %30 = vector.broadcast %18 : i32 to vector<4x1xi32>
    %31 = arith.addi %20, %30 : vector<4x1xi32>
    %32 = arith.select %29, %31, %20 : vector<4x1xi1>, vector<4x1xi32>
    %cst_14 = arith.constant 0.000000e+00 : f32
    %33 = vector.broadcast %cst_14 : f32 to vector<4x64xf32>
    %c5 = arith.constant 5 : index
    %c0_15 = arith.constant 0 : index
    %34 = vector.load %arg14[%c5, %c0_15] : memref<16x64xf32, #tpu.memory_space<vmem>>, vector<4x64xf32>
    %c-1_i32 = arith.constant -1 : i32
    %35 = vector.broadcast %c-1_i32 : i32 to vector<4x1xi32>
    %36 = arith.addi %32, %35 : vector<4x1xi32>
    %c0_i32_16 = arith.constant 0 : i32
    %37 = vector.broadcast %c0_i32_16 : i32 to vector<4x1xi32>
    %38 = arith.cmpi sge, %36, %37 : vector<4x1xi32>
    %c-1_i32_17 = arith.constant -1 : i32
    %39 = vector.broadcast %c-1_i32_17 : i32 to vector<4x1xi32>
    %40 = arith.addi %32, %39 : vector<4x1xi32>
    %c2_i32_18 = arith.constant 2 : i32
    %41 = vector.broadcast %c2_i32_18 : i32 to vector<4x1xi32>
    %42 = arith.cmpi slt, %40, %41 : vector<4x1xi32>
    %43 = arith.andi %38, %42 : vector<4x1xi1>
    %cst_19 = arith.constant 0.000000e+00 : f32
    %44 = vector.shape_cast %43 : vector<4x1xi1> to vector<4x1xi1>
    %45 = vector.broadcast %44 : vector<4x1xi1> to vector<4x64xi1>
    %46 = vector.broadcast %cst_19 : f32 to vector<4x64xf32>
    %47 = arith.select %45, %34, %46 : vector<4x64xi1>, vector<4x64xf32>
    %c0_20 = arith.constant 0 : index
    %c0_21 = arith.constant 0 : index
    %c0_22 = arith.constant 0 : index
    %48 = vector.load %arg4[%c0_20, %c0_21, %c0_22] : memref<9x1x64xf32, #tpu.memory_space<vmem>>, vector<1x1x64xf32>
    %49 = vector.shape_cast %48 : vector<1x1x64xf32> to vector<1x64xf32>
    %50 = vector.broadcast %49 : vector<1x64xf32> to vector<4x64xf32>
    %51 = arith.mulf %47, %50 : vector<4x64xf32>
    %52 = arith.addf %33, %51 : vector<4x64xf32>
    %c6 = arith.constant 6 : index
    %c0_23 = arith.constant 0 : index
    %53 = vector.load %arg14[%c6, %c0_23] : memref<16x64xf32, #tpu.memory_space<vmem>>, vector<4x64xf32>
    %c0_i32_24 = arith.constant 0 : i32
    %54 = vector.broadcast %c0_i32_24 : i32 to vector<4x1xi32>
    %55 = arith.addi %32, %54 : vector<4x1xi32>
    %c0_i32_25 = arith.constant 0 : i32
    %56 = vector.broadcast %c0_i32_25 : i32 to vector<4x1xi32>
    %57 = arith.cmpi sge, %55, %56 : vector<4x1xi32>
    %c0_i32_26 = arith.constant 0 : i32
    %58 = vector.broadcast %c0_i32_26 : i32 to vector<4x1xi32>
    %59 = arith.addi %32, %58 : vector<4x1xi32>
    %c2_i32_27 = arith.constant 2 : i32
    %60 = vector.broadcast %c2_i32_27 : i32 to vector<4x1xi32>
    %61 = arith.cmpi slt, %59, %60 : vector<4x1xi32>
    %62 = arith.andi %57, %61 : vector<4x1xi1>
    %cst_28 = arith.constant 0.000000e+00 : f32
    %63 = vector.shape_cast %62 : vector<4x1xi1> to vector<4x1xi1>
    %64 = vector.broadcast %63 : vector<4x1xi1> to vector<4x64xi1>
    %65 = vector.broadcast %cst_28 : f32 to vector<4x64xf32>
    %66 = arith.select %64, %53, %65 : vector<4x64xi1>, vector<4x64xf32>
    %c1 = arith.constant 1 : index
    %c0_29 = arith.constant 0 : index
    %c0_30 = arith.constant 0 : index
    %67 = vector.load %arg4[%c1, %c0_29, %c0_30] : memref<9x1x64xf32, #tpu.memory_space<vmem>>, vector<1x1x64xf32>
    %68 = vector.shape_cast %67 : vector<1x1x64xf32> to vector<1x64xf32>
    %69 = vector.broadcast %68 : vector<1x64xf32> to vector<4x64xf32>
    %70 = arith.mulf %66, %69 : vector<4x64xf32>
    %71 = arith.addf %52, %70 : vector<4x64xf32>
    %c7 = arith.constant 7 : index
    %c0_31 = arith.constant 0 : index
    %72 = vector.load %arg14[%c7, %c0_31] : memref<16x64xf32, #tpu.memory_space<vmem>>, vector<4x64xf32>
    %c1_i32_32 = arith.constant 1 : i32
    %73 = vector.broadcast %c1_i32_32 : i32 to vector<4x1xi32>
    %74 = arith.addi %32, %73 : vector<4x1xi32>
    %c0_i32_33 = arith.constant 0 : i32
    %75 = vector.broadcast %c0_i32_33 : i32 to vector<4x1xi32>
    %76 = arith.cmpi sge, %74, %75 : vector<4x1xi32>
    %c1_i32_34 = arith.constant 1 : i32
    %77 = vector.broadcast %c1_i32_34 : i32 to vector<4x1xi32>
    %78 = arith.addi %32, %77 : vector<4x1xi32>
    %c2_i32_35 = arith.constant 2 : i32
    %79 = vector.broadcast %c2_i32_35 : i32 to vector<4x1xi32>
    %80 = arith.cmpi slt, %78, %79 : vector<4x1xi32>
    %81 = arith.andi %76, %80 : vector<4x1xi1>
    %cst_36 = arith.constant 0.000000e+00 : f32
    %82 = vector.shape_cast %81 : vector<4x1xi1> to vector<4x1xi1>
    %83 = vector.broadcast %82 : vector<4x1xi1> to vector<4x64xi1>
    %84 = vector.broadcast %cst_36 : f32 to vector<4x64xf32>
    %85 = arith.select %83, %72, %84 : vector<4x64xi1>, vector<4x64xf32>
    %c2 = arith.constant 2 : index
    %c0_37 = arith.constant 0 : index
    %c0_38 = arith.constant 0 : index
    %86 = vector.load %arg4[%c2, %c0_37, %c0_38] : memref<9x1x64xf32, #tpu.memory_space<vmem>>, vector<1x1x64xf32>
    %87 = vector.shape_cast %86 : vector<1x1x64xf32> to vector<1x64xf32>
    %88 = vector.broadcast %87 : vector<1x64xf32> to vector<4x64xf32>
    %89 = arith.mulf %85, %88 : vector<4x64xf32>
    %90 = arith.addf %71, %89 : vector<4x64xf32>
    %c7_39 = arith.constant 7 : index
    %c0_40 = arith.constant 0 : index
    %91 = vector.load %arg14[%c7_39, %c0_40] : memref<16x64xf32, #tpu.memory_space<vmem>>, vector<4x64xf32>
    %c-1_i32_41 = arith.constant -1 : i32
    %92 = vector.broadcast %c-1_i32_41 : i32 to vector<4x1xi32>
    %93 = arith.addi %32, %92 : vector<4x1xi32>
    %c0_i32_42 = arith.constant 0 : i32
    %94 = vector.broadcast %c0_i32_42 : i32 to vector<4x1xi32>
    %95 = arith.cmpi sge, %93, %94 : vector<4x1xi32>
    %c-1_i32_43 = arith.constant -1 : i32
    %96 = vector.broadcast %c-1_i32_43 : i32 to vector<4x1xi32>
    %97 = arith.addi %32, %96 : vector<4x1xi32>
    %c2_i32_44 = arith.constant 2 : i32
    %98 = vector.broadcast %c2_i32_44 : i32 to vector<4x1xi32>
    %99 = arith.cmpi slt, %97, %98 : vector<4x1xi32>
    %100 = arith.andi %95, %99 : vector<4x1xi1>
    %cst_45 = arith.constant 0.000000e+00 : f32
    %101 = vector.shape_cast %100 : vector<4x1xi1> to vector<4x1xi1>
    %102 = vector.broadcast %101 : vector<4x1xi1> to vector<4x64xi1>
    %103 = vector.broadcast %cst_45 : f32 to vector<4x64xf32>
    %104 = arith.select %102, %91, %103 : vector<4x64xi1>, vector<4x64xf32>
    %c3 = arith.constant 3 : index
    %c0_46 = arith.constant 0 : index
    %c0_47 = arith.constant 0 : index
    %105 = vector.load %arg4[%c3, %c0_46, %c0_47] : memref<9x1x64xf32, #tpu.memory_space<vmem>>, vector<1x1x64xf32>
    %106 = vector.shape_cast %105 : vector<1x1x64xf32> to vector<1x64xf32>
    %107 = vector.broadcast %106 : vector<1x64xf32> to vector<4x64xf32>
    %108 = arith.mulf %104, %107 : vector<4x64xf32>
    %109 = arith.addf %90, %108 : vector<4x64xf32>
    %c8_48 = arith.constant 8 : index
    %c0_49 = arith.constant 0 : index
    %110 = vector.load %arg14[%c8_48, %c0_49] : memref<16x64xf32, #tpu.memory_space<vmem>>, vector<4x64xf32>
    %c0_i32_50 = arith.constant 0 : i32
    %111 = vector.broadcast %c0_i32_50 : i32 to vector<4x1xi32>
    %112 = arith.addi %32, %111 : vector<4x1xi32>
    %c0_i32_51 = arith.constant 0 : i32
    %113 = vector.broadcast %c0_i32_51 : i32 to vector<4x1xi32>
    %114 = arith.cmpi sge, %112, %113 : vector<4x1xi32>
    %c0_i32_52 = arith.constant 0 : i32
    %115 = vector.broadcast %c0_i32_52 : i32 to vector<4x1xi32>
    %116 = arith.addi %32, %115 : vector<4x1xi32>
    %c2_i32_53 = arith.constant 2 : i32
    %117 = vector.broadcast %c2_i32_53 : i32 to vector<4x1xi32>
    %118 = arith.cmpi slt, %116, %117 : vector<4x1xi32>
    %119 = arith.andi %114, %118 : vector<4x1xi1>
    %cst_54 = arith.constant 0.000000e+00 : f32
    %120 = vector.shape_cast %119 : vector<4x1xi1> to vector<4x1xi1>
    %121 = vector.broadcast %120 : vector<4x1xi1> to vector<4x64xi1>
    %122 = vector.broadcast %cst_54 : f32 to vector<4x64xf32>
    %123 = arith.select %121, %110, %122 : vector<4x64xi1>, vector<4x64xf32>
    %c4 = arith.constant 4 : index
    %c0_55 = arith.constant 0 : index
    %c0_56 = arith.constant 0 : index
    %124 = vector.load %arg4[%c4, %c0_55, %c0_56] : memref<9x1x64xf32, #tpu.memory_space<vmem>>, vector<1x1x64xf32>
    %125 = vector.shape_cast %124 : vector<1x1x64xf32> to vector<1x64xf32>
    %126 = vector.broadcast %125 : vector<1x64xf32> to vector<4x64xf32>
    %127 = arith.mulf %123, %126 : vector<4x64xf32>
    %128 = arith.addf %109, %127 : vector<4x64xf32>
    %c9 = arith.constant 9 : index
    %c0_57 = arith.constant 0 : index
    %129 = vector.load %arg14[%c9, %c0_57] : memref<16x64xf32, #tpu.memory_space<vmem>>, vector<4x64xf32>
    %c1_i32_58 = arith.constant 1 : i32
    %130 = vector.broadcast %c1_i32_58 : i32 to vector<4x1xi32>
    %131 = arith.addi %32, %130 : vector<4x1xi32>
    %c0_i32_59 = arith.constant 0 : i32
    %132 = vector.broadcast %c0_i32_59 : i32 to vector<4x1xi32>
    %133 = arith.cmpi sge, %131, %132 : vector<4x1xi32>
    %c1_i32_60 = arith.constant 1 : i32
    %134 = vector.broadcast %c1_i32_60 : i32 to vector<4x1xi32>
    %135 = arith.addi %32, %134 : vector<4x1xi32>
    %c2_i32_61 = arith.constant 2 : i32
    %136 = vector.broadcast %c2_i32_61 : i32 to vector<4x1xi32>
    %137 = arith.cmpi slt, %135, %136 : vector<4x1xi32>
    %138 = arith.andi %133, %137 : vector<4x1xi1>
    %cst_62 = arith.constant 0.000000e+00 : f32
    %139 = vector.shape_cast %138 : vector<4x1xi1> to vector<4x1xi1>
    %140 = vector.broadcast %139 : vector<4x1xi1> to vector<4x64xi1>
    %141 = vector.broadcast %cst_62 : f32 to vector<4x64xf32>
    %142 = arith.select %140, %129, %141 : vector<4x64xi1>, vector<4x64xf32>
    %c5_63 = arith.constant 5 : index
    %c0_64 = arith.constant 0 : index
    %c0_65 = arith.constant 0 : index
    %143 = vector.load %arg4[%c5_63, %c0_64, %c0_65] : memref<9x1x64xf32, #tpu.memory_space<vmem>>, vector<1x1x64xf32>
    %144 = vector.shape_cast %143 : vector<1x1x64xf32> to vector<1x64xf32>
    %145 = vector.broadcast %144 : vector<1x64xf32> to vector<4x64xf32>
    %146 = arith.mulf %142, %145 : vector<4x64xf32>
    %147 = arith.addf %128, %146 : vector<4x64xf32>
    %c9_66 = arith.constant 9 : index
    %c0_67 = arith.constant 0 : index
    %148 = vector.load %arg14[%c9_66, %c0_67] : memref<16x64xf32, #tpu.memory_space<vmem>>, vector<4x64xf32>
    %c-1_i32_68 = arith.constant -1 : i32
    %149 = vector.broadcast %c-1_i32_68 : i32 to vector<4x1xi32>
    %150 = arith.addi %32, %149 : vector<4x1xi32>
    %c0_i32_69 = arith.constant 0 : i32
    %151 = vector.broadcast %c0_i32_69 : i32 to vector<4x1xi32>
    %152 = arith.cmpi sge, %150, %151 : vector<4x1xi32>
    %c-1_i32_70 = arith.constant -1 : i32
    %153 = vector.broadcast %c-1_i32_70 : i32 to vector<4x1xi32>
    %154 = arith.addi %32, %153 : vector<4x1xi32>
    %c2_i32_71 = arith.constant 2 : i32
    %155 = vector.broadcast %c2_i32_71 : i32 to vector<4x1xi32>
    %156 = arith.cmpi slt, %154, %155 : vector<4x1xi32>
    %157 = arith.andi %152, %156 : vector<4x1xi1>
    %cst_72 = arith.constant 0.000000e+00 : f32
    %158 = vector.shape_cast %157 : vector<4x1xi1> to vector<4x1xi1>
    %159 = vector.broadcast %158 : vector<4x1xi1> to vector<4x64xi1>
    %160 = vector.broadcast %cst_72 : f32 to vector<4x64xf32>
    %161 = arith.select %159, %148, %160 : vector<4x64xi1>, vector<4x64xf32>
    %c6_73 = arith.constant 6 : index
    %c0_74 = arith.constant 0 : index
    %c0_75 = arith.constant 0 : index
    %162 = vector.load %arg4[%c6_73, %c0_74, %c0_75] : memref<9x1x64xf32, #tpu.memory_space<vmem>>, vector<1x1x64xf32>
    %163 = vector.shape_cast %162 : vector<1x1x64xf32> to vector<1x64xf32>
    %164 = vector.broadcast %163 : vector<1x64xf32> to vector<4x64xf32>
    %165 = arith.mulf %161, %164 : vector<4x64xf32>
    %166 = arith.addf %147, %165 : vector<4x64xf32>
    %c10 = arith.constant 10 : index
    %c0_76 = arith.constant 0 : index
    %167 = vector.load %arg14[%c10, %c0_76] : memref<16x64xf32, #tpu.memory_space<vmem>>, vector<4x64xf32>
    %c0_i32_77 = arith.constant 0 : i32
    %168 = vector.broadcast %c0_i32_77 : i32 to vector<4x1xi32>
    %169 = arith.addi %32, %168 : vector<4x1xi32>
    %c0_i32_78 = arith.constant 0 : i32
    %170 = vector.broadcast %c0_i32_78 : i32 to vector<4x1xi32>
    %171 = arith.cmpi sge, %169, %170 : vector<4x1xi32>
    %c0_i32_79 = arith.constant 0 : i32
    %172 = vector.broadcast %c0_i32_79 : i32 to vector<4x1xi32>
    %173 = arith.addi %32, %172 : vector<4x1xi32>
    %c2_i32_80 = arith.constant 2 : i32
    %174 = vector.broadcast %c2_i32_80 : i32 to vector<4x1xi32>
    %175 = arith.cmpi slt, %173, %174 : vector<4x1xi32>
    %176 = arith.andi %171, %175 : vector<4x1xi1>
    %cst_81 = arith.constant 0.000000e+00 : f32
    %177 = vector.shape_cast %176 : vector<4x1xi1> to vector<4x1xi1>
    %178 = vector.broadcast %177 : vector<4x1xi1> to vector<4x64xi1>
    %179 = vector.broadcast %cst_81 : f32 to vector<4x64xf32>
    %180 = arith.select %178, %167, %179 : vector<4x64xi1>, vector<4x64xf32>
    %c7_82 = arith.constant 7 : index
    %c0_83 = arith.constant 0 : index
    %c0_84 = arith.constant 0 : index
    %181 = vector.load %arg4[%c7_82, %c0_83, %c0_84] : memref<9x1x64xf32, #tpu.memory_space<vmem>>, vector<1x1x64xf32>
    %182 = vector.shape_cast %181 : vector<1x1x64xf32> to vector<1x64xf32>
    %183 = vector.broadcast %182 : vector<1x64xf32> to vector<4x64xf32>
    %184 = arith.mulf %180, %183 : vector<4x64xf32>
    %185 = arith.addf %166, %184 : vector<4x64xf32>
    %c11 = arith.constant 11 : index
    %c0_85 = arith.constant 0 : index
    %186 = vector.load %arg14[%c11, %c0_85] : memref<16x64xf32, #tpu.memory_space<vmem>>, vector<4x64xf32>
    %c1_i32_86 = arith.constant 1 : i32
    %187 = vector.broadcast %c1_i32_86 : i32 to vector<4x1xi32>
    %188 = arith.addi %32, %187 : vector<4x1xi32>
    %c0_i32_87 = arith.constant 0 : i32
    %189 = vector.broadcast %c0_i32_87 : i32 to vector<4x1xi32>
    %190 = arith.cmpi sge, %188, %189 : vector<4x1xi32>
    %c1_i32_88 = arith.constant 1 : i32
    %191 = vector.broadcast %c1_i32_88 : i32 to vector<4x1xi32>
    %192 = arith.addi %32, %191 : vector<4x1xi32>
    %c2_i32_89 = arith.constant 2 : i32
    %193 = vector.broadcast %c2_i32_89 : i32 to vector<4x1xi32>
    %194 = arith.cmpi slt, %192, %193 : vector<4x1xi32>
    %195 = arith.andi %190, %194 : vector<4x1xi1>
    %cst_90 = arith.constant 0.000000e+00 : f32
    %196 = vector.shape_cast %195 : vector<4x1xi1> to vector<4x1xi1>
    %197 = vector.broadcast %196 : vector<4x1xi1> to vector<4x64xi1>
    %198 = vector.broadcast %cst_90 : f32 to vector<4x64xf32>
    %199 = arith.select %197, %186, %198 : vector<4x64xi1>, vector<4x64xf32>
    %c8_91 = arith.constant 8 : index
    %c0_92 = arith.constant 0 : index
    %c0_93 = arith.constant 0 : index
    %200 = vector.load %arg4[%c8_91, %c0_92, %c0_93] : memref<9x1x64xf32, #tpu.memory_space<vmem>>, vector<1x1x64xf32>
    %201 = vector.shape_cast %200 : vector<1x1x64xf32> to vector<1x64xf32>
    %202 = vector.broadcast %201 : vector<1x64xf32> to vector<4x64xf32>
    %203 = arith.mulf %199, %202 : vector<4x64xf32>
    %204 = arith.addf %185, %203 : vector<4x64xf32>
    %c0_94 = arith.constant 0 : index
    %c0_95 = arith.constant 0 : index
    %205 = vector.load %arg5[%c0_94, %c0_95] : memref<1x64xf32, #tpu.memory_space<vmem>>, vector<1x64xf32>
    %206 = vector.broadcast %205 : vector<1x64xf32> to vector<4x64xf32>
    %207 = arith.addf %204, %206 : vector<4x64xf32>
    %208 = arith.negf %207 : vector<4x64xf32>
    %209 = math.exp %208 : vector<4x64xf32>
    %cst_96 = arith.constant 1.000000e+00 : f32
    %210 = vector.broadcast %cst_96 : f32 to vector<4x64xf32>
    %211 = arith.addf %210, %209 : vector<4x64xf32>
    %212 = arith.divf %210, %211 : vector<4x64xf32>
    %213 = arith.mulf %207, %212 : vector<4x64xf32>
    %c0_97 = arith.constant 0 : index
    %c0_98 = arith.constant 0 : index
    %214 = vector.load %arg12[%c0_97, %c0_98] : memref<1x4xf32, #tpu.memory_space<vmem>>, vector<1x4xf32>
    %cst_99 = arith.constant dense<0.000000e+00> : vector<1x64xf32>
    %215 = tpu.matmul %214, %213, %cst_99 {dimension_numbers = #tpu.dot_dimension_numbers<[1], [0], [0], [1], [0, 0, 1, 1], [], []>} : vector<1x4xf32>, vector<4x64xf32>, vector<1x64xf32> -> vector<1x64xf32>
    %216 = arith.truncf %215 : vector<1x64xf32> to vector<1x64xbf16>
    %c0_100 = arith.constant 0 : index
    %c0_101 = arith.constant 0 : index
    %217 = vector.load %arg6[%c0_100, %c0_101] : memref<64x48xbf16, #tpu.memory_space<vmem>>, vector<64x48xbf16>
    %cst_102 = arith.constant dense<0.000000e+00> : vector<1x48xf32>
    %218 = tpu.matmul %216, %217, %cst_102 {dimension_numbers = #tpu.dot_dimension_numbers<[1], [0], [0], [1], [0, 0, 1, 1], [], []>} : vector<1x64xbf16>, vector<64x48xbf16>, vector<1x48xf32> -> vector<1x48xf32>
    %c0_103 = arith.constant 0 : index
    %c0_104 = arith.constant 0 : index
    %219 = vector.load %arg7[%c0_103, %c0_104] : memref<1x48xf32, #tpu.memory_space<vmem>>, vector<1x48xf32>
    %220 = arith.addf %218, %219 : vector<1x48xf32>
    %cst_105 = arith.constant dense<0.000000e+00> : vector<48xf32>
    %221 = vector.multi_reduction <add>, %220, %cst_105 [0] : vector<1x48xf32> to vector<48xf32>
    %222 = vector.shape_cast %221 : vector<48xf32> to vector<1x48xf32>
    %cst_106 = arith.constant 1.000000e+00 : f32
    %223 = vector.broadcast %cst_106 : f32 to vector<1x48xf32>
    %224 = arith.divf %222, %223 : vector<1x48xf32>
    %c0_107 = arith.constant 0 : index
    %c0_108 = arith.constant 0 : index
    %225 = vector.load %arg8[%c0_107, %c0_108] : memref<3x48xf32, #tpu.memory_space<vmem>>, vector<3x48xf32>
    %226 = vector.broadcast %224 : vector<1x48xf32> to vector<3x48xf32>
    %227 = arith.mulf %225, %226 : vector<3x48xf32>
    %cst_109 = arith.constant dense<0.000000e+00> : vector<3xf32>
    %228 = vector.multi_reduction <add>, %227, %cst_109 [1] : vector<3x48xf32> to vector<3xf32>
    %229 = vector.shape_cast %228 : vector<3xf32> to vector<3x1xf32>
    %c0_110 = arith.constant 0 : index
    %c0_111 = arith.constant 0 : index
    %230 = vector.load %arg9[%c0_110, %c0_111] : memref<3x1xf32, #tpu.memory_space<vmem>>, vector<3x1xf32>
    %231 = arith.addf %229, %230 : vector<3x1xf32>
    %232 = arith.negf %231 : vector<3x1xf32>
    %233 = math.exp %232 : vector<3x1xf32>
    %cst_112 = arith.constant 1.000000e+00 : f32
    %234 = vector.broadcast %cst_112 : f32 to vector<3x1xf32>
    %235 = arith.addf %234, %233 : vector<3x1xf32>
    %236 = arith.divf %234, %235 : vector<3x1xf32>
    %237 = arith.mulf %231, %236 : vector<3x1xf32>
    %c0_113 = arith.constant 0 : index
    %c0_114 = arith.constant 0 : index
    %238 = vector.load %arg10[%c0_113, %c0_114] : memref<3x48xf32, #tpu.memory_space<vmem>>, vector<3x48xf32>
    %239 = vector.broadcast %237 : vector<3x1xf32> to vector<3x48xf32>
    %240 = arith.mulf %239, %238 : vector<3x48xf32>
    %cst_115 = arith.constant dense<0.000000e+00> : vector<48xf32>
    %241 = vector.multi_reduction <add>, %240, %cst_115 [0] : vector<3x48xf32> to vector<48xf32>
    %242 = vector.shape_cast %241 : vector<48xf32> to vector<1x48xf32>
    %c0_116 = arith.constant 0 : index
    %c0_117 = arith.constant 0 : index
    %243 = vector.load %arg11[%c0_116, %c0_117] : memref<1x48xf32, #tpu.memory_space<vmem>>, vector<1x48xf32>
    %244 = arith.addf %242, %243 : vector<1x48xf32>
    %245 = arith.negf %244 : vector<1x48xf32>
    %246 = math.exp %245 : vector<1x48xf32>
    %cst_118 = arith.constant 1.000000e+00 : f32
    %247 = vector.broadcast %cst_118 : f32 to vector<1x48xf32>
    %248 = arith.addf %247, %246 : vector<1x48xf32>
    %249 = arith.divf %247, %248 : vector<1x48xf32>
    %250 = arith.mulf %220, %249 : vector<1x48xf32>
    %251 = arith.addf %250, %220 : vector<1x48xf32>
    %252 = arith.truncf %251 : vector<1x48xf32> to vector<1x48xbf16>
    %c0_119 = arith.constant 0 : index
    %c0_120 = arith.constant 0 : index
    %c0_121 = arith.constant 0 : index
    %253 = vector.load %arg13[%c0_119, %c0_120, %c0_121] : memref<1x1x48xbf16, #tpu.memory_space<vmem>>, vector<1x1x48xbf16>
    %254 = vector.shape_cast %253 : vector<1x1x48xbf16> to vector<1x48xbf16>
    %255 = vector.shape_cast %252 : vector<1x48xbf16> to vector<1x1x48xbf16>
    tpu.vector_store %arg13[%c0_119, %c0_120, %c0_121], %255 {strides = array<i32>} : memref<1x1x48xbf16, #tpu.memory_space<vmem>>, vector<1x1x48xbf16>,
    return
  }
  func.func @transform_0(%arg0: i32) -> (i32, i32, i32) {
    %c0_i32 = arith.constant 0 : i32
    %c0_i32_0 = arith.constant 0 : i32
    %c0_i32_1 = arith.constant 0 : i32
    return %arg0, %c0_i32, %c0_i32_0 : i32, i32, i32
  }
  func.func @transform_1(%arg0: i32) -> (i32, i32) {
    %c0_i32 = arith.constant 0 : i32
    %c0_i32_0 = arith.constant 0 : i32
    %c0_i32_1 = arith.constant 0 : i32
    return %c0_i32, %c0_i32_0 : i32, i32
  }
  func.func @transform_2(%arg0: i32) -> (i32, i32) {
    %c0_i32 = arith.constant 0 : i32
    %c0_i32_0 = arith.constant 0 : i32
    %c0_i32_1 = arith.constant 0 : i32
    return %c0_i32, %c0_i32_0 : i32, i32
  }
  func.func @transform_3(%arg0: i32) -> (i32, i32, i32) {
    %c0_i32 = arith.constant 0 : i32
    %c0_i32_0 = arith.constant 0 : i32
    %c0_i32_1 = arith.constant 0 : i32
    %c0_i32_2 = arith.constant 0 : i32
    return %c0_i32, %c0_i32_0, %c0_i32_1 : i32, i32, i32
  }
  func.func @transform_4(%arg0: i32) -> (i32, i32) {
    %c0_i32 = arith.constant 0 : i32
    %c0_i32_0 = arith.constant 0 : i32
    %c0_i32_1 = arith.constant 0 : i32
    return %c0_i32, %c0_i32_0 : i32, i32
  }
  func.func @transform_5(%arg0: i32) -> (i32, i32) {
    %c0_i32 = arith.constant 0 : i32
    %c0_i32_0 = arith.constant 0 : i32
    %c0_i32_1 = arith.constant 0 : i32
    return %c0_i32, %c0_i32_0 : i32, i32
  }
  func.func @transform_6(%arg0: i32) -> (i32, i32) {
    %c0_i32 = arith.constant 0 : i32
    %c0_i32_0 = arith.constant 0 : i32
    %c0_i32_1 = arith.constant 0 : i32
    return %c0_i32, %c0_i32_0 : i32, i32
  }
  func.func @transform_7(%arg0: i32) -> (i32, i32) {
    %c0_i32 = arith.constant 0 : i32
    %c0_i32_0 = arith.constant 0 : i32
    %c0_i32_1 = arith.constant 0 : i32
    return %c0_i32, %c0_i32_0 : i32, i32
  }
  func.func @transform_8(%arg0: i32) -> (i32, i32) {
    %c0_i32 = arith.constant 0 : i32
    %c0_i32_0 = arith.constant 0 : i32
    %c0_i32_1 = arith.constant 0 : i32
    return %c0_i32, %c0_i32_0 : i32, i32
  }
  func.func @transform_9(%arg0: i32) -> (i32, i32) {
    %c0_i32 = arith.constant 0 : i32
    %c0_i32_0 = arith.constant 0 : i32
    %c0_i32_1 = arith.constant 0 : i32
    return %c0_i32, %c0_i32_0 : i32, i32
  }
  func.func @transform_10(%arg0: i32) -> (i32, i32) {
    %c0_i32 = arith.constant 0 : i32
    %c0_i32_0 = arith.constant 0 : i32
    %c0_i32_1 = arith.constant 0 : i32
    return %c0_i32, %c0_i32_0 : i32, i32
  }
  func.func @transform_11(%arg0: i32) -> (i32, i32) {
    %c0_i32 = arith.constant 0 : i32
    %c0_i32_0 = arith.constant 0 : i32
    %c0_i32_1 = arith.constant 0 : i32
    return %c0_i32, %c0_i32_0 : i32, i32
  }
  func.func @transform_12(%arg0: i32) -> (i32, i32, i32) {
    %c0_i32 = arith.constant 0 : i32
    %c0_i32_0 = arith.constant 0 : i32
    %c0_i32_1 = arith.constant 0 : i32
    return %arg0, %c0_i32, %c0_i32_0 : i32, i32, i32
  }
}

module attributes {stable_mosaic.version = 11 : i64} {
  func.func @_mm_kernel(%arg0: i32, %arg1: memref<2x48xbf16, #tpu.memory_space<vmem>>, %arg2: memref<48x10xbf16, #tpu.memory_space<vmem>>, %arg3: memref<1x10xf32, #tpu.memory_space<vmem>>, %arg4: memref<2x10xf32, #tpu.memory_space<vmem>>) attributes {dimension_semantics = [#tpu.dimension_semantics<parallel>], iteration_bounds = array<i64: 1>, scalar_prefetch = 0 : i64, scratch_operands = 0 : i64, tpu.core_type = #tpu.core_type<tc>, window_params = [{transform_indices = @transform_0, window_bounds = array<i64: 2, 48>}, {pipeline_mode = #tpu.pipeline_mode<synchronous>, transform_indices = @transform_1, window_bounds = array<i64: 48, 10>}, {pipeline_mode = #tpu.pipeline_mode<synchronous>, transform_indices = @transform_2, window_bounds = array<i64: 1, 10>}, {transform_indices = @transform_3, window_bounds = array<i64: 2, 10>}]} {
    %c0 = arith.constant 0 : index
    %c0_0 = arith.constant 0 : index
    %0 = vector.load %arg1[%c0, %c0_0] : memref<2x48xbf16, #tpu.memory_space<vmem>>, vector<2x48xbf16>
    %c0_1 = arith.constant 0 : index
    %c0_2 = arith.constant 0 : index
    %1 = vector.load %arg2[%c0_1, %c0_2] : memref<48x10xbf16, #tpu.memory_space<vmem>>, vector<48x10xbf16>
    %cst = arith.constant dense<0.000000e+00> : vector<2x10xf32>
    %2 = tpu.matmul %0, %1, %cst {dimension_numbers = #tpu.dot_dimension_numbers<[1], [0], [0], [1], [0, 0, 1, 1], [], []>} : vector<2x48xbf16>, vector<48x10xbf16>, vector<2x10xf32> -> vector<2x10xf32>
    %c0_3 = arith.constant 0 : index
    %c0_4 = arith.constant 0 : index
    %3 = vector.load %arg3[%c0_3, %c0_4] : memref<1x10xf32, #tpu.memory_space<vmem>>, vector<1x10xf32>
    %4 = vector.broadcast %3 : vector<1x10xf32> to vector<2x10xf32>
    %5 = arith.addf %2, %4 : vector<2x10xf32>
    %c0_5 = arith.constant 0 : index
    %c0_6 = arith.constant 0 : index
    %6 = vector.load %arg4[%c0_5, %c0_6] : memref<2x10xf32, #tpu.memory_space<vmem>>, vector<2x10xf32>
    tpu.vector_store %arg4[%c0_5, %c0_6], %5 {strides = array<i32>} : memref<2x10xf32, #tpu.memory_space<vmem>>, vector<2x10xf32>,
    return
  }
  func.func @transform_0(%arg0: i32) -> (i32, i32) {
    %c0_i32 = arith.constant 0 : i32
    %c0_i32_0 = arith.constant 0 : i32
    return %arg0, %c0_i32 : i32, i32
  }
  func.func @transform_1(%arg0: i32) -> (i32, i32) {
    %c0_i32 = arith.constant 0 : i32
    %c0_i32_0 = arith.constant 0 : i32
    %c0_i32_1 = arith.constant 0 : i32
    return %c0_i32, %c0_i32_0 : i32, i32
  }
  func.func @transform_2(%arg0: i32) -> (i32, i32) {
    %c0_i32 = arith.constant 0 : i32
    %c0_i32_0 = arith.constant 0 : i32
    %c0_i32_1 = arith.constant 0 : i32
    return %c0_i32, %c0_i32_0 : i32, i32
  }
  func.func @transform_3(%arg0: i32) -> (i32, i32) {
    %c0_i32 = arith.constant 0 : i32
    %c0_i32_0 = arith.constant 0 : i32
    return %arg0, %c0_i32 : i32, i32
  }
}

</mosaic_0001>

<bundles_post_ra>
// kernel: _lambda_.6
= control target key start
LH: loop header
LB: loop body
LE: loop exit
PB: predicated region body
PF: predicated region fallthrough
CT: control target
= control target key end

     0   :  { %vm115_vm0 = vcmask 1044480   ;;  %vm116_vm1 = vcmask 1045504   ;;  %v674_v2 = vmov 65535   ;;  %vm90_vm2 = vcmask 220160   ;;  %s1099_s1 = inlined_call_operand.vmem [shape: bf16[27,32], index: 1, kind: input, shape index: {}]   ;;  %s1100_s2 = inlined_call_operand.vmem [shape: f32[1,32], index: 2, kind: input, shape index: {}]   ;;  %s1101_s0 = inlined_call_operand.vmem [shape: bf16[128,27], index: 0, kind: input, shape index: {}]   ;;  %s1102_s3 = inlined_call_operand.vmem [shape: bf16[128,32], index: 3, kind: output, shape index: {}]  }
   0x1   :  { %v566_v0 = vld [vmem:[%s1099_s1 + $0x8] sm:$0xf]  ;;  %v601_v1 = vld [vmem:[%s1099_s1 + $0x8] sm:$0x30]  ;;  %v117_v3 = vsel %vm115_vm0, 4294967295, %v674_v2  ;;  %v600_v7 = vld [vmem:[%s1099_s1] sm:$0xff] }
   0x2   :  { %v567_v4 = vor.u32 %v601_v1, %v566_v0  ;;  %v118_v5 = vsel %vm116_vm1, %v117_v3, 0  ;;  %v592_v8 = vld [vmem:[%s1101_s0] sm:$0xff]  ;;  %v594_v9 = vld [vmem:[%s1101_s0 + $0x10] sm:$0xff]  ;;  %v593_v12 = vld [vmem:[%s1101_s0 + $0x8] sm:$0xff]  ;;  %vm507_vm8 = vcmask 257024  }
   0x3   :  { %v596_v10 = vld [vmem:[%s1101_s0 + $0x20] sm:$0xff]  ;;  %v598_v11 = vld [vmem:[%s1101_s0 + $0x30] sm:$0xff]  ;;  %v595_v13 = vld [vmem:[%s1101_s0 + $0x18] sm:$0xff] }
   0x4   :  { %v120_v6 = vand.u32 %v567_v4, %v118_v5  ;;  %v597_v14 = vld [vmem:[%s1101_s0 + $0x28] sm:$0xff]  ;;  %v599_v15 = vld [vmem:[%s1101_s0 + $0x38] sm:$0xff]  ;;  %v739_v16 = vld [vmem:[%s1100_s2] ss:$0 sm:$0xff] }
   0x6   :  { %128 = vmatpush.bf16.msra.mxu0 %v120_v6  ;;  %602 = vmatpush.bf16.msra.mxu1 %v120_v6 }
   0x7   :  { %603 = vmatpush.bf16.msra.mxu2 %v120_v6  ;;  %604 = vmatpush.bf16.msra.mxu3 %v120_v6 }
   0xa   :  { %129 = vmatpush.bf16.msra.mxu0 %v600_v7  ;;  %605 = vmatpush.bf16.msra.mxu1 %v600_v7 }
   0xb   :  { %606 = vmatpush.bf16.msra.mxu2 %v600_v7  ;;  %607 = vmatpush.bf16.msra.mxu3 %v600_v7 }
   0xd   :  { %568 = vmatmul.msk.bf16.vlgmr.msra.gmra.mxu0 %vm90_vm2, %v592_v8  ;;  %570 = vmatmul.msk.bf16.vlgmr.msra.gmra.mxu1 %vm90_vm2, %v594_v9 }
   0xe   :  { %572 = vmatmul.msk.bf16.vlgmr.msra.gmra.mxu2 %vm90_vm2, %v596_v10  ;;  %574 = vmatmul.msk.bf16.vlgmr.msra.gmra.mxu3 %vm90_vm2, %v598_v11 }
  0x1d   :  { %569 = vmatmul.msk.bf16.gmra.mxu0 %vm90_vm2, %v593_v12  ;;  %571 = vmatmul.msk.bf16.gmra.mxu1 %vm90_vm2, %v595_v13 }
  0x1e   :  { %573 = vmatmul.msk.bf16.gmra.mxu2 %vm90_vm2, %v597_v14  ;;  %575 = vmatmul.msk.bf16.gmra.mxu3 %vm90_vm2, %v599_v15 }
  0x8a   :  { %v131_v17 = vpop.f32.mrf.mxu0  ;;  %v141_v18 = vpop.f32.mrf.mxu1 }
  0x8b   :  { %v742_v19 = vadd.f32 %v739_v16, %v131_v17  ;;  %v745_v20 = vadd.f32 %v739_v16, %v141_v18 }
  0x8d   :  { %v576_v21 = vmul.f32 -1.442695, %v742_v19  ;;  %v580_v22 = vmul.f32 -1.442695, %v745_v20 }
  0x8f   :  { %610 = vpow2.f32 %v576_v21 }
  0x90   :  { %612 = vpow2.f32 %v580_v22 }
  0x91   :  { %v151_v23 = vpop.f32.mrf.mxu2  ;;  %v161_v24 = vpop.f32.mrf.mxu3 }
  0x92   :  { %v750_v25 = vadd.f32 %v739_v16, %v151_v23  ;;  %v753_v26 = vadd.f32 %v739_v16, %v161_v24  ;;  %v133_v27 = vpop.f32.mrf.mxu0  ;;  %v143_v28 = vpop.f32.mrf.mxu1 }
  0x93   :  { %v756_v29 = vadd.f32 %v739_v16, %v133_v27  ;;  %v759_v30 = vadd.f32 %v739_v16, %v143_v28 }
  0x94   :  { %v584_v31 = vmul.f32 -1.442695, %v750_v25  ;;  %v588_v32 = vmul.f32 -1.442695, %v753_v26 }
  0x95   :  { %v611_v33 = vpop.eup %610  ;;  %v577_v36 = vmul.f32 -1.442695, %v756_v29  ;;  %v581_v38 = vmul.f32 -1.442695, %v759_v30 }
  0x96   :  { %v613_v34 = vpop.eup %612  ;;  %v763_v35 = vadd.f32 1.0, %v611_v33  ;;  %614 = vpow2.f32 %v584_v31 }
  0x97   :  { %v766_v37 = vadd.f32 1.0, %v613_v34  ;;  %616 = vpow2.f32 %v588_v32 }
  0x98   :  { %618 = vrcp.f32 %v763_v35  ;;  %v244_v43 = vand.u32 2147483647, %v763_v35  ;;  %v246_v44 = vand.u32 2147483648, %v763_v35  ;;  %vm240_vm3 = vweird.f32 %v763_v35 }
  0x99   :  { %620 = vrcp.f32 %v766_v37  ;;  %v153_v39 = vpop.f32.mrf.mxu2  ;;  %v163_v40 = vpop.f32.mrf.mxu3  ;;  %v304_v46 = vand.u32 2147483647, %v766_v37  ;;  %v306_v47 = vand.u32 2147483648, %v766_v37  ;;  %vm300_vm4 = vweird.f32 %v766_v37 }
  0x9a   :  { %622 = vpow2.f32 %v577_v36  ;;  %v772_v41 = vadd.f32 %v739_v16, %v153_v39  ;;  %v136_v42 = vpop.f32.mrf.mxu0  ;;  %v780_v49 = vadd.f32 %v739_v16, %v163_v40  ;;  %v146_v55 = vpop.f32.mrf.mxu1  ;;  %vm792_vm5 = vcmp.eq.f32.partialorder %v244_v43, 8.507059e+37 }
  0x9b   :  { %624 = vpow2.f32 %v581_v38  ;;  %v785_v52 = vadd.f32 %v739_v16, %v136_v42  ;;  %v247_v59 = vor.u32 1.1754944e-38, %v246_v44  ;;  %vm798_vm6 = vcmp.eq.f32.partialorder %v304_v46, 8.507059e+37 }
  0x9c   :  { %v615_v45 = vpop.eup %614  ;;  %v585_v48 = vmul.f32 -1.442695, %v772_v41  ;;  %v307_v63 = vor.u32 1.1754944e-38, %v306_v47  ;;  %v589_v0 = vmul.f32 -1.442695, %v780_v49  ;;  %v808_v4 = vadd.f32 %v739_v16, %v146_v55 }
  0x9d   :  { %v617_v50 = vpop.eup %616  ;;  %v782_v51 = vadd.f32 1.0, %v615_v45  ;;  %v805_v3 = vmul.f32 -1.442695, %v785_v52 }
  0x9e   :  { %v619_v53 = vpop.eup %618  ;;  %v789_v54 = vadd.f32 1.0, %v617_v50  ;;  %v821_v17 = vmul.f32 -1.442695, %v808_v4 }
  0x9f   :  { %v621_v56 = vpop.eup %620  ;;  %v236_v57 = vmul.f32 %v619_v53, %v763_v35  ;;  %626 = vrcp.f32 %v782_v51  ;;  %vm241_vm7 = vweird.f32 %v619_v53  ;;  %v364_v6 = vand.u32 2147483647, %v782_v51 }
  0xa0   :  { %v623_v60 = vpop.eup %622  ;;  %v296_v61 = vmul.f32 %v621_v56, %v766_v37  ;;  %628 = vpow2.f32 %v585_v48  ;;  %v366_v7 = vand.u32 2147483648, %v782_v51  ;;  %v426_v9 = vand.u32 2147483648, %v789_v54  ;;  %vm242_vm11 = vmor %vm240_vm3, %vm241_vm7 }
  0xa1   :  { %v625_v1 = vpop.eup %624  ;;  %v237_v2 = vsub.f32 1.0, %v236_v57  ;;  %630 = vrcp.f32 %v789_v54  ;;  %v813_v10 = vadd.f32 1.0, %v623_v60  ;;  %vm301_vm9 = vweird.f32 %v621_v56  ;;  %v156_v24 = vpop.f32.mrf.mxu2 }
  0xa2   :  { %v297_v5 = vsub.f32 1.0, %v296_v61  ;;  %v815_v11 = vadd.f32 1.0, %v625_v1  ;;  %v424_v13 = vand.u32 2147483647, %v789_v54  ;;  %632 = vpow2.f32 %v589_v0  ;;  %vm302_vm14 = vmor %vm300_vm4, %vm301_vm9 }
  0xa3   :  { %v238_v8 = vmul.f32 %v619_v53, %v237_v2  ;;  %vm360_vm10 = vweird.f32 %v782_v51  ;;  %634 = vrcp.f32 %v813_v10  ;;  %vm827_vm12 = vcmp.eq.f32.partialorder %v364_v6, 8.507059e+37 }
  0xa4   :  { %v298_v12 = vmul.f32 %v621_v56, %v297_v5  ;;  %vm420_vm13 = vweird.f32 %v789_v54  ;;  %v367_v31 = vor.u32 1.1754944e-38, %v366_v7  ;;  %v427_v32 = vor.u32 1.1754944e-38, %v426_v9 }
  0xa5   :  { %v627_v14 = vpop.eup %626  ;;  %v239_v15 = vadd.f32 %v619_v53, %v238_v8  ;;  %636 = vrcp.f32 %v815_v11  ;;  %vm839_vm15 = vcmp.eq.f32.partialorder %v424_v13, 8.507059e+37  ;;  %v259_v40 = vand.u32 2147483647, %v813_v10 }
  0xa6   :  { %v629_v18 = vpop.eup %628  ;;  %v299_v21 = vadd.f32 %v621_v56, %v298_v12  ;;  %v356_v22 = vmul.f32 %v627_v14, %v782_v51  ;;  %v848_v42 = vadd.f32 %v739_v16, %v156_v24  ;;  %vm361_vm0 = vweird.f32 %v627_v14 }
  0xa7   :  { %v631_v27 = vpop.eup %630  ;;  %v243_v28 = vsel %vm242_vm11, %v619_v53, %v239_v15  ;;  %vm255_vm1 = vweird.f32 %v813_v10  ;;  %v853_v50 = vadd.f32 1.0, %v629_v18  ;;  %vm362_vm3 = vmor %vm360_vm10, %vm361_vm0  ;;  %vm862_vm4 = vcmp.eq.f32.partialorder %v259_v40, 8.507059e+37 }
  0xa8   :  { %v248_v33 = vsel %vm792_vm5, %v247_v59, %v243_v28  ;;  %v303_v34 = vsel %vm302_vm14, %v621_v56, %v299_v21  ;;  %v357_v35 = vsub.f32 1.0, %v356_v22  ;;  %v416_v36 = vmul.f32 %v631_v27, %v789_v54  ;;  %v633_v43 = vpop.eup %632 }
  0xa9   :  { %v475_v39 = vmul.f32 %v248_v33, %v742_v19  ;;  %v308_v37 = vsel %vm798_vm6, %v307_v63, %v303_v34  ;;  %v635_v47 = vpop.eup %634  ;;  %vm421_vm2 = vweird.f32 %v631_v27  ;;  %v261_v19 = vand.u32 2147483648, %v813_v10 }
  0xaa   :  { %v479_v44 = vmul.f32 %v308_v37, %v745_v20  ;;  %v358_v45 = vmul.f32 %v627_v14, %v357_v35  ;;  %v417_v46 = vsub.f32 1.0, %v416_v36  ;;  %v251_v57 = vmul.f32 %v635_v47, %v813_v10  ;;  %vm422_vm6 = vmor %vm420_vm13, %vm421_vm2  ;;  %v166_v10 = vpop.f32.mrf.mxu3  ;;  %v148_v37 = vpop.f32.mrf.mxu1 }
  0xab   :  { %v491_v48 = vpack.c.bf16 %v475_v39, %v475_v39  ;;  %v637_v58 = vpop.eup %636  ;;  %vm315_vm5 = vweird.f32 %v815_v11  ;;  %638 = vrcp.f32 %v853_v50  ;;  %v868_v59 = vadd.f32 1.0, %v633_v43 }
  0xac   :  { %v495_v53 = vpack.c.bf16 %v479_v44, %v479_v44  ;;  %v359_v55 = vadd.f32 %v627_v14, %v358_v45  ;;  %v418_v56 = vmul.f32 %v631_v27, %v417_v46  ;;  %v252_v62 = vsub.f32 1.0, %v251_v57 }
  0xad   :  { %508 = vst.msk [vmem:[%s1102_s3] sm:$0xf] %vm507_vm8, %v491_v48  ;;  %v311_v51 = vmul.f32 %v637_v58, %v815_v11  ;;  %vm256_vm7 = vweird.f32 %v635_v47  ;;  %v319_v0 = vand.u32 2147483647, %v815_v11  ;;  %v321_v1 = vand.u32 2147483648, %v815_v11  ;;  %v138_v11 = vpop.f32.mrf.mxu0 }
  0xae   :  { %512 = vst.msk [vmem:[%s1102_s3 + $0x10] sm:$0xf] %vm507_vm8, %v495_v53  ;;  %v363_v60 = vsel %vm362_vm3, %v627_v14, %v359_v55  ;;  %v419_v61 = vadd.f32 %v631_v27, %v418_v56  ;;  %v253_v6 = vmul.f32 %v635_v47, %v252_v62  ;;  %vm316_vm9 = vweird.f32 %v637_v58  ;;  %vm257_vm10 = vmor %vm255_vm1, %vm256_vm7 }
  0xaf   :  { %v368_v63 = vsel %vm827_vm12, %v367_v31, %v363_v60  ;;  %v312_v7 = vsub.f32 1.0, %v311_v51  ;;  %v379_v9 = vand.u32 2147483647, %v853_v50  ;;  %640 = vrcp.f32 %v868_v59  ;;  %vm317_vm13 = vmor %vm315_vm5, %vm316_vm9 }
  0xb0   :  { %v483_v2 = vmul.f32 %v368_v63, %v750_v25  ;;  %v423_v5 = vsel %vm422_vm6, %v631_v27, %v419_v61  ;;  %v254_v13 = vadd.f32 %v635_v47, %v253_v6  ;;  %v262_v25 = vor.u32 1.1754944e-38, %v261_v19 }
  0xb1   :  { %v428_v8 = vsel %vm839_vm15, %v427_v32, %v423_v5  ;;  %v313_v14 = vmul.f32 %v637_v58, %v312_v7  ;;  %v639_v15 = vpop.eup %638  ;;  %vm891_vm11 = vcmp.eq.f32.partialorder %v319_v0, 8.507059e+37  ;;  %v322_v21 = vor.u32 1.1754944e-38, %v321_v1 }
  0xb2   :  { %v499_v54 = vpack.c.bf16 %v483_v2, %v483_v2  ;;  %v487_v12 = vmul.f32 %v428_v8, %v753_v26  ;;  %vm375_vm12 = vweird.f32 %v853_v50  ;;  %v258_v22 = vsel %vm257_vm10, %v635_v47, %v254_v13  ;;  %v168_v1 = vpop.f32.mrf.mxu3 }
  0xb3   :  { %v314_v23 = vadd.f32 %v637_v58, %v313_v14  ;;  %v371_v24 = vmul.f32 %v639_v15, %v853_v50  ;;  %v263_v27 = vsel %vm862_vm4, %v262_v25, %v258_v22  ;;  %vm376_vm14 = vweird.f32 %v639_v15 }
  0xb4   :  { %516 = vst.msk [vmem:[%s1102_s3 + $0x20] sm:$0xf] %vm507_vm8, %v499_v54  ;;  %v503_v26 = vpack.c.bf16 %v487_v12, %v487_v12  ;;  %vm906_vm15 = vcmp.eq.f32.partialorder %v379_v9, 8.507059e+37  ;;  %v381_v31 = vand.u32 2147483648, %v853_v50  ;;  %v476_v32 = vmul.f32 %v263_v27, %v756_v29  ;;  %vm377_vm0 = vmor %vm375_vm12, %vm376_vm14  ;;  %v158_v50 = vpop.f32.mrf.mxu2 }
  0xb5   :  { %v318_v33 = vsel %vm317_vm13, %v637_v58, %v314_v23  ;;  %v372_v34 = vsub.f32 1.0, %v371_v24  ;;  %642 = vpow2.f32 %v805_v3  ;;  %v641_v35 = vpop.eup %640  ;;  %v586_v38 = vmul.f32 -1.442695, %v848_v42 }
  0xb6   :  { %520 = vst.msk [vmem:[%s1102_s3 + $0x30] sm:$0xf] %vm507_vm8, %v503_v26  ;;  %v323_v36 = vsel %vm891_vm11, %v322_v21, %v318_v33  ;;  %644 = vpow2.f32 %v821_v17  ;;  %v922_v39 = vadd.f32 %v739_v16, %v166_v10  ;;  %v492_v40 = vpack.c.bf16 %v476_v32, %v476_v32 }
  0xb7   :  { %v480_v29 = vmul.f32 %v323_v36, %v759_v30  ;;  %v373_v43 = vmul.f32 %v639_v15, %v372_v34  ;;  %v431_v44 = vmul.f32 %v641_v35, %v868_v59  ;;  %v382_v3 = vor.u32 1.1754944e-38, %v381_v31 }
  0xb8   :  { %646 = vpow2.f32 %v586_v38  ;;  %v590_v45 = vmul.f32 -1.442695, %v922_v39  ;;  %v928_v46 = vadd.f32 %v739_v16, %v138_v11  ;;  %509 = vst.msk [vmem:[%s1102_s3 + $0x4] sm:$0xf] %vm507_vm8, %v492_v40  ;;  %v935_v30 = vadd.f32 %v739_v16, %v148_v37 }
  0xb9   :  { %v496_v17 = vpack.c.bf16 %v480_v29, %v480_v29  ;;  %v374_v47 = vadd.f32 %v639_v15, %v373_v43  ;;  %v432_v48 = vsub.f32 1.0, %v431_v44  ;;  %v439_v19 = vand.u32 2147483647, %v868_v59 }
  0xba   :  { %v441_v53 = vand.u32 2147483648, %v868_v59  ;;  %648 = vpow2.f32 %v590_v45  ;;  %v579_v55 = vmul.f32 -1.442695, %v928_v46  ;;  %vm436_vm1 = vweird.f32 %v641_v35 }
  0xbb   :  { %v643_v56 = vpop.eup %642  ;;  %513 = vst.msk [vmem:[%s1102_s3 + $0x14] sm:$0xf] %vm507_vm8, %v496_v17  ;;  %v378_v57 = vsel %vm377_vm0, %v639_v15, %v374_v47  ;;  %v433_v58 = vmul.f32 %v641_v35, %v432_v48  ;;  %v583_v20 = vmul.f32 -1.442695, %v935_v30  ;;  %vm435_vm2 = vweird.f32 %v868_v59 }
  0xbc   :  { %v645_v60 = vpop.eup %644  ;;  %v383_v61 = vsel %vm906_vm15, %v382_v3, %v378_v57  ;;  %v951_v62 = vadd.f32 1.0, %v643_v56  ;;  %650 = vpow2.f32 %v579_v55  ;;  %vm437_vm3 = vmor %vm435_vm2, %vm436_vm1  ;;  %v442_v5 = vor.u32 1.1754944e-38, %v441_v53 }
  0xbd   :  { %v484_v51 = vmul.f32 %v383_v61, %v772_v41  ;;  %v434_v63 = vadd.f32 %v641_v35, %v433_v58  ;;  %v954_v0 = vadd.f32 1.0, %v645_v60  ;;  %652 = vpow2.f32 %v583_v20 }
  0xbe   :  { %v647_v2 = vpop.eup %646  ;;  %654 = vrcp.f32 %v951_v62  ;;  %v958_v6 = vadd.f32 %v739_v16, %v158_v50  ;;  %vm440_vm4 = vcmp.eq.f32.partialorder %v439_v19, 8.507059e+37  ;;  %v274_v9 = vand.u32 2147483647, %v951_v62 }
  0xbf   :  { %v500_v7 = vpack.c.bf16 %v484_v51, %v484_v51  ;;  %v438_v59 = vsel %vm437_vm3, %v641_v35, %v434_v63  ;;  %656 = vrcp.f32 %v954_v0  ;;  %v963_v54 = vadd.f32 %v739_v16, %v168_v1 }
  0xc0   :  { %v649_v8 = vpop.eup %648  ;;  %v443_v41 = vsel %vm440_vm4, %v442_v5, %v438_v59  ;;  %v276_v13 = vand.u32 2147483648, %v951_v62  ;;  %v971_v14 = vadd.f32 1.0, %v647_v2  ;;  %v334_v18 = vand.u32 2147483647, %v954_v0 }
  0xc1   :  { %517 = vst.msk [vmem:[%s1102_s3 + $0x24] sm:$0xf] %vm507_vm8, %v500_v7  ;;  %v488_v12 = vmul.f32 %v443_v41, %v780_v49  ;;  %v973_v15 = vadd.f32 1.0, %v649_v8  ;;  %v336_v21 = vand.u32 2147483648, %v954_v0  ;;  %v587_v16 = vmul.f32 -1.442695, %v958_v6 }
  0xc2   :  { %v651_v25 = vpop.eup %650  ;;  %658 = vrcp.f32 %v971_v14  ;;  %vm270_vm5 = vweird.f32 %v951_v62  ;;  %v591_v49 = vmul.f32 -1.442695, %v963_v54  ;;  %vm987_vm6 = vcmp.eq.f32.partialorder %v274_v9, 8.507059e+37 }
  0xc3   :  { %v653_v26 = vpop.eup %652  ;;  %v504_v22 = vpack.c.bf16 %v488_v12, %v488_v12  ;;  %660 = vrcp.f32 %v973_v15  ;;  %v277_v28 = vor.u32 1.1754944e-38, %v276_v13  ;;  %vm330_vm7 = vweird.f32 %v954_v0 }
  0xc4   :  { %v655_v23 = vpop.eup %654  ;;  %vm993_vm9 = vcmp.eq.f32.partialorder %v334_v18, 8.507059e+37  ;;  %v337_v33 = vor.u32 1.1754944e-38, %v336_v21  ;;  %662 = vpow2.f32 %v587_v16  ;;  %v394_v11 = vand.u32 2147483647, %v971_v14 }
  0xc5   :  { %v657_v24 = vpop.eup %656  ;;  %521 = vst.msk [vmem:[%s1102_s3 + $0x34] sm:$0xf] %vm507_vm8, %v504_v22  ;;  %v266_v10 = vmul.f32 %v655_v23, %v951_v62  ;;  %v396_v35 = vand.u32 2147483648, %v971_v14  ;;  %v999_v36 = vadd.f32 1.0, %v651_v25  ;;  %vm271_vm10 = vweird.f32 %v655_v23 }
  0xc6   :  { %v326_v31 = vmul.f32 %v657_v24, %v954_v0  ;;  %v1001_v37 = vadd.f32 1.0, %v653_v26  ;;  %664 = vpow2.f32 %v591_v49  ;;  %v454_v43 = vand.u32 2147483647, %v973_v15  ;;  %vm272_vm15 = vmor %vm270_vm5, %vm271_vm10 }
  0xc7   :  { %v267_v34 = vsub.f32 1.0, %v266_v10  ;;  %v456_v44 = vand.u32 2147483648, %v973_v15  ;;  %666 = vrcp.f32 %v999_v36  ;;  %vm331_vm11 = vweird.f32 %v657_v24 }
  0xc8   :  { %v327_v38 = vsub.f32 1.0, %v326_v31  ;;  %v659_v40 = vpop.eup %658  ;;  %vm390_vm12 = vweird.f32 %v971_v14  ;;  %vm1008_vm13 = vcmp.eq.f32.partialorder %v394_v11, 8.507059e+37  ;;  %vm450_vm14 = vweird.f32 %v973_v15  ;;  %vm332_vm0 = vmor %vm330_vm7, %vm331_vm11 }
  0xc9   :  { %v268_v29 = vmul.f32 %v655_v23, %v267_v34  ;;  %v661_v3 = vpop.eup %660  ;;  %v386_v17 = vmul.f32 %v659_v40, %v971_v14  ;;  %v397_v57 = vor.u32 1.1754944e-38, %v396_v35  ;;  %668 = vrcp.f32 %v1001_v37 }
  0xca   :  { %v328_v45 = vmul.f32 %v657_v24, %v327_v38  ;;  %v446_v19 = vmul.f32 %v661_v3, %v973_v15  ;;  %v663_v53 = vpop.eup %662  ;;  %vm1020_vm1 = vcmp.eq.f32.partialorder %v454_v43, 8.507059e+37  ;;  %v457_v60 = vor.u32 1.1754944e-38, %v456_v44 }
  0xcb   :  { %v269_v47 = vadd.f32 %v655_v23, %v268_v29  ;;  %v387_v56 = vsub.f32 1.0, %v386_v17  ;;  %vm391_vm2 = vweird.f32 %v659_v40  ;;  %vm451_vm3 = vweird.f32 %v661_v3 }
  0xcc   :  { %v329_v55 = vadd.f32 %v657_v24, %v328_v45  ;;  %v447_v20 = vsub.f32 1.0, %v446_v19  ;;  %v665_v61 = vpop.eup %664  ;;  %v289_v41 = vand.u32 2147483647, %v999_v36  ;;  %vm392_vm4 = vmor %vm390_vm12, %vm391_vm2  ;;  %v291_v13 = vand.u32 2147483648, %v999_v36 }
  0xcd   :  { %v273_v58 = vsel %vm272_vm15, %v655_v23, %v269_v47  ;;  %v388_v63 = vmul.f32 %v659_v40, %v387_v56  ;;  %v667_v1 = vpop.eup %666  ;;  %vm452_vm5 = vmor %vm450_vm14, %vm451_vm3  ;;  %v1039_v16 = vadd.f32 1.0, %v665_v61  ;;  %vm285_vm7 = vweird.f32 %v999_v36 }
  0xce   :  { %v278_v62 = vsel %vm987_vm6, %v277_v28, %v273_v58  ;;  %v333_v51 = vsel %vm332_vm0, %v657_v24, %v329_v55  ;;  %v448_v5 = vmul.f32 %v661_v3, %v447_v20  ;;  %v281_v8 = vmul.f32 %v667_v1, %v999_v36 }
  0xcf   :  { %v477_v2 = vmul.f32 %v278_v62, %v785_v52  ;;  %v338_v0 = vsel %vm993_vm9, %v337_v33, %v333_v51  ;;  %v389_v59 = vadd.f32 %v659_v40, %v388_v63  ;;  %v1035_v52 = vadd.f32 1.0, %v663_v53  ;;  %v669_v25 = vpop.eup %668 }
  0xd0   :  { %v481_v7 = vmul.f32 %v338_v0, %v808_v4  ;;  %v449_v12 = vadd.f32 %v661_v3, %v448_v5  ;;  %v282_v4 = vsub.f32 1.0, %v281_v8  ;;  %vm286_vm6 = vweird.f32 %v667_v1 }
  0xd1   :  { %v493_v9 = vpack.c.bf16 %v477_v2, %v477_v2  ;;  %v393_v21 = vsel %vm392_vm4, %v659_v40, %v389_v59  ;;  %v341_v22 = vmul.f32 %v669_v25, %v1001_v37  ;;  %670 = vrcp.f32 %v1035_v52  ;;  %vm287_vm9 = vmor %vm285_vm7, %vm286_vm6 }
  0xd2   :  { %v497_v18 = vpack.c.bf16 %v481_v7, %v481_v7  ;;  %v398_v14 = vsel %vm1008_vm13, %v397_v57, %v393_v21  ;;  %v453_v26 = vsel %vm452_vm5, %v661_v3, %v449_v12  ;;  %v283_v49 = vmul.f32 %v667_v1, %v282_v4 }
  0xd3   :  { %510 = vst.msk [vmem:[%s1102_s3 + $0x8] sm:$0xf] %vm507_vm8, %v493_v9  ;;  %v485_v15 = vmul.f32 %v398_v14, %v848_v42  ;;  %v458_v23 = vsel %vm1020_vm1, %v457_v60, %v453_v26  ;;  %v292_v10 = vor.u32 1.1754944e-38, %v291_v13  ;;  %v342_v27 = vsub.f32 1.0, %v341_v22 }
  0xd4   :  { %514 = vst.msk [vmem:[%s1102_s3 + $0x18] sm:$0xf] %vm507_vm8, %v497_v18  ;;  %v489_v24 = vmul.f32 %v458_v23, %v922_v39  ;;  %v284_v31 = vadd.f32 %v667_v1, %v283_v49  ;;  %v351_v32 = vand.u32 2147483648, %v1001_v37  ;;  %672 = vrcp.f32 %v1039_v16 }
  0xd5   :  { %v501_v28 = vpack.c.bf16 %v485_v15, %v485_v15  ;;  %v343_v42 = vmul.f32 %v669_v25, %v342_v27  ;;  %vm346_vm10 = vweird.f32 %v669_v25  ;;  %v349_v34 = vand.u32 2147483647, %v1001_v37 }
  0xd6   :  { %v505_v33 = vpack.c.bf16 %v489_v24, %v489_v24  ;;  %v288_v39 = vsel %vm287_vm9, %v667_v1, %v284_v31  ;;  %vm290_vm11 = vcmp.eq.f32.partialorder %v289_v41, 8.507059e+37  ;;  %vm345_vm12 = vweird.f32 %v1001_v37 }
  0xd7   :  { %518 = vst.msk [vmem:[%s1102_s3 + $0x28] sm:$0xf] %vm507_vm8, %v501_v28  ;;  %v293_v11 = vsel %vm290_vm11, %v292_v10, %v288_v39  ;;  %v344_v35 = vadd.f32 %v669_v25, %v343_v42  ;;  %v671_v36 = vpop.eup %670  ;;  %vm347_vm13 = vmor %vm345_vm12, %vm346_vm10  ;;  %v352_v40 = vor.u32 1.1754944e-38, %v351_v32  ;;  %vm350_vm14 = vcmp.eq.f32.partialorder %v349_v34, 8.507059e+37 }
  0xd8   :  { %522 = vst.msk [vmem:[%s1102_s3 + $0x38] sm:$0xf] %vm507_vm8, %v505_v33  ;;  %v478_v38 = vmul.f32 %v293_v11, %v928_v46  ;;  %v401_v43 = vmul.f32 %v671_v36, %v1035_v52  ;;  %v409_v46 = vand.u32 2147483647, %v1035_v52  ;;  %v411_v37 = vand.u32 2147483648, %v1035_v52 }
  0xd9   :  { %v348_v29 = vsel %vm347_vm13, %v669_v25, %v344_v35  ;;  %vm406_vm15 = vweird.f32 %v671_v36  ;;  %vm405_vm0 = vweird.f32 %v1035_v52  ;;  %v469_v58 = vand.u32 2147483647, %v1039_v16 }
  0xda   :  { %v673_v44 = vpop.eup %672  ;;  %v494_v3 = vpack.c.bf16 %v478_v38, %v478_v38  ;;  %v353_v45 = vsel %vm350_vm14, %v352_v40, %v348_v29  ;;  %v402_v47 = vsub.f32 1.0, %v401_v43  ;;  %vm407_vm2 = vmor %vm405_vm0, %vm406_vm15  ;;  %v412_v20 = vor.u32 1.1754944e-38, %v411_v37 }
  0xdb   :  { %v482_v17 = vmul.f32 %v353_v45, %v935_v30  ;;  %v461_v48 = vmul.f32 %v673_v44, %v1039_v16  ;;  %v471_v30 = vand.u32 2147483648, %v1039_v16  ;;  %vm466_vm1 = vweird.f32 %v673_v44 }
  0xdc   :  { %511 = vst.msk [vmem:[%s1102_s3 + $0xc] sm:$0xf] %vm507_vm8, %v494_v3  ;;  %v403_v53 = vmul.f32 %v671_v36, %v402_v47  ;;  %vm410_vm3 = vcmp.eq.f32.partialorder %v409_v46, 8.507059e+37  ;;  %vm465_vm4 = vweird.f32 %v1039_v16  ;;  %vm470_vm6 = vcmp.eq.f32.partialorder %v469_v58, 8.507059e+37 }
  0xdd   :  { %v498_v19 = vpack.c.bf16 %v482_v17, %v482_v17  ;;  %v462_v55 = vsub.f32 1.0, %v461_v48  ;;  %vm467_vm5 = vmor %vm465_vm4, %vm466_vm1  ;;  %v472_v62 = vor.u32 1.1754944e-38, %v471_v30 }
  0xde   :  { %v404_v56 = vadd.f32 %v671_v36, %v403_v53 }
  0xdf   :  { %515 = vst.msk [vmem:[%s1102_s3 + $0x1c] sm:$0xf] %vm507_vm8, %v498_v19  ;;  %v463_v57 = vmul.f32 %v673_v44, %v462_v55 }
  0xe0   :  { %v408_v50 = vsel %vm407_vm2, %v671_v36, %v404_v56 }
  0xe1   :  { %v464_v60 = vadd.f32 %v673_v44, %v463_v57  ;;  %v413_v61 = vsel %vm410_vm3, %v412_v20, %v408_v50 }
  0xe2   :  { %v486_v51 = vmul.f32 %v413_v61, %v958_v6 }
  0xe3   :  { %v468_v63 = vsel %vm467_vm5, %v673_v44, %v464_v60 }
  0xe4   :  { %v473_v1 = vsel %vm470_vm6, %v472_v62, %v468_v63  ;;  %v502_v2 = vpack.c.bf16 %v486_v51, %v486_v51 }
  0xe5   :  { %v490_v0 = vmul.f32 %v473_v1, %v963_v54 }
  0xe6   :  { %519 = vst.msk [vmem:[%s1102_s3 + $0x2c] sm:$0xf] %vm507_vm8, %v502_v2 }
  0xe7   :  { %v506_v5 = vpack.c.bf16 %v490_v0, %v490_v0 }
  0xe9   :  { %523 = vst.msk [vmem:[%s1102_s3 + $0x3c] sm:$0xf] %vm507_vm8, %v506_v5 }

// kernel: _lambda_.7
= control target key start
LH: loop header
LB: loop body
LE: loop exit
PB: predicated region body
PF: predicated region fallthrough
CT: control target
= control target key end

     0   :  { %s2001_s27 = smov 0   ;;  %s2771_s0 = inlined_call_operand.vmem [shape: bf16[2,64,32], index: 0, kind: input, shape index: {}]   ;;  %s2772_s1 = inlined_call_operand.vmem [shape: bf16[32,32], index: 1, kind: input, shape index: {}]   ;;  %s2773_s2 = inlined_call_operand.vmem [shape: f32[1,32], index: 2, kind: input, shape index: {}]   ;;  %s2774_s3 = inlined_call_operand.vmem [shape: f32[9,1,32], index: 3, kind: input, shape index: {}]   ;;  %s2775_s4 = inlined_call_operand.vmem [shape: f32[1,32], index: 4, kind: input, shape index: {}]   ;;  %s2776_s5 = inlined_call_operand.vmem [shape: bf16[32,16], index: 5, kind: input, shape index: {}]   ;;  %s2777_s6 = inlined_call_operand.vmem [shape: f32[1,16], index: 6, kind: input, shape index: {}]   ;;  %s2778_s7 = inlined_call_operand.vmem [shape: f32[1,16], index: 7, kind: input, shape index: {}]   ;;  %s2779_s8 = inlined_call_operand.<no memory space> [shape: f32[1,1], index: 8, kind: input, shape index: {}]   ;;  %s2780_s9 = inlined_call_operand.vmem [shape: f32[1,16], index: 9, kind: input, shape index: {}]   ;;  %s2781_s10 = inlined_call_operand.vmem [shape: f32[1,16], index: 10, kind: input, shape index: {}]   ;;  %s2782_s11 = inlined_call_operand.vmem [shape: bf16[32,16], index: 11, kind: input, shape index: {}]   ;;  %s2783_s12 = inlined_call_operand.vmem [shape: f32[1,16], index: 12, kind: input, shape index: {}]   ;;  %s2784_s13 = inlined_call_operand.vmem [shape: bf16[2,64,16], index: 13, kind: output, shape index: {}]  }
   0x1   :  { %v18_v0 = vstv %s2779_s8 }
   0x2   :  { %19 = vst [vmem:[#allocation3] sm:$0x1] %v18_v0 }
   0x3 LB: > { %s1707_s28 = sadd.s32 4294967295, %s1923_s27   ;;  %p1711_p0 = scmp.ge.s32.totalorder %s1923_s27, 1  ;;  %s1923_s27 = sphi %s2001_s27, %s25_s27  }
   0x4   : > { %p389_p1 = scmp.lt.s32.totalorder %s1923_s27, 3 }
   0x6   : > { %p390_p2 = pnand %p1711_p0, %p389_p1 }
   0x7   : > { %p433_p3 = scmp.lt.s32.totalorder (!%p390_p2), %s1707_s28, 1 }
   0x8   : > { %393 = sbr.rel (%p390_p2) target bundleno = 783 (0x30f), region = 72 }
   0xd   : > { %v1803_v1 = vld [vmem:[%s2772_s1 + $0x8] sm:$0xff]  ;;  %v1802_v2 = vld [vmem:[%s2772_s1] sm:$0xff]  ;;  %s2806_s28 = smov (!%p433_p3, %s1707_s28), 1  ;;  %vm492_vm0 = vcmask 261120   ;;  %v1925_v8 = vmov 0.0   ;;  %v714_v11 = vlaneseq }
   0xe   : > { %511 = vmatpush.bf16.msra.mxu0 %v1803_v1  ;;  %1808 = vmatpush.bf16.msra.mxu3 %v1803_v1  ;;  %s1796_s15 = sshll.u32 %s2806_s28, 5  ;;  %v2036_v7 = vld [vmem:[%s2773_s2] ss:$0 sm:$0xff]  ;;  %696 = vst.msk [vmem:[#allocation2 + $0x10] sm:$0xff] %vm492_vm0, %v1925_v8  ;;  %v2083_v33 = vld [vmem:[%s2774_s3 + $0x1] ss:$0 sm:$0xff] }
   0xf   : > { %s2023_s18 = scalar_lea.vmem %s2771_s0, %s1796_s15  ;;  %694 = vst.msk [vmem:[#allocation2] sm:$0xff] %vm492_vm0, %v1925_v8  ;;  %v2049_v13 = vshrl.u32 %v714_v11, 7  ;;  %v2078_v32 = vld [vmem:[%s2774_s3] ss:$0 sm:$0xff]  ;;  %s442_s17 = scalar_lea.vmem %s2784_s13, %s1796_s15 }
  0x10   : > { %v1798_v3 = vld [vmem:[%s2023_s18] sm:$0xff]  ;;  %v1799_v4 = vld [vmem:[%s2023_s18 + $0x8] sm:$0xff]  ;;  %v1800_v5 = vld [vmem:[%s2023_s18 + $0x10] sm:$0xff]  ;;  %695 = vst.msk [vmem:[#allocation2 + $0x8] sm:$0xff] %vm492_vm0, %v1925_v8 }
  0x11   : > { %v1801_v6 = vld [vmem:[%s2023_s18 + $0x18] sm:$0xff]  ;;  %697 = vst.msk [vmem:[#allocation2 + $0x18] sm:$0xff] %vm492_vm0, %v1925_v8  ;;  %v727_v19 = vand.u32 7, %v2049_v13  ;;  %v716_v30 = vadd.s32 8, %v2049_v13 }
  0x12   : > { %512 = vmatpush.bf16.msra.mxu0 %v1802_v2  ;;  %1809 = vmatpush.bf16.msra.mxu3 %v1802_v2  ;;  %698 = vst.msk [vmem:[#allocation2 + $0x20] sm:$0xff] %vm492_vm0, %v1925_v8 }
  0x13   : > { %699 = vst.msk [vmem:[#allocation2 + $0x28] sm:$0xff] %vm492_vm0, %v1925_v8  ;;  %v2065_v23 = vadd.s32 4294967295, %v727_v19  ;;  %v734_v40 = vand.u32 7, %v716_v30  ;;  %v2104_v56 = vadd.s32 1, %v727_v19 }
  0x14   : > { %700 = vst.msk [vmem:[#allocation2 + $0x30] sm:$0xff] %vm492_vm0, %v1925_v8 }
  0x15   : > { %1740 = vmatmul.msk.bf16.vlgmr.msra.gmra.mxu0 %vm492_vm0, %v1798_v3  ;;  %1741 = vmatmul.msk.bf16.vlgmr.msra.gmra.mxu3 %vm492_vm0, %v1799_v4  ;;  %701 = vst.msk [vmem:[#allocation2 + $0x38] sm:$0xff] %vm492_vm0, %v1925_v8  ;;  %vm835_vm1 = vcmp.ge.s32.totalorder %v2065_v23, 0  ;;  %v2099_v52 = vadd.s32 4294967295, %v734_v40  ;;  %v2111_v2 = vadd.s32 1, %v734_v40  ;;  %v2114_v3 = vadd.s32 16, %v2049_v13 }
  0x16   : > { %702 = vst.msk [vmem:[#allocation2 + $0x40] sm:$0xff] %vm492_vm0, %v1925_v8  ;;  %vm1004_vm8 = vcmp.lt.s32.totalorder %v2104_v56, 8 }
  0x17   : > { %703 = vst.msk [vmem:[#allocation2 + $0x48] sm:$0xff] %vm492_vm0, %v1925_v8  ;;  %v819_v28 = vld [vmem:[#allocation2 + $0x7] sm:$0xff]  ;;  %vm836_vm6 = vcmp.ge.s32.totalorder %v2099_v52, 0 }
  0x18   : > { %704 = vst.msk [vmem:[#allocation2 + $0x50] sm:$0xff] %vm492_vm0, %v1925_v8  ;;  %v875_v35 = vsel %vm835_vm1, %v819_v28, 0.0  ;;  %v903_v36 = vld [vmem:[#allocation2 + $0x8] sm:$0xff] }
  0x19   : > { %705 = vst.msk [vmem:[#allocation2 + $0x58] sm:$0xff] %vm492_vm0, %v1925_v8  ;;  %v887_v42 = vmul.f32 %v2078_v32, %v875_v35  ;;  %v964_v43 = vmul.f32 %v2083_v33, %v903_v36 }
  0x1b   : > { %v2102_v55 = vadd.f32 %v964_v43, %v887_v42 }
  0x25   : > { %1742 = vmatmul.msk.bf16.gmra.mxu3 %vm492_vm0, %v1800_v5 }
  0x35   : > { %1743 = vmatmul.msk.bf16.gmra.mxu3 %vm492_vm0, %v1801_v6 }
  0x92   : > { %v514_v9 = vpop.f32.mrf.mxu0 }
  0x93   : > { %v2041_v10 = vadd.f32 %v2036_v7, %v514_v9 }
  0x95   : > { %v1744_v12 = vmul.f32 -1.442695, %v2041_v10 }
  0x97   : > { %1839 = vpow2.f32 %v1744_v12 }
  0x98   : > { %v519_v14 = vpop.f32.mrf.mxu3 }
  0x99   : > { %v2054_v15 = vadd.f32 %v2036_v7, %v519_v14 }
  0x9a   : > { %v516_v16 = vpop.f32.mrf.mxu0 }
  0x9b   : > { %v1746_v17 = vmul.f32 -1.442695, %v2054_v15  ;;  %v2060_v18 = vadd.f32 %v2036_v7, %v516_v16 }
  0x9d   : > { %v1840_v20 = vpop.eup %1839  ;;  %1841 = vpow2.f32 %v1746_v17  ;;  %v1745_v21 = vmul.f32 -1.442695, %v2060_v18 }
  0x9e   : > { %v558_v22 = vadd.f32 1.0, %v1840_v20  ;;  %v2132_v20 = vadd.s32 24, %v2049_v13 }
  0x9f   : > { %1843 = vpow2.f32 %v1745_v21 }
  0xa0   : > { %1845 = vrcp.f32 %v558_v22  ;;  %v521_v24 = vpop.f32.mrf.mxu3  ;;  %v577_v44 = vand.u32 2147483648, %v558_v22  ;;  %vm571_vm2 = vweird.f32 %v558_v22  ;;  %v575_v48 = vand.u32 2147483647, %v558_v22 }
  0xa1   : > { %v2068_v25 = vadd.f32 %v2036_v7, %v521_v24  ;;  %v748_v40 = vand.u32 7, %v2132_v20 }
  0xa2   : > { %v578_v57 = vor.u32 1.1754944e-38, %v577_v44  ;;  %vm576_vm5 = vcmp.eq.f32.partialorder %v575_v48, 8.507059e+37 }
  0xa3   : > { %v1842_v26 = vpop.eup %1841  ;;  %v1747_v27 = vmul.f32 -1.442695, %v2068_v25  ;;  %v2214_v20 = vadd.s32 1, %v748_v40 }
  0xa4   : > { %v2072_v29 = vadd.f32 1.0, %v1842_v26  ;;  %v741_v26 = vand.u32 7, %v2114_v3 }
  0xa5   : > { %v1844_v31 = vpop.eup %1843  ;;  %1847 = vpow2.f32 %v1747_v27 }
  0xa6   : > { %v1846_v34 = vpop.eup %1845  ;;  %1849 = vrcp.f32 %v2072_v29  ;;  %v2088_v38 = vadd.f32 1.0, %v1844_v31  ;;  %v605_v58 = vand.u32 2147483647, %v2072_v29  ;;  %v607_v59 = vand.u32 2147483648, %v2072_v29 }
  0xa7   : > { %v567_v37 = vmul.f32 %v1846_v34, %v558_v22  ;;  %vm572_vm3 = vweird.f32 %v1846_v34  ;;  %vm601_vm9 = vweird.f32 %v2072_v29  ;;  %v2162_v48 = vadd.s32 4294967295, %v741_v26 }
  0xa8   : > { %v524_v39 = vpop.f32.mrf.mxu3  ;;  %1851 = vrcp.f32 %v2088_v38  ;;  %vm573_vm4 = vmor %vm571_vm2, %vm572_vm3  ;;  %vm2122_vm10 = vcmp.eq.f32.partialorder %v605_v58, 8.507059e+37  ;;  %v608_v9 = vor.u32 1.1754944e-38, %v607_v59  ;;  %vm586_vm11 = vweird.f32 %v2088_v38 }
  0xa9   : > { %v568_v41 = vsub.f32 1.0, %v567_v37  ;;  %v2094_v45 = vadd.f32 %v2036_v7, %v524_v39  ;;  %v590_v19 = vand.u32 2147483647, %v2088_v38 }
  0xab   : > { %v1848_v46 = vpop.eup %1847  ;;  %v569_v47 = vmul.f32 %v1846_v34, %v568_v41  ;;  %v1748_v51 = vmul.f32 -1.442695, %v2094_v45  ;;  %vm591_vm15 = vcmp.eq.f32.partialorder %v590_v19, 8.507059e+37  ;;  %v2212_v19 = vadd.s32 1, %v741_v26 }
  0xac   : > { %v1850_v49 = vpop.eup %1849  ;;  %v2096_v50 = vadd.f32 1.0, %v1848_v46 }
  0xad   : > { %v570_v53 = vadd.f32 %v1846_v34, %v569_v47  ;;  %v597_v54 = vmul.f32 %v1850_v49, %v2072_v29  ;;  %vm602_vm7 = vweird.f32 %v1850_v49 }
  0xae   : > { %1853 = vrcp.f32 %v2096_v50  ;;  %v1852_v60 = vpop.eup %1851  ;;  %vm603_vm12 = vmor %vm601_vm9, %vm602_vm7  ;;  %v620_v29 = vand.u32 2147483647, %v2096_v50  ;;  %v622_v36 = vand.u32 2147483648, %v2096_v50  ;;  %vm616_vm3 = vweird.f32 %v2096_v50 }
  0xaf   : > { %v574_v61 = vsel %vm573_vm4, %v1846_v34, %v570_v53  ;;  %v598_v62 = vsub.f32 1.0, %v597_v54  ;;  %1855 = vpow2.f32 %v1748_v51  ;;  %v582_v0 = vmul.f32 %v1852_v60, %v2088_v38 }
  0xb0   : > { %v579_v63 = vsel %vm576_vm5, %v578_v57, %v574_v61  ;;  %v526_v1 = vpop.f32.mrf.mxu3  ;;  %vm587_vm13 = vweird.f32 %v1852_v60  ;;  %vm2158_vm4 = vcmp.eq.f32.partialorder %v620_v29, 8.507059e+37  ;;  %v623_v53 = vor.u32 1.1754944e-38, %v622_v36  ;;  %v1804_v36 = vld [vmem:[%s2776_s5] sm:$0xff] }
  0xb1   : > { %v686_v4 = vmul.f32 %v579_v63, %v2041_v10  ;;  %v599_v5 = vmul.f32 %v1850_v49, %v598_v62  ;;  %v2118_v6 = vadd.f32 %v2036_v7, %v526_v1  ;;  %v583_v11 = vsub.f32 1.0, %v582_v0  ;;  %vm588_vm14 = vmor %vm586_vm11, %vm587_vm13 }
  0xb2   : > { %v592_v10 = vand.u32 2147483648, %v2088_v38  ;;  %v2154_v38 = vld [vmem:[%s2774_s3 + $0x2] ss:$0 sm:$0xff]  ;;  %vm1005_vm7 = vcmp.lt.s32.totalorder %v2111_v2, 8  ;;  %v2228_v29 = vadd.s32 32, %v2049_v13 }
  0xb3   : > { %706 = vst.msk [vmem:[#allocation2 + $0x10] sm:$0xff] %vm492_vm0, %v686_v4  ;;  %v600_v12 = vadd.f32 %v1850_v49, %v599_v5  ;;  %v1749_v14 = vmul.f32 -1.442695, %v2118_v6  ;;  %v584_v17 = vmul.f32 %v1852_v60, %v583_v11  ;;  %v2189_v5 = vld [vmem:[%s2774_s3 + $0x3] ss:$0 sm:$0xff] }
  0xb4   : > { %v1854_v16 = vpop.eup %1853  ;;  %v593_v34 = vor.u32 1.1754944e-38, %v592_v10  ;;  %v2200_v10 = vld [vmem:[%s2774_s3 + $0x4] ss:$0 sm:$0xff] }
  0xb5   : > { %v1856_v21 = vpop.eup %1855  ;;  %v604_v22 = vsel %vm603_vm12, %v1850_v49, %v600_v12  ;;  %v612_v24 = vmul.f32 %v1854_v16, %v2096_v50  ;;  %1857 = vpow2.f32 %v1749_v14  ;;  %v585_v28 = vadd.f32 %v1852_v60, %v584_v17  ;;  %v2210_v17 = vld [vmem:[%s2774_s3 + $0x7] ss:$0 sm:$0xff] }
  0xb6   : > { %v609_v27 = vsel %vm2122_vm10, %v608_v9, %v604_v22  ;;  %v2139_v30 = vadd.f32 1.0, %v1856_v21  ;;  %vm617_vm2 = vweird.f32 %v1854_v16 }
  0xb7   : > { %v688_v31 = vmul.f32 %v609_v27, %v2054_v15  ;;  %v613_v35 = vsub.f32 1.0, %v612_v24  ;;  %v589_v37 = vsel %vm588_vm14, %v1852_v60, %v585_v28  ;;  %vm618_vm5 = vmor %vm616_vm3, %vm617_vm2  ;;  %v2175_v60 = vadd.s32 4294967295, %v748_v40 }
  0xb8   : > { %1859 = vrcp.f32 %v2139_v30  ;;  %v529_v39 = vpop.f32.mrf.mxu3  ;;  %v594_v41 = vsel %vm591_vm15, %v593_v34, %v589_v37  ;;  %v637_v62 = vand.u32 2147483648, %v2139_v30  ;;  %vm631_vm10 = vweird.f32 %v2139_v30 }
  0xb9   : > { %708 = vst.msk [vmem:[#allocation2 + $0x20] sm:$0xff] %vm492_vm0, %v688_v31  ;;  %v614_v42 = vmul.f32 %v1854_v16, %v613_v35  ;;  %v2149_v15 = vadd.f32 %v2036_v7, %v529_v39  ;;  %v687_v43 = vmul.f32 %v594_v41, %v2060_v18  ;;  %v635_v18 = vand.u32 2147483647, %v2139_v30 }
  0xba   : > { %v820_v46 = vld [vmem:[#allocation2 + $0xf] sm:$0xff]  ;;  %v638_v26 = vor.u32 1.1754944e-38, %v637_v62  ;;  %vm837_vm15 = vcmp.ge.s32.totalorder %v2162_v48, 0  ;;  %vm838_vm2 = vcmp.ge.s32.totalorder %v2175_v60, 0 }
  0xbb   : > { %v980_v47 = vld [vmem:[#allocation2 + $0x9] sm:$0xff]  ;;  %v1858_v49 = vpop.eup %1857  ;;  %v615_v51 = vadd.f32 %v1854_v16, %v614_v42  ;;  %v1750_v54 = vmul.f32 -1.442695, %v2149_v15  ;;  %v876_v57 = vsel %vm836_vm6, %v820_v46, 0.0  ;;  %707 = vst.msk [vmem:[#allocation2 + $0x18] sm:$0xff] %vm492_vm0, %v687_v43  ;;  %v1066_v12 = vsel %vm835_vm1, %v820_v46, 0.0 }
  0xbc   : > { %v904_v58 = vld [vmem:[#allocation2 + $0x10] sm:$0xff]  ;;  %v2170_v50 = vadd.f32 1.0, %v1858_v49  ;;  %v1036_v59 = vsel %vm1004_vm8, %v980_v47, 0.0  ;;  %v888_v3 = vmul.f32 %v2078_v32, %v876_v57  ;;  %vm2202_vm9 = vcmp.eq.f32.partialorder %v635_v18, 8.507059e+37  ;;  %v2272_v18 = vld [vmem:[%s2774_s3 + $0x5] ss:$0 sm:$0xff] }
  0xbd   : > { %v619_v61 = vsel %vm618_vm5, %v1854_v16, %v615_v51  ;;  %1861 = vpow2.f32 %v1750_v54  ;;  %v1049_v63 = vmul.f32 %v2154_v38, %v1036_v59  ;;  %v965_v4 = vmul.f32 %v2083_v33, %v904_v58 }
  0xbe   : > { %v2179_v0 = vpop.eup %1859  ;;  %v624_v1 = vsel %vm2158_vm4, %v623_v53, %v619_v61  ;;  %1863 = vrcp.f32 %v2170_v50  ;;  %v652_v11 = vand.u32 2147483648, %v2170_v50  ;;  %v650_v22 = vand.u32 2147483647, %v2170_v50 }
  0xbf   : > { %v689_v8 = vmul.f32 %v624_v1, %v2068_v25  ;;  %v627_v9 = vmul.f32 %v2179_v0, %v2139_v30  ;;  %v1057_v25 = vadd.f32 %v1049_v63, %v2102_v55  ;;  %v1805_v55 = vld [vmem:[%s2776_s5 + $0x8] sm:$0xff]  ;;  %vm632_vm11 = vweird.f32 %v2179_v0 }
  0xc0   : > { %v531_v16 = vpop.f32.mrf.mxu3  ;;  %v906_v27 = vld [vmem:[#allocation2 + $0x20] sm:$0xff]  ;;  %v1079_v28 = vmul.f32 %v2189_v5, %v1066_v12  ;;  %vm646_vm12 = vweird.f32 %v2170_v50  ;;  %1459 = vmatpush.bf16.msrb.mxu0 %v1805_v55  ;;  %v973_v40 = vadd.f32 %v965_v4, %v888_v3  ;;  %1810 = vmatpush.bf16.msra.mxu1 %v1805_v55  ;;  %v1109_v47 = vmul.f32 %v2200_v10, %v904_v58  ;;  %vm633_vm14 = vmor %vm631_vm10, %vm632_vm11 }
  0xc1   : > { %709 = vst.msk [vmem:[#allocation2 + $0x28] sm:$0xff] %vm492_vm0, %v689_v8  ;;  %v628_v21 = vsub.f32 1.0, %v627_v9  ;;  %v2220_v24 = vadd.f32 %v2036_v7, %v531_v16  ;;  %v2232_v7 = vor.u32 1.1754944e-38, %v652_v11  ;;  %v2245_v43 = vmul.f32 %v2083_v33, %v906_v27 }
  0xc2   : > { %v2238_v37 = vld [vmem:[#allocation2 + $0x17] sm:$0xff]  ;;  %v1087_v46 = vadd.f32 %v1079_v28, %v1057_v25  ;;  %vm2250_vm13 = vcmp.eq.f32.partialorder %v650_v22, 8.507059e+37  ;;  %v2255_v54 = vmul.f32 %v2210_v17, %v906_v27  ;;  %v2275_v59 = vmul.f32 %v2200_v10, %v906_v27  ;;  %v2292_v12 = vld [vmem:[#allocation2 + $0x1f] sm:$0xff] }
  0xc3   : > { %v1862_v31 = vpop.eup %1861  ;;  %v629_v34 = vmul.f32 %v2179_v0, %v628_v21  ;;  %v1751_v35 = vmul.f32 -1.442695, %v2220_v24  ;;  %v2240_v39 = vld [vmem:[#allocation2 + $0x18] sm:$0xff]  ;;  %v1067_v58 = vsel %vm836_vm6, %v2238_v37, 0.0  ;;  %vm1006_vm4 = vcmp.lt.s32.totalorder %v2212_v19, 8 }
  0xc4   : > { %v1864_v41 = vpop.eup %1863  ;;  %v2242_v42 = vadd.f32 1.0, %v1862_v31  ;;  %v981_v44 = vld [vmem:[#allocation2 + $0x11] sm:$0xff]  ;;  %v2264_v57 = vmul.f32 %v2083_v33, %v2240_v39  ;;  %1460 = vmatpush.bf16.msrb.mxu0 %v1804_v36  ;;  %v1110_v63 = vmul.f32 %v2200_v10, %v2240_v39  ;;  %1811 = vmatpush.bf16.msra.mxu1 %v1804_v36  ;;  %v1080_v25 = vmul.f32 %v2189_v5, %v1067_v58 }
  0xc5   : > { %v630_v49 = vadd.f32 %v2179_v0, %v629_v34  ;;  %v642_v51 = vmul.f32 %v1864_v41, %v2170_v50  ;;  %1865 = vpow2.f32 %v1751_v35  ;;  %v1037_v62 = vsel %vm1005_vm7, %v981_v44, 0.0 }
  0xc6   : > { %1867 = vrcp.f32 %v2242_v42  ;;  %vm647_vm3 = vweird.f32 %v1864_v41  ;;  %v665_v3 = vand.u32 2147483647, %v2242_v42  ;;  %v1050_v4 = vmul.f32 %v2154_v38, %v1037_v62 }
  0xc7   : > { %v634_v30 = vsel %vm633_vm14, %v2179_v0, %v630_v49  ;;  %v643_v61 = vsub.f32 1.0, %v642_v51  ;;  %v2287_v0 = vld [vmem:[#allocation2 + $0x19] sm:$0xff]  ;;  %v667_v11 = vand.u32 2147483648, %v2242_v42  ;;  %v1126_v16 = vsel %vm1004_vm8, %v981_v44, 0.0 }
  0xc8   : > { %v639_v1 = vsel %vm2202_vm9, %v638_v26, %v634_v30  ;;  %v1058_v14 = vadd.f32 %v1050_v4, %v973_v40  ;;  %v1117_v21 = vadd.f32 %v1109_v47, %v1087_v46  ;;  %v1139_v22 = vmul.f32 %v2272_v18, %v1126_v16  ;;  %vm648_vm9 = vmor %vm646_vm12, %vm647_vm3  ;;  %v2330_v49 = vld [vmem:[#allocation2 + $0x21] sm:$0xff] }
  0xc9   : > { %v690_v8 = vmul.f32 %v639_v1, %v2094_v45  ;;  %v644_v9 = vmul.f32 %v1864_v41, %v643_v61  ;;  %v2302_v45 = vld [vmem:[%s2774_s3 + $0x6] ss:$0 sm:$0xff]  ;;  %vm661_vm5 = vweird.f32 %v2242_v42  ;;  %v1127_v26 = vsel %vm1005_vm7, %v2287_v0, 0.0 }
  0xca   : > { %v1156_v28 = vsel %vm835_vm1, %v2238_v37, 0.0  ;;  %v1088_v35 = vadd.f32 %v1080_v25, %v1058_v14  ;;  %v1147_v36 = vadd.f32 %v1139_v22, %v1117_v21  ;;  %v1157_v40 = vsel %vm836_vm6, %v2292_v12, 0.0 }
  0xcb   : > { %v1866_v55 = vpop.eup %1865  ;;  %710 = vst.msk [vmem:[#allocation2 + $0x30] sm:$0xff] %vm492_vm0, %v690_v8  ;;  %v645_v27 = vadd.f32 %v1864_v41, %v644_v9  ;;  %vm1007_vm10 = vcmp.lt.s32.totalorder %v2214_v20, 8  ;;  %vm2322_vm11 = vcmp.eq.f32.partialorder %v665_v3, 8.507059e+37  ;;  %v668_v47 = vor.u32 1.1754944e-38, %v667_v11 }
  0xcc   : > { %v1868_v31 = vpop.eup %1867  ;;  %v2315_v34 = vadd.f32 1.0, %v1866_v55  ;;  %v1140_v52 = vmul.f32 %v2272_v18, %v1127_v26  ;;  %v1169_v51 = vmul.f32 %v2302_v45, %v1156_v28  ;;  %v1118_v61 = vadd.f32 %v1110_v63, %v1088_v35 }
  0xcd   : > { %v649_v44 = vsel %vm648_vm9, %v1864_v41, %v645_v27  ;;  %v657_v46 = vmul.f32 %v1868_v31, %v2242_v42  ;;  %v2337_v41 = vld [vmem:[%s2774_s3 + $0x8] ss:$0 sm:$0xff]  ;;  %v1170_v53 = vmul.f32 %v2302_v45, %v1157_v40  ;;  %vm662_vm1 = vweird.f32 %v1868_v31 }
  0xce   : > { %v654_v50 = vsel %vm2250_vm13, %v2232_v7, %v649_v44  ;;  %1869 = vrcp.f32 %v2315_v34  ;;  %v1177_v7 = vadd.f32 %v1169_v51, %v1147_v36  ;;  %v1199_v62 = vmul.f32 %v2210_v17, %v2240_v39  ;;  %v2355_v39 = vld [vmem:[%s2775_s4] ss:$0 sm:$0xff]  ;;  %v2385_v44 = vld [vmem:[#allocation2 + $0x27] sm:$0xff] }
  0xcf   : > { %v691_v58 = vmul.f32 %v654_v50, %v2118_v6  ;;  %v658_v30 = vsub.f32 1.0, %v657_v46  ;;  %v1216_v1 = vsel %vm1004_vm8, %v2287_v0, 0.0  ;;  %v680_v4 = vand.u32 2147483647, %v2315_v34  ;;  %vm663_vm8 = vmor %vm661_vm5, %vm662_vm1 }
  0xd0   : > { %v1148_v8 = vadd.f32 %v1140_v52, %v1118_v61  ;;  %v1217_v6 = vsel %vm1005_vm7, %v2330_v49, 0.0  ;;  %v1207_v63 = vadd.f32 %v1199_v62, %v1177_v7  ;;  %v1229_v9 = vmul.f32 %v2337_v41, %v1216_v1 }
  0xd1   : > { %711 = vst.msk [vmem:[#allocation2 + $0x38] sm:$0xff] %vm492_vm0, %v691_v58  ;;  %v659_v3 = vmul.f32 %v1868_v31, %v658_v30  ;;  %v877_v56 = vsel %vm837_vm15, %v2238_v37, 0.0  ;;  %v878_v11 = vsel %vm838_vm2, %v2292_v12, 0.0  ;;  %vm676_vm6 = vweird.f32 %v2315_v34 }
  0xd2   : > { %v1178_v2 = vadd.f32 %v1170_v53, %v1148_v8  ;;  %v889_v14 = vmul.f32 %v2078_v32, %v877_v56  ;;  %v890_v25 = vmul.f32 %v2078_v32, %v878_v11  ;;  %v682_v22 = vand.u32 2147483648, %v2315_v34  ;;  %v2405_v30 = vld [vmem:[#allocation2 + $0x29] sm:$0xff] }
  0xd3   : > { %v660_v16 = vadd.f32 %v1868_v31, %v659_v3  ;;  %v1230_v37 = vmul.f32 %v2337_v41, %v1217_v6  ;;  %v1237_v55 = vadd.f32 %v1229_v9, %v1207_v63  ;;  %v1038_v27 = vsel %vm1006_vm4, %v2287_v0, 0.0  ;;  %v2418_v6 = vld [vmem:[#allocation2 + $0x2f] sm:$0xff] }
  0xd4   : > { %v1870_v21 = vpop.eup %1869  ;;  %vm2375_vm12 = vcmp.eq.f32.partialorder %v680_v4, 8.507059e+37  ;;  %v1208_v42 = vadd.f32 %v2255_v54, %v1178_v2  ;;  %v974_v0 = vadd.f32 %v2264_v57, %v889_v14  ;;  %v1039_v54 = vsel %vm1007_vm10, %v2330_v49, 0.0 }
  0xd5   : > { %v664_v26 = vsel %vm663_vm8, %v1868_v31, %v660_v16  ;;  %v672_v28 = vmul.f32 %v1870_v21, %v2315_v34  ;;  %vm677_vm7 = vweird.f32 %v1870_v21  ;;  %v2383_v40 = vadd.f32 %v2355_v39, %v1237_v55 }
  0xd6   : > { %v669_v36 = vsel %vm2322_vm11, %v668_v47, %v664_v26  ;;  %v975_v31 = vadd.f32 %v2245_v43, %v890_v25  ;;  %v1238_v52 = vadd.f32 %v1230_v37, %v1208_v42  ;;  %v2394_v47 = vld [vmem:[#allocation2 + $0x28] sm:$0xff]  ;;  %v1051_v51 = vmul.f32 %v2154_v38, %v1038_v27  ;;  %vm678_vm13 = vmor %vm676_vm6, %vm677_vm7 }
  0xd7   : > { %v692_v46 = vmul.f32 %v669_v36, %v2149_v15  ;;  %v673_v50 = vsub.f32 1.0, %v672_v28  ;;  %v1760_v23 = vmul.f32 -1.442695, %v2383_v40  ;;  %v1052_v58 = vmul.f32 %v2154_v38, %v1039_v54  ;;  %v908_v28 = vld [vmem:[#allocation2 + $0x30] sm:$0xff] }
  0xd8   : > { %v1068_v43 = vsel %vm837_vm15, %v2292_v12, 0.0  ;;  %v2403_v57 = vadd.f32 %v2355_v39, %v1238_v52  ;;  %v1069_v61 = vsel %vm838_vm2, %v2385_v44, 0.0  ;;  %v1059_v7 = vadd.f32 %v1051_v51, %v974_v0  ;;  %v2430_v25 = vld [vmem:[#allocation2 + $0x31] sm:$0xff] }
  0xd9   : > { %712 = vst.msk [vmem:[#allocation2 + $0x40] sm:$0xff] %vm492_vm0, %v692_v46  ;;  %v674_v15 = vmul.f32 %v1870_v21, %v673_v50  ;;  %v1081_v53 = vmul.f32 %v2189_v5, %v1068_v43  ;;  %1871 = vpow2.f32 %v1760_v23  ;;  %v1060_v62 = vadd.f32 %v1052_v58, %v975_v31 }
  0xda   : > { %v1082_v1 = vmul.f32 %v2189_v5, %v1069_v61  ;;  %v683_v3 = vor.u32 1.1754944e-38, %v682_v22  ;;  %v1761_v4 = vmul.f32 -1.442695, %v2403_v57  ;;  %v1112_v8 = vmul.f32 %v2200_v10, %v2394_v47 }
  0xdb   : > { %v675_v12 = vadd.f32 %v1870_v21, %v674_v15  ;;  %v1089_v63 = vadd.f32 %v1081_v53, %v1059_v7  ;;  %v1128_v56 = vsel %vm1006_vm4, %v2330_v49, 0.0  ;;  %v1129_v11 = vsel %vm1007_vm10, %v2405_v30, 0.0 }
  0xdc   : > { %v1090_v9 = vadd.f32 %v1082_v1, %v1060_v62  ;;  %1873 = vpow2.f32 %v1761_v4  ;;  %v1141_v2 = vmul.f32 %v2272_v18, %v1128_v56  ;;  %v1142_v14 = vmul.f32 %v2272_v18, %v1129_v11 }
  0xdd   : > { %v679_v16 = vsel %vm678_vm13, %v1870_v21, %v675_v12  ;;  %v1119_v22 = vadd.f32 %v2275_v59, %v1089_v63  ;;  %v1158_v49 = vsel %vm837_vm15, %v2385_v44, 0.0  ;;  %v1159_v21 = vsel %vm838_vm2, %v2418_v6, 0.0 }
  0xde   : > { %v684_v34 = vsel %vm2375_vm12, %v683_v3, %v679_v16  ;;  %v1120_v37 = vadd.f32 %v1112_v8, %v1090_v9  ;;  %v720_v27 = vadd.s32 40, %v2049_v13  ;;  %v1171_v36 = vmul.f32 %v2302_v45, %v1158_v49 }
  0xdf   : > { %v693_v55 = vmul.f32 %v684_v34, %v2220_v24  ;;  %v1872_v26 = vpop.eup %1871  ;;  %v1149_v35 = vadd.f32 %v1141_v2, %v1119_v22  ;;  %v1172_v59 = vmul.f32 %v2302_v45, %v1159_v21  ;;  %v1218_v24 = vsel %vm1006_vm4, %v2405_v30, 0.0  ;;  %v2502_v21 = vld [vmem:[#allocation2 + $0x37] sm:$0xff] }
  0xe0   : > { %v1150_v42 = vadd.f32 %v1142_v14, %v1120_v37  ;;  %v2444_v48 = vadd.f32 1.0, %v1872_v26  ;;  %v1219_v60 = vsel %vm1007_vm10, %v2430_v25, 0.0  ;;  %v755_v0 = vand.u32 7, %v2228_v29 }
  0xe1   : > { %713 = vst.msk [vmem:[#allocation2 + $0x48] sm:$0xff] %vm492_vm0, %v693_v55  ;;  %v1179_v31 = vadd.f32 %v1171_v36, %v1149_v35  ;;  %v1201_v50 = vmul.f32 %v2210_v17, %v2394_v47  ;;  %v1202_v54 = vmul.f32 %v2210_v17, %v908_v28  ;;  %v1231_v23 = vmul.f32 %v2337_v41, %v1218_v24 }
  0xe2   : > { %v1180_v46 = vadd.f32 %v1172_v59, %v1150_v42  ;;  %v1874_v52 = vpop.eup %1873  ;;  %1875 = vrcp.f32 %v2444_v48  ;;  %v1232_v19 = vmul.f32 %v2337_v41, %v1219_v60  ;;  %v1300_v20 = vand.u32 2147483648, %v2444_v48 }
  0xe3   : > { %v2459_v51 = vadd.f32 1.0, %v1874_v52  ;;  %v1209_v58 = vadd.f32 %v1201_v50, %v1179_v31  ;;  %v762_v29 = vand.u32 7, %v720_v27  ;;  %v2462_v15 = vadd.s32 4294967295, %v755_v0  ;;  %v2527_v52 = vld [vmem:[#allocation2 + $0x39] sm:$0xff] }
  0xe4   : > { %v1210_v43 = vadd.f32 %v1202_v54, %v1180_v46  ;;  %v1298_v61 = vand.u32 2147483647, %v2444_v48  ;;  %v968_v53 = vmul.f32 %v2083_v33, %v2394_v47  ;;  %v969_v7 = vmul.f32 %v2083_v33, %v908_v28 }
  0xe5   : > { %1877 = vrcp.f32 %v2459_v51  ;;  %v1239_v62 = vadd.f32 %v1231_v23, %v1209_v58  ;;  %v2469_v12 = vadd.s32 4294967295, %v762_v29  ;;  %vm839_vm14 = vcmp.ge.s32.totalorder %v2462_v15, 0  ;;  %v909_v23 = vld [vmem:[#allocation2 + $0x38] sm:$0xff] }
  0xe6   : > { %v1240_v1 = vadd.f32 %v1232_v19, %v1210_v43  ;;  %vm1294_vm15 = vweird.f32 %v2444_v48  ;;  %v1301_v3 = vor.u32 1.1754944e-38, %v1300_v20  ;;  %v2474_v4 = vmul.f32 %v2200_v10, %v908_v28 }
  0xe7   : > { %v879_v8 = vsel %vm839_vm14, %v2385_v44, 0.0  ;;  %v2480_v47 = vadd.f32 %v2355_v39, %v1239_v62  ;;  %vm840_vm2 = vcmp.ge.s32.totalorder %v2469_v12, 0  ;;  %vm2488_vm3 = vcmp.eq.f32.partialorder %v1298_v61, 8.507059e+37 }
  0xe8   : > { %v1876_v63 = vpop.eup %1875  ;;  %v2483_v9 = vadd.f32 %v2355_v39, %v1240_v1  ;;  %v891_v56 = vmul.f32 %v2078_v32, %v879_v8  ;;  %v1313_v2 = vand.u32 2147483647, %v2459_v51  ;;  %v880_v44 = vsel %vm840_vm2, %v2418_v6, 0.0 }
  0xe9   : > { %v1290_v11 = vmul.f32 %v1876_v63, %v2444_v48  ;;  %v2496_v14 = vadd.s32 1, %v755_v0  ;;  %vm1295_vm4 = vweird.f32 %v1876_v63  ;;  %vm1309_vm5 = vweird.f32 %v2459_v51 }
  0xea   : > { %v1315_v34 = vand.u32 2147483648, %v2459_v51  ;;  %v1762_v22 = vmul.f32 -1.442695, %v2480_v47  ;;  %v1763_v37 = vmul.f32 -1.442695, %v2483_v9  ;;  %v892_v27 = vmul.f32 %v2078_v32, %v880_v44  ;;  %vm1296_vm1 = vmor %vm1294_vm15, %vm1295_vm4  ;;  %v2551_v44 = vld [vmem:[#allocation2 + $0x40] sm:$0xff] }
  0xeb   : > { %v1878_v49 = vpop.eup %1877  ;;  %v1291_v55 = vsub.f32 1.0, %v1290_v11  ;;  %v2505_v26 = vadd.s32 1, %v762_v29  ;;  %vm1008_vm9 = vcmp.lt.s32.totalorder %v2496_v14, 8  ;;  %v976_v35 = vadd.f32 %v968_v53, %v891_v56 }
  0xec   : > { %v1305_v28 = vmul.f32 %v1878_v49, %v2459_v51  ;;  %1879 = vpow2.f32 %v1762_v22  ;;  %v1070_v42 = vsel %vm839_vm14, %v2418_v6, 0.0  ;;  %v1040_v59 = vsel %vm1008_vm9, %v2405_v30, 0.0  ;;  %v2557_v51 = vld [vmem:[#allocation2 + $0x3f] sm:$0xff] }
  0xed   : > { %v1292_v36 = vmul.f32 %v1876_v63, %v1291_v55  ;;  %1881 = vpow2.f32 %v1763_v37  ;;  %vm1009_vm10 = vcmp.lt.s32.totalorder %v2505_v26, 8  ;;  %v1053_v0 = vmul.f32 %v2154_v38, %v1040_v59 }
  0xee   : > { %v1306_v24 = vsub.f32 1.0, %v1305_v28  ;;  %v1041_v60 = vsel %vm1009_vm10, %v2430_v25, 0.0  ;;  %v1071_v31 = vsel %vm840_vm2, %v2502_v21, 0.0  ;;  %vm2523_vm11 = vcmp.eq.f32.partialorder %v1313_v2, 8.507059e+37 }
  0xef   : > { %v1293_v6 = vadd.f32 %v1876_v63, %v1292_v36  ;;  %v977_v50 = vadd.f32 %v969_v7, %v892_v27  ;;  %v1054_v30 = vmul.f32 %v2154_v38, %v1041_v60  ;;  %vm1310_vm6 = vweird.f32 %v1878_v49 }
  0xf0   : > { %v1307_v54 = vmul.f32 %v1878_v49, %v1306_v24  ;;  %v1061_v19 = vadd.f32 %v1053_v0, %v976_v35  ;;  %v1083_v20 = vmul.f32 %v2189_v5, %v1070_v42  ;;  %v1084_v43 = vmul.f32 %v2189_v5, %v1071_v31  ;;  %vm1311_vm8 = vmor %vm1309_vm5, %vm1310_vm6 }
  0xf1   : > { %v1297_v58 = vsel %vm1296_vm1, %v1876_v63, %v1293_v6  ;;  %v1062_v29 = vadd.f32 %v1054_v30, %v977_v50  ;;  %v1130_v61 = vsel %vm1008_vm9, %v2430_v25, 0.0  ;;  %v1131_v1 = vsel %vm1009_vm10, %v2527_v52, 0.0 }
  0xf2   : > { %v1880_v53 = vpop.eup %1879  ;;  %v1302_v7 = vsel %vm2488_vm3, %v1301_v3, %v1297_v58  ;;  %v1308_v48 = vadd.f32 %v1878_v49, %v1307_v54  ;;  %v1091_v62 = vadd.f32 %v1083_v20, %v1061_v19  ;;  %v1316_v63 = vor.u32 1.1754944e-38, %v1315_v34 }
  0xf3   : > { %v1882_v8 = vpop.eup %1881  ;;  %v2545_v56 = vadd.f32 1.0, %v1880_v53  ;;  %v1092_v11 = vadd.f32 %v1084_v43, %v1062_v29  ;;  %v1114_v25 = vmul.f32 %v2200_v10, %v909_v23  ;;  %v1409_v16 = vmul.f32 %v1302_v7, %v2383_v40  ;;  %v1155_v53 = vld [vmem:[#allocation2 + $0x4f] sm:$0xff] }
  0xf4   : > { %v1312_v2 = vsel %vm1311_vm8, %v1878_v49, %v1308_v48  ;;  %v2549_v3 = vadd.f32 1.0, %v1882_v8  ;;  %v1143_v22 = vmul.f32 %v2272_v18, %v1130_v61  ;;  %v1121_v34 = vadd.f32 %v2474_v4, %v1091_v62 }
  0xf5   : > { %v1317_v37 = vsel %vm2523_vm11, %v1316_v63, %v1312_v2  ;;  %1883 = vrcp.f32 %v2545_v56  ;;  %v1144_v55 = vmul.f32 %v2272_v18, %v1131_v1  ;;  %v1330_v40 = vand.u32 2147483648, %v2545_v56 }
  0xf6   : > { %v1410_v49 = vmul.f32 %v1317_v37, %v2403_v57  ;;  %1885 = vrcp.f32 %v2549_v3  ;;  %v1160_v27 = vsel %vm839_vm14, %v2502_v21, 0.0  ;;  %v2568_v28 = vmul.f32 %v2083_v33, %v909_v23  ;;  %v2575_v57 = vld [vmem:[#allocation2 + $0x41] sm:$0xff] }
  0xf7   : > { %v2572_v35 = vmul.f32 %v2083_v33, %v2551_v44  ;;  %v1122_v4 = vadd.f32 %v1114_v25, %v1092_v11  ;;  %v1328_v36 = vand.u32 2147483647, %v2545_v56  ;;  %v1151_v59 = vadd.f32 %v1143_v22, %v1121_v34 }
  0xf8   : > { %v1417_v42 = vpack.c.bf16 %v1410_v49, %v1409_v16  ;;  %v1161_v24 = vsel %vm840_vm2, %v2557_v51, 0.0  ;;  %v1343_v15 = vand.u32 2147483647, %v2549_v3  ;;  %v1345_v60 = vand.u32 2147483648, %v2549_v3 }
  0xf9   : > { %v1152_v0 = vadd.f32 %v1144_v55, %v1122_v4  ;;  %v1173_v31 = vmul.f32 %v2302_v45, %v1160_v27  ;;  %vm1324_vm7 = vweird.f32 %v2545_v56  ;;  %v1331_v33 = vor.u32 1.1754944e-38, %v1330_v40 }
  0xfa   : > { %1776 = vmatmul.msk.bf16.vlgmr.msrb.gmra.mxu0 %vm492_vm0, %v1417_v42  ;;  %v1174_v6 = vmul.f32 %v2302_v45, %v1161_v24  ;;  %v1203_v46 = vmul.f32 %v2210_v17, %v909_v23  ;;  %v1220_v12 = vsel %vm1008_vm9, %v2527_v52, 0.0  ;;  %vm1339_vm12 = vweird.f32 %v2549_v3 }
  0xfb   : > { %v1884_v50 = vpop.eup %1883  ;;  %v1181_v30 = vadd.f32 %v1173_v31, %v1151_v59  ;;  %v1221_v54 = vsel %vm1009_vm10, %v2575_v57, 0.0  ;;  %v1233_v19 = vmul.f32 %v2337_v41, %v1220_v12  ;;  %v721_v20 = vadd.s32 48, %v2049_v13 }
  0xfc   : > { %v1886_v58 = vpop.eup %1885  ;;  %v1320_v29 = vmul.f32 %v1884_v50, %v2545_v56  ;;  %vm2597_vm13 = vcmp.eq.f32.partialorder %v1328_v36, 8.507059e+37  ;;  %v1182_v14 = vadd.f32 %v1174_v6, %v1152_v0  ;;  %v1204_v43 = vmul.f32 %v2210_v17, %v2551_v44 }
  0xfd   : > { %v1234_v61 = vmul.f32 %v2337_v41, %v1221_v54  ;;  %v1335_v26 = vmul.f32 %v1886_v58, %v2549_v3  ;;  %vm2605_vm14 = vcmp.eq.f32.partialorder %v1343_v15, 8.507059e+37  ;;  %v1346_v7 = vor.u32 1.1754944e-38, %v1345_v60 }
  0xfe   : > { %v1211_v48 = vadd.f32 %v1203_v46, %v1181_v30  ;;  %v722_v62 = vadd.s32 56, %v2049_v13  ;;  %v1321_v1 = vsub.f32 1.0, %v1320_v29  ;;  %vm1325_vm15 = vweird.f32 %v1884_v50 }
  0xff   : > { %v1212_v8 = vadd.f32 %v1204_v43, %v1182_v14  ;;  %v769_v63 = vand.u32 7, %v721_v20  ;;  %v1336_v11 = vsub.f32 1.0, %v1335_v26  ;;  %vm1340_vm2 = vweird.f32 %v1886_v58  ;;  %vm1326_vm5 = vmor %vm1324_vm7, %vm1325_vm15  ;;  %v1095_v43 = vld [vmem:[#allocation2 + $0x48] sm:$0xff] }
 0x100   : > { %v1241_v25 = vadd.f32 %v1233_v19, %v1211_v48  ;;  %v776_v2 = vand.u32 7, %v722_v62  ;;  %v1322_v16 = vmul.f32 %v1884_v50, %v1321_v1  ;;  %vm1341_vm10 = vmor %vm1339_vm12, %vm1340_vm2 }
 0x101   : > { %v1242_v22 = vadd.f32 %v1234_v61, %v1212_v8  ;;  %v833_v37 = vadd.s32 4294967295, %v769_v63  ;;  %v2610_v34 = vadd.s32 1, %v769_v63  ;;  %v1337_v55 = vmul.f32 %v1886_v58, %v1336_v11  ;;  %v1185_v11 = vld [vmem:[#allocation2 + $0x50] sm:$0xff] }
 0x102   : > { %v2613_v49 = vadd.f32 %v2355_v39, %v1241_v25  ;;  %v834_v40 = vadd.s32 4294967295, %v776_v2  ;;  %v2615_v27 = vadd.s32 1, %v776_v2  ;;  %v1323_v13 = vadd.f32 %v1884_v50, %v1322_v16 }
 0x103   : > { %v2618_v4 = vadd.f32 %v2355_v39, %v1242_v22  ;;  %vm841_vm3 = vcmp.ge.s32.totalorder %v833_v37, 0  ;;  %vm1010_vm4 = vcmp.lt.s32.totalorder %v2610_v34, 8  ;;  %v1338_v42 = vadd.f32 %v1886_v58, %v1337_v55 }
 0x104   : > { %v1764_v36 = vmul.f32 -1.442695, %v2613_v49  ;;  %vm842_vm9 = vcmp.ge.s32.totalorder %v834_v40, 0  ;;  %v881_v59 = vsel %vm841_vm3, %v2502_v21, 0.0  ;;  %v1327_v24 = vsel %vm1326_vm5, %v1884_v50, %v1323_v13  ;;  %v1065_v21 = vld [vmem:[#allocation2 + $0x47] sm:$0xff] }
 0x105   : > { %v1765_v15 = vmul.f32 -1.442695, %v2618_v4  ;;  %v882_v60 = vsel %vm842_vm9, %v2557_v51, 0.0  ;;  %v893_v56 = vmul.f32 %v2078_v32, %v881_v59  ;;  %v1332_v0 = vsel %vm2597_vm13, %v1331_v33, %v1327_v24 }
 0x106   : > { %v1342_v31 = vsel %vm1341_vm10, %v1886_v58, %v1338_v42  ;;  %1887 = vpow2.f32 %v1764_v36  ;;  %v894_v6 = vmul.f32 %v2078_v32, %v882_v60  ;;  %v1411_v3 = vmul.f32 %v1332_v0, %v2480_v47 }
 0x107   : > { %v1347_v46 = vsel %vm2605_vm14, %v1346_v7, %v1342_v31  ;;  %1889 = vpow2.f32 %v1765_v15  ;;  %v978_v50 = vadd.f32 %v2568_v28, %v893_v56  ;;  %vm1011_vm11 = vcmp.lt.s32.totalorder %v2615_v27, 8 }
 0x108   : > { %v1412_v12 = vmul.f32 %v1347_v46, %v2483_v9  ;;  %v1042_v33 = vsel %vm1010_vm4, %v2527_v52, 0.0  ;;  %v1043_v32 = vsel %vm1011_vm11, %v2575_v57, 0.0  ;;  %v1072_v47 = vsel %vm841_vm3, %v2557_v51, 0.0  ;;  %v1125_v52 = vld [vmem:[#allocation2 + $0x49] sm:$0xff] }
 0x109   : > { %v1055_v30 = vmul.f32 %v2154_v38, %v1042_v33  ;;  %v1073_v54 = vsel %vm842_vm9, %v1065_v21, 0.0  ;;  %v979_v28 = vadd.f32 %v2572_v35, %v894_v6  ;;  %v1056_v19 = vmul.f32 %v2154_v38, %v1043_v32 }
 0x10a   : > { %v1418_v9 = vpack.c.bf16 %v1412_v12, %v1411_v3  ;;  %v1085_v58 = vmul.f32 %v2189_v5, %v1072_v47  ;;  %v1086_v14 = vmul.f32 %v2189_v5, %v1073_v54  ;;  %v1132_v51 = vsel %vm1010_vm4, %v2575_v57, 0.0  ;;  %v1215_v57 = vld [vmem:[#allocation2 + $0x51] sm:$0xff] }
 0x10b   : > { %v1063_v20 = vadd.f32 %v1055_v30, %v978_v50  ;;  %v1064_v23 = vadd.f32 %v1056_v19, %v979_v28  ;;  %v1115_v38 = vmul.f32 %v2200_v10, %v2551_v44  ;;  %v1133_v62 = vsel %vm1011_vm11, %v1125_v52, 0.0 }
 0x10c   : > { %v1888_v29 = vpop.eup %1887  ;;  %1777 = vmatmul.msk.bf16.vlgmr.msra.gmra.mxu1 %vm492_vm0, %v1418_v9  ;;  %v1116_v5 = vmul.f32 %v2200_v10, %v1095_v43  ;;  %v1145_v1 = vmul.f32 %v2272_v18, %v1132_v51  ;;  %v1162_v8 = vsel %vm841_vm3, %v1065_v21, 0.0  ;;  %v1163_v63 = vsel %vm842_vm9, %v1155_v53, 0.0 }
 0x10d   : > { %v1890_v61 = vpop.eup %1889  ;;  %v1285_v26 = vadd.f32 1.0, %v1888_v29  ;;  %v1093_v35 = vadd.f32 %v1085_v58, %v1063_v20  ;;  %v1094_v48 = vadd.f32 %v1086_v14, %v1064_v23  ;;  %v1146_v44 = vmul.f32 %v2272_v18, %v1133_v62 }
 0x10e   : > { %v1286_v7 = vadd.f32 1.0, %v1890_v61  ;;  %v1175_v16 = vmul.f32 %v2302_v45, %v1162_v8  ;;  %v1223_v22 = vsel %vm1011_vm11, %v1215_v57, 0.0  ;;  %v1176_v13 = vmul.f32 %v2302_v45, %v1163_v63 }
 0x10f   : > { %1891 = vrcp.f32 %v1285_v26  ;;  %v1123_v25 = vadd.f32 %v1115_v38, %v1093_v35  ;;  %v1124_v2 = vadd.f32 %v1116_v5, %v1094_v48  ;;  %v1206_v37 = vmul.f32 %v2210_v17, %v1185_v11 }
 0x110   : > { %1893 = vrcp.f32 %v1286_v7  ;;  %v1222_v40 = vsel %vm1010_vm4, %v1125_v52, 0.0  ;;  %v1205_v24 = vmul.f32 %v2210_v17, %v1095_v43  ;;  %v1236_v18 = vmul.f32 %v2337_v41, %v1223_v22 }
 0x111   : > { %v1153_v55 = vadd.f32 %v1145_v1, %v1123_v25  ;;  %v1154_v10 = vadd.f32 %v1146_v44, %v1124_v2  ;;  %v1235_v31 = vmul.f32 %v2337_v41, %v1222_v40  ;;  %v1358_v6 = vand.u32 2147483647, %v1285_v26 }
 0x112   : > { %v1360_v21 = vand.u32 2147483648, %v1285_v26  ;;  %v1373_v50 = vand.u32 2147483647, %v1286_v7  ;;  %v1375_v33 = vand.u32 2147483648, %v1286_v7  ;;  %vm1354_vm8 = vweird.f32 %v1285_v26 }
 0x113   : > { %v1183_v36 = vadd.f32 %v1175_v16, %v1153_v55  ;;  %v1184_v59 = vadd.f32 %v1176_v13, %v1154_v10  ;;  %vm1369_vm7 = vweird.f32 %v1286_v7  ;;  %vm1359_vm13 = vcmp.eq.f32.partialorder %v1358_v6, 8.507059e+37 }
 0x114   : > { %v1361_v41 = vor.u32 1.1754944e-38, %v1360_v21  ;;  %v1376_v20 = vor.u32 1.1754944e-38, %v1375_v33  ;;  %vm1374_vm15 = vcmp.eq.f32.partialorder %v1373_v50, 8.507059e+37  ;;  %v1926_v21 = vmov 64.0  }
 0x115   : > { %v1892_v42 = vpop.eup %1891  ;;  %v1213_v56 = vadd.f32 %v1205_v24, %v1183_v36  ;;  %v1214_v0 = vadd.f32 %v1206_v37, %v1184_v59 }
 0x116   : > { %v1894_v15 = vpop.eup %1893  ;;  %v1350_v60 = vmul.f32 %v1892_v42, %v1285_v26  ;;  %vm1355_vm1 = vweird.f32 %v1892_v42 }
 0x117   : > { %v1365_v27 = vmul.f32 %v1894_v15, %v1286_v7  ;;  %v1243_v34 = vadd.f32 %v1235_v31, %v1213_v56  ;;  %v1244_v3 = vadd.f32 %v1236_v18, %v1214_v0  ;;  %vm1370_vm6 = vweird.f32 %v1894_v15  ;;  %vm1356_vm12 = vmor %vm1354_vm8, %vm1355_vm1  ;;  %v1837_v18 = vld [vmem:[%s2777_s6] ss:$0 sm:$0xff] }
 0x118   : > { %v1351_v45 = vsub.f32 1.0, %v1350_v60  ;;  %vm1371_vm14 = vmor %vm1369_vm7, %vm1370_vm6  ;;  %vm1531_vm6 = vcmask 130048   ;;  %vm1563_vm7 = vcmask 122880  }
 0x119   : > { %v1366_v46 = vsub.f32 1.0, %v1365_v27  ;;  %v1255_v32 = vadd.f32 %v2355_v39, %v1243_v34  ;;  %v1256_v30 = vadd.f32 %v2355_v39, %v1244_v3  ;;  %v1807_v3 = vld [vmem:[%s2782_s11 + $0x8] sm:$0xff] }
 0x11a   : > { %v1352_v12 = vmul.f32 %v1892_v42, %v1351_v45  ;;  %1812 = vmatpush.bf16.msra.mxu2 %v1807_v3  ;;  %1508 = vmatpush.bf16.msra.mxu0 %v1807_v3  ;;  %v1597_v3 = vld [vmem:[%s2781_s10] sm:$0x1] }
 0x11b   : > { %v1367_v17 = vmul.f32 %v1894_v15, %v1366_v46  ;;  %v1766_v9 = vmul.f32 -1.442695, %v1255_v32  ;;  %v1767_v28 = vmul.f32 -1.442695, %v1256_v30 }
 0x11c   : > { %v1353_v47 = vadd.f32 %v1892_v42, %v1352_v12 }
 0x11d   : > { %v1368_v54 = vadd.f32 %v1894_v15, %v1367_v17  ;;  %1895 = vpow2.f32 %v1766_v9  ;;  %v1806_v17 = vld [vmem:[%s2782_s11] sm:$0xff] }
 0x11e   : > { %v1357_v19 = vsel %vm1356_vm12, %v1892_v42, %v1353_v47  ;;  %1897 = vpow2.f32 %v1767_v28  ;;  %1813 = vmatpush.bf16.msra.mxu2 %v1806_v17  ;;  %1509 = vmatpush.bf16.msra.mxu0 %v1806_v17 }
 0x11f   : > { %v1362_v58 = vsel %vm1359_vm13, %v1361_v41, %v1357_v19  ;;  %v1372_v52 = vsel %vm1371_vm14, %v1894_v15, %v1368_v54 }
 0x120   : > { %v1377_v29 = vsel %vm1374_vm15, %v1376_v20, %v1372_v52  ;;  %v1413_v39 = vmul.f32 %v1362_v58, %v2613_v49 }
 0x121   : > { %v1414_v23 = vmul.f32 %v1377_v29, %v2618_v4  ;;  %v1913_v29 = vld [vmem:[%s2023_s18 + $0x8] sm:$0xff] }
 0x122   : > { %1789 = vmatmul.msk.bf16.vlgmr.msra.gmra.mxu2 %vm492_vm0, %v1913_v29 }
 0x123   : > { %v1419_v14 = vpack.c.bf16 %v1414_v23, %v1413_v39  ;;  %v1896_v43 = vpop.eup %1895  ;;  %v1914_v39 = vld [vmem:[%s2023_s18] sm:$0xff] }
 0x124   : > { %v1898_v51 = vpop.eup %1897  ;;  %v1287_v61 = vadd.f32 1.0, %v1896_v43  ;;  %1788 = vmatmul.msk.bf16.vlgmr.msra.gmra.mxu0 %vm492_vm0, %v1914_v39 }
 0x125   : > { %1778 = vmatmul.msk.bf16.gmra.mxu1 %vm492_vm0, %v1419_v14  ;;  %v1288_v26 = vadd.f32 1.0, %v1898_v51 }
 0x126   : > { %1899 = vrcp.f32 %v1287_v61  ;;  %v1390_v62 = vand.u32 2147483648, %v1287_v61  ;;  %v1388_v49 = vand.u32 2147483647, %v1287_v61  ;;  %vm1384_vm4 = vweird.f32 %v1287_v61 }
 0x127   : > { %1901 = vrcp.f32 %v1288_v26  ;;  %v1405_v4 = vand.u32 2147483648, %v1288_v26  ;;  %v1403_v57 = vand.u32 2147483647, %v1288_v26  ;;  %vm1399_vm9 = vweird.f32 %v1288_v26 }
 0x128   : > { %v1391_v11 = vor.u32 1.1754944e-38, %v1390_v62  ;;  %vm1389_vm10 = vcmp.eq.f32.partialorder %v1388_v49, 8.507059e+37  ;;  %1903 = vrcp.f32 %v1926_v21  ;;  %v1915_v49 = vld [vmem:[%s2023_s18 + $0x10] sm:$0xff] }
 0x129   : > { %v1406_v44 = vor.u32 1.1754944e-38, %v1405_v4  ;;  %vm1404_vm1 = vcmp.eq.f32.partialorder %v1403_v57, 8.507059e+37  ;;  %v1561_v4 = vld [vmem:[%s2778_s7] sm:$0x1] }
 0x12c   : > { %v1900_v35 = vpop.eup %1899 }
 0x12d   : > { %v1902_v53 = vpop.eup %1901  ;;  %v1380_v38 = vmul.f32 %v1900_v35, %v1287_v61  ;;  %vm1385_vm2 = vweird.f32 %v1900_v35 }
 0x12e   : > { %v1395_v7 = vmul.f32 %v1902_v53, %v1288_v26  ;;  %vm1400_vm3 = vweird.f32 %v1902_v53  ;;  %vm1386_vm5 = vmor %vm1384_vm4, %vm1385_vm2  ;;  %v1904_v41 = vpop.eup %1903 }
 0x12f   : > { %v1381_v48 = vsub.f32 1.0, %v1380_v38  ;;  %vm1401_vm11 = vmor %vm1399_vm9, %vm1400_vm3  ;;  %v1554_v20 = vmul.f32 64.0, %v1904_v41  ;;  %vm1558_vm8 = vweird.f32 %v1904_v41 }
 0x130   : > { %v1396_v5 = vsub.f32 1.0, %v1395_v7 }
 0x131   : > { %v1382_v1 = vmul.f32 %v1900_v35, %v1381_v48  ;;  %v1555_v51 = vsub.f32 1.0, %v1554_v20 }
 0x132   : > { %v1397_v8 = vmul.f32 %v1902_v53, %v1396_v5  ;;  %1790 = vmatmul.msk.bf16.gmra.mxu2 %vm492_vm0, %v1915_v49 }
 0x133   : > { %v1383_v63 = vadd.f32 %v1900_v35, %v1382_v1 }
 0x134   : > { %v1398_v25 = vadd.f32 %v1902_v53, %v1397_v8 }
 0x135   : > { %v1387_v2 = vsel %vm1386_vm5, %v1900_v35, %v1383_v63  ;;  %v1556_v35 = vmul.f32 %v1904_v41, %v1555_v51  ;;  %vm1643_vm5 = vcmask 125952  }
 0x136   : > { %v1392_v16 = vsel %vm1389_vm10, %v1391_v11, %v1387_v2  ;;  %v1402_v22 = vsel %vm1401_vm11, %v1902_v53, %v1398_v25  ;;  %v1916_v11 = vld [vmem:[%s2023_s18 + $0x18] sm:$0xff]  ;;  %v1567_v25 = vld [vmem:[#allocation3] sm:$0x1] }
 0x137   : > { %v1407_v55 = vsel %vm1404_vm1, %v1406_v44, %v1402_v22  ;;  %v1415_v10 = vmul.f32 %v1392_v16, %v1255_v32  ;;  %v1557_v7 = vadd.f32 %v1904_v41, %v1556_v35  ;;  %v1927_v44 = vmov 0  }
 0x138   : > { %v1416_v13 = vmul.f32 %v1407_v55, %v1256_v30  ;;  %1825 = vset.pattern.permute.xlu0 %v1927_v44 }
 0x139   : > { %v1559_v5 = vsel %vm1558_vm8, %v1904_v41, %v1557_v7 }
 0x13a   : > { %v1420_v37 = vpack.c.bf16 %v1416_v13, %v1415_v10 }
 0x13c   : > { %1779 = vmatmul.msk.bf16.gmra.mxu1 %vm492_vm0, %v1420_v37 }
 0x142   : > { %1791 = vmatmul.msk.bf16.gmra.mxu2 %vm492_vm0, %v1916_v11 }
 0x177   : > { %v1462_v36 = vpop.f32.mrf.mxu0 }
 0x178   : > { %v2691_v27 = vadd.f32 %v1837_v18, %v1462_v36 }
 0x17a   : > { %v1532_v31 = vsel %vm1531_vm6, %v2691_v27, 0.0 }
 0x17f   : > { %v1464_v24 = vpop.f32.mrf.mxu0 }
 0x180   : > { %v2689_v60 = vadd.f32 %v1837_v18, %v1464_v24 }
 0x182   : > { %v1533_v56 = vsel %vm1531_vm6, %v2689_v60, 0.0 }
 0x183   : > { %v1534_v6 = vadd.f32 %v1533_v56, %v1532_v31 }
 0x189   : > { %v1467_v40 = vpop.f32.mrf.mxu1 }
 0x18a   : > { %v2695_v0 = vadd.f32 %v1837_v18, %v1467_v40 }
 0x18c   : > { %v1535_v46 = vsel %vm1531_vm6, %v2695_v0, 0.0 }
 0x18d   : > { %v1536_v32 = vadd.f32 %v1535_v46, %v1534_v6  ;;  %v1589_v46 = vld [vmem:[%s2780_s9] sm:$0x1] }
 0x191   : > { %v1469_v42 = vpop.f32.mrf.mxu1 }
 0x192   : > { %v2699_v45 = vadd.f32 %v1837_v18, %v1469_v42 }
 0x194   : > { %v1537_v50 = vsel %vm1531_vm6, %v2699_v45, 0.0 }
 0x195   : > { %v1538_v54 = vadd.f32 %v1537_v50, %v1536_v32 }
 0x1a2   : > { %v1472_v59 = vpop.f32.mrf.mxu1 }
 0x1a3   : > { %v2703_v34 = vadd.f32 %v1837_v18, %v1472_v59 }
 0x1a5   : > { %v1539_v30 = vsel %vm1531_vm6, %v2703_v34, 0.0  ;;  %v1516_v6 = vpop.f32.mrf.mxu2 }
 0x1a6   : > { %v1540_v28 = vadd.f32 %v1539_v30, %v1538_v54 }
 0x1aa   : > { %v1474_v15 = vpop.f32.mrf.mxu1 }
 0x1ab   : > { %v2710_v33 = vadd.f32 %v1837_v18, %v1474_v15 }
 0x1ad   : > { %v1541_v9 = vsel %vm1531_vm6, %v2710_v33, 0.0  ;;  %v1518_v21 = vpop.f32.mrf.mxu2 }
 0x1ae   : > { %v1542_v58 = vadd.f32 %v1541_v9, %v1540_v28  ;;  %v1511_v28 = vpop.f32.mrf.mxu0 }
 0x1b5   : > { %v1521_v30 = vpop.f32.mrf.mxu2 }
 0x1b6   : > { %v1513_v35 = vpop.f32.mrf.mxu0 }
 0x1b9   : > { %v1477_v12 = vpop.f32.mrf.mxu1 }
 0x1ba   : > { %v2717_v47 = vadd.f32 %v1837_v18, %v1477_v12 }
 0x1bc   : > { %v1543_v19 = vsel %vm1531_vm6, %v2717_v47, 0.0 }
 0x1bd   : > { %v1544_v14 = vadd.f32 %v1543_v19, %v1542_v58  ;;  %v1523_v9 = vpop.f32.mrf.mxu2 }
 0x1c1   : > { %v1479_v52 = vpop.f32.mrf.mxu1 }
 0x1c2   : > { %v2727_v23 = vadd.f32 %v1837_v18, %v1479_v52 }
 0x1c4   : > { %v1545_v43 = vsel %vm1531_vm6, %v2727_v23, 0.0 }
 0x1c5   : > { %v1546_v61 = vadd.f32 %v1545_v43, %v1544_v14  ;;  %v1526_v52 = vpop.f32.mrf.mxu2  ;;  %v1838_v43 = vld [vmem:[%s2783_s12] ss:$0 sm:$0xff] }
 0x1c6   : > { %v1519_v7 = vadd.f32 %v1838_v43, %v1518_v21  ;;  %v1527_v49 = vadd.f32 %v1838_v43, %v1526_v52 }
 0x1c7   : > { %v1547_v26 = vrot.slane %v1546_v61, 4 }
 0x1c9   : > { %v1548_v53 = vadd.f32 %v1547_v26, %v1546_v61 }
 0x1cb   : > { %v1549_v38 = vrot.slane %v1548_v53, 2 }
 0x1cd   : > { %v1550_v48 = vadd.f32 %v1549_v38, %v1548_v53  ;;  %v1517_v38 = vadd.f32 %v1838_v43, %v1516_v6 }
 0x1cf   : > { %v1551_v62 = vrot.slane %v1550_v48, 1 }
 0x1d1   : > { %v1552_v1 = vadd.f32 %v1551_v62, %v1550_v48  ;;  %v1522_v62 = vadd.f32 %v1838_v43, %v1521_v30 }
 0x1d3   : > { %v1560_v8 = vmul.f32 %v1559_v5, %v1552_v1  ;;  %v1524_v5 = vadd.f32 %v1838_v43, %v1523_v9  ;;  %v1512_v1 = vadd.f32 %v1838_v43, %v1511_v28 }
 0x1d5   : > { %v1562_v57 = vmul.f32 %v1561_v4, %v1560_v8  ;;  %v1514_v4 = vadd.f32 %v1838_v43, %v1513_v35 }
 0x1d7   : > { %v1564_v63 = vsel %vm1563_vm7, %v1562_v57, 0.0 }
 0x1d8   : > { %1565 = vadd.xlane.f32.xlu0 %v1564_v63 }
 0x24b   : > { %v1566_v2 = vpop.xlane.xlu0 %1565 }
 0x24c   : > { %v1568_v16 = vadd.f32 %v1567_v25, %v1566_v2  ;;  %v1528_v25 = vpop.f32.mrf.mxu2 }
 0x24e   : > { %v1792_v22 = vmul.f32 -1.442695, %v1568_v16 }
 0x250   : > { %1905 = vpow2.f32 %v1792_v22 }
 0x256   : > { %v1906_v55 = vpop.eup %1905 }
 0x257   : > { %v1572_v10 = vadd.f32 1.0, %v1906_v55 }
 0x259   : > { %1907 = vrcp.f32 %v1572_v10  ;;  %v1584_v42 = vand.u32 2147483648, %v1572_v10  ;;  %v1582_v59 = vand.u32 2147483647, %v1572_v10  ;;  %vm1578_vm13 = vweird.f32 %v1572_v10 }
 0x25b   : > { %v1585_v18 = vor.u32 1.1754944e-38, %v1584_v42  ;;  %vm1583_vm14 = vcmp.eq.f32.partialorder %v1582_v59, 8.507059e+37 }
 0x25f   : > { %v1908_v13 = vpop.eup %1907 }
 0x260   : > { %v1574_v37 = vmul.f32 %v1908_v13, %v1572_v10  ;;  %vm1579_vm12 = vweird.f32 %v1908_v13 }
 0x261   : > { %vm1580_vm0 = vmor %vm1578_vm13, %vm1579_vm12 }
 0x262   : > { %v1575_v40 = vsub.f32 1.0, %v1574_v37 }
 0x264   : > { %v1576_v36 = vmul.f32 %v1908_v13, %v1575_v40 }
 0x266   : > { %v1577_v24 = vadd.f32 %v1908_v13, %v1576_v36 }
 0x268   : > { %v1581_v15 = vsel %vm1580_vm0, %v1908_v13, %v1577_v24 }
 0x269   : > { %v1586_v56 = vsel %vm1583_vm14, %v1585_v18, %v1581_v15 }
 0x26a   : > { %v1588_v31 = vmul.f32 %v1586_v56, %v1568_v16 }
 0x26c   : > { %1592 = vperm.xlu0 %1825, %v1588_v31  }
 0x2de   : > { %v1593_v12 = vpop.permute.xlu0 %1592 }
 0x2df   : > { %v1595_v50 = vmul.f32 %v1593_v12, %v1589_v46 }
 0x2e1   : > { %v1598_v17 = vadd.f32 %v1597_v3, %v1595_v50 }
 0x2e3   : > { %v1793_v32 = vmul.f32 -1.442695, %v1598_v17 }
 0x2e5   : > { %1909 = vpow2.f32 %v1793_v32 }
 0x2eb   : > { %v1910_v41 = vpop.eup %1909 }
 0x2ec   : > { %v1602_v54 = vadd.f32 1.0, %v1910_v41 }
 0x2ee   : > { %1911 = vrcp.f32 %v1602_v54  ;;  %v1614_v29 = vand.u32 2147483648, %v1602_v54  ;;  %v1612_v14 = vand.u32 2147483647, %v1602_v54  ;;  %vm1608_vm2 = vweird.f32 %v1602_v54 }
 0x2f0   : > { %v1615_v61 = vor.u32 1.1754944e-38, %v1614_v29  ;;  %vm1613_vm4 = vcmp.eq.f32.partialorder %v1612_v14, 8.507059e+37 }
 0x2f4   : > { %v1912_v19 = vpop.eup %1911 }
 0x2f5   : > { %v1604_v20 = vmul.f32 %v1912_v19, %v1602_v54  ;;  %vm1609_vm15 = vweird.f32 %v1912_v19 }
 0x2f6   : > { %vm1610_vm3 = vmor %vm1608_vm2, %vm1609_vm15 }
 0x2f7   : > { %v1605_v58 = vsub.f32 1.0, %v1604_v20 }
 0x2f9   : > { %v1606_v39 = vmul.f32 %v1912_v19, %v1605_v58 }
 0x2fb   : > { %v1607_v51 = vadd.f32 %v1912_v19, %v1606_v39 }
 0x2fd   : > { %v1611_v26 = vsel %vm1610_vm3, %v1912_v19, %v1607_v51 }
 0x2fe   : > { %v1616_v53 = vsel %vm1613_vm4, %v1615_v61, %v1611_v26 }
 0x2ff   : > { %v1618_v48 = vperm.slane %v1616_v53, 0 }
 0x301   : > { %v1621_v8 = vmul.f32 %v1618_v48, %v2695_v0  ;;  %v1622_v57 = vmul.f32 %v1618_v48, %v2699_v45  ;;  %v1623_v63 = vmul.f32 %v1618_v48, %v2703_v34  ;;  %v1624_v11 = vmul.f32 %v1618_v48, %v2710_v33 }
 0x302   : > { %v1619_v2 = vmul.f32 %v1618_v48, %v2691_v27  ;;  %v1625_v44 = vmul.f32 %v1618_v48, %v2717_v47  ;;  %v1620_v16 = vmul.f32 %v1618_v48, %v2689_v60  ;;  %v1626_v22 = vmul.f32 %v1618_v48, %v2727_v23 }
 0x303   : > { %v1629_v55 = vadd.f32 %v1621_v8, %v1517_v38  ;;  %v1630_v10 = vadd.f32 %v1622_v57, %v1519_v7  ;;  %v1631_v13 = vadd.f32 %v1623_v63, %v1522_v62  ;;  %v1632_v37 = vadd.f32 %v1624_v11, %v1524_v5 }
 0x304   : > { %v1627_v0 = vadd.f32 %v1619_v2, %v1512_v1  ;;  %v1633_v45 = vadd.f32 %v1625_v44, %v1527_v49  ;;  %v1529_v34 = vadd.f32 %v1838_v43, %v1528_v25  ;;  %v1628_v40 = vadd.f32 %v1620_v16, %v1514_v4 }
 0x305   : > { %v1637_v27 = vpack.c.bf16 %v1629_v55, %v1629_v55  ;;  %v1638_v33 = vpack.c.bf16 %v1630_v10, %v1630_v10  ;;  %v1639_v47 = vpack.c.bf16 %v1631_v13, %v1631_v13  ;;  %v1640_v60 = vpack.c.bf16 %v1632_v37, %v1632_v37 }
 0x306   : > { %v1634_v42 = vadd.f32 %v1626_v22, %v1529_v34  ;;  %v1635_v23 = vpack.c.bf16 %v1627_v0, %v1627_v0  ;;  %v1641_v36 = vpack.c.bf16 %v1633_v45, %v1633_v45  ;;  %v1636_v59 = vpack.c.bf16 %v1628_v40, %v1628_v40 }
 0x307   : > { %1646 = vst.msk [vmem:[%s442_s17 + $0x8] sm:$0xf] %vm1643_vm5, %v1637_v27 }
 0x308   : > { %1647 = vst.msk [vmem:[%s442_s17 + $0xc] sm:$0xf] %vm1643_vm5, %v1638_v33  ;;  %v1642_v24 = vpack.c.bf16 %v1634_v42, %v1634_v42 }
 0x309   : > { %1648 = vst.msk [vmem:[%s442_s17 + $0x10] sm:$0xf] %vm1643_vm5, %v1639_v47 }
 0x30a   : > { %1649 = vst.msk [vmem:[%s442_s17 + $0x14] sm:$0xf] %vm1643_vm5, %v1640_v60 }
 0x30b   : > { %1644 = vst.msk [vmem:[%s442_s17] sm:$0xf] %vm1643_vm5, %v1635_v23 }
 0x30c   : > { %1650 = vst.msk [vmem:[%s442_s17 + $0x18] sm:$0xf] %vm1643_vm5, %v1641_v36 }
 0x30d   : > { %1645 = vst.msk [vmem:[%s442_s17 + $0x4] sm:$0xf] %vm1643_vm5, %v1636_v59 }
 0x30e   : > { %1651 = vst.msk [vmem:[%s442_s17 + $0x1c] sm:$0xf] %vm1643_vm5, %v1642_v24 }
 0x30f PF: > { %s25_s27 = sadd.s32 1, %s1923_s27  }
 0x310   : > { %p22_p4 = scmp.ge.s32.totalorder %s25_s27, 4  }
 0x312   :  { %24 = sbr.rel (!%p22_p4) target bundleno = 3 (0x3), region = 110 }

// kernel: _lambda_.8
= control target key start
LH: loop header
LB: loop body
LE: loop exit
PB: predicated region body
PF: predicated region fallthrough
CT: control target
= control target key end

     0   :  { %s1852_s21 = smov 0   ;;  %s2604_s0 = inlined_call_operand.vmem [shape: bf16[2,64,16], index: 0, kind: input, shape index: {}]   ;;  %s2605_s1 = inlined_call_operand.vmem [shape: bf16[16,32], index: 1, kind: input, shape index: {}]   ;;  %s2606_s2 = inlined_call_operand.vmem [shape: f32[1,32], index: 2, kind: input, shape index: {}]   ;;  %s2607_s3 = inlined_call_operand.vmem [shape: f32[9,1,32], index: 3, kind: input, shape index: {}]   ;;  %s2608_s4 = inlined_call_operand.vmem [shape: f32[1,32], index: 4, kind: input, shape index: {}]   ;;  %s2609_s5 = inlined_call_operand.vmem [shape: bf16[32,32], index: 5, kind: input, shape index: {}]   ;;  %s2610_s6 = inlined_call_operand.vmem [shape: f32[1,32], index: 6, kind: input, shape index: {}]   ;;  %s2611_s7 = inlined_call_operand.vmem [shape: f32[2,32], index: 7, kind: input, shape index: {}]   ;;  %s2612_s8 = inlined_call_operand.vmem [shape: f32[2,1], index: 8, kind: input, shape index: {}]   ;;  %s2613_s9 = inlined_call_operand.vmem [shape: f32[2,32], index: 9, kind: input, shape index: {}]   ;;  %s2614_s10 = inlined_call_operand.vmem [shape: f32[1,32], index: 10, kind: input, shape index: {}]   ;;  %s2615_s11 = inlined_call_operand.vmem [shape: f32[16,64], index: 11, kind: input, shape index: {}]   ;;  %s2616_s12 = inlined_call_operand.vmem [shape: bf16[2,16,32], index: 12, kind: output, shape index: {}]  }
   0x1 LB: > { %s1596_s22 = sadd.s32 4294967295, %s1782_s21   ;;  %p1600_p0 = scmp.ge.s32.totalorder %s1782_s21, 1  ;;  %s1782_s21 = sphi %s1852_s21, %s22_s21  }
   0x2   : > { %p362_p1 = scmp.lt.s32.totalorder %s1782_s21, 3 }
   0x4   : > { %p363_p2 = pnand %p1600_p0, %p362_p1 }
   0x6   : > { %366 = sbr.rel (%p363_p2) target bundleno = 937 (0x3a9), region = 68 }
   0xb   : > { %v1674_v0 = vld [vmem:[%s2605_s1] sm:$0xff]  ;;  %p404_p3 = scmp.lt.s32.totalorder %s1596_s22, 1  ;;  %vm455_vm0 = vcmask 130048   ;;  %vm657_vm1 = vcmask 261120   ;;  %v1784_v6 = vmov 0.0   ;;  %v678_v28 = vlaneseq }
   0xc   : > { %475 = vmatpush.bf16.msra.mxu0 %v1674_v0  ;;  %1677 = vmatpush.bf16.msra.mxu3 %v1674_v0  ;;  %v1872_v5 = vld [vmem:[%s2606_s2] ss:$0 sm:$0xff]  ;;  %660 = vst.msk [vmem:[#allocation2 + $0x10] sm:$0xff] %vm657_vm1, %v1784_v6 }
   0xd   : > { %s2660_s22 = smov (!%p404_p3, %s1596_s22), 1  ;;  %658 = vst.msk [vmem:[#allocation2] sm:$0xff] %vm657_vm1, %v1784_v6  ;;  %v1917_v39 = vshrl.u32 %v678_v28, 7 }
   0xe   : > { %s1668_s25 = sshll.u32 %s2660_s22, 5  ;;  %659 = vst.msk [vmem:[#allocation2 + $0x8] sm:$0xff] %vm657_vm1, %v1784_v6  ;;  %s1669_s19 = sshll.u32 %s2660_s22, 3 }
   0xf   : > { %s408_s28 = scalar_lea.vmem %s2604_s0, %s1668_s25  ;;  %661 = vst.msk [vmem:[#allocation2 + $0x18] sm:$0xff] %vm657_vm1, %v1784_v6  ;;  %v1947_v63 = vadd.s32 48, %v1917_v39  ;;  %v1950_v0 = vadd.s32 40, %v1917_v39  ;;  %s413_s24 = scalar_lea.vmem %s2616_s12, %s1669_s19 }
  0x10   : > { %v1670_v1 = vld [vmem:[%s408_s28] sm:$0xff]  ;;  %v1672_v2 = vld [vmem:[%s408_s28 + $0x10] sm:$0xff]  ;;  %v1671_v3 = vld [vmem:[%s408_s28 + $0x8] sm:$0xff]  ;;  %662 = vst.msk [vmem:[#allocation2 + $0x20] sm:$0xff] %vm657_vm1, %v1784_v6 }
  0x11   : > { %1625 = vmatmul.msk.bf16.vlgmr.msra.gmra.mxu0 %vm455_vm0, %v1670_v1  ;;  %1627 = vmatmul.msk.bf16.vlgmr.msra.gmra.mxu3 %vm455_vm0, %v1672_v2  ;;  %v1673_v4 = vld [vmem:[%s408_s28 + $0x18] sm:$0xff]  ;;  %663 = vst.msk [vmem:[#allocation2 + $0x28] sm:$0xff] %vm657_vm1, %v1784_v6 }
  0x12   : > { %664 = vst.msk [vmem:[#allocation2 + $0x30] sm:$0xff] %vm657_vm1, %v1784_v6 }
  0x13   : > { %665 = vst.msk [vmem:[#allocation2 + $0x38] sm:$0xff] %vm657_vm1, %v1784_v6 }
  0x14   : > { %666 = vst.msk [vmem:[#allocation2 + $0x40] sm:$0xff] %vm657_vm1, %v1784_v6 }
  0x15   : > { %667 = vst.msk [vmem:[#allocation2 + $0x48] sm:$0xff] %vm657_vm1, %v1784_v6 }
  0x16   : > { %668 = vst.msk [vmem:[#allocation2 + $0x50] sm:$0xff] %vm657_vm1, %v1784_v6 }
  0x17   : > { %669 = vst.msk [vmem:[#allocation2 + $0x58] sm:$0xff] %vm657_vm1, %v1784_v6 }
  0x18   : > { %2625 = vst [vmem:[#allocation3_spill] sm:$0xff] %v1917_v39 }
  0x21   : > { %1626 = vmatmul.msk.bf16.gmra.mxu0 %vm455_vm0, %v1671_v3  ;;  %1628 = vmatmul.msk.bf16.gmra.mxu3 %vm455_vm0, %v1673_v4 }
  0x8e   : > { %v477_v7 = vpop.f32.mrf.mxu0 }
  0x8f   : > { %v1877_v8 = vadd.f32 %v1872_v5, %v477_v7  ;;  %v1960_v7 = vadd.s32 32, %v1917_v39 }
  0x91   : > { %v1629_v9 = vmul.f32 -1.442695, %v1877_v8 }
  0x93   : > { %1702 = vpow2.f32 %v1629_v9 }
  0x94   : > { %v487_v10 = vpop.f32.mrf.mxu3 }
  0x95   : > { %v1888_v11 = vadd.f32 %v1872_v5, %v487_v10 }
  0x96   : > { %v479_v12 = vpop.f32.mrf.mxu0 }
  0x97   : > { %v1633_v13 = vmul.f32 -1.442695, %v1888_v11  ;;  %v1894_v14 = vadd.f32 %v1872_v5, %v479_v12 }
  0x99   : > { %v1703_v15 = vpop.eup %1702  ;;  %1704 = vpow2.f32 %v1633_v13  ;;  %v1630_v16 = vmul.f32 -1.442695, %v1894_v14 }
  0x9a   : > { %v521_v17 = vadd.f32 1.0, %v1703_v15  ;;  %v733_v15 = vand.u32 7, %v1947_v63  ;;  %v2067_v63 = vld [vmem:[%s2607_s3 + $0x4] ss:$0 sm:$0xff] }
  0x9b   : > { %1706 = vpow2.f32 %v1630_v16 }
  0x9c   : > { %1708 = vrcp.f32 %v521_v17  ;;  %v489_v18 = vpop.f32.mrf.mxu3  ;;  %v538_v30 = vand.u32 2147483647, %v521_v17  ;;  %v540_v32 = vand.u32 2147483648, %v521_v17  ;;  %vm534_vm2 = vweird.f32 %v521_v17 }
  0x9d   : > { %v1899_v19 = vadd.f32 %v1872_v5, %v489_v18 }
  0x9e   : > { %v482_v20 = vpop.f32.mrf.mxu0  ;;  %vm1919_vm4 = vcmp.eq.f32.partialorder %v538_v30, 8.507059e+37  ;;  %v541_v45 = vor.u32 1.1754944e-38, %v540_v32 }
  0x9f   : > { %v1705_v21 = vpop.eup %1704  ;;  %v1634_v22 = vmul.f32 -1.442695, %v1899_v19  ;;  %v1903_v23 = vadd.f32 %v1872_v5, %v482_v20 }
  0xa0   : > { %v1905_v24 = vadd.f32 1.0, %v1705_v21 }
  0xa1   : > { %v1707_v25 = vpop.eup %1706  ;;  %1710 = vpow2.f32 %v1634_v22  ;;  %v1631_v26 = vmul.f32 -1.442695, %v1903_v23 }
  0xa2   : > { %v1709_v27 = vpop.eup %1708  ;;  %1712 = vrcp.f32 %v1905_v24  ;;  %v1909_v31 = vadd.f32 1.0, %v1707_v25  ;;  %v598_v35 = vand.u32 2147483647, %v1905_v24  ;;  %v600_v36 = vand.u32 2147483648, %v1905_v24 }
  0xa3   : > { %v530_v29 = vmul.f32 %v1709_v27, %v521_v17  ;;  %1714 = vpow2.f32 %v1631_v26  ;;  %vm535_vm3 = vweird.f32 %v1709_v27  ;;  %vm594_vm5 = vweird.f32 %v1905_v24 }
  0xa4   : > { %v492_v33 = vpop.f32.mrf.mxu3  ;;  %1716 = vrcp.f32 %v1909_v31  ;;  %vm1931_vm6 = vcmp.eq.f32.partialorder %v598_v35, 8.507059e+37  ;;  %v601_v52 = vor.u32 1.1754944e-38, %v600_v36  ;;  %vm536_vm7 = vmor %vm534_vm2, %vm535_vm3  ;;  %vm549_vm8 = vweird.f32 %v1909_v31 }
  0xa5   : > { %v531_v34 = vsub.f32 1.0, %v530_v29  ;;  %v1915_v37 = vadd.f32 %v1872_v5, %v492_v33  ;;  %v553_v53 = vand.u32 2147483647, %v1909_v31  ;;  %v555_v54 = vand.u32 2147483648, %v1909_v31 }
  0xa6   : > { %v484_v38 = vpop.f32.mrf.mxu0  ;;  %v686_v29 = vadd.s32 56, %v1917_v39 }
  0xa7   : > { %v1711_v40 = vpop.eup %1710  ;;  %v532_v41 = vmul.f32 %v1709_v27, %v531_v34  ;;  %v1924_v43 = vadd.f32 %v1872_v5, %v484_v38  ;;  %v1635_v47 = vmul.f32 -1.442695, %v1915_v37  ;;  %vm1954_vm10 = vcmp.eq.f32.partialorder %v553_v53, 8.507059e+37 }
  0xa8   : > { %v1713_v44 = vpop.eup %1712  ;;  %v1927_v46 = vadd.f32 1.0, %v1711_v40  ;;  %v556_v10 = vor.u32 1.1754944e-38, %v555_v54 }
  0xa9   : > { %v1715_v48 = vpop.eup %1714  ;;  %v533_v49 = vadd.f32 %v1709_v27, %v532_v41  ;;  %v590_v50 = vmul.f32 %v1713_v44, %v1905_v24  ;;  %v1632_v55 = vmul.f32 -1.442695, %v1924_v43  ;;  %vm595_vm9 = vweird.f32 %v1713_v44 }
  0xaa   : > { %1718 = vrcp.f32 %v1927_v46  ;;  %v1717_v56 = vpop.eup %1716  ;;  %v1941_v59 = vadd.f32 1.0, %v1715_v48  ;;  %v613_v6 = vand.u32 2147483647, %v1927_v46  ;;  %vm596_vm11 = vmor %vm594_vm5, %vm595_vm9  ;;  %vm609_vm13 = vweird.f32 %v1927_v46 }
  0xab   : > { %v537_v57 = vsel %vm536_vm7, %v1709_v27, %v533_v49  ;;  %v591_v58 = vsub.f32 1.0, %v590_v50  ;;  %1720 = vpow2.f32 %v1635_v47  ;;  %v545_v61 = vmul.f32 %v1717_v56, %v1909_v31 }
  0xac   : > { %v542_v60 = vsel %vm1919_vm4, %v541_v45, %v537_v57  ;;  %v494_v62 = vpop.f32.mrf.mxu3  ;;  %1722 = vrcp.f32 %v1941_v59  ;;  %vm550_vm12 = vweird.f32 %v1717_v56  ;;  %v615_v20 = vand.u32 2147483648, %v1927_v46 }
  0xad   : > { %v649_v1 = vmul.f32 %v542_v60, %v1877_v8  ;;  %v592_v2 = vmul.f32 %v1713_v44, %v591_v58  ;;  %v546_v3 = vsub.f32 1.0, %v545_v61  ;;  %1724 = vpow2.f32 %v1632_v55  ;;  %vm551_vm15 = vmor %vm549_vm8, %vm550_vm12  ;;  %v2128_v58 = vld [vmem:[%s2607_s3 + $0x2] ss:$0 sm:$0xff] }
  0xae   : > { %v1964_v8 = vadd.f32 %v1872_v5, %v494_v62  ;;  %vm1975_vm14 = vcmp.eq.f32.partialorder %v613_v6, 8.507059e+37  ;;  %v568_v33 = vand.u32 2147483647, %v1941_v59  ;;  %v570_v31 = vand.u32 2147483648, %v1941_v59 }
  0xaf   : > { %670 = vst.msk [vmem:[#allocation2 + $0x10] sm:$0xff] %vm657_vm1, %v649_v1  ;;  %v593_v9 = vadd.f32 %v1713_v44, %v592_v2  ;;  %v547_v13 = vmul.f32 %v1717_v56, %v546_v3  ;;  %v616_v38 = vor.u32 1.1754944e-38, %v615_v20  ;;  %v740_v45 = vand.u32 7, %v686_v29 }
  0xb0   : > { %v1719_v12 = vpop.eup %1718  ;;  %v1636_v21 = vmul.f32 -1.442695, %v1964_v8  ;;  %v1998_v47 = vadd.s32 4294967295, %v733_v15  ;;  %vm564_vm3 = vweird.f32 %v1941_v59  ;;  %vm2005_vm5 = vcmp.eq.f32.partialorder %v568_v33, 8.507059e+37  ;;  %v1179_v33 = vld [vmem:[#allocation2 + $0x51] sm:$0xff] }
  0xb1   : > { %v1721_v16 = vpop.eup %1720  ;;  %v597_v17 = vsel %vm596_vm11, %v1713_v44, %v593_v9  ;;  %v605_v18 = vmul.f32 %v1719_v12, %v1927_v46  ;;  %v548_v22 = vadd.f32 %v1717_v56, %v547_v13  ;;  %vm610_vm0 = vweird.f32 %v1719_v12 }
  0xb2   : > { %v602_v5 = vsel %vm1931_vm6, %v601_v52, %v597_v17  ;;  %v1979_v25 = vadd.f32 1.0, %v1721_v16  ;;  %v1723_v26 = vpop.eup %1722  ;;  %1726 = vpow2.f32 %v1636_v21  ;;  %vm611_vm2 = vmor %vm609_vm13, %vm610_vm0  ;;  %v571_v51 = vor.u32 1.1754944e-38, %v570_v31  ;;  %v2041_v17 = vld [vmem:[%s2607_s3 + $0x1] ss:$0 sm:$0xff] }
  0xb3   : > { %v653_v27 = vmul.f32 %v602_v5, %v1888_v11  ;;  %v606_v28 = vsub.f32 1.0, %v605_v18  ;;  %v552_v30 = vsel %vm551_vm15, %v1717_v56, %v548_v22  ;;  %v560_v32 = vmul.f32 %v1723_v26, %v1941_v59  ;;  %v1725_v34 = vpop.eup %1724  ;;  %2638 = vst [vmem:[#allocation4_spill] sm:$0xff] %v2041_v17 }
  0xb4   : > { %1728 = vrcp.f32 %v1979_v25  ;;  %v557_v11 = vsel %vm1954_vm10, %v556_v10, %v552_v30  ;;  %v1993_v41 = vadd.f32 1.0, %v1725_v34  ;;  %v628_v44 = vand.u32 2147483647, %v1979_v25 }
  0xb5   : > { %674 = vst.msk [vmem:[#allocation2 + $0x30] sm:$0xff] %vm657_vm1, %v653_v27  ;;  %v607_v35 = vmul.f32 %v1719_v12, %v606_v28  ;;  %v650_v36 = vmul.f32 %v557_v11, %v1894_v14  ;;  %v561_v40 = vsub.f32 1.0, %v560_v32  ;;  %vm565_vm4 = vweird.f32 %v1723_v26 }
  0xb6   : > { %1730 = vrcp.f32 %v1993_v41  ;;  %v630_v52 = vand.u32 2147483648, %v1979_v25  ;;  %vm624_vm6 = vweird.f32 %v1979_v25  ;;  %vm566_vm7 = vmor %vm564_vm3, %vm565_vm4  ;;  %vm2017_vm8 = vcmp.eq.f32.partialorder %v628_v44, 8.507059e+37 }
  0xb7   : > { %v608_v42 = vadd.f32 %v1719_v12, %v607_v35  ;;  %671 = vst.msk [vmem:[#allocation2 + $0x18] sm:$0xff] %vm657_vm1, %v650_v36  ;;  %v562_v48 = vmul.f32 %v1723_v26, %v561_v40  ;;  %v2021_v59 = vadd.s32 4294967295, %v740_v45  ;;  %vm805_vm9 = vcmp.ge.s32.totalorder %v1998_v47, 0  ;;  %v2092_v40 = vld [vmem:[%s2607_s3 + $0x7] ss:$0 sm:$0xff] }
  0xb8   : > { %v1727_v14 = vpop.eup %1726  ;;  %v583_v61 = vand.u32 2147483647, %v1993_v41  ;;  %v2026_v62 = vadd.s32 1, %v740_v45  ;;  %v631_v2 = vor.u32 1.1754944e-38, %v630_v52  ;;  %vm579_vm10 = vweird.f32 %v1993_v41  ;;  %v1149_v45 = vld [vmem:[#allocation2 + $0x50] sm:$0xff] }
  0xb9   : > { %v612_v49 = vsel %vm611_vm2, %v1719_v12, %v608_v42  ;;  %v563_v54 = vadd.f32 %v1723_v26, %v562_v48  ;;  %v2013_v55 = vadd.f32 1.0, %v1727_v14  ;;  %v585_v6 = vand.u32 2147483648, %v1993_v41 }
  0xba   : > { %v1729_v53 = vpop.eup %1728  ;;  %v617_v46 = vsel %vm1975_vm14, %v616_v38, %v612_v49  ;;  %v726_v9 = vand.u32 7, %v1950_v0  ;;  %vm2044_vm12 = vcmp.eq.f32.partialorder %v583_v61, 8.507059e+37  ;;  %vm975_vm13 = vcmp.lt.s32.totalorder %v2026_v62, 8  ;;  %v2136_v61 = vld [vmem:[%s2607_s3 + $0x8] ss:$0 sm:$0xff] }
  0xbb   : > { %v654_v56 = vmul.f32 %v617_v46, %v1899_v19  ;;  %v620_v57 = vmul.f32 %v1729_v53, %v1979_v25  ;;  %v567_v60 = vsel %vm566_vm7, %v1723_v26, %v563_v54  ;;  %1732 = vrcp.f32 %v2013_v55 }
  0xbc   : > { %v572_v19 = vsel %vm2005_vm5, %v571_v51, %v567_v60  ;;  %v1731_v3 = vpop.eup %1730  ;;  %vm625_vm11 = vweird.f32 %v1729_v53  ;;  %v643_v13 = vand.u32 2147483647, %v2013_v55  ;;  %v645_v16 = vand.u32 2147483648, %v2013_v55  ;;  %v872_v18 = vld [vmem:[#allocation2 + $0x30] sm:$0xff] }
  0xbd   : > { %675 = vst.msk [vmem:[#allocation2 + $0x38] sm:$0xff] %vm657_vm1, %v654_v56  ;;  %v621_v1 = vsub.f32 1.0, %v620_v57  ;;  %v651_v4 = vmul.f32 %v572_v19, %v1903_v23  ;;  %v575_v12 = vmul.f32 %v1731_v3, %v1993_v41  ;;  %v2051_v0 = vadd.s32 1, %v733_v15  ;;  %vm626_vm14 = vmor %vm624_vm6, %vm625_vm11 }
  0xbe   : > { %v2053_v20 = vadd.s32 4294967295, %v726_v9  ;;  %v2055_v22 = vadd.s32 1, %v726_v9  ;;  %v719_v24 = vand.u32 7, %v1960_v7  ;;  %vm580_vm15 = vweird.f32 %v1731_v3 }
  0xbf   : > { %v622_v10 = vmul.f32 %v1729_v53, %v621_v1  ;;  %672 = vst.msk [vmem:[#allocation2 + $0x20] sm:$0xff] %vm657_vm1, %v651_v4  ;;  %v576_v5 = vsub.f32 1.0, %v575_v12  ;;  %v586_v27 = vor.u32 1.1754944e-38, %v585_v6  ;;  %vm639_vm0 = vweird.f32 %v2013_v55  ;;  %vm581_vm7 = vmor %vm579_vm10, %vm580_vm15 }
  0xc0   : > { %v2070_v15 = vmul.f32 %v2041_v17, %v872_v18  ;;  %vm2074_vm2 = vcmp.eq.f32.partialorder %v643_v13, 8.507059e+37  ;;  %v646_v30 = vor.u32 1.1754944e-38, %v645_v16  ;;  %vm806_vm3 = vcmp.ge.s32.totalorder %v2021_v59, 0  ;;  %v2178_v16 = vld [vmem:[%s2607_s3 + $0x5] ss:$0 sm:$0xff] }
  0xc1   : > { %v623_v21 = vadd.f32 %v1729_v53, %v622_v10  ;;  %v2058_v26 = vpop.eup %1732  ;;  %v577_v7 = vmul.f32 %v1731_v3, %v576_v5  ;;  %vm974_vm4 = vcmp.lt.s32.totalorder %v2051_v0, 8  ;;  %vm804_vm5 = vcmp.ge.s32.totalorder %v2053_v20, 0 }
  0xc2   : > { %v635_v29 = vmul.f32 %v2058_v26, %v2013_v55  ;;  %v2083_v11 = vadd.s32 4294967295, %v719_v24  ;;  %v2086_v35 = vmul.f32 %v2067_v63, %v872_v18  ;;  %vm973_vm6 = vcmp.lt.s32.totalorder %v2055_v22, 8  ;;  %v2160_v55 = vld [vmem:[%s2607_s3 + $0x6] ss:$0 sm:$0xff] }
  0xc3   : > { %v627_v28 = vsel %vm626_vm14, %v1729_v53, %v623_v21  ;;  %v578_v36 = vadd.f32 %v1731_v3, %v577_v7  ;;  %v2108_v14 = vadd.s32 1, %v719_v24  ;;  %v682_v49 = vadd.s32 24, %v1917_v39 }
  0xc4   : > { %v632_v32 = vsel %vm2017_vm8, %v631_v2, %v627_v28  ;;  %v789_v34 = vld [vmem:[#allocation2 + $0x37] sm:$0xff]  ;;  %v636_v38 = vsub.f32 1.0, %v635_v29  ;;  %vm640_vm8 = vweird.f32 %v2058_v26  ;;  %v1187_v51 = vsel %vm975_vm13, %v1179_v33, 0.0 }
  0xc5   : > { %v655_v31 = vmul.f32 %v632_v32, %v1915_v37  ;;  %v873_v42 = vld [vmem:[#allocation2 + $0x38] sm:$0xff]  ;;  %v2104_v37 = vld [vmem:[%s2607_s3] ss:$0 sm:$0xff]  ;;  %v845_v48 = vsel %vm805_vm9, %v789_v34, 0.0  ;;  %v582_v50 = vsel %vm581_vm7, %v1731_v3, %v578_v36  ;;  %vm803_vm10 = vcmp.ge.s32.totalorder %v2083_v11, 0  ;;  %vm641_vm11 = vmor %vm639_vm0, %vm640_vm8 }
  0xc6   : > { %v2094_v44 = vld [vmem:[#allocation2 + $0x31] sm:$0xff]  ;;  %v637_v41 = vmul.f32 %v2058_v26, %v636_v38  ;;  %v934_v52 = vmul.f32 %v2041_v17, %v873_v42  ;;  %v587_v53 = vsel %vm2044_vm12, %v586_v27, %v582_v50  ;;  %v857_v46 = vmul.f32 %v2104_v37, %v845_v48  ;;  %v2171_v12 = vld [vmem:[#allocation2 + $0x20] sm:$0xff] }
  0xc7   : > { %676 = vst.msk [vmem:[#allocation2 + $0x40] sm:$0xff] %vm657_vm1, %v655_v31  ;;  %v1005_v54 = vsel %vm973_vm6, %v2094_v44, 0.0  ;;  %v652_v56 = vmul.f32 %v587_v53, %v1924_v43  ;;  %v2131_v60 = vmul.f32 %v2092_v40, %v1149_v45  ;;  %v2139_v19 = vmul.f32 %v2092_v40, %v872_v18  ;;  %v2148_v43 = vld [vmem:[%s2607_s3 + $0x3] ss:$0 sm:$0xff]  ;;  %v2195_v28 = vld [vmem:[#allocation2 + $0x18] sm:$0xff] }
  0xc8   : > { %v638_v57 = vadd.f32 %v2058_v26, %v637_v41  ;;  %v1035_v1 = vsel %vm804_vm5, %v789_v34, 0.0  ;;  %vm972_vm12 = vcmp.lt.s32.totalorder %v2108_v14, 8  ;;  %v1124_v2 = vsel %vm803_vm10, %v789_v34, 0.0  ;;  %2643 = vst [vmem:[#allocation5_spill] sm:$0xff] %v2171_v12 }
  0xc9   : > { %v712_v3 = vand.u32 7, %v682_v49  ;;  %673 = vst.msk [vmem:[#allocation2 + $0x28] sm:$0xff] %vm657_vm1, %v652_v56  ;;  %v2163_v6 = vmul.f32 %v2136_v61, %v1187_v51  ;;  %v2166_v9 = vmul.f32 %v2128_v58, %v1005_v54  ;;  %v1094_v10 = vsel %vm972_vm12, %v2094_v44, 0.0 }
  0xca   : > { %v642_v4 = vsel %vm641_vm11, %v2058_v26, %v638_v57  ;;  %v942_v18 = vadd.f32 %v934_v52, %v857_v46  ;;  %v2181_v23 = vmul.f32 %v2067_v63, %v873_v42  ;;  %v2187_v24 = vmul.f32 %v2148_v43, %v1035_v1  ;;  %2644 = vst [vmem:[#allocation6_spill] sm:$0xff] %v2195_v28  ;;  %v2230_v52 = vld [vmem:[#allocation2 + $0x1f] sm:$0xff] }
  0xcb   : > { %v647_v13 = vsel %vm2074_vm2, %v646_v30, %v642_v4  ;;  %v2183_v21 = vadd.s32 4294967295, %v712_v3  ;;  %v2190_v26 = vmul.f32 %v2160_v55, %v1124_v2  ;;  %v2193_v27 = vmul.f32 %v2092_v40, %v873_v42 }
  0xcc   : > { %v656_v5 = vmul.f32 %v647_v13, %v1964_v8  ;;  %v2198_v30 = vmul.f32 %v2178_v16, %v1094_v10  ;;  %v2202_v8 = vmul.f32 %v2041_v17, %v2171_v12  ;;  %v2204_v32 = vadd.s32 1, %v712_v3 }
  0xcd   : > { %v2207_v33 = vadd.s32 16, %v1917_v39  ;;  %vm802_vm14 = vcmp.ge.s32.totalorder %v2183_v21, 0  ;;  %v2222_v48 = vmul.f32 %v2041_v17, %v2195_v28 }
  0xce   : > { %v790_v7 = vld [vmem:[#allocation2 + $0x3f] sm:$0xff]  ;;  %677 = vst.msk [vmem:[#allocation2 + $0x48] sm:$0xff] %vm657_vm1, %v656_v5  ;;  %vm971_vm15 = vcmp.lt.s32.totalorder %v2204_v32, 8  ;;  %v842_v11 = vsel %vm802_vm14, %v2230_v52, 0.0 }
  0xcf   : > { %v874_v29 = vld [vmem:[#allocation2 + $0x40] sm:$0xff]  ;;  %v846_v34 = vsel %vm806_vm3, %v790_v7, 0.0  ;;  %v1036_v38 = vsel %vm805_vm9, %v790_v7, 0.0  ;;  %v1125_v51 = vsel %vm804_vm5, %v790_v7, 0.0 }
  0xd0   : > { %v950_v25 = vld [vmem:[#allocation2 + $0x39] sm:$0xff]  ;;  %v935_v31 = vmul.f32 %v2041_v17, %v874_v29  ;;  %v858_v42 = vmul.f32 %v2104_v37, %v846_v34  ;;  %v1049_v49 = vmul.f32 %v2148_v43, %v1036_v38  ;;  %v1079_v50 = vmul.f32 %v2067_v63, %v874_v29  ;;  %v2232_v54 = vld [vmem:[#allocation2 + $0x2f] sm:$0xff]  ;;  %v2237_v57 = vld [vmem:[#allocation2 + $0x27] sm:$0xff] }
  0xd1   : > { %v1006_v36 = vsel %vm974_vm4, %v950_v25, 0.0  ;;  %v1095_v41 = vsel %vm973_vm6, %v950_v25, 0.0  ;;  %v2235_v56 = vmul.f32 %v2092_v40, %v874_v29  ;;  %v2239_v1 = vld [vmem:[#allocation2 + $0x28] sm:$0xff]  ;;  %v1184_v2 = vsel %vm972_vm12, %v950_v25, 0.0 }
  0xd2   : > { %v1019_v45 = vmul.f32 %v2128_v58, %v1006_v36  ;;  %v943_v53 = vadd.f32 %v935_v31, %v858_v42  ;;  %v844_v3 = vsel %vm804_vm5, %v2232_v54, 0.0  ;;  %v843_v4 = vsel %vm803_vm10, %v2237_v57, 0.0  ;;  %v2251_v13 = vld [vmem:[#allocation2 + $0x29] sm:$0xff] }
  0xd3   : > { %v932_v10 = vmul.f32 %v2041_v17, %v2239_v1  ;;  %v856_v7 = vmul.f32 %v2104_v37, %v844_v3  ;;  %v855_v29 = vmul.f32 %v2104_v37, %v843_v4  ;;  %v1004_v20 = vsel %vm972_vm12, %v2251_v13, 0.0 }
  0xd4   : > { %v1027_v46 = vadd.f32 %v1019_v45, %v942_v18  ;;  %v1034_v18 = vsel %vm803_vm10, %v2232_v54, 0.0  ;;  %v1108_v25 = vmul.f32 %v2178_v16, %v1095_v41  ;;  %v2264_v34 = vmul.f32 %v2160_v55, %v1125_v51 }
  0xd5   : > { %v1017_v31 = vmul.f32 %v2128_v58, %v1004_v20  ;;  %v951_v36 = vld [vmem:[#allocation2 + $0x41] sm:$0xff]  ;;  %v941_v14 = vadd.f32 %v2070_v15, %v856_v7  ;;  %v1089_v3 = vld [vmem:[#allocation2 + $0x49] sm:$0xff]  ;;  %v940_v28 = vadd.f32 %v932_v10, %v855_v29 }
  0xd6   : > { %v1057_v5 = vadd.f32 %v1049_v49, %v1027_v46  ;;  %v1029_v38 = vld [vmem:[#allocation2 + $0x47] sm:$0xff]  ;;  %v1047_v49 = vmul.f32 %v2148_v43, %v1034_v18  ;;  %v2273_v46 = vmul.f32 %v2136_v61, %v1184_v2  ;;  %v1007_v41 = vsel %vm975_vm13, %v951_v36, 0.0  ;;  %v1119_v4 = vld [vmem:[#allocation2 + $0x4f] sm:$0xff] }
  0xd7   : > { %v1059_v42 = vld [vmem:[#allocation2 + $0x48] sm:$0xff]  ;;  %v1037_v51 = vsel %vm806_vm3, %v1029_v38, 0.0  ;;  %v1096_v20 = vsel %vm974_vm4, %v951_v36, 0.0  ;;  %v1097_v15 = vsel %vm975_vm13, %v1089_v3, 0.0  ;;  %v1127_v2 = vsel %vm806_vm3, %v1119_v4, 0.0 }
  0xd8   : > { %v1087_v45 = vadd.f32 %v1079_v50, %v1057_v5  ;;  %v1020_v50 = vmul.f32 %v2128_v58, %v1007_v41  ;;  %v854_v18 = vmul.f32 %v2104_v37, %v842_v11  ;;  %v1050_v5 = vmul.f32 %v2148_v43, %v1037_v51  ;;  %v2296_v41 = vld [vmem:[#allocation2 + $0x21] sm:$0xff] }
  0xd9   : > { %v1080_v7 = vmul.f32 %v2067_v63, %v1059_v42  ;;  %v1109_v17 = vmul.f32 %v2178_v16, %v1096_v20  ;;  %v1126_v12 = vsel %vm805_vm9, %v1029_v38, 0.0  ;;  %v1110_v29 = vmul.f32 %v2178_v16, %v1097_v15 }
  0xda   : > { %v1028_v10 = vadd.f32 %v1020_v50, %v943_v53  ;;  %v1140_v62 = vmul.f32 %v2160_v55, %v1127_v2  ;;  %v1186_v59 = vsel %vm974_vm4, %v1089_v3, 0.0  ;;  %v1139_v51 = vmul.f32 %v2160_v55, %v1126_v12 }
  0xdb   : > { %v1117_v11 = vadd.f32 %v1109_v17, %v1087_v45  ;;  %v1169_v4 = vmul.f32 %v2092_v40, %v1059_v42  ;;  %v1026_v20 = vadd.f32 %v2166_v9, %v941_v14  ;;  %v1199_v47 = vmul.f32 %v2136_v61, %v1186_v59 }
  0xdc   : > { %v1058_v39 = vadd.f32 %v1050_v5, %v1028_v10  ;;  %v1185_v53 = vsel %vm973_vm6, %v951_v36, 0.0  ;;  %v1025_v38 = vadd.f32 %v1017_v31, %v940_v28  ;;  %v1003_v17 = vsel %vm971_vm15, %v2296_v41, 0.0 }
  0xdd   : > { %v1147_v50 = vadd.f32 %v1139_v51, %v1117_v11  ;;  %v1056_v0 = vadd.f32 %v2187_v24, %v1026_v20  ;;  %v1033_v12 = vsel %vm802_vm14, %v2237_v57, 0.0  ;;  %v939_v45 = vadd.f32 %v2202_v8, %v854_v18  ;;  %v2323_v8 = vld [vmem:[%s2608_s4] ss:$0 sm:$0xff]  ;;  %v2345_v20 = vld [vmem:[#allocation2 + $0x17] sm:$0xff] }
  0xde   : > { %v1088_v42 = vadd.f32 %v1080_v7, %v1058_v39  ;;  %v1055_v9 = vadd.f32 %v1047_v49, %v1025_v38  ;;  %v1016_v14 = vmul.f32 %v2128_v58, %v1003_v17  ;;  %v1198_v31 = vmul.f32 %v2136_v61, %v1185_v53  ;;  %v2350_v53 = vld [vmem:[#allocation2 + $0x19] sm:$0xff] }
  0xdf   : > { %v1177_v22 = vadd.f32 %v1169_v4, %v1147_v50  ;;  %v1086_v28 = vadd.f32 %v2181_v23, %v1056_v0  ;;  %v1093_v24 = vsel %vm971_vm15, %v2251_v13, 0.0  ;;  %v1046_v39 = vmul.f32 %v2148_v43, %v1033_v12 }
  0xe0   : > { %v1118_v36 = vadd.f32 %v1110_v29, %v1088_v42  ;;  %v1085_v3 = vadd.f32 %v2086_v35, %v1055_v9  ;;  %v1024_v15 = vadd.f32 %v1016_v14, %v939_v45  ;;  %v1076_v23 = vmul.f32 %v2067_v63, %v2239_v1 }
  0xe1   : > { %v1207_v49 = vadd.f32 %v1199_v47, %v1177_v22  ;;  %v1116_v2 = vadd.f32 %v1108_v25, %v1086_v28  ;;  %v1123_v18 = vsel %vm802_vm14, %v2232_v54, 0.0  ;;  %v1106_v10 = vmul.f32 %v2178_v16, %v1093_v24  ;;  %v2645_v28 = vld [vmem:[#allocation3_spill] sm:$0xff] }
  0xe2   : > { %v1148_v5 = vadd.f32 %v1140_v62, %v1118_v36  ;;  %v1115_v35 = vadd.f32 %v2198_v30, %v1085_v3  ;;  %v1054_v7 = vadd.f32 %v1046_v39, %v1024_v15  ;;  %v1183_v25 = vsel %vm971_vm15, %v2094_v44, 0.0 }
  0xe3   : > { %v2333_v29 = vadd.f32 %v2323_v8, %v1207_v49  ;;  %v1146_v59 = vadd.f32 %v2264_v34, %v1116_v2  ;;  %v705_v11 = vand.u32 7, %v2207_v33  ;;  %v1136_v30 = vmul.f32 %v2160_v55, %v1123_v18  ;;  %v2646_v18 = vld [vmem:[#allocation5_spill] sm:$0xff] }
  0xe4   : > { %v1178_v21 = vadd.f32 %v2131_v60, %v1148_v5  ;;  %v1145_v54 = vadd.f32 %v2190_v26, %v1115_v35  ;;  %v1084_v62 = vadd.f32 %v1076_v23, %v1054_v7  ;;  %v1196_v60 = vmul.f32 %v2136_v61, %v1183_v25 }
  0xe5   : > { %v1651_v51 = vmul.f32 -1.442695, %v2333_v29  ;;  %v1176_v4 = vadd.f32 %v2235_v56, %v1146_v59  ;;  %v793_v34 = vadd.s32 4294967295, %v705_v11  ;;  %v954_v47 = vadd.s32 1, %v705_v11 }
  0xe6   : > { %v1208_v32 = vadd.f32 %v2163_v6, %v1178_v21  ;;  %v1175_v44 = vadd.f32 %v2193_v27, %v1145_v54  ;;  %v1114_v33 = vadd.f32 %v1106_v10, %v1084_v62  ;;  %v1075_v5 = vmul.f32 %v2067_v63, %v2646_v18  ;;  %v2396_v62 = vld [vmem:[#allocation2 + $0x10] sm:$0xff] }
  0xe7   : > { %1734 = vpow2.f32 %v1651_v51  ;;  %v1206_v26 = vadd.f32 %v1198_v31, %v1176_v4  ;;  %vm801_vm9 = vcmp.ge.s32.totalorder %v793_v34, 0  ;;  %vm970_vm13 = vcmp.lt.s32.totalorder %v954_v47, 8 }
  0xe8   : > { %v2353_v38 = vadd.f32 %v2323_v8, %v1208_v32  ;;  %v1205_v56 = vadd.f32 %v2273_v46, %v1175_v44  ;;  %v1144_v50 = vadd.f32 %v1136_v30, %v1114_v33  ;;  %v841_v6 = vsel %vm801_vm9, %v2345_v20, 0.0  ;;  %v2406_v33 = vld [vmem:[#allocation2 + $0xf] sm:$0xff] }
  0xe9   : > { %v2359_v27 = vadd.f32 %v2323_v8, %v1206_v26  ;;  %v853_v0 = vmul.f32 %v2104_v37, %v841_v6  ;;  %v1002_v17 = vsel %vm970_vm13, %v2350_v53, 0.0  ;;  %v1032_v12 = vsel %vm801_vm9, %v2230_v52, 0.0 }
  0xea   : > { %v1652_v42 = vmul.f32 -1.442695, %v2353_v38  ;;  %v2368_v9 = vadd.f32 %v2323_v8, %v1205_v56  ;;  %v1174_v46 = vadd.f32 %v2139_v19, %v1144_v50  ;;  %v1015_v45 = vmul.f32 %v2128_v58, %v1002_v17 }
  0xeb   : > { %v1650_v14 = vmul.f32 -1.442695, %v2359_v27  ;;  %v938_v22 = vadd.f32 %v2222_v48, %v853_v0  ;;  %v680_v31 = vadd.s32 8, %v2645_v28  ;;  %v1045_v39 = vmul.f32 %v2148_v43, %v1032_v12  ;;  %v2648_v12 = vld [vmem:[#allocation6_spill] sm:$0xff] }
  0xec   : > { %1736 = vpow2.f32 %v1652_v42  ;;  %v1649_v24 = vmul.f32 -1.442695, %v2368_v9  ;;  %v1204_v36 = vadd.f32 %v1196_v60, %v1174_v46  ;;  %v1092_v19 = vsel %vm970_vm13, %v2296_v41, 0.0  ;;  %v2647_v60 = vld [vmem:[#allocation4_spill] sm:$0xff] }
  0xed   : > { %v1735_v3 = vpop.eup %1734  ;;  %1738 = vpow2.f32 %v1650_v14  ;;  %v1023_v15 = vadd.f32 %v1015_v45, %v938_v22  ;;  %v698_v23 = vand.u32 7, %v680_v31  ;;  %v1105_v35 = vmul.f32 %v2178_v16, %v1092_v19 }
  0xee   : > { %v2379_v49 = vadd.f32 1.0, %v1735_v3  ;;  %v2382_v2 = vadd.f32 %v2323_v8, %v1204_v36  ;;  %1740 = vpow2.f32 %v1649_v24  ;;  %v1122_v7 = vsel %vm801_vm9, %v2237_v57, 0.0 }
  0xef   : > { %v1053_v48 = vadd.f32 %v1045_v39, %v1023_v15  ;;  %v2391_v59 = vadd.s32 4294967295, %v698_v23  ;;  %v1182_v54 = vsel %vm970_vm13, %v2251_v13, 0.0  ;;  %v1135_v4 = vmul.f32 %v2160_v55, %v1122_v7  ;;  %v2439_v39 = vld [vmem:[#allocation2 + $0x11] sm:$0xff] }
  0xf0   : > { %1742 = vrcp.f32 %v2379_v49  ;;  %v1648_v10 = vmul.f32 -1.442695, %v2382_v2  ;;  %v1354_v11 = vand.u32 2147483648, %v2379_v49  ;;  %v1165_v57 = vmul.f32 %v2092_v40, %v2239_v1 }
  0xf1   : > { %v1083_v21 = vadd.f32 %v1075_v5, %v1053_v48  ;;  %v1352_v34 = vand.u32 2147483647, %v2379_v49  ;;  %vm800_vm0 = vcmp.ge.s32.totalorder %v2391_v59, 0  ;;  %v1195_v47 = vmul.f32 %v2136_v61, %v1182_v54 }
  0xf2   : > { %v1737_v25 = vpop.eup %1736  ;;  %1744 = vpow2.f32 %v1648_v10  ;;  %v929_v26 = vmul.f32 %v2647_v60, %v2396_v62  ;;  %v2413_v56 = vadd.s32 1, %v698_v23  ;;  %vm1348_vm2 = vweird.f32 %v2379_v49 }
  0xf3   : > { %v1739_v30 = vpop.eup %1738  ;;  %v2398_v51 = vadd.f32 1.0, %v1737_v25  ;;  %v1113_v44 = vadd.f32 %v1105_v35, %v1083_v21  ;;  %v1355_v6 = vor.u32 1.1754944e-38, %v1354_v11  ;;  %v840_v17 = vsel %vm800_vm0, %v2406_v33, 0.0 }
  0xf4   : > { %v2404_v32 = vadd.f32 1.0, %v1739_v30  ;;  %v1741_v13 = vpop.eup %1740  ;;  %v2424_v42 = vmul.f32 %v2067_v63, %v2648_v12  ;;  %v2428_v46 = vmul.f32 %v2092_v40, %v2646_v18  ;;  %vm2431_vm3 = vcmp.eq.f32.partialorder %v1352_v34, 8.507059e+37 }
  0xf5   : > { %1746 = vrcp.f32 %v2398_v51  ;;  %v1369_v50 = vand.u32 2147483648, %v2398_v51  ;;  %v1367_v45 = vand.u32 2147483647, %v2398_v51  ;;  %v2436_v31 = vadd.f32 1.0, %v1741_v13 }
  0xf6   : > { %v1743_v1 = vpop.eup %1742  ;;  %1748 = vrcp.f32 %v2404_v32  ;;  %v1339_v22 = vand.u32 2147483648, %v2404_v32  ;;  %v1143_v24 = vadd.f32 %v1135_v4, %v1113_v44  ;;  %v1337_v15 = vand.u32 2147483647, %v2404_v32 }
  0xf7   : > { %v1344_v0 = vmul.f32 %v1743_v1, %v2379_v49  ;;  %vm969_vm4 = vcmp.lt.s32.totalorder %v2413_v56, 8  ;;  %v1031_v19 = vsel %vm800_vm0, %v2345_v20, 0.0  ;;  %vm1363_vm5 = vweird.f32 %v2398_v51 }
  0xf8   : > { %v1745_v36 = vpop.eup %1744  ;;  %v1370_v48 = vor.u32 1.1754944e-38, %v1369_v50  ;;  %1750 = vrcp.f32 %v2436_v31  ;;  %v852_v23 = vmul.f32 %v2104_v37, %v840_v17  ;;  %vm1349_vm6 = vweird.f32 %v1743_v1 }
  0xf9   : > { %v1345_v3 = vsub.f32 1.0, %v1344_v0  ;;  %vm1333_vm7 = vweird.f32 %v2404_v32  ;;  %v2449_v35 = vadd.f32 1.0, %v1745_v36  ;;  %v1173_v7 = vadd.f32 %v1165_v57, %v1143_v24  ;;  %vm1350_vm12 = vmor %vm1348_vm2, %vm1349_vm6 }
  0xfa   : > { %vm2452_vm8 = vcmp.eq.f32.partialorder %v1367_v45, 8.507059e+37  ;;  %v1340_v21 = vor.u32 1.1754944e-38, %v1339_v22  ;;  %v1324_v54 = vand.u32 2147483648, %v2436_v31  ;;  %v1001_v30 = vsel %vm969_vm4, %v2439_v39, 0.0 }
  0xfb   : > { %v1747_v18 = vpop.eup %1746  ;;  %v1346_v5 = vmul.f32 %v1743_v1, %v1345_v3  ;;  %vm2461_vm10 = vcmp.eq.f32.partialorder %v1337_v15, 8.507059e+37  ;;  %v1322_v57 = vand.u32 2147483647, %v2436_v31  ;;  %1752 = vrcp.f32 %v2449_v35 }
  0xfc   : > { %v1749_v10 = vpop.eup %1748  ;;  %v1359_v25 = vmul.f32 %v1747_v18, %v2398_v51  ;;  %vm1364_vm11 = vweird.f32 %v1747_v18  ;;  %v937_v50 = vadd.f32 %v929_v26, %v852_v23  ;;  %v1044_v0 = vmul.f32 %v2148_v43, %v1031_v19 }
  0xfd   : > { %v1347_v4 = vadd.f32 %v1743_v1, %v1346_v5  ;;  %v1329_v34 = vmul.f32 %v1749_v10, %v2404_v32  ;;  %vm1318_vm14 = vweird.f32 %v2436_v31  ;;  %v1203_v22 = vadd.f32 %v1195_v47, %v1173_v7  ;;  %vm1365_vm2 = vmor %vm1363_vm5, %vm1364_vm11 }
  0xfe   : > { %v1360_v13 = vsub.f32 1.0, %v1359_v25  ;;  %v1014_v24 = vmul.f32 %v2128_v58, %v1001_v30  ;;  %v1751_v36 = vpop.eup %1750  ;;  %vm1334_vm15 = vweird.f32 %v1749_v10  ;;  %v1325_v15 = vor.u32 1.1754944e-38, %v1324_v54 }
  0xff   : > { %v1351_v17 = vsel %vm1350_vm12, %v1743_v1, %v1347_v4  ;;  %v1330_v45 = vsub.f32 1.0, %v1329_v34  ;;  %v1307_v5 = vand.u32 2147483647, %v2449_v35  ;;  %v1314_v26 = vmul.f32 %v1751_v36, %v2436_v31  ;;  %vm1335_vm6 = vmor %vm1333_vm7, %vm1334_vm15 }
 0x100   : > { %v1361_v3 = vmul.f32 %v1747_v18, %v1360_v13  ;;  %v1356_v49 = vsel %vm2431_vm3, %v1355_v6, %v1351_v17  ;;  %vm2477_vm9 = vcmp.eq.f32.partialorder %v1322_v57, 8.507059e+37  ;;  %v1309_v47 = vand.u32 2147483648, %v2449_v35 }
 0x101   : > { %v1331_v25 = vmul.f32 %v1749_v10, %v1330_v45  ;;  %vm1303_vm13 = vweird.f32 %v2449_v35  ;;  %v2484_v23 = vadd.f32 %v2323_v8, %v1203_v22  ;;  %v1022_v7 = vadd.f32 %v1014_v24, %v937_v50  ;;  %v1753_v14 = vpop.eup %1752 }
 0x102   : > { %v1362_v19 = vadd.f32 %v1747_v18, %v1361_v3  ;;  %v1091_v6 = vsel %vm969_vm4, %v2350_v53, 0.0  ;;  %v1315_v30 = vsub.f32 1.0, %v1314_v26  ;;  %vm1319_vm3 = vweird.f32 %v1751_v36 }
 0x103   : > { %v1332_v54 = vadd.f32 %v1749_v10, %v1331_v25  ;;  %v1104_v4 = vmul.f32 %v2178_v16, %v1091_v6  ;;  %v1299_v57 = vmul.f32 %v1753_v14, %v2449_v35  ;;  %v1647_v13 = vmul.f32 -1.442695, %v2484_v23 }
 0x104   : > { %v1366_v34 = vsel %vm1365_vm2, %v1747_v18, %v1362_v19  ;;  %v1121_v50 = vsel %vm800_vm0, %v2230_v52, 0.0  ;;  %v1316_v45 = vmul.f32 %v1751_v36, %v1315_v30  ;;  %v1052_v22 = vadd.f32 %v1044_v0, %v1022_v7  ;;  %vm1320_vm0 = vmor %vm1318_vm14, %vm1319_vm3  ;;  %v783_v0 = vld [vmem:[#allocation2 + $0x7] sm:$0xff] }
 0x105   : > { %v1371_v51 = vsel %vm2452_vm8, %v1370_v48, %v1366_v34  ;;  %v1336_v17 = vsel %vm1335_vm6, %v1749_v10, %v1332_v54  ;;  %v1300_v24 = vsub.f32 1.0, %v1299_v57  ;;  %1754 = vpow2.f32 %v1647_v13  ;;  %v867_v48 = vld [vmem:[#allocation2 + $0x8] sm:$0xff] }
 0x106   : > { %v1380_v18 = vmul.f32 %v1371_v51, %v2353_v38  ;;  %v1341_v32 = vsel %vm2461_vm10, %v1340_v21, %v1336_v17  ;;  %v1379_v3 = vmul.f32 %v1356_v49, %v2333_v29  ;;  %v1317_v25 = vadd.f32 %v1751_v36, %v1316_v45 }
 0x107   : > { %vm2507_vm5 = vcmp.eq.f32.partialorder %v1307_v5, 8.507059e+37  ;;  %v1082_v52 = vadd.f32 %v2424_v42, %v1052_v22  ;;  %v1301_v38 = vmul.f32 %v1753_v14, %v1300_v24  ;;  %vm1304_vm7 = vweird.f32 %v1753_v14 }
 0x108   : > { %1398 = vmatpush.msra.mxu1 %v1380_v18  ;;  %v1181_v59 = vsel %vm969_vm4, %v2296_v41, 0.0  ;;  %v691_v29 = vand.u32 7, %v2645_v28  ;;  %v1378_v10 = vmul.f32 %v1341_v32, %v2359_v27  ;;  %v1321_v11 = vsel %vm1320_vm0, %v1751_v36, %v1317_v25  ;;  %vm1305_vm4 = vmor %vm1303_vm13, %vm1304_vm7  ;;  %v944_v36 = vld [vmem:[#allocation2 + $0x9] sm:$0xff] }
 0x109   : > { %v1112_v21 = vadd.f32 %v1104_v4, %v1082_v52  ;;  %v1134_v42 = vmul.f32 %v2160_v55, %v1121_v50  ;;  %v1326_v31 = vsel %vm2477_vm9, %v1325_v15, %v1321_v11  ;;  %v1302_v44 = vadd.f32 %v1753_v14, %v1301_v38 }
 0x10a   : > { %1399 = vmatpush.msra.mxu1 %v1379_v3  ;;  %v791_v5 = vadd.s32 4294967295, %v691_v29  ;;  %v952_v49 = vadd.s32 1, %v691_v29  ;;  %v1310_v41 = vor.u32 1.1754944e-38, %v1309_v47  ;;  %v1194_v56 = vmul.f32 %v2136_v61, %v1181_v59 }
 0x10b   : > { %v1142_v28 = vadd.f32 %v1134_v42, %v1112_v21  ;;  %v928_v27 = vmul.f32 %v2647_v60, %v867_v48  ;;  %v1755_v19 = vpop.eup %1754  ;;  %v1377_v7 = vmul.f32 %v1326_v31, %v2368_v9  ;;  %v1306_v1 = vsel %vm1305_vm4, %v1753_v14, %v1302_v44 }
 0x10c   : > { %1400 = vmatpush.msra.mxu1 %v1378_v10  ;;  %vm799_vm8 = vcmp.ge.s32.totalorder %v791_v5, 0  ;;  %vm968_vm10 = vcmp.lt.s32.totalorder %v952_v49, 8  ;;  %v1311_v15 = vsel %vm2507_vm5, %v1310_v41, %v1306_v1  ;;  %v1247_v6 = vadd.f32 1.0, %v1755_v19 }
 0x10d   : > { %v839_v35 = vsel %vm799_vm8, %v783_v0, 0.0  ;;  %v1376_v47 = vmul.f32 %v1311_v15, %v2382_v2  ;;  %v1172_v54 = vadd.f32 %v2428_v46, %v1142_v28  ;;  %v1000_v30 = vsel %vm968_vm10, %v944_v36, 0.0 }
 0x10e   : > { %1401 = vmatpush.msra.mxu1 %v1377_v7  ;;  %v851_v60 = vmul.f32 %v2104_v37, %v839_v35  ;;  %1756 = vrcp.f32 %v1247_v6  ;;  %v1030_v9 = vsel %vm799_vm8, %v2406_v33, 0.0  ;;  %v1013_v34 = vmul.f32 %v2128_v58, %v1000_v30  ;;  %v1676_v30 = vld [vmem:[%s2609_s5 + $0x8] sm:$0xff] }
 0x10f   : > { %v1202_v14 = vadd.f32 %v1194_v56, %v1172_v54  ;;  %v1090_v57 = vsel %vm968_vm10, %v2439_v39, 0.0  ;;  %v1043_v46 = vmul.f32 %v2148_v43, %v1030_v9  ;;  %v1073_v51 = vmul.f32 %v2067_v63, %v2396_v62  ;;  %v1381_v54 = vld [vmem:[%s2615_s11] sm:$0xff]  ;;  %1443 = vmatpush.bf16.msra.mxu2 %v1676_v30 }
 0x110   : > { %1402 = vmatpush.msra.mxu1 %v1376_v47  ;;  %v936_v4 = vadd.f32 %v928_v27, %v851_v60  ;;  %v1103_v33 = vmul.f32 %v2178_v16, %v1090_v57  ;;  %v1120_v45 = vsel %vm799_vm8, %v2345_v20, 0.0  ;;  %v1180_v39 = vsel %vm968_vm10, %v2350_v53, 0.0  ;;  %v1382_v60 = vld [vmem:[%s2615_s11 + $0x8] sm:$0xff]  ;;  %v1675_v9 = vld [vmem:[%s2609_s5] sm:$0xff] }
 0x111   : > { %v1214_v2 = vadd.f32 %v2323_v8, %v1202_v14  ;;  %v1133_v43 = vmul.f32 %v2160_v55, %v1120_v45  ;;  %v1292_v24 = vand.u32 2147483647, %v1247_v6  ;;  %v1294_v3 = vand.u32 2147483648, %v1247_v6 }
 0x112   : > { %v1021_v13 = vadd.f32 %v1013_v34, %v936_v4  ;;  %v1163_v63 = vmul.f32 %v2092_v40, %v2648_v12  ;;  %v1193_v20 = vmul.f32 %v2136_v61, %v1180_v39  ;;  %vm1288_vm12 = vweird.f32 %v1247_v6 }
 0x113   : > { %v1646_v37 = vmul.f32 -1.442695, %v1214_v2  ;;  %v1295_v53 = vor.u32 1.1754944e-38, %v1294_v3  ;;  %vm1293_vm15 = vcmp.eq.f32.partialorder %v1292_v24, 8.507059e+37  ;;  %vm1383_vm4 = vcmask 523264   ;;  %1444 = vmatpush.bf16.msra.mxu2 %v1675_v9 }
 0x114   : > { %v1051_v50 = vadd.f32 %v1043_v46, %v1021_v13  ;;  %v1757_v17 = vpop.eup %1756  ;;  %v1785_v57 = vmov 16.0   ;;  %v1701_v13 = vld [vmem:[%s2610_s6] ss:$0 sm:$0xff]  ;;  %vm1470_vm10 = vcmask 254976  }
 0x115   : > { %v1284_v58 = vmul.f32 %v1757_v17, %v1247_v6  ;;  %1758 = vpow2.f32 %v1646_v37  ;;  %vm1289_vm11 = vweird.f32 %v1757_v17 }
 0x116   : > { %v1081_v22 = vadd.f32 %v1073_v51, %v1051_v50  ;;  %vm1290_vm14 = vmor %vm1288_vm12, %vm1289_vm11 }
 0x117   : > { %v1285_v18 = vsub.f32 1.0, %v1284_v58 }
 0x118   : > { %v1111_v32 = vadd.f32 %v1103_v33, %v1081_v22 }
 0x119   : > { %v1286_v16 = vmul.f32 %v1757_v17, %v1285_v18 }
 0x11a   : > { %v1141_v62 = vadd.f32 %v1133_v43, %v1111_v32 }
 0x11b   : > { %v1759_v25 = vpop.eup %1758  ;;  %v1287_v26 = vadd.f32 %v1757_v17, %v1286_v16 }
 0x11c   : > { %v1171_v52 = vadd.f32 %v1163_v63, %v1141_v62  ;;  %v1246_v38 = vadd.f32 1.0, %v1759_v25 }
 0x11d   : > { %v1291_v59 = vsel %vm1290_vm14, %v1757_v17, %v1287_v26 }
 0x11e   : > { %v1201_v55 = vadd.f32 %v1193_v20, %v1171_v52  ;;  %v1296_v29 = vsel %vm1293_vm15, %v1295_v53, %v1291_v59  ;;  %1760 = vrcp.f32 %v1246_v38  ;;  %v1279_v21 = vand.u32 2147483648, %v1246_v38  ;;  %v1468_v20 = vld [vmem:[%s2611_s7] sm:$0x3] }
 0x11f   : > { %v1375_v48 = vmul.f32 %v1296_v29, %v2484_v23  ;;  %v1277_v44 = vand.u32 2147483647, %v1246_v38  ;;  %vm1273_vm13 = vweird.f32 %v1246_v38  ;;  %v1474_v53 = vld [vmem:[%s2612_s8] sm:$0x3]  ;;  %v1786_v59 = vmov 0  }
 0x120   : > { %v1213_v40 = vadd.f32 %v2323_v8, %v1201_v55  ;;  %v1280_v49 = vor.u32 1.1754944e-38, %v1279_v21  ;;  %1689 = vset.pattern.permute.xlu0 %v1786_v59 }
 0x121   : > { %1403 = vmatpush.msra.mxu1 %v1375_v48  ;;  %vm1278_vm3 = vcmp.eq.f32.partialorder %v1277_v44, 8.507059e+37 }
 0x122   : > { %v1645_v12 = vmul.f32 -1.442695, %v1213_v40 }
 0x124   : > { %1762 = vpow2.f32 %v1645_v12  ;;  %v1761_v61 = vpop.eup %1760 }
 0x125   : > { %v1269_v10 = vmul.f32 %v1761_v61, %v1246_v38  ;;  %vm1274_vm9 = vweird.f32 %v1761_v61 }
 0x126   : > { %vm1275_vm2 = vmor %vm1273_vm13, %vm1274_vm9 }
 0x127   : > { %v1270_v11 = vsub.f32 1.0, %v1269_v10 }
 0x129   : > { %v1271_v31 = vmul.f32 %v1761_v61, %v1270_v11 }
 0x12a   : > { %v1763_v42 = vpop.eup %1762 }
 0x12b   : > { %v1245_v0 = vadd.f32 1.0, %v1763_v42  ;;  %v1272_v5 = vadd.f32 %v1761_v61, %v1271_v31 }
 0x12d   : > { %1764 = vrcp.f32 %v1245_v0  ;;  %v1276_v23 = vsel %vm1275_vm2, %v1761_v61, %v1272_v5  ;;  %v1264_v36 = vand.u32 2147483648, %v1245_v0  ;;  %v1262_v7 = vand.u32 2147483647, %v1245_v0 }
 0x12e   : > { %v1281_v8 = vsel %vm1278_vm3, %v1280_v49, %v1276_v23  ;;  %vm1258_vm5 = vweird.f32 %v1245_v0  ;;  %1766 = vrcp.f32 %v1785_v57  ;;  %v1496_v23 = vld [vmem:[%s2613_s9] sm:$0x3]  ;;  %vm1538_vm3 = vcmask 257024  }
 0x12f   : > { %v1374_v41 = vmul.f32 %v1281_v8, %v1214_v2  ;;  %v1265_v15 = vor.u32 1.1754944e-38, %v1264_v36  ;;  %vm1263_vm7 = vcmp.eq.f32.partialorder %v1262_v7, 8.507059e+37 }
 0x131   : > { %1404 = vmatpush.msra.mxu1 %v1374_v41 }
 0x133   : > { %v1765_v28 = vpop.eup %1764 }
 0x134   : > { %v1254_v56 = vmul.f32 %v1765_v28, %v1245_v0  ;;  %vm1259_vm6 = vweird.f32 %v1765_v28  ;;  %v1767_v46 = vpop.eup %1766 }
 0x135   : > { %vm1260_vm0 = vmor %vm1258_vm5, %vm1259_vm6  ;;  %v1461_v50 = vmul.f32 16.0, %v1767_v46  ;;  %vm1465_vm8 = vweird.f32 %v1767_v46 }
 0x136   : > { %v1255_v27 = vsub.f32 1.0, %v1254_v56 }
 0x137   : > { %v1462_v58 = vsub.f32 1.0, %v1461_v50 }
 0x138   : > { %v1256_v19 = vmul.f32 %v1765_v28, %v1255_v27 }
 0x139   : > { %v1463_v18 = vmul.f32 %v1767_v46, %v1462_v58 }
 0x13a   : > { %v1257_v1 = vadd.f32 %v1765_v28, %v1256_v19 }
 0x13b   : > { %v1464_v24 = vadd.f32 %v1767_v46, %v1463_v18 }
 0x13c   : > { %v1261_v6 = vsel %vm1260_vm0, %v1765_v28, %v1257_v1  ;;  %v1510_v1 = vld [vmem:[%s2614_s10] sm:$0x1] }
 0x13d   : > { %v1266_v35 = vsel %vm1263_vm7, %v1265_v15, %v1261_v6  ;;  %v1466_v16 = vsel %vm1465_vm8, %v1767_v46, %v1464_v24 }
 0x13e   : > { %v1373_v47 = vmul.f32 %v1266_v35, %v1213_v40 }
 0x140   : > { %1405 = vmatpush.msra.mxu1 %v1373_v47 }
 0x141   : > { %1653 = vmatmul.msk.f32.vlgmr.msra.gmra.mxu1 %vm1383_vm4, %v1381_v54 }
 0x149   : > { %1654 = vmatmul.msk.f32.gmra.mxu1 %vm1383_vm4, %v1382_v60 }
 0x1be   : > { %v1407_v14 = vpop.f32.mrf.mxu1 }
 0x1c6   : > { %v1410_v4 = vpop.f32.mrf.mxu1 }
 0x1c7   : > { %v1413_v34 = vpack.c.bf16 %v1410_v4, %v1407_v14 }
 0x1c9   : > { %1663 = vmatmul.msk.bf16.vlgmr.msra.gmra.mxu2 %vm657_vm1, %v1413_v34 }
 0x24c   : > { %v1446_v2 = vpop.f32.mrf.mxu2 }
 0x24d   : > { %v2571_v37 = vadd.f32 %v1701_v13, %v1446_v2 }
 0x24f   : > { %v1451_v17 = vsel %vm657_vm1, %v2571_v37, 0.0 }
 0x254   : > { %v1448_v51 = vpop.f32.mrf.mxu2 }
 0x255   : > { %v2573_v33 = vadd.f32 %v1701_v13, %v1448_v51 }
 0x257   : > { %v1452_v45 = vsel %vm657_vm1, %v2573_v33, 0.0 }
 0x258   : > { %v1453_v22 = vadd.f32 %v1452_v45, %v1451_v17 }
 0x25a   : > { %v1454_v39 = vrot.slane %v1453_v22, 4 }
 0x25c   : > { %v1455_v32 = vadd.f32 %v1454_v39, %v1453_v22 }
 0x25e   : > { %v1456_v43 = vrot.slane %v1455_v32, 2 }
 0x260   : > { %v1457_v3 = vadd.f32 %v1456_v43, %v1455_v32 }
 0x262   : > { %v1458_v63 = vrot.slane %v1457_v3, 1 }
 0x264   : > { %v1459_v62 = vadd.f32 %v1458_v63, %v1457_v3 }
 0x266   : > { %v1467_v25 = vmul.f32 %v1466_v16, %v1459_v62 }
 0x268   : > { %v1469_v26 = vmul.f32 %v1468_v20, %v1467_v25 }
 0x26a   : > { %v1471_v52 = vsel %vm1470_vm10, %v1469_v26, 0.0 }
 0x26b   : > { %1472 = vadd.xlane.f32.xlu0 %v1471_v52 }
 0x2de   : > { %v1473_v38 = vpop.xlane.xlu0 %1472 }
 0x2df   : > { %v1475_v55 = vadd.f32 %v1474_v53, %v1473_v38 }
 0x2e1   : > { %v1664_v29 = vmul.f32 -1.442695, %v1475_v55 }
 0x2e3   : > { %1768 = vpow2.f32 %v1664_v29 }
 0x2e9   : > { %v1769_v48 = vpop.eup %1768 }
 0x2ea   : > { %v1479_v40 = vadd.f32 1.0, %v1769_v48 }
 0x2ec   : > { %1770 = vrcp.f32 %v1479_v40  ;;  %v1491_v11 = vand.u32 2147483648, %v1479_v40  ;;  %v1489_v42 = vand.u32 2147483647, %v1479_v40  ;;  %vm1485_vm11 = vweird.f32 %v1479_v40 }
 0x2ee   : > { %v1492_v44 = vor.u32 1.1754944e-38, %v1491_v11  ;;  %vm1490_vm14 = vcmp.eq.f32.partialorder %v1489_v42, 8.507059e+37 }
 0x2f2   : > { %v1771_v12 = vpop.eup %1770 }
 0x2f3   : > { %v1481_v61 = vmul.f32 %v1771_v12, %v1479_v40  ;;  %vm1486_vm1 = vweird.f32 %v1771_v12 }
 0x2f4   : > { %vm1487_vm12 = vmor %vm1485_vm11, %vm1486_vm1 }
 0x2f5   : > { %v1482_v10 = vsub.f32 1.0, %v1481_v61 }
 0x2f7   : > { %v1483_v21 = vmul.f32 %v1771_v12, %v1482_v10 }
 0x2f9   : > { %v1484_v31 = vadd.f32 %v1771_v12, %v1483_v21 }
 0x2fb   : > { %v1488_v0 = vsel %vm1487_vm12, %v1771_v12, %v1484_v31 }
 0x2fc   : > { %v1493_v5 = vsel %vm1490_vm14, %v1492_v44, %v1488_v0 }
 0x2fd   : > { %v1495_v49 = vmul.f32 %v1493_v5, %v1475_v55 }
 0x2ff   : > { %1499 = vperm.xlu0 %1689, %v1495_v49  }
 0x371   : > { %v1500_v8 = vpop.permute.xlu0 %1499 }
 0x372   : > { %v1502_v41 = vmul.f32 %v1500_v8, %v1496_v23 }
 0x374   : > { %v1503_v28 = vsel %vm1470_vm10, %v1502_v41, 0.0 }
 0x375   : > { %v1504_v56 = vrot.slane %v1503_v28, 4 }
 0x377   : > { %v1505_v27 = vadd.f32 %v1504_v56, %v1503_v28 }
 0x379   : > { %v1506_v36 = vrot.slane %v1505_v27, 2 }
 0x37b   : > { %v1507_v19 = vadd.f32 %v1506_v36, %v1505_v27 }
 0x37d   : > { %v1508_v7 = vrot.slane %v1507_v19, 1 }
 0x37f   : > { %v1509_v15 = vadd.f32 %v1508_v7, %v1507_v19 }
 0x381   : > { %v1511_v6 = vadd.f32 %v1510_v1, %v1509_v15 }
 0x383   : > { %v1665_v35 = vmul.f32 -1.442695, %v1511_v6 }
 0x385   : > { %1772 = vpow2.f32 %v1665_v35 }
 0x38b   : > { %v1773_v47 = vpop.eup %1772 }
 0x38c   : > { %v1515_v54 = vadd.f32 1.0, %v1773_v47 }
 0x38e   : > { %1774 = vrcp.f32 %v1515_v54  ;;  %v1527_v14 = vand.u32 2147483648, %v1515_v54  ;;  %v1525_v34 = vand.u32 2147483647, %v1515_v54  ;;  %vm1521_vm9 = vweird.f32 %v1515_v54 }
 0x390   : > { %v1528_v2 = vor.u32 1.1754944e-38, %v1527_v14  ;;  %vm1526_vm2 = vcmp.eq.f32.partialorder %v1525_v34, 8.507059e+37 }
 0x394   : > { %v1775_v60 = vpop.eup %1774 }
 0x395   : > { %v1517_v30 = vmul.f32 %v1775_v60, %v1515_v54  ;;  %vm1522_vm15 = vweird.f32 %v1775_v60 }
 0x396   : > { %vm1523_vm13 = vmor %vm1521_vm9, %vm1522_vm15 }
 0x397   : > { %v1518_v9 = vsub.f32 1.0, %v1517_v30 }
 0x399   : > { %v1519_v4 = vmul.f32 %v1775_v60, %v1518_v9 }
 0x39b   : > { %v1520_v57 = vadd.f32 %v1775_v60, %v1519_v4 }
 0x39d   : > { %v1524_v13 = vsel %vm1523_vm13, %v1775_v60, %v1520_v57 }
 0x39e   : > { %v1529_v46 = vsel %vm1526_vm2, %v1528_v2, %v1524_v13 }
 0x39f   : > { %v1531_v50 = vperm.slane %v1529_v46, 0 }
 0x3a1   : > { %v1532_v51 = vmul.f32 %v1531_v50, %v2571_v37  ;;  %v1533_v17 = vmul.f32 %v1531_v50, %v2573_v33 }
 0x3a3   : > { %v1534_v45 = vadd.f32 %v1532_v51, %v2571_v37  ;;  %v1535_v58 = vadd.f32 %v1533_v17, %v2573_v33 }
 0x3a5   : > { %v1536_v22 = vpack.c.bf16 %v1534_v45, %v1534_v45  ;;  %v1537_v39 = vpack.c.bf16 %v1535_v58, %v1535_v58 }
 0x3a7   : > { %1539 = vst.msk [vmem:[%s413_s24] sm:$0xf] %vm1538_vm3, %v1536_v22 }
 0x3a8   : > { %1540 = vst.msk [vmem:[%s413_s24 + $0x4] sm:$0xf] %vm1538_vm3, %v1537_v39 }
 0x3a9 PF: > { %s22_s21 = sadd.s32 1, %s1782_s21  }
 0x3aa   : > { %p19_p4 = scmp.ge.s32.totalorder %s22_s21, 4  }
 0x3ac   :  { %21 = sbr.rel (!%p19_p4) target bundleno = 1 (0x1), region = 106 }

// kernel: _lambda_.11
= control target key start
LH: loop header
LB: loop body
LE: loop exit
PB: predicated region body
PF: predicated region fallthrough
CT: control target
= control target key end

     0   :  { %s163_s0 = inlined_call_operand.vmem [shape: bf16[2,48], index: 0, kind: input, shape index: {}]   ;;  %s164_s1 = inlined_call_operand.vmem [shape: bf16[48,10], index: 1, kind: input, shape index: {}]   ;;  %s165_s2 = inlined_call_operand.vmem [shape: f32[1,10], index: 2, kind: input, shape index: {}]   ;;  %s166_s3 = inlined_call_operand.hbm [shape: f32[2,10], index: 3, kind: output, shape index: {}]  }
   0x1   :  { %v95_v0 = vld [vmem:[%s164_s1 + $0x10] sm:$0xff]  ;;  %v94_v1 = vld [vmem:[%s164_s1 + $0x8] sm:$0xff] }
   0x2   :  { %54 = vmatpush.bf16.msra.mxu0 %v95_v0 }
   0x3   :  { %8 = vsyncpa [#allocation3], 0  ;;  %v93_v2 = vld [vmem:[%s164_s1] sm:$0xff]  ;;  %vm45_vm0 = vcmask 392192   ;;  %s124_s22 = smov [#allocation2]   ;;  %s71_s26 = sshll.u32 %s166_s3, 4  ;;  %s72_s26 = int_to_ptr.hbm [resolvable:$true] %s71_s26 }
   0x4   :  { %v16_v3 = vld [vmem:[%s163_s0] sm:$0x1]  ;;  %s69_s23 = sshll.u32 %s124_s22, 4  ;;  %vm62_vm1 = vcmask 74752   ;;  %s70_s23 = int_to_ptr.vmem [resolvable:$true] %s69_s23 }
   0x5   :  { %v97_v4 = vld [vmem:[%s165_s2] ss:$0 sm:$0xff] }
   0x6   :  { %55 = vmatpush.bf16.msra.mxu0 %v94_v1 }
   0xa   :  { %56 = vmatpush.bf16.msra.mxu0 %v93_v2 }
   0xd   :  { %92 = vmatmul.msk.bf16.vlgmr.msra.gmra.mxu0 %vm45_vm0, %v16_v3 }
  0x8a   :  { %v58_v5 = vpop.f32.mrf.mxu0 }
  0x8b   :  { %v59_v6 = vadd.f32 %v97_v4, %v58_v5 }
  0x8d   :  { %63 = vst.msk [vmem:[#allocation2] sm:$0x3] %vm62_vm1, %v59_v6 }
  0x8e   :  { %74 = dma.vmem_to_hbm [thread:$0]  %s70_s23, 32, %s72_s26, [#allocation3]  }
  0x92   :  { %v60_v7 = vpop.f32.mrf.mxu0 }
  0x93   :  { %122 = dma.done.wait [#allocation3], 32  }
  0x94   :  { %123 = vsyncadd [#allocation3], 4294967264 }
  0x95   :  { %79 = vsyncpa [#allocation3], 1 }

// kernel: _lambda_.9
= control target key start
LH: loop header
LB: loop body
LE: loop exit
PB: predicated region body
PF: predicated region fallthrough
CT: control target
= control target key end

     0   :  { %s1129_s21 = smov 0   ;;  %s1252_s0 = inlined_call_operand.vmem [shape: bf16[2,16,32], index: 0, kind: input, shape index: {}]   ;;  %s1253_s1 = inlined_call_operand.vmem [shape: bf16[32,64], index: 1, kind: input, shape index: {}]   ;;  %s1254_s2 = inlined_call_operand.vmem [shape: f32[1,64], index: 2, kind: input, shape index: {}]   ;;  %s1255_s3 = inlined_call_operand.vmem [shape: f32[9,1,64], index: 3, kind: input, shape index: {}]   ;;  %s1256_s4 = inlined_call_operand.vmem [shape: f32[1,64], index: 4, kind: input, shape index: {}]   ;;  %s1257_s5 = inlined_call_operand.vmem [shape: bf16[64,32], index: 5, kind: input, shape index: {}]   ;;  %s1258_s6 = inlined_call_operand.vmem [shape: f32[1,32], index: 6, kind: input, shape index: {}]   ;;  %s1259_s7 = inlined_call_operand.vmem [shape: f32[2,32], index: 7, kind: input, shape index: {}]   ;;  %s1260_s8 = inlined_call_operand.vmem [shape: f32[2,1], index: 8, kind: input, shape index: {}]   ;;  %s1261_s9 = inlined_call_operand.vmem [shape: f32[2,32], index: 9, kind: input, shape index: {}]   ;;  %s1262_s10 = inlined_call_operand.vmem [shape: f32[1,32], index: 10, kind: input, shape index: {}]   ;;  %s1263_s11 = inlined_call_operand.vmem [shape: f32[4,16], index: 11, kind: input, shape index: {}]   ;;  %s1264_s12 = inlined_call_operand.vmem [shape: bf16[2,4,32], index: 12, kind: output, shape index: {}]  }
   0x1 LB: > { %s940_s22 = sadd.s32 4294967295, %s1059_s21   ;;  %p944_p0 = scmp.ge.s32.totalorder %s1059_s21, 1  ;;  %s1059_s21 = sphi %s1129_s21, %s22_s21  }
   0x2   : > { %p362_p1 = scmp.lt.s32.totalorder %s1059_s21, 3 }
   0x4   : > { %p363_p2 = pnand %p944_p0, %p362_p1 }
   0x5   : > { %p403_p3 = scmp.lt.s32.totalorder (!%p363_p2), %s940_s22, 1 }
   0x6   : > { %366 = sbr.rel (%p363_p2) target bundleno = 844 (0x34c), region = 68 }
   0xb   : > { %v998_v0 = vld [vmem:[%s1253_s1 + $0x8] sm:$0xff]  ;;  %v997_v1 = vld [vmem:[%s1253_s1] sm:$0xff]  ;;  %s1266_s22 = smov (!%p403_p3, %s940_s22), 1  ;;  %vm440_vm0 = vcmask 261120   ;;  %vm498_vm1 = vcmask 523264   ;;  %v1061_v5 = vmov 0.0   ;;  %v505_v17 = vlaneseq }
   0xc   : > { %450 = vmatpush.bf16.msra.mxu0 %v998_v0  ;;  %s995_s27 = sshll.u32 %s1266_s22, 3  ;;  %v1015_v3 = vld [vmem:[%s1254_s2] ss:$0 sm:$0xff]  ;;  %499 = vst.msk [vmem:[#allocation2] sm:$0xff] %vm498_vm1, %v1061_v5  ;;  %v1017_v41 = vld [vmem:[%s1255_s3 + $0x1] ss:$0 sm:$0xff] }
   0xd   : > { %s407_s30 = scalar_lea.vmem %s1252_s0, %s995_s27  ;;  %500 = vst.msk [vmem:[#allocation2 + $0x8] sm:$0xff] %vm498_vm1, %v1061_v5  ;;  %v506_v22 = vshrl.u32 %v505_v17, 7  ;;  %v1016_v44 = vld [vmem:[%s1255_s3] ss:$0 sm:$0xff]  ;;  %v1018_v46 = vld [vmem:[%s1255_s3 + $0x2] ss:$0 sm:$0xff] }
   0xe   : > { %v996_v2 = vld [vmem:[%s407_s30] sm:$0xff]  ;;  %502 = vst.msk [vmem:[#allocation2 + $0x18] sm:$0xff] %vm498_vm1, %v1061_v5  ;;  %s947_s25 = sshll.u32 %s1266_s22, 1 }
   0xf   : > { %501 = vst.msk [vmem:[#allocation2 + $0x10] sm:$0xff] %vm498_vm1, %v1061_v5  ;;  %v512_v29 = vand.u32 3, %v506_v22  ;;  %v507_v35 = vadd.s32 8, %v506_v22  ;;  %v1019_v57 = vld [vmem:[%s1255_s3 + $0x3] ss:$0 sm:$0xff]  ;;  %s411_s28 = scalar_lea.vmem %s1264_s12, %s947_s25 }
  0x10   : > { %451 = vmatpush.bf16.msra.mxu0 %v997_v1  ;;  %v1020_v62 = vld [vmem:[%s1255_s3 + $0x4] ss:$0 sm:$0xff]  ;;  %v1022_v17 = vld [vmem:[%s1255_s3 + $0x6] ss:$0 sm:$0xff] }
  0x11   : > { %v534_v36 = vadd.s32 4294967295, %v512_v29  ;;  %v1157_v37 = vadd.s32 1, %v512_v29  ;;  %v519_v43 = vand.u32 3, %v507_v35 }
  0x13   : > { %960 = vmatmul.msk.bf16.vlgmr.msra.gmra.mxu0 %vm440_vm0, %v996_v2  ;;  %vm536_vm10 = vcmp.ge.s32.totalorder %v534_v36, 0  ;;  %vm585_vm11 = vcmp.lt.s32.totalorder %v1157_v37, 4  ;;  %v535_v54 = vadd.s32 4294967295, %v519_v43  ;;  %v582_v55 = vadd.s32 1, %v519_v43 }
  0x15   : > { %vm537_vm12 = vcmp.ge.s32.totalorder %v535_v54, 0  ;;  %vm586_vm13 = vcmp.lt.s32.totalorder %v582_v55, 4  ;;  %v1001_v55 = vld [vmem:[%s1257_s5 + $0x10] sm:$0xff] }
  0x90   : > { %v453_v4 = vpop.f32.mrf.mxu0 }
  0x91   : > { %v454_v6 = vadd.f32 %v1015_v3, %v453_v4 }
  0x93   : > { %v961_v7 = vmul.f32 -1.442695, %v454_v6 }
  0x95   : > { %1027 = vpow2.f32 %v961_v7 }
  0x98   : > { %v455_v8 = vpop.f32.mrf.mxu0 }
  0x99   : > { %v456_v9 = vadd.f32 %v1015_v3, %v455_v8 }
  0x9b   : > { %v1028_v10 = vpop.eup %1027  ;;  %v962_v11 = vmul.f32 -1.442695, %v456_v9 }
  0x9c   : > { %v464_v12 = vadd.f32 1.0, %v1028_v10  ;;  %v1021_v10 = vld [vmem:[%s1255_s3 + $0x5] ss:$0 sm:$0xff] }
  0x9d   : > { %1029 = vpow2.f32 %v962_v11 }
  0x9e   : > { %1031 = vrcp.f32 %v464_v12  ;;  %v477_v19 = vand.u32 2147483648, %v464_v12  ;;  %v475_v21 = vand.u32 2147483647, %v464_v12  ;;  %vm471_vm3 = vweird.f32 %v464_v12 }
  0xa0   : > { %v478_v25 = vor.u32 1.1754944e-38, %v477_v19  ;;  %vm476_vm5 = vcmp.eq.f32.partialorder %v475_v21, 8.507059e+37 }
  0xa3   : > { %v1030_v13 = vpop.eup %1029 }
  0xa4   : > { %v1032_v14 = vpop.eup %1031  ;;  %v465_v15 = vadd.f32 1.0, %v1030_v13 }
  0xa5   : > { %v467_v16 = vmul.f32 %v1032_v14, %v464_v12  ;;  %vm472_vm2 = vweird.f32 %v1032_v14 }
  0xa6   : > { %1033 = vrcp.f32 %v465_v15  ;;  %vm473_vm4 = vmor %vm471_vm3, %vm472_vm2  ;;  %v492_v32 = vand.u32 2147483648, %v465_v15  ;;  %v490_v34 = vand.u32 2147483647, %v465_v15  ;;  %vm486_vm7 = vweird.f32 %v465_v15 }
  0xa7   : > { %v468_v18 = vsub.f32 1.0, %v467_v16 }
  0xa8   : > { %v493_v39 = vor.u32 1.1754944e-38, %v492_v32  ;;  %vm491_vm9 = vcmp.eq.f32.partialorder %v490_v34, 8.507059e+37 }
  0xa9   : > { %v469_v20 = vmul.f32 %v1032_v14, %v468_v18 }
  0xab   : > { %v470_v23 = vadd.f32 %v1032_v14, %v469_v20 }
  0xac   : > { %v1034_v24 = vpop.eup %1033 }
  0xad   : > { %v474_v26 = vsel %vm473_vm4, %v1032_v14, %v470_v23  ;;  %v482_v27 = vmul.f32 %v1034_v24, %v465_v15  ;;  %vm487_vm6 = vweird.f32 %v1034_v24 }
  0xae   : > { %v479_v28 = vsel %vm476_vm5, %v478_v25, %v474_v26  ;;  %vm488_vm8 = vmor %vm486_vm7, %vm487_vm6  ;;  %v1023_v25 = vld [vmem:[%s1255_s3 + $0x7] ss:$0 sm:$0xff]  ;;  %vm726_vm7 = vcmask 130048  }
  0xaf   : > { %v496_v30 = vmul.f32 %v479_v28, %v454_v6  ;;  %v483_v31 = vsub.f32 1.0, %v482_v27 }
  0xb1   : > { %503 = vst.msk [vmem:[#allocation2 + $0x8] sm:$0xff] %vm498_vm1, %v496_v30  ;;  %v484_v33 = vmul.f32 %v1034_v24, %v483_v31  ;;  %v1024_v30 = vld [vmem:[%s1255_s3 + $0x8] ss:$0 sm:$0xff] }
  0xb3   : > { %v485_v38 = vadd.f32 %v1034_v24, %v484_v33 }
  0xb5   : > { %v489_v40 = vsel %vm488_vm8, %v1034_v24, %v485_v38  ;;  %vm803_vm8 = vcmask 257024  }
  0xb6   : > { %v494_v42 = vsel %vm491_vm9, %v493_v39, %v489_v40  ;;  %vm821_vm9 = vcmask 254976  }
  0xb7   : > { %v497_v45 = vmul.f32 %v494_v42, %v456_v9 }
  0xb8   : > { %v532_v47 = vld [vmem:[#allocation2 + $0x3] sm:$0xff] }
  0xb9   : > { %v556_v48 = vld [vmem:[#allocation2 + $0x4] sm:$0xff]  ;;  %504 = vst.msk [vmem:[#allocation2 + $0x10] sm:$0xff] %vm498_vm1, %v497_v45  ;;  %v546_v50 = vsel %vm536_vm10, %v532_v47, 0.0 }
  0xba   : > { %v579_v49 = vld [vmem:[#allocation2 + $0x5] sm:$0xff]  ;;  %v575_v51 = vmul.f32 %v1017_v41, %v556_v48  ;;  %v552_v56 = vmul.f32 %v1016_v44, %v546_v50 }
  0xbb   : > { %v593_v52 = vsel %vm585_vm11, %v579_v49, 0.0  ;;  %v604_v53 = vld [vmem:[#allocation2 + $0x7] sm:$0xff] }
  0xbc   : > { %v577_v58 = vadd.f32 %v575_v51, %v552_v56  ;;  %v600_v59 = vmul.f32 %v1018_v46, %v593_v52  ;;  %v606_v60 = vsel %vm536_vm10, %v604_v53, 0.0  ;;  %v617_v0 = vld [vmem:[#allocation2 + $0x8] sm:$0xff] }
  0xbd   : > { %v613_v63 = vmul.f32 %v1019_v57, %v606_v60  ;;  %v626_v12 = vmul.f32 %v1020_v62, %v617_v0 }
  0xbe   : > { %v602_v61 = vadd.f32 %v600_v59, %v577_v58  ;;  %v1002_v58 = vld [vmem:[%s1257_s5 + $0x18] sm:$0xff] }
  0xbf   : > { %794 = vmatpush.bf16.msra.mxu2 %v1002_v58 }
  0xc0   : > { %v533_v1 = vld [vmem:[#allocation2 + $0xb] sm:$0xff]  ;;  %v615_v8 = vadd.f32 %v613_v63, %v602_v61  ;;  %v643_v24 = vld [vmem:[#allocation2 + $0x13] sm:$0xff] }
  0xc1   : > { %v557_v2 = vld [vmem:[#allocation2 + $0xc] sm:$0xff]  ;;  %v547_v4 = vsel %vm537_vm12, %v533_v1, 0.0  ;;  %v644_v21 = vsel %vm536_vm10, %v533_v1, 0.0  ;;  %v645_v33 = vsel %vm537_vm12, %v643_v24, 0.0  ;;  %v667_v38 = vld [vmem:[#allocation2 + $0x15] sm:$0xff] }
  0xc2   : > { %v580_v3 = vld [vmem:[#allocation2 + $0xd] sm:$0xff]  ;;  %v576_v5 = vmul.f32 %v1017_v41, %v557_v2  ;;  %v553_v9 = vmul.f32 %v1016_v44, %v547_v4  ;;  %v628_v19 = vadd.f32 %v626_v12, %v615_v8  ;;  %v651_v32 = vmul.f32 %v1022_v17, %v644_v21  ;;  %v1025_v44 = vld [vmem:[%s1256_s4] ss:$0 sm:$0xff] }
  0xc3   : > { %v594_v6 = vsel %vm586_vm13, %v580_v3, 0.0  ;;  %v605_v7 = vld [vmem:[#allocation2 + $0xf] sm:$0xff]  ;;  %v668_v34 = vsel %vm585_vm11, %v580_v3, 0.0  ;;  %v663_v40 = vmul.f32 %v1023_v25, %v557_v2  ;;  %v652_v43 = vmul.f32 %v1022_v17, %v645_v33  ;;  %795 = vmatpush.bf16.msra.mxu2 %v1001_v55 }
  0xc4   : > { %v607_v11 = vsel %vm537_vm12, %v605_v7, 0.0  ;;  %v630_v13 = vld [vmem:[#allocation2 + $0x9] sm:$0xff]  ;;  %v578_v14 = vadd.f32 %v576_v5, %v553_v9  ;;  %v601_v15 = vmul.f32 %v1018_v46, %v594_v6  ;;  %v631_v16 = vld [vmem:[#allocation2 + $0x11] sm:$0xff]  ;;  %v675_v46 = vmul.f32 %v1024_v30, %v668_v34 }
  0xc5   : > { %v618_v18 = vld [vmem:[#allocation2 + $0x10] sm:$0xff]  ;;  %v632_v20 = vsel %vm585_vm11, %v630_v13, 0.0  ;;  %v614_v23 = vmul.f32 %v1019_v57, %v607_v11  ;;  %v633_v27 = vsel %vm586_vm13, %v631_v16, 0.0  ;;  %v669_v47 = vsel %vm586_vm13, %v667_v38, 0.0  ;;  %v1000_v61 = vld [vmem:[%s1257_s5 + $0x8] sm:$0xff] }
  0xc6   : > { %v603_v22 = vadd.f32 %v601_v15, %v578_v14  ;;  %v639_v26 = vmul.f32 %v1021_v10, %v632_v20  ;;  %v627_v29 = vmul.f32 %v1020_v62, %v618_v18  ;;  %v640_v36 = vmul.f32 %v1021_v10, %v633_v27  ;;  %v655_v41 = vld [vmem:[#allocation2 + $0x14] sm:$0xff] }
  0xc7   : > { %v664_v49 = vmul.f32 %v1023_v25, %v655_v41  ;;  %v676_v51 = vmul.f32 %v1024_v30, %v669_v47  ;;  %796 = vmatpush.bf16.msra.mxu2 %v1000_v61 }
  0xc8   : > { %v616_v28 = vadd.f32 %v614_v23, %v603_v22  ;;  %v641_v31 = vadd.f32 %v639_v26, %v628_v19  ;;  %v725_v22 = vld [vmem:[%s1263_s11] sm:$0xf]  ;;  %v1062_v26 = vmov 4.0  }
  0xc9   : > { %v999_v23 = vld [vmem:[%s1257_s5] sm:$0xff] }
  0xca   : > { %v629_v35 = vadd.f32 %v627_v29, %v616_v28  ;;  %v653_v39 = vadd.f32 %v651_v32, %v641_v31  ;;  %v1026_v28 = vld [vmem:[%s1258_s6] ss:$0 sm:$0xff] }
  0xcb   : > { %797 = vmatpush.bf16.msra.mxu2 %v999_v23 }
  0xcc   : > { %v642_v42 = vadd.f32 %v640_v36, %v629_v35  ;;  %v665_v45 = vadd.f32 %v663_v40, %v653_v39 }
  0xce   : > { %v654_v48 = vadd.f32 %v652_v43, %v642_v42  ;;  %v677_v37 = vadd.f32 %v675_v46, %v665_v45  ;;  %v819_v45 = vld [vmem:[%s1259_s7] sm:$0x3] }
  0xd0   : > { %v666_v50 = vadd.f32 %v664_v49, %v654_v48  ;;  %v683_v52 = vadd.f32 %v1025_v44, %v677_v37  ;;  %v825_v49 = vld [vmem:[%s1260_s8] sm:$0x3] }
  0xd2   : > { %v678_v53 = vadd.f32 %v676_v51, %v666_v50  ;;  %v971_v54 = vmul.f32 -1.442695, %v683_v52  ;;  %v1063_v50 = vmov 0  }
  0xd3   : > { %1014 = vset.pattern.permute.xlu0 %v1063_v50 }
  0xd4   : > { %v684_v56 = vadd.f32 %v1025_v44, %v678_v53  ;;  %1035 = vpow2.f32 %v971_v54 }
  0xd6   : > { %v972_v57 = vmul.f32 -1.442695, %v684_v56 }
  0xd8   : > { %1037 = vpow2.f32 %v972_v57 }
  0xda   : > { %v1036_v59 = vpop.eup %1035 }
  0xdb   : > { %v691_v60 = vadd.f32 1.0, %v1036_v59 }
  0xdd   : > { %1039 = vrcp.f32 %v691_v60  ;;  %vm698_vm15 = vweird.f32 %v691_v60  ;;  %v704_v9 = vand.u32 2147483648, %v691_v60  ;;  %v702_v12 = vand.u32 2147483647, %v691_v60 }
  0xde   : > { %v1038_v62 = vpop.eup %1037 }
  0xdf   : > { %v692_v63 = vadd.f32 1.0, %v1038_v62  ;;  %v705_v16 = vor.u32 1.1754944e-38, %v704_v9  ;;  %vm703_vm6 = vcmp.eq.f32.partialorder %v702_v12, 8.507059e+37 }
  0xe1   : > { %1041 = vrcp.f32 %v692_v63  ;;  %v719_v8 = vand.u32 2147483648, %v692_v63  ;;  %v717_v11 = vand.u32 2147483647, %v692_v63  ;;  %vm713_vm3 = vweird.f32 %v692_v63 }
  0xe2   : > { %1043 = vrcp.f32 %v1062_v26 }
  0xe3   : > { %v1040_v0 = vpop.eup %1039  ;;  %v720_v15 = vor.u32 1.1754944e-38, %v719_v8  ;;  %vm718_vm5 = vcmp.eq.f32.partialorder %v717_v11, 8.507059e+37  ;;  %v861_v11 = vld [vmem:[%s1262_s10] sm:$0x1] }
  0xe4   : > { %v694_v1 = vmul.f32 %v1040_v0, %v691_v60  ;;  %vm699_vm14 = vweird.f32 %v1040_v0 }
  0xe5   : > { %vm700_vm2 = vmor %vm698_vm15, %vm699_vm14 }
  0xe6   : > { %v695_v2 = vsub.f32 1.0, %v694_v1 }
  0xe7   : > { %v1042_v3 = vpop.eup %1041 }
  0xe8   : > { %v709_v4 = vmul.f32 %v1042_v3, %v692_v63  ;;  %v696_v5 = vmul.f32 %v1040_v0, %v695_v2  ;;  %vm714_vm0 = vweird.f32 %v1042_v3  ;;  %v1044_v27 = vpop.eup %1043  ;;  %v847_v2 = vld [vmem:[%s1261_s9] sm:$0x3] }
  0xe9   : > { %vm715_vm4 = vmor %vm713_vm3, %vm714_vm0  ;;  %v812_v29 = vmul.f32 4.0, %v1044_v27 }
  0xea   : > { %v710_v6 = vsub.f32 1.0, %v709_v4  ;;  %v697_v7 = vadd.f32 %v1040_v0, %v696_v5 }
  0xeb   : > { %v813_v32 = vsub.f32 1.0, %v812_v29 }
  0xec   : > { %v711_v10 = vmul.f32 %v1042_v3, %v710_v6  ;;  %v701_v14 = vsel %vm700_vm2, %v1040_v0, %v697_v7 }
  0xed   : > { %v706_v19 = vsel %vm703_vm6, %v705_v16, %v701_v14  ;;  %v814_v35 = vmul.f32 %v1044_v27, %v813_v32 }
  0xee   : > { %v712_v13 = vadd.f32 %v1042_v3, %v711_v10  ;;  %v723_v21 = vmul.f32 %v706_v19, %v683_v52 }
  0xef   : > { %v815_v40 = vadd.f32 %v1044_v27, %v814_v35 }
  0xf0   : > { %v716_v17 = vsel %vm715_vm4, %v1042_v3, %v712_v13 }
  0xf1   : > { %v721_v18 = vsel %vm718_vm5, %v720_v15, %v716_v17 }
  0xf2   : > { %v724_v20 = vmul.f32 %v721_v18, %v684_v56 }
  0xf4   : > { %744 = vmatpush.msra.mxu1 %v724_v20 }
  0xf6   : > { %745 = vmatpush.msra.mxu1 %v723_v21 }
  0xf7   : > { %973 = vmatmul.msk.f32.vlgmr.msra.gmra.mxu1 %vm726_vm7, %v725_v22 }
 0x174   : > { %v747_v24 = vpop.f32.mrf.mxu1 }
 0x175   : > { %v750_v25 = vpack.c.bf16 %v747_v24, %v747_v24 }
 0x177   : > { %990 = vmatmul.msk.bf16.vlgmr.msra.gmra.mxu2 %vm498_vm1, %v750_v25  ;;  %vm816_vm1 = vweird.f32 %v1044_v27 }
 0x178   : > { %v817_v43 = vsel %vm816_vm1, %v1044_v27, %v815_v40 }
 0x1fa   : > { %v799_v30 = vpop.f32.mrf.mxu2 }
 0x1fb   : > { %v1225_v31 = vadd.f32 %v1026_v28, %v799_v30 }
 0x1fd   : > { %v804_v33 = vsel %vm803_vm8, %v1225_v31, 0.0 }
 0x1fe   : > { %v805_v34 = vrot.slane %v804_v33, 4 }
 0x200   : > { %v806_v36 = vadd.f32 %v805_v34, %v804_v33 }
 0x202   : > { %v807_v38 = vrot.slane %v806_v36, 2  ;;  %v801_v39 = vpop.f32.mrf.mxu2 }
 0x204   : > { %v808_v41 = vadd.f32 %v807_v38, %v806_v36 }
 0x206   : > { %v809_v42 = vrot.slane %v808_v41, 1 }
 0x208   : > { %v810_v44 = vadd.f32 %v809_v42, %v808_v41 }
 0x20a   : > { %v818_v46 = vmul.f32 %v817_v43, %v810_v44 }
 0x20c   : > { %v820_v47 = vmul.f32 %v819_v45, %v818_v46 }
 0x20e   : > { %v822_v48 = vsel %vm821_vm9, %v820_v47, 0.0 }
 0x20f   : > { %823 = vadd.xlane.f32.xlu0 %v822_v48 }
 0x282   : > { %v824_v37 = vpop.xlane.xlu0 %823 }
 0x283   : > { %v826_v51 = vadd.f32 %v825_v49, %v824_v37 }
 0x285   : > { %v991_v52 = vmul.f32 -1.442695, %v826_v51 }
 0x287   : > { %1045 = vpow2.f32 %v991_v52 }
 0x28d   : > { %v1046_v53 = vpop.eup %1045 }
 0x28e   : > { %v830_v54 = vadd.f32 1.0, %v1046_v53 }
 0x290   : > { %1047 = vrcp.f32 %v830_v54  ;;  %v842_v55 = vand.u32 2147483648, %v830_v54  ;;  %v840_v60 = vand.u32 2147483647, %v830_v54  ;;  %vm836_vm11 = vweird.f32 %v830_v54 }
 0x292   : > { %v843_v62 = vor.u32 1.1754944e-38, %v842_v55  ;;  %vm841_vm13 = vcmp.eq.f32.partialorder %v840_v60, 8.507059e+37 }
 0x296   : > { %v1048_v56 = vpop.eup %1047 }
 0x297   : > { %v832_v57 = vmul.f32 %v1048_v56, %v830_v54  ;;  %vm837_vm10 = vweird.f32 %v1048_v56 }
 0x298   : > { %vm838_vm12 = vmor %vm836_vm11, %vm837_vm10 }
 0x299   : > { %v833_v58 = vsub.f32 1.0, %v832_v57 }
 0x29b   : > { %v834_v59 = vmul.f32 %v1048_v56, %v833_v58 }
 0x29d   : > { %v835_v61 = vadd.f32 %v1048_v56, %v834_v59 }
 0x29f   : > { %v839_v63 = vsel %vm838_vm12, %v1048_v56, %v835_v61 }
 0x2a0   : > { %v844_v0 = vsel %vm841_vm13, %v843_v62, %v839_v63 }
 0x2a1   : > { %v846_v1 = vmul.f32 %v844_v0, %v826_v51 }
 0x2a3   : > { %850 = vperm.xlu0 %1014, %v846_v1  }
 0x315   : > { %v851_v3 = vpop.permute.xlu0 %850 }
 0x316   : > { %v853_v4 = vmul.f32 %v851_v3, %v847_v2 }
 0x318   : > { %v854_v5 = vsel %vm821_vm9, %v853_v4, 0.0 }
 0x319   : > { %v855_v6 = vrot.slane %v854_v5, 4 }
 0x31b   : > { %v856_v7 = vadd.f32 %v855_v6, %v854_v5 }
 0x31d   : > { %v857_v8 = vrot.slane %v856_v7, 2 }
 0x31f   : > { %v858_v9 = vadd.f32 %v857_v8, %v856_v7 }
 0x321   : > { %v859_v10 = vrot.slane %v858_v9, 1 }
 0x323   : > { %v860_v12 = vadd.f32 %v859_v10, %v858_v9 }
 0x325   : > { %v862_v13 = vadd.f32 %v861_v11, %v860_v12 }
 0x327   : > { %v992_v14 = vmul.f32 -1.442695, %v862_v13 }
 0x329   : > { %1049 = vpow2.f32 %v992_v14 }
 0x32f   : > { %v1050_v15 = vpop.eup %1049 }
 0x330   : > { %v866_v16 = vadd.f32 1.0, %v1050_v15 }
 0x332   : > { %1051 = vrcp.f32 %v866_v16  ;;  %v878_v20 = vand.u32 2147483648, %v866_v16  ;;  %v876_v22 = vand.u32 2147483647, %v866_v16  ;;  %vm872_vm15 = vweird.f32 %v866_v16 }
 0x334   : > { %v879_v24 = vor.u32 1.1754944e-38, %v878_v20  ;;  %vm877_vm2 = vcmp.eq.f32.partialorder %v876_v22, 8.507059e+37 }
 0x338   : > { %v1052_v17 = vpop.eup %1051 }
 0x339   : > { %v868_v18 = vmul.f32 %v1052_v17, %v866_v16  ;;  %vm873_vm14 = vweird.f32 %v1052_v17 }
 0x33a   : > { %vm874_vm0 = vmor %vm872_vm15, %vm873_vm14 }
 0x33b   : > { %v869_v19 = vsub.f32 1.0, %v868_v18 }
 0x33d   : > { %v870_v21 = vmul.f32 %v1052_v17, %v869_v19 }
 0x33f   : > { %v871_v23 = vadd.f32 %v1052_v17, %v870_v21 }
 0x341   : > { %v875_v25 = vsel %vm874_vm0, %v1052_v17, %v871_v23 }
 0x342   : > { %v880_v26 = vsel %vm877_vm2, %v879_v24, %v875_v25 }
 0x343   : > { %v882_v27 = vperm.slane %v880_v26, 0 }
 0x345   : > { %v883_v28 = vmul.f32 %v882_v27, %v1225_v31 }
 0x347   : > { %v884_v29 = vadd.f32 %v883_v28, %v1225_v31 }
 0x349   : > { %v885_v30 = vpack.c.bf16 %v884_v29, %v884_v29 }
 0x34b   : > { %886 = vst.msk [vmem:[%s411_s28] sm:$0x3] %vm821_vm9, %v885_v30 }
 0x34c PF: > { %s22_s21 = sadd.s32 1, %s1059_s21  }
 0x34d   : > { %p19_p4 = scmp.ge.s32.totalorder %s22_s21, 4  }
 0x34f   :  { %21 = sbr.rel (!%p19_p4) target bundleno = 1 (0x1), region = 106 }

// kernel: _lambda_.10
= control target key start
LH: loop header
LB: loop body
LE: loop exit
PB: predicated region body
PF: predicated region fallthrough
CT: control target
= control target key end

     0   :  { %s972_s21 = smov 0   ;;  %s1078_s0 = inlined_call_operand.vmem [shape: bf16[2,4,32], index: 0, kind: input, shape index: {}]   ;;  %s1079_s1 = inlined_call_operand.vmem [shape: bf16[32,64], index: 1, kind: input, shape index: {}]   ;;  %s1080_s2 = inlined_call_operand.vmem [shape: f32[1,64], index: 2, kind: input, shape index: {}]   ;;  %s1081_s3 = inlined_call_operand.vmem [shape: f32[9,1,64], index: 3, kind: input, shape index: {}]   ;;  %s1082_s4 = inlined_call_operand.vmem [shape: f32[1,64], index: 4, kind: input, shape index: {}]   ;;  %s1083_s5 = inlined_call_operand.vmem [shape: bf16[64,48], index: 5, kind: input, shape index: {}]   ;;  %s1084_s6 = inlined_call_operand.vmem [shape: f32[1,48], index: 6, kind: input, shape index: {}]   ;;  %s1085_s7 = inlined_call_operand.vmem [shape: f32[3,48], index: 7, kind: input, shape index: {}]   ;;  %s1086_s8 = inlined_call_operand.vmem [shape: f32[3,1], index: 8, kind: input, shape index: {}]   ;;  %s1087_s9 = inlined_call_operand.vmem [shape: f32[3,48], index: 9, kind: input, shape index: {}]   ;;  %s1088_s10 = inlined_call_operand.vmem [shape: f32[1,48], index: 10, kind: input, shape index: {}]   ;;  %s1089_s11 = inlined_call_operand.vmem [shape: f32[1,4], index: 11, kind: input, shape index: {}]   ;;  %s1090_s12 = inlined_call_operand.vmem [shape: bf16[2,1,48], index: 12, kind: output, shape index: {}]  }
   0x1 LB: > { %s805_s22 = sadd.s32 4294967295, %s903_s21   ;;  %p809_p0 = scmp.ge.s32.totalorder %s903_s21, 1  ;;  %s903_s21 = sphi %s972_s21, %s22_s21  }
   0x2   : > { %p361_p1 = scmp.lt.s32.totalorder %s903_s21, 3 }
   0x4   : > { %p362_p2 = pnand %p809_p0, %p361_p1 }
   0x5   : > { %p400_p3 = scmp.lt.s32.totalorder (!%p362_p2), %s805_s22, 1 }
   0x6   : > { %365 = sbr.rel (%p362_p2) target bundleno = 820 (0x334), region = 68 }
   0xb   : > { %v854_v0 = vld [vmem:[%s1079_s1 + $0x8] sm:$0xff]  ;;  %v853_v1 = vld [vmem:[%s1079_s1] sm:$0xff]  ;;  %s1092_s22 = smov (!%p400_p3, %s805_s22), 1  ;;  %vm429_vm0 = vcmask 261120   ;;  %vm466_vm1 = vcmask 523264   ;;  %v905_v5 = vmov 0.0   ;;  %v471_v13 = vlaneseq }
   0xc   : > { %439 = vmatpush.bf16.msra.mxu0 %v854_v0  ;;  %s810_s27 = sshll.u32 %s1092_s22, 1  ;;  %v870_v3 = vld [vmem:[%s1080_s2] ss:$0 sm:$0xff]  ;;  %467 = vst.msk [vmem:[#allocation2] sm:$0xff] %vm466_vm1, %v905_v5  ;;  %vm469_vm6 = vcmask 519168   ;;  %vm610_vm13 = vcmask 1043456  }
   0xd   : > { %s403_s30 = scalar_lea.vmem %s1078_s0, %s810_s27  ;;  %468 = vst.msk [vmem:[#allocation2 + $0x8] sm:$0xff] %vm466_vm1, %v905_v5  ;;  %v472_v18 = vshrl.u32 %v471_v13, 7  ;;  %v872_v27 = vld [vmem:[%s1081_s3 + $0x1] ss:$0 sm:$0xff]  ;;  %v871_v28 = vld [vmem:[%s1081_s3] ss:$0 sm:$0xff]  ;;  %s406_s27 = scalar_lea.vmem %s1090_s12, %s1092_s22 }
   0xe   : > { %v408_v2 = vld [vmem:[%s403_s30] sm:$0x3]  ;;  %v873_v29 = vld [vmem:[%s1081_s3 + $0x2] ss:$0 sm:$0xff]  ;;  %v874_v37 = vld [vmem:[%s1081_s3 + $0x3] ss:$0 sm:$0xff] }
   0xf   : > { %v477_v23 = vand.u32 1, %v472_v18  ;;  %v875_v41 = vld [vmem:[%s1081_s3 + $0x4] ss:$0 sm:$0xff]  ;;  %v876_v46 = vld [vmem:[%s1081_s3 + $0x5] ss:$0 sm:$0xff]  ;;  %vm606_vm14 = vcmask 31744  }
  0x10   : > { %440 = vmatpush.bf16.msra.mxu0 %v853_v1  ;;  %v877_v50 = vld [vmem:[%s1081_s3 + $0x6] ss:$0 sm:$0xff]  ;;  %v878_v54 = vld [vmem:[%s1081_s3 + $0x7] ss:$0 sm:$0xff]  ;;  %v879_v59 = vld [vmem:[%s1081_s3 + $0x8] ss:$0 sm:$0xff] }
  0x11   : > { %v486_v25 = vadd.s32 4294967295, %v477_v23  ;;  %v514_v26 = vadd.s32 1, %v477_v23  ;;  %v880_v1 = vld [vmem:[%s1082_s4] ss:$0 sm:$0xff]  ;;  %vm688_vm15 = vcmask 387072  }
  0x13   : > { %819 = vmatmul.msk.bf16.vlgmr.msra.gmra.mxu0 %vm429_vm0, %v408_v2  ;;  %vm487_vm7 = vcmp.ge.s32.totalorder %v486_v25, 0  ;;  %vm516_vm8 = vcmp.lt.s32.totalorder %v514_v26, 2  ;;  %v643_v25 = vld [vmem:[%s1084_s6] sm:$0x1] }
  0x90   : > { %v442_v4 = vpop.f32.mrf.mxu0 }
  0x91   : > { %v443_v6 = vadd.f32 %v870_v3, %v442_v4  ;;  %v858_v4 = vld [vmem:[%s1083_s5 + $0x18] sm:$0xff] }
  0x92   : > { %675 = vmatpush.bf16.msra.mxu2 %v858_v4 }
  0x93   : > { %v820_v7 = vmul.f32 -1.442695, %v443_v6 }
  0x95   : > { %881 = vpow2.f32 %v820_v7  ;;  %v856_v7 = vld [vmem:[%s1083_s5 + $0x8] sm:$0xff] }
  0x98   : > { %v444_v8 = vpop.f32.mrf.mxu0 }
  0x9b   : > { %v882_v9 = vpop.eup %881 }
  0x9c   : > { %v449_v10 = vadd.f32 1.0, %v882_v9 }
  0x9e   : > { %883 = vrcp.f32 %v449_v10  ;;  %v461_v15 = vand.u32 2147483648, %v449_v10  ;;  %v459_v17 = vand.u32 2147483647, %v449_v10  ;;  %vm455_vm3 = vweird.f32 %v449_v10 }
  0xa0   : > { %v462_v20 = vor.u32 1.1754944e-38, %v461_v15  ;;  %vm460_vm5 = vcmp.eq.f32.partialorder %v459_v17, 8.507059e+37 }
  0xa4   : > { %v884_v11 = vpop.eup %883 }
  0xa5   : > { %v451_v12 = vmul.f32 %v884_v11, %v449_v10  ;;  %vm456_vm2 = vweird.f32 %v884_v11 }
  0xa6   : > { %vm457_vm4 = vmor %vm455_vm3, %vm456_vm2 }
  0xa7   : > { %v452_v14 = vsub.f32 1.0, %v451_v12 }
  0xa9   : > { %v453_v16 = vmul.f32 %v884_v11, %v452_v14 }
  0xab   : > { %v454_v19 = vadd.f32 %v884_v11, %v453_v16 }
  0xad   : > { %v458_v21 = vsel %vm457_vm4, %v884_v11, %v454_v19 }
  0xae   : > { %v463_v22 = vsel %vm460_vm5, %v462_v20, %v458_v21  ;;  %v605_v21 = vld [vmem:[%s1089_s11] sm:$0x1] }
  0xaf   : > { %v465_v24 = vmul.f32 %v463_v22, %v443_v6  ;;  %v857_v6 = vld [vmem:[%s1083_s5 + $0x10] sm:$0xff]  ;;  %v855_v22 = vld [vmem:[%s1083_s5] sm:$0xff] }
  0xb0   : > { %676 = vmatpush.bf16.msra.mxu2 %v857_v6 }
  0xb1   : > { %470 = vst.msk [vmem:[#allocation2 + $0x8] sm:$0xf] %vm469_vm6, %v465_v24 }
  0xb4   : > { %677 = vmatpush.bf16.msra.mxu2 %v856_v7 }
  0xb8   : > { %v485_v30 = vld [vmem:[#allocation2 + $0x5] sm:$0xf]  ;;  %v545_v42 = vld [vmem:[#allocation2 + $0x9] sm:$0xf]  ;;  %678 = vmatpush.bf16.msra.mxu2 %v855_v22 }
  0xb9   : > { %v499_v31 = vld [vmem:[#allocation2 + $0x6] sm:$0xf]  ;;  %v492_v33 = vsel %vm487_vm7, %v485_v30, 0.0  ;;  %v546_v47 = vsel %vm516_vm8, %v545_v42, 0.0  ;;  %v554_v51 = vsel %vm487_vm7, %v545_v42, 0.0 }
  0xba   : > { %v513_v32 = vld [vmem:[#allocation2 + $0x7] sm:$0xf]  ;;  %v511_v34 = vmul.f32 %v872_v27, %v499_v31  ;;  %v497_v36 = vmul.f32 %v871_v28, %v492_v33  ;;  %v552_v53 = vmul.f32 %v876_v46, %v546_v47  ;;  %v571_v55 = vld [vmem:[#allocation2 + $0xb] sm:$0xf]  ;;  %v560_v58 = vmul.f32 %v877_v50, %v554_v51  ;;  %v685_v28 = vld [vmem:[%s1085_s7] sm:$0x7] }
  0xbb   : > { %v520_v35 = vsel %vm516_vm8, %v513_v32, 0.0  ;;  %v528_v38 = vsel %vm487_vm7, %v513_v32, 0.0  ;;  %v536_v43 = vld [vmem:[#allocation2 + $0x8] sm:$0xf]  ;;  %v572_v60 = vsel %vm516_vm8, %v571_v55, 0.0  ;;  %vm752_vm8 = vcmask 385024  }
  0xbc   : > { %v512_v39 = vadd.f32 %v511_v34, %v497_v36  ;;  %v526_v40 = vmul.f32 %v873_v29, %v520_v35  ;;  %v534_v45 = vmul.f32 %v874_v37, %v528_v38  ;;  %v543_v49 = vmul.f32 %v875_v41, %v536_v43  ;;  %v562_v56 = vld [vmem:[#allocation2 + $0xa] sm:$0xf]  ;;  %v692_v33 = vld [vmem:[%s1086_s8] sm:$0x7] }
  0xbd   : > { %v569_v62 = vmul.f32 %v878_v54, %v562_v56  ;;  %v578_v0 = vmul.f32 %v879_v59, %v572_v60  ;;  %v906_v35 = vmov 0   ;;  %v714_v51 = vld [vmem:[%s1087_s9] sm:$0x7] }
  0xbe   : > { %v527_v44 = vadd.f32 %v526_v40, %v512_v39  ;;  %869 = vset.pattern.permute.xlu0 %v906_v35  ;;  %v728_v60 = vld [vmem:[%s1088_s10] sm:$0x1] }
  0xc0   : > { %v535_v48 = vadd.f32 %v534_v45, %v527_v44 }
  0xc2   : > { %v544_v52 = vadd.f32 %v543_v49, %v535_v48 }
  0xc4   : > { %v553_v57 = vadd.f32 %v552_v53, %v544_v52 }
  0xc6   : > { %v561_v61 = vadd.f32 %v560_v58, %v553_v57 }
  0xc8   : > { %v570_v63 = vadd.f32 %v569_v62, %v561_v61 }
  0xca   : > { %v579_v2 = vadd.f32 %v578_v0, %v570_v63 }
  0xcc   : > { %v584_v3 = vadd.f32 %v880_v1, %v579_v2 }
  0xce   : > { %v829_v5 = vmul.f32 -1.442695, %v584_v3 }
  0xd0   : > { %885 = vpow2.f32 %v829_v5 }
  0xd6   : > { %v886_v8 = vpop.eup %885 }
  0xd7   : > { %v588_v9 = vadd.f32 1.0, %v886_v8 }
  0xd9   : > { %887 = vrcp.f32 %v588_v9  ;;  %v600_v13 = vand.u32 2147483648, %v588_v9  ;;  %v598_v15 = vand.u32 2147483647, %v588_v9  ;;  %vm594_vm10 = vweird.f32 %v588_v9 }
  0xdb   : > { %v601_v17 = vor.u32 1.1754944e-38, %v600_v13  ;;  %vm599_vm12 = vcmp.eq.f32.partialorder %v598_v15, 8.507059e+37 }
  0xdf   : > { %v888_v10 = vpop.eup %887 }
  0xe0   : > { %v590_v11 = vmul.f32 %v888_v10, %v588_v9  ;;  %vm595_vm9 = vweird.f32 %v888_v10 }
  0xe1   : > { %vm596_vm11 = vmor %vm594_vm10, %vm595_vm9  ;;  %vm753_vm9 = vsmask.f32 256 }
  0xe2   : > { %v591_v12 = vsub.f32 1.0, %v590_v11  ;;  %vm754_vm10 = vmand %vm752_vm8, %vm753_vm9 }
  0xe4   : > { %v592_v14 = vmul.f32 %v888_v10, %v591_v12 }
  0xe6   : > { %v593_v16 = vadd.f32 %v888_v10, %v592_v14  ;;  %v755_v14 = vld [vmem:[%s406_s27] sm:$0x1] }
  0xe8   : > { %v597_v18 = vsel %vm596_vm11, %v888_v10, %v593_v16 }
  0xe9   : > { %v602_v19 = vsel %vm599_vm12, %v601_v17, %v597_v18 }
  0xea   : > { %v604_v20 = vmul.f32 %v602_v19, %v584_v3 }
  0xec   : > { %830 = vmatpush.msk.msra.mxu1 %vm610_vm13, %v604_v20 }
  0xed   : > { %831 = vmatmul.msk.f32.vlgmr.msra.gmra.mxu1 %vm606_vm14, %v605_v21 }
 0x16a   : > { %v631_v23 = vpop.f32.mrf.mxu1 }
 0x16b   : > { %v634_v24 = vpack.c.bf16 %v631_v23, %v631_v23 }
 0x16d   : > { %848 = vmatmul.msk.bf16.vlgmr.msra.gmra.mxu2 %vm466_vm1, %v634_v24 }
 0x1f0   : > { %v680_v26 = vpop.f32.mrf.mxu2 }
 0x1f1   : > { %v1052_v27 = vadd.f32 %v680_v26, %v643_v25 }
 0x1f3   : > { %v686_v29 = vperm.slane %v1052_v27, 0 }
 0x1f5   : > { %v687_v30 = vmul.f32 %v686_v29, %v685_v28 }
 0x1f7   : > { %v689_v31 = vsel %vm688_vm15, %v687_v30, 0.0 }
 0x1f8   : > { %v682_v32 = vpop.f32.mrf.mxu2  ;;  %690 = vadd.xlane.f32.xlu0 %v689_v31 }
 0x26b   : > { %v691_v34 = vpop.xlane.xlu0 %690 }
 0x26c   : > { %v693_v36 = vadd.f32 %v692_v33, %v691_v34 }
 0x26e   : > { %v849_v37 = vmul.f32 -1.442695, %v693_v36 }
 0x270   : > { %889 = vpow2.f32 %v849_v37 }
 0x276   : > { %v890_v38 = vpop.eup %889 }
 0x277   : > { %v697_v39 = vadd.f32 1.0, %v890_v38 }
 0x279   : > { %891 = vrcp.f32 %v697_v39  ;;  %v709_v43 = vand.u32 2147483648, %v697_v39  ;;  %v707_v45 = vand.u32 2147483647, %v697_v39  ;;  %vm703_vm1 = vweird.f32 %v697_v39 }
 0x27b   : > { %v710_v47 = vor.u32 1.1754944e-38, %v709_v43  ;;  %vm708_vm3 = vcmp.eq.f32.partialorder %v707_v45, 8.507059e+37 }
 0x27f   : > { %v892_v40 = vpop.eup %891 }
 0x280   : > { %v699_v41 = vmul.f32 %v892_v40, %v697_v39  ;;  %vm704_vm0 = vweird.f32 %v892_v40 }
 0x281   : > { %vm705_vm2 = vmor %vm703_vm1, %vm704_vm0 }
 0x282   : > { %v700_v42 = vsub.f32 1.0, %v699_v41 }
 0x284   : > { %v701_v44 = vmul.f32 %v892_v40, %v700_v42 }
 0x286   : > { %v702_v46 = vadd.f32 %v892_v40, %v701_v44 }
 0x288   : > { %v706_v48 = vsel %vm705_vm2, %v892_v40, %v702_v46 }
 0x289   : > { %v711_v49 = vsel %vm708_vm3, %v710_v47, %v706_v48 }
 0x28a   : > { %v713_v50 = vmul.f32 %v711_v49, %v693_v36 }
 0x28c   : > { %717 = vperm.xlu0 %869, %v713_v50  }
 0x2fe   : > { %v718_v52 = vpop.permute.xlu0 %717 }
 0x2ff   : > { %v720_v53 = vmul.f32 %v718_v52, %v714_v51 }
 0x301   : > { %v721_v54 = vsel %vm688_vm15, %v720_v53, 0.0 }
 0x302   : > { %v722_v55 = vrot.slane %v721_v54, 4 }
 0x304   : > { %v723_v56 = vadd.f32 %v722_v55, %v721_v54 }
 0x306   : > { %v724_v57 = vrot.slane %v723_v56, 2 }
 0x308   : > { %v725_v58 = vadd.f32 %v724_v57, %v723_v56 }
 0x30a   : > { %v726_v59 = vrot.slane %v725_v58, 1 }
 0x30c   : > { %v727_v61 = vadd.f32 %v726_v59, %v725_v58 }
 0x30e   : > { %v729_v62 = vadd.f32 %v728_v60, %v727_v61 }
 0x310   : > { %v850_v63 = vmul.f32 -1.442695, %v729_v62 }
 0x312   : > { %893 = vpow2.f32 %v850_v63 }
 0x318   : > { %v894_v0 = vpop.eup %893 }
 0x319   : > { %v733_v1 = vadd.f32 1.0, %v894_v0 }
 0x31b   : > { %895 = vrcp.f32 %v733_v1  ;;  %v745_v5 = vand.u32 2147483648, %v733_v1  ;;  %v743_v7 = vand.u32 2147483647, %v733_v1  ;;  %vm739_vm5 = vweird.f32 %v733_v1 }
 0x31d   : > { %v746_v9 = vor.u32 1.1754944e-38, %v745_v5  ;;  %vm744_vm7 = vcmp.eq.f32.partialorder %v743_v7, 8.507059e+37 }
 0x321   : > { %v896_v2 = vpop.eup %895 }
 0x322   : > { %v735_v3 = vmul.f32 %v896_v2, %v733_v1  ;;  %vm740_vm4 = vweird.f32 %v896_v2 }
 0x323   : > { %vm741_vm6 = vmor %vm739_vm5, %vm740_vm4 }
 0x324   : > { %v736_v4 = vsub.f32 1.0, %v735_v3 }
 0x326   : > { %v737_v6 = vmul.f32 %v896_v2, %v736_v4 }
 0x328   : > { %v738_v8 = vadd.f32 %v896_v2, %v737_v6 }
 0x32a   : > { %v742_v10 = vsel %vm741_vm6, %v896_v2, %v738_v8 }
 0x32b   : > { %v747_v11 = vsel %vm744_vm7, %v746_v9, %v742_v10 }
 0x32c   : > { %v749_v12 = vmul.f32 %v747_v11, %v1052_v27 }
 0x32e   : > { %v750_v13 = vadd.f32 %v749_v12, %v1052_v27 }
 0x330   : > { %v751_v15 = vpack.c.bf16 %v750_v13, %v750_v13 }
 0x332   : > { %v756_v16 = vsel %vm754_vm10, %v751_v15, %v755_v14 }
 0x333   : > { %757 = vst [vmem:[%s406_s27] sm:$0x1] %v756_v16 }
 0x334 PF: > { %s22_s21 = sadd.s32 1, %s903_s21  }
 0x335   : > { %p19_p4 = scmp.ge.s32.totalorder %s22_s21, 4  }
 0x337   :  { %21 = sbr.rel (!%p19_p4) target bundleno = 1 (0x1), region = 106 }

</bundles_post_ra>
